<compile_context>
chip_gen: v7x
topology: tpu7x:2x2x1
jax: 0.10.0
libtpu: 0.0.40
codegen_flags: <defaults>
</compile_context>

<pallas_src>
import functools

import jax
import jax.numpy as jnp
from jax.experimental import pallas as pl
from jax.experimental.pallas import tpu as pltpu

_K = 5                       # conv kernel size (fixed in MCADNNet)
_LANES = 128                 # lane width: out-channel / class padding target
_CONV_OC = (10, 20, 50)      # conv out-channels (fixed by the nn.Module spec)


# ---------------------------------------------------------------------------
# Small helpers
# ---------------------------------------------------------------------------
def _round_up(x, m):
    return ((x + m - 1) // m) * m


def _padded_k(k):
    """Pad an im2col contraction dim to a multiple of 128 lanes only when the
    overhead is small (<=12.5%): 250->256, 500->512; 25 stays 25."""
    kp = _round_up(k, _LANES)
    return kp if (kp - k) * 8 <= k else k


def _split_rows(m, max_tile=1024):
    """(row_tile, grid_steps). Single full-extent block when it fits (no forced
    2-block split: pure overhead on single-TC v5e/v6e); otherwise max_tile-row
    tiles, which give plenty of "parallel" blocks for v7x megacore and keep
    double-buffered VMEM footprints small. Callers guarantee m % 16 == 0."""
    if m <= max_tile:
        return m, 1
    return max_tile, pl.cdiv(m, max_tile)


# ---------------------------------------------------------------------------
# Pallas kernels
# ---------------------------------------------------------------------------
def _conv_pool_kernel(x_ref, w_ref, b_ref, o_ref):
    """Fused conv-as-matmul + bias + ReLU + 2x2 max-pool (floor mode).

    x_ref: (4, tm, Kp) bf16  -- im2col patches, grouped by pool-window corner
    w_ref: (Kp, 128)   bf16  -- conv weight, OC zero-padded to 128 lanes
    b_ref: (1, 128)    f32
    o_ref: (tm, 128)   bf16  -- pooled activations, lane-dense

    One large MXU dot over all 4 corners (amortizes weight push / MRF drain),
    corner-max in f32, then a single bias+ReLU epilogue. tm is always a
    multiple of 16, so the reshape / row slices are tile-aligned (no relayout).
    """
    tm = o_ref.shape[0]
    kp = x_ref.shape[2]
    lhs = x_ref[...].reshape(4 * tm, kp)              # leading-dim fold only
    r = jnp.dot(lhs, w_ref[...], preferred_element_type=jnp.float32)
    best = jnp.maximum(jnp.maximum(r[:tm], r[tm:2 * tm]),
                       jnp.maximum(r[2 * tm:3 * tm], r[3 * tm:]))
    o_ref[...] = jnp.maximum(best + b_ref[...], 0.0).astype(o_ref.dtype)


def _mlp_kernel(x_ref, w1_ref, b1_ref, w2_ref, b2_ref, o_ref):
    """Fused FC1 + ReLU + (dropout = identity at eval) + FC2.

    x_ref: (tm, F) bf16   w1_ref: (F, 256) bf16   b1_ref: (1, 256) f32
    w2_ref: (256, 128) bf16   b2_ref: (1, 128) f32   o_ref: (tm, 128) f32
    """
    h = jnp.dot(x_ref[...], w1_ref[...], preferred_element_type=jnp.float32)
    h = jnp.maximum(h + b1_ref[...], 0.0)
    o = jnp.dot(h.astype(jnp.bfloat16), w2_ref[...],
                preferred_element_type=jnp.float32)
    o_ref[...] = (o + b2_ref[...]).astype(o_ref.dtype)


# ---------------------------------------------------------------------------
# Wrappers (glue in plain JAX, hot path in Pallas)
# ---------------------------------------------------------------------------
def _conv_pool_block(pats, w, b):
    """pats: (4, Mpad, Kp) bf16; w: (Kp, 128) bf16; b: (1, 128) f32.
    Returns maxpool2x2(relu(conv)) as (Mpad, 128) bf16 (rows = pooled pixels)."""
    _, mpad, kp = pats.shape
    tm, steps = _split_rows(mpad)
    return pl.pallas_call(
        _conv_pool_kernel,
        out_shape=jax.ShapeDtypeStruct((mpad, _LANES), jnp.bfloat16),
        grid=(steps,),
        in_specs=[
            pl.BlockSpec((4, tm, kp), lambda i: (0, i, 0)),
            pl.BlockSpec((kp, _LANES), lambda i: (0, 0)),   # weights resident
            pl.BlockSpec((1, _LANES), lambda i: (0, 0)),
        ],
        out_specs=pl.BlockSpec((tm, _LANES), lambda i: (i, 0)),
        compiler_params=pltpu.CompilerParams(
            dimension_semantics=("parallel",)),
    )(pats, w, b)


def _mlp_head(x, w1, b1, w2, b2, row_tile=512):
    """x: (N, F) bf16 -> (N, 128) f32 = fc2(relu(fc1(x)))   (classes padded).
    Tiled over rows so both v7x TensorCores get work and VMEM stays bounded."""
    n, f = x.shape
    hid = w1.shape[1]
    npad = _round_up(n, 16)
    if npad != n:
        x = jnp.pad(x, ((0, npad - n), (0, 0)))
    tm, steps = _split_rows(npad, max_tile=row_tile)
    out = pl.pallas_call(
        _mlp_kernel,
        out_shape=jax.ShapeDtypeStruct((npad, _LANES), jnp.float32),
        grid=(steps,),
        in_specs=[
            pl.BlockSpec((tm, f), lambda i: (i, 0)),
            pl.BlockSpec((f, hid), lambda i: (0, 0)),        # weights resident
            pl.BlockSpec((1, hid), lambda i: (0, 0)),
            pl.BlockSpec((hid, _LANES), lambda i: (0, 0)),
            pl.BlockSpec((1, _LANES), lambda i: (0, 0)),
        ],
        out_specs=pl.BlockSpec((tm, _LANES), lambda i: (i, 0)),
        compiler_params=pltpu.CompilerParams(
            dimension_semantics=("parallel",)),
    )(x, w1, b1, w2, b2)
    return out[:n]


def _pooled_patches(x, ic, kp, k=_K):
    """Corner-grouped im2col patches for a fused conv + 2x2 max-pool (floor).

    x: (N, H, W, C) bf16 NHWC (only the first `ic` channels are real).
    Returns (pats (4, Mpad, kp) bf16, PH, PW): M = N*PH*PW padded to a multiple
    of 16, contraction dim k*k*ic zero-padded to kp. K order is (kh, kw, c),
    matching the packed weights.
    """
    n, h, w, _ = x.shape
    oh, ow = h - k + 1, w - k + 1
    ph, pw = oh // 2, ow // 2
    xs = x[..., :ic]
    # 25 taps built once, then 4 strided corner views (vs 100 slices before).
    taps = jnp.stack([xs[:, i:i + oh, j:j + ow, :]
                      for i in range(k) for j in range(k)], axis=3)
    kk = k * k * ic
    corners = []
    for dy in (0, 1):
        for dx in (0, 1):
            c = taps[:, dy:dy + 2 * ph - 1:2, dx:dx + 2 * pw - 1:2]
            corners.append(c.reshape(n * ph * pw, kk))
    pats = jnp.stack(corners, axis=0)                       # (4, M, kk)
    m = n * ph * pw
    mpad = _round_up(m, 16)
    if mpad != m or kp != kk:
        pats = jnp.pad(pats, ((0, 0), (0, mpad - m), (0, kp - kk)))
    return pats, ph, pw


# ---------------------------------------------------------------------------
# Parameters
# ---------------------------------------------------------------------------
def _spatial_trace(input_shape, k=_K):
    """(H_i, W_i) after each conv(k, stride 1) + maxpool(2, 2) block."""
    _, h, w = input_shape
    dims = []
    for _ in range(3):
        h, w = (h - k + 1) // 2, (w - k + 1) // 2
        dims.append((h, w))
    return dims


def init_params(key, num_classes=2, input_shape=(1, 64, 64)):
    """Random parameters in PyTorch layout (same shapes as the nn.Module)."""
    c_in = input_shape[0]
    h3, w3 = _spatial_trace(input_shape)[-1]
    flatten_dim = _CONV_OC[2] * h3 * w3
    ks = jax.random.split(key, 10)
    s = 0.05
    return {
        "w0": s * jax.random.normal(ks[0], (_CONV_OC[0], c_in, _K, _K), jnp.float32),
        "b0": s * jax.random.normal(ks[1], (_CONV_OC[0],), jnp.float32),
        "w1": s * jax.random.normal(ks[2], (_CONV_OC[1], _CONV_OC[0], _K, _K), jnp.float32),
        "b1": s * jax.random.normal(ks[3], (_CONV_OC[1],), jnp.float32),
        "w2": s * jax.random.normal(ks[4], (_CONV_OC[2], _CONV_OC[1], _K, _K), jnp.float32),
        "b2": s * jax.random.normal(ks[5], (_CONV_OC[2],), jnp.float32),
        "wf1": s * jax.random.normal(ks[6], (256, flatten_dim), jnp.float32),
        "bf1": s * jax.random.normal(ks[7], (256,), jnp.float32),
        "wf2": s * jax.random.normal(ks[8], (num_classes, 256), jnp.float32),
        "bf2": s * jax.random.normal(ks[9], (num_classes,), jnp.float32),
    }


def prepare_params(p, num_classes=2, input_shape=(1, 64, 64)):
    """One-time repack of PyTorch-layout weights into kernel layout (not jitted).

    conv l: (OC, IC, kh, kw) -> 'cwl' (Kp, 128) bf16 with K=(kh,kw,IC) order,
            K zero-padded to Kp (multiple of 128 when cheap), OC padded to 128.
            bias             -> 'cbl' (1, 128) f32, zero-padded.
    fc1:    (256, 50*H3*W3)  -> 'w1'  (H3*W3*128, 256) bf16, rows permuted from
            torch (C,H,W) flatten order to NHWC (H,W,Cpad) order, channel-padded
            with zero rows (so the 128-channel flatten needs no slicing).
    fc2:    (NC, 256)        -> 'w2'  (256, 128) bf16, classes zero-padded.
    """
    out = {}
    for li in range(3):
        w, b = p[f"w{li}"], p[f"b{li}"]
        oc, ic = w.shape[0], w.shape[1]
        kk = _K * _K * ic
        kp = _padded_k(kk)
        wk = jnp.transpose(w, (2, 3, 1, 0)).reshape(kk, oc)
        wk = jnp.pad(wk, ((0, kp - kk), (0, _LANES - oc)))
        out[f"cw{li}"] = wk.astype(jnp.bfloat16)
        out[f"cb{li}"] = jnp.pad(b, (0, _LANES - oc)).reshape(1, _LANES).astype(jnp.float32)
    h3, w3 = _spatial_trace(input_shape)[-1]
    oc_last = p["w2"].shape[0]                           # 50
    hid = p["wf1"].shape[0]                              # 256
    wf1 = p["wf1"].T.reshape(oc_last, h3, w3, hid)       # (C, H, W, hid) torch order
    wf1 = jnp.pad(wf1, ((0, _LANES - oc_last), (0, 0), (0, 0), (0, 0)))
    out["w1"] = jnp.transpose(wf1, (1, 2, 0, 3)).reshape(
        h3 * w3 * _LANES, hid).astype(jnp.bfloat16)
    out["b1"] = p["bf1"].reshape(1, hid).astype(jnp.float32)
    out["w2"] = jnp.pad(p["wf2"].T, ((0, 0), (0, _LANES - num_classes))).astype(jnp.bfloat16)
    out["b2"] = jnp.pad(p["bf2"], (0, _LANES - num_classes)).reshape(1, _LANES).astype(jnp.float32)
    return out


# ---------------------------------------------------------------------------
# MCADNNet forward
# ---------------------------------------------------------------------------
@functools.partial(jax.jit, static_argnames="num_classes")
def mcadnnet_forward(x, params, num_classes=2):
    """x: (N, C, H, W) float32 NCHW (PyTorch layout) -> (N, num_classes) f32."""
    x = jnp.transpose(x, (0, 2, 3, 1)).astype(jnp.bfloat16)   # NHWC, bf16 early
    n = x.shape[0]
    in_ch = x.shape[-1]
    for li in range(3):
        cw, cb = params[f"cw{li}"], params[f"cb{li}"]
        ic = in_ch if li == 0 else _CONV_OC[li - 1]           # real in-channels
        pats, ph, pw = _pooled_patches(x, ic, cw.shape[0])
        y = _conv_pool_block(pats, cw, cb)                    # (Mpad, 128) bf16
        x = y[: n * ph * pw].reshape(n, ph, pw, _LANES)
    # Lane-dense flatten over (H, W, Cpad=128); padded channels are exactly
    # zero and multiply zero w1 rows, so this is exact (just redundant FLOPs).
    x = x.reshape(n, -1)
    # TODO(synk): nn.Dropout(p=0.5) is identity at inference (eval mode); training-mode RNG dropout not implemented.
    out = _mlp_head(x, params["w1"], params["b1"], params["w2"], params["b2"])
    return out[:, :num_classes]


# ---------------------------------------------------------------------------
# Pure-JAX reference (f32) for a loose numerical sanity check
# ---------------------------------------------------------------------------
def _reference_forward(x_nchw, p):
    x = jnp.transpose(x_nchw, (0, 2, 3, 1))
    for li in range(3):
        w = jnp.transpose(p[f"w{li}"], (2, 3, 1, 0))          # HWIO
        x = jax.lax.conv_general_dilated(
            x, w, (1, 1), "VALID",
            dimension_numbers=("NHWC", "HWIO", "NHWC"))
        x = jax.nn.relu(x + p[f"b{li}"])
        x = jax.lax.reduce_window(x, -jnp.inf, jax.lax.max,
                                  (1, 2, 2, 1), (1, 2, 2, 1), "VALID")
    x = jnp.transpose(x, (0, 3, 1, 2)).reshape(x.shape[0], -1)  # torch flatten
    x = jax.nn.relu(x @ p["wf1"].T + p["bf1"])
    return x @ p["wf2"].T + p["bf2"]


if __name__ == "__main__":
    key = jax.random.PRNGKey(0)
    k_par, k_x = jax.random.split(key)
    torch_layout = init_params(k_par, num_classes=2, input_shape=(1, 64, 64))
    params = prepare_params(torch_layout, num_classes=2, input_shape=(1, 64, 64))
    x = jax.random.normal(k_x, (2, 1, 64, 64), jnp.float32)

    out = jax.block_until_ready(mcadnnet_forward(x, params, num_classes=2))
    assert out.shape == (2, 2), out.shape
    assert out.dtype == jnp.float32

    ref = _reference_forward(x, torch_layout)
    # Loose tolerance: conv/FC matmuls use bf16 operands (f32 accumulation).
    assert jnp.allclose(out, ref, atol=5e-2, rtol=5e-2), (out, ref)
    print("KERNEL_OK")
</pallas_src>

<mosaic_0001>
module attributes {stable_mosaic.version = 11 : i64} {
  func.func @_conv_pool_kernel(%arg0: i32, %arg1: memref<4x1024x25xbf16, #tpu.memory_space<vmem>>, %arg2: memref<25x128xbf16, #tpu.memory_space<vmem>>, %arg3: memref<1x128xf32, #tpu.memory_space<vmem>>, %arg4: memref<1024x128xbf16, #tpu.memory_space<vmem>>) attributes {dimension_semantics = [#tpu.dimension_semantics<parallel>], iteration_bounds = array<i64: 2>, scalar_prefetch = 0 : i64, scratch_operands = 0 : i64, tpu.core_type = #tpu.core_type<tc>, window_params = [{transform_indices = @transform_0, window_bounds = array<i64: 4, 1024, 25>}, {pipeline_mode = #tpu.pipeline_mode<synchronous>, transform_indices = @transform_1, window_bounds = array<i64: 25, 128>}, {pipeline_mode = #tpu.pipeline_mode<synchronous>, transform_indices = @transform_2, window_bounds = array<i64: 1, 128>}, {transform_indices = @transform_3, window_bounds = array<i64: 1024, 128>}]} {
    %c0 = arith.constant 0 : index
    %c0_0 = arith.constant 0 : index
    %c0_1 = arith.constant 0 : index
    %0 = vector.load %arg1[%c0, %c0_0, %c0_1] : memref<4x1024x25xbf16, #tpu.memory_space<vmem>>, vector<4x1024x25xbf16>
    %1 = vector.shape_cast %0 : vector<4x1024x25xbf16> to vector<4096x25xbf16>
    %c0_2 = arith.constant 0 : index
    %c0_3 = arith.constant 0 : index
    %2 = vector.load %arg2[%c0_2, %c0_3] : memref<25x128xbf16, #tpu.memory_space<vmem>>, vector<25x128xbf16>
    %cst = arith.constant dense<0.000000e+00> : vector<4096x128xf32>
    %3 = tpu.matmul %1, %2, %cst {dimension_numbers = #tpu.dot_dimension_numbers<[1], [0], [0], [1], [0, 0, 1, 1], [], []>} : vector<4096x25xbf16>, vector<25x128xbf16>, vector<4096x128xf32> -> vector<4096x128xf32>
    %4 = vector.extract_strided_slice %3 {offsets = [0, 0], sizes = [1024, 128], strides = [1, 1]} : vector<4096x128xf32> to vector<1024x128xf32>
    %5 = vector.extract_strided_slice %3 {offsets = [1024, 0], sizes = [1024, 128], strides = [1, 1]} : vector<4096x128xf32> to vector<1024x128xf32>
    %6 = arith.maximumf %4, %5 : vector<1024x128xf32>
    %7 = vector.extract_strided_slice %3 {offsets = [2048, 0], sizes = [1024, 128], strides = [1, 1]} : vector<4096x128xf32> to vector<1024x128xf32>
    %8 = vector.extract_strided_slice %3 {offsets = [3072, 0], sizes = [1024, 128], strides = [1, 1]} : vector<4096x128xf32> to vector<1024x128xf32>
    %9 = arith.maximumf %7, %8 : vector<1024x128xf32>
    %10 = arith.maximumf %6, %9 : vector<1024x128xf32>
    %c0_4 = arith.constant 0 : index
    %c0_5 = arith.constant 0 : index
    %11 = vector.load %arg3[%c0_4, %c0_5] : memref<1x128xf32, #tpu.memory_space<vmem>>, vector<1x128xf32>
    %12 = vector.broadcast %11 : vector<1x128xf32> to vector<1024x128xf32>
    %13 = arith.addf %10, %12 : vector<1024x128xf32>
    %cst_6 = arith.constant 0.000000e+00 : f32
    %14 = vector.broadcast %cst_6 : f32 to vector<1024x128xf32>
    %15 = arith.maximumf %13, %14 : vector<1024x128xf32>
    %16 = arith.truncf %15 : vector<1024x128xf32> to vector<1024x128xbf16>
    %c0_7 = arith.constant 0 : index
    %c0_8 = arith.constant 0 : index
    %17 = vector.load %arg4[%c0_7, %c0_8] : memref<1024x128xbf16, #tpu.memory_space<vmem>>, vector<1024x128xbf16>
    tpu.vector_store %arg4[%c0_7, %c0_8], %16 {strides = array<i32>} : memref<1024x128xbf16, #tpu.memory_space<vmem>>, vector<1024x128xbf16>,
    return
  }
  func.func @transform_0(%arg0: i32) -> (i32, i32, i32) {
    %c0_i32 = arith.constant 0 : i32
    %c0_i32_0 = arith.constant 0 : i32
    %c0_i32_1 = arith.constant 0 : i32
    return %c0_i32, %arg0, %c0_i32_0 : i32, i32, i32
  }
  func.func @transform_1(%arg0: i32) -> (i32, i32) {
    %c0_i32 = arith.constant 0 : i32
    %c0_i32_0 = arith.constant 0 : i32
    %c0_i32_1 = arith.constant 0 : i32
    return %c0_i32, %c0_i32_0 : i32, i32
  }
  func.func @transform_2(%arg0: i32) -> (i32, i32) {
    %c0_i32 = arith.constant 0 : i32
    %c0_i32_0 = arith.constant 0 : i32
    %c0_i32_1 = arith.constant 0 : i32
    return %c0_i32, %c0_i32_0 : i32, i32
  }
  func.func @transform_3(%arg0: i32) -> (i32, i32) {
    %c0_i32 = arith.constant 0 : i32
    %c0_i32_0 = arith.constant 0 : i32
    return %arg0, %c0_i32 : i32, i32
  }
}

module attributes {stable_mosaic.version = 11 : i64} {
  func.func @_conv_pool_kernel(%arg0: i32, %arg1: memref<4x352x256xbf16, #tpu.memory_space<vmem>>, %arg2: memref<256x128xbf16, #tpu.memory_space<vmem>>, %arg3: memref<1x128xf32, #tpu.memory_space<vmem>>, %arg4: memref<352x128xbf16, #tpu.memory_space<vmem>>) attributes {dimension_semantics = [#tpu.dimension_semantics<parallel>], iteration_bounds = array<i64: 1>, scalar_prefetch = 0 : i64, scratch_operands = 0 : i64, tpu.core_type = #tpu.core_type<tc>, window_params = [{transform_indices = @transform_0, window_bounds = array<i64: 4, 352, 256>}, {pipeline_mode = #tpu.pipeline_mode<synchronous>, transform_indices = @transform_1, window_bounds = array<i64: 256, 128>}, {pipeline_mode = #tpu.pipeline_mode<synchronous>, transform_indices = @transform_2, window_bounds = array<i64: 1, 128>}, {transform_indices = @transform_3, window_bounds = array<i64: 352, 128>}]} {
    %c0 = arith.constant 0 : index
    %c0_0 = arith.constant 0 : index
    %c0_1 = arith.constant 0 : index
    %0 = vector.load %arg1[%c0, %c0_0, %c0_1] : memref<4x352x256xbf16, #tpu.memory_space<vmem>>, vector<4x352x256xbf16>
    %1 = vector.shape_cast %0 : vector<4x352x256xbf16> to vector<1408x256xbf16>
    %c0_2 = arith.constant 0 : index
    %c0_3 = arith.constant 0 : index
    %2 = vector.load %arg2[%c0_2, %c0_3] : memref<256x128xbf16, #tpu.memory_space<vmem>>, vector<256x128xbf16>
    %cst = arith.constant dense<0.000000e+00> : vector<1408x128xf32>
    %3 = tpu.matmul %1, %2, %cst {dimension_numbers = #tpu.dot_dimension_numbers<[1], [0], [0], [1], [0, 0, 1, 1], [], []>} : vector<1408x256xbf16>, vector<256x128xbf16>, vector<1408x128xf32> -> vector<1408x128xf32>
    %4 = vector.extract_strided_slice %3 {offsets = [0, 0], sizes = [352, 128], strides = [1, 1]} : vector<1408x128xf32> to vector<352x128xf32>
    %5 = vector.extract_strided_slice %3 {offsets = [352, 0], sizes = [352, 128], strides = [1, 1]} : vector<1408x128xf32> to vector<352x128xf32>
    %6 = arith.maximumf %4, %5 : vector<352x128xf32>
    %7 = vector.extract_strided_slice %3 {offsets = [704, 0], sizes = [352, 128], strides = [1, 1]} : vector<1408x128xf32> to vector<352x128xf32>
    %8 = vector.extract_strided_slice %3 {offsets = [1056, 0], sizes = [352, 128], strides = [1, 1]} : vector<1408x128xf32> to vector<352x128xf32>
    %9 = arith.maximumf %7, %8 : vector<352x128xf32>
    %10 = arith.maximumf %6, %9 : vector<352x128xf32>
    %c0_4 = arith.constant 0 : index
    %c0_5 = arith.constant 0 : index
    %11 = vector.load %arg3[%c0_4, %c0_5] : memref<1x128xf32, #tpu.memory_space<vmem>>, vector<1x128xf32>
    %12 = vector.broadcast %11 : vector<1x128xf32> to vector<352x128xf32>
    %13 = arith.addf %10, %12 : vector<352x128xf32>
    %cst_6 = arith.constant 0.000000e+00 : f32
    %14 = vector.broadcast %cst_6 : f32 to vector<352x128xf32>
    %15 = arith.maximumf %13, %14 : vector<352x128xf32>
    %16 = arith.truncf %15 : vector<352x128xf32> to vector<352x128xbf16>
    %c0_7 = arith.constant 0 : index
    %c0_8 = arith.constant 0 : index
    %17 = vector.load %arg4[%c0_7, %c0_8] : memref<352x128xbf16, #tpu.memory_space<vmem>>, vector<352x128xbf16>
    tpu.vector_store %arg4[%c0_7, %c0_8], %16 {strides = array<i32>} : memref<352x128xbf16, #tpu.memory_space<vmem>>, vector<352x128xbf16>,
    return
  }
  func.func @transform_0(%arg0: i32) -> (i32, i32, i32) {
    %c0_i32 = arith.constant 0 : i32
    %c0_i32_0 = arith.constant 0 : i32
    %c0_i32_1 = arith.constant 0 : i32
    return %c0_i32, %arg0, %c0_i32_0 : i32, i32, i32
  }
  func.func @transform_1(%arg0: i32) -> (i32, i32) {
    %c0_i32 = arith.constant 0 : i32
    %c0_i32_0 = arith.constant 0 : i32
    %c0_i32_1 = arith.constant 0 : i32
    return %c0_i32, %c0_i32_0 : i32, i32
  }
  func.func @transform_2(%arg0: i32) -> (i32, i32) {
    %c0_i32 = arith.constant 0 : i32
    %c0_i32_0 = arith.constant 0 : i32
    %c0_i32_1 = arith.constant 0 : i32
    return %c0_i32, %c0_i32_0 : i32, i32
  }
  func.func @transform_3(%arg0: i32) -> (i32, i32) {
    %c0_i32 = arith.constant 0 : i32
    %c0_i32_0 = arith.constant 0 : i32
    return %arg0, %c0_i32 : i32, i32
  }
}

module attributes {stable_mosaic.version = 11 : i64} {
  func.func @_conv_pool_kernel(%arg0: i32, %arg1: memref<4x32x512xbf16, #tpu.memory_space<vmem>>, %arg2: memref<512x128xbf16, #tpu.memory_space<vmem>>, %arg3: memref<1x128xf32, #tpu.memory_space<vmem>>, %arg4: memref<32x128xbf16, #tpu.memory_space<vmem>>) attributes {dimension_semantics = [#tpu.dimension_semantics<parallel>], iteration_bounds = array<i64: 1>, scalar_prefetch = 0 : i64, scratch_operands = 0 : i64, tpu.core_type = #tpu.core_type<tc>, window_params = [{transform_indices = @transform_0, window_bounds = array<i64: 4, 32, 512>}, {pipeline_mode = #tpu.pipeline_mode<synchronous>, transform_indices = @transform_1, window_bounds = array<i64: 512, 128>}, {pipeline_mode = #tpu.pipeline_mode<synchronous>, transform_indices = @transform_2, window_bounds = array<i64: 1, 128>}, {transform_indices = @transform_3, window_bounds = array<i64: 32, 128>}]} {
    %c0 = arith.constant 0 : index
    %c0_0 = arith.constant 0 : index
    %c0_1 = arith.constant 0 : index
    %0 = vector.load %arg1[%c0, %c0_0, %c0_1] : memref<4x32x512xbf16, #tpu.memory_space<vmem>>, vector<4x32x512xbf16>
    %1 = vector.shape_cast %0 : vector<4x32x512xbf16> to vector<128x512xbf16>
    %c0_2 = arith.constant 0 : index
    %c0_3 = arith.constant 0 : index
    %2 = vector.load %arg2[%c0_2, %c0_3] : memref<512x128xbf16, #tpu.memory_space<vmem>>, vector<512x128xbf16>
    %cst = arith.constant dense<0.000000e+00> : vector<128x128xf32>
    %3 = tpu.matmul %1, %2, %cst {dimension_numbers = #tpu.dot_dimension_numbers<[1], [0], [0], [1], [0, 0, 1, 1], [], []>} : vector<128x512xbf16>, vector<512x128xbf16>, vector<128x128xf32> -> vector<128x128xf32>
    %4 = vector.extract_strided_slice %3 {offsets = [0, 0], sizes = [32, 128], strides = [1, 1]} : vector<128x128xf32> to vector<32x128xf32>
    %5 = vector.extract_strided_slice %3 {offsets = [32, 0], sizes = [32, 128], strides = [1, 1]} : vector<128x128xf32> to vector<32x128xf32>
    %6 = arith.maximumf %4, %5 : vector<32x128xf32>
    %7 = vector.extract_strided_slice %3 {offsets = [64, 0], sizes = [32, 128], strides = [1, 1]} : vector<128x128xf32> to vector<32x128xf32>
    %8 = vector.extract_strided_slice %3 {offsets = [96, 0], sizes = [32, 128], strides = [1, 1]} : vector<128x128xf32> to vector<32x128xf32>
    %9 = arith.maximumf %7, %8 : vector<32x128xf32>
    %10 = arith.maximumf %6, %9 : vector<32x128xf32>
    %c0_4 = arith.constant 0 : index
    %c0_5 = arith.constant 0 : index
    %11 = vector.load %arg3[%c0_4, %c0_5] : memref<1x128xf32, #tpu.memory_space<vmem>>, vector<1x128xf32>
    %12 = vector.broadcast %11 : vector<1x128xf32> to vector<32x128xf32>
    %13 = arith.addf %10, %12 : vector<32x128xf32>
    %cst_6 = arith.constant 0.000000e+00 : f32
    %14 = vector.broadcast %cst_6 : f32 to vector<32x128xf32>
    %15 = arith.maximumf %13, %14 : vector<32x128xf32>
    %16 = arith.truncf %15 : vector<32x128xf32> to vector<32x128xbf16>
    %c0_7 = arith.constant 0 : index
    %c0_8 = arith.constant 0 : index
    %17 = vector.load %arg4[%c0_7, %c0_8] : memref<32x128xbf16, #tpu.memory_space<vmem>>, vector<32x128xbf16>
    tpu.vector_store %arg4[%c0_7, %c0_8], %16 {strides = array<i32>} : memref<32x128xbf16, #tpu.memory_space<vmem>>, vector<32x128xbf16>,
    return
  }
  func.func @transform_0(%arg0: i32) -> (i32, i32, i32) {
    %c0_i32 = arith.constant 0 : i32
    %c0_i32_0 = arith.constant 0 : i32
    %c0_i32_1 = arith.constant 0 : i32
    return %c0_i32, %arg0, %c0_i32_0 : i32, i32, i32
  }
  func.func @transform_1(%arg0: i32) -> (i32, i32) {
    %c0_i32 = arith.constant 0 : i32
    %c0_i32_0 = arith.constant 0 : i32
    %c0_i32_1 = arith.constant 0 : i32
    return %c0_i32, %c0_i32_0 : i32, i32
  }
  func.func @transform_2(%arg0: i32) -> (i32, i32) {
    %c0_i32 = arith.constant 0 : i32
    %c0_i32_0 = arith.constant 0 : i32
    %c0_i32_1 = arith.constant 0 : i32
    return %c0_i32, %c0_i32_0 : i32, i32
  }
  func.func @transform_3(%arg0: i32) -> (i32, i32) {
    %c0_i32 = arith.constant 0 : i32
    %c0_i32_0 = arith.constant 0 : i32
    return %arg0, %c0_i32 : i32, i32
  }
}

module attributes {stable_mosaic.version = 11 : i64} {
  func.func @_mlp_kernel(%arg0: i32, %arg1: memref<16x2048xbf16, #tpu.memory_space<vmem>>, %arg2: memref<2048x256xbf16, #tpu.memory_space<vmem>>, %arg3: memref<1x256xf32, #tpu.memory_space<vmem>>, %arg4: memref<256x128xbf16, #tpu.memory_space<vmem>>, %arg5: memref<1x128xf32, #tpu.memory_space<vmem>>, %arg6: memref<16x128xf32, #tpu.memory_space<vmem>>) attributes {dimension_semantics = [#tpu.dimension_semantics<parallel>], iteration_bounds = array<i64: 1>, scalar_prefetch = 0 : i64, scratch_operands = 0 : i64, tpu.core_type = #tpu.core_type<tc>, window_params = [{transform_indices = @transform_0, window_bounds = array<i64: 16, 2048>}, {pipeline_mode = #tpu.pipeline_mode<synchronous>, transform_indices = @transform_1, window_bounds = array<i64: 2048, 256>}, {pipeline_mode = #tpu.pipeline_mode<synchronous>, transform_indices = @transform_2, window_bounds = array<i64: 1, 256>}, {pipeline_mode = #tpu.pipeline_mode<synchronous>, transform_indices = @transform_3, window_bounds = array<i64: 256, 128>}, {pipeline_mode = #tpu.pipeline_mode<synchronous>, transform_indices = @transform_4, window_bounds = array<i64: 1, 128>}, {transform_indices = @transform_5, window_bounds = array<i64: 16, 128>}]} {
    %c0 = arith.constant 0 : index
    %c0_0 = arith.constant 0 : index
    %0 = vector.load %arg1[%c0, %c0_0] : memref<16x2048xbf16, #tpu.memory_space<vmem>>, vector<16x2048xbf16>
    %c0_1 = arith.constant 0 : index
    %c0_2 = arith.constant 0 : index
    %1 = vector.load %arg2[%c0_1, %c0_2] : memref<2048x256xbf16, #tpu.memory_space<vmem>>, vector<2048x256xbf16>
    %cst = arith.constant dense<0.000000e+00> : vector<16x256xf32>
    %2 = tpu.matmul %0, %1, %cst {dimension_numbers = #tpu.dot_dimension_numbers<[1], [0], [0], [1], [0, 0, 1, 1], [], []>} : vector<16x2048xbf16>, vector<2048x256xbf16>, vector<16x256xf32> -> vector<16x256xf32>
    %c0_3 = arith.constant 0 : index
    %c0_4 = arith.constant 0 : index
    %3 = vector.load %arg3[%c0_3, %c0_4] : memref<1x256xf32, #tpu.memory_space<vmem>>, vector<1x256xf32>
    %4 = vector.broadcast %3 : vector<1x256xf32> to vector<16x256xf32>
    %5 = arith.addf %2, %4 : vector<16x256xf32>
    %cst_5 = arith.constant 0.000000e+00 : f32
    %6 = vector.broadcast %cst_5 : f32 to vector<16x256xf32>
    %7 = arith.maximumf %5, %6 : vector<16x256xf32>
    %8 = arith.truncf %7 : vector<16x256xf32> to vector<16x256xbf16>
    %c0_6 = arith.constant 0 : index
    %c0_7 = arith.constant 0 : index
    %9 = vector.load %arg4[%c0_6, %c0_7] : memref<256x128xbf16, #tpu.memory_space<vmem>>, vector<256x128xbf16>
    %cst_8 = arith.constant dense<0.000000e+00> : vector<16x128xf32>
    %10 = tpu.matmul %8, %9, %cst_8 {dimension_numbers = #tpu.dot_dimension_numbers<[1], [0], [0], [1], [0, 0, 1, 1], [], []>} : vector<16x256xbf16>, vector<256x128xbf16>, vector<16x128xf32> -> vector<16x128xf32>
    %c0_9 = arith.constant 0 : index
    %c0_10 = arith.constant 0 : index
    %11 = vector.load %arg5[%c0_9, %c0_10] : memref<1x128xf32, #tpu.memory_space<vmem>>, vector<1x128xf32>
    %12 = vector.broadcast %11 : vector<1x128xf32> to vector<16x128xf32>
    %13 = arith.addf %10, %12 : vector<16x128xf32>
    %c0_11 = arith.constant 0 : index
    %c0_12 = arith.constant 0 : index
    %14 = vector.load %arg6[%c0_11, %c0_12] : memref<16x128xf32, #tpu.memory_space<vmem>>, vector<16x128xf32>
    tpu.vector_store %arg6[%c0_11, %c0_12], %13 {strides = array<i32>} : memref<16x128xf32, #tpu.memory_space<vmem>>, vector<16x128xf32>,
    return
  }
  func.func @transform_0(%arg0: i32) -> (i32, i32) {
    %c0_i32 = arith.constant 0 : i32
    %c0_i32_0 = arith.constant 0 : i32
    return %arg0, %c0_i32 : i32, i32
  }
  func.func @transform_1(%arg0: i32) -> (i32, i32) {
    %c0_i32 = arith.constant 0 : i32
    %c0_i32_0 = arith.constant 0 : i32
    %c0_i32_1 = arith.constant 0 : i32
    return %c0_i32, %c0_i32_0 : i32, i32
  }
  func.func @transform_2(%arg0: i32) -> (i32, i32) {
    %c0_i32 = arith.constant 0 : i32
    %c0_i32_0 = arith.constant 0 : i32
    %c0_i32_1 = arith.constant 0 : i32
    return %c0_i32, %c0_i32_0 : i32, i32
  }
  func.func @transform_3(%arg0: i32) -> (i32, i32) {
    %c0_i32 = arith.constant 0 : i32
    %c0_i32_0 = arith.constant 0 : i32
    %c0_i32_1 = arith.constant 0 : i32
    return %c0_i32, %c0_i32_0 : i32, i32
  }
  func.func @transform_4(%arg0: i32) -> (i32, i32) {
    %c0_i32 = arith.constant 0 : i32
    %c0_i32_0 = arith.constant 0 : i32
    %c0_i32_1 = arith.constant 0 : i32
    return %c0_i32, %c0_i32_0 : i32, i32
  }
  func.func @transform_5(%arg0: i32) -> (i32, i32) {
    %c0_i32 = arith.constant 0 : i32
    %c0_i32_0 = arith.constant 0 : i32
    return %arg0, %c0_i32 : i32, i32
  }
}

</mosaic_0001>

<bundles_post_ra>
// kernel: mcadnnet_forward.4
= control target key start
LH: loop header
LB: loop body
LE: loop exit
PB: predicated region body
PF: predicated region fallthrough
CT: control target
= control target key end

     0   :  { %s9633_s12 = smov 0   ;;  %s9635_s13 = smov 0   ;;  %s11577_s0 = inlined_call_operand.vmem [shape: bf16[4,1808,25], index: 0, kind: input, shape index: {}]   ;;  %s11578_s1 = inlined_call_operand.vmem [shape: bf16[25,128], index: 1, kind: input, shape index: {}]   ;;  %s11579_s2 = inlined_call_operand.vmem [shape: f32[1,128], index: 2, kind: input, shape index: {}]   ;;  %s11580_s3 = inlined_call_operand.vmem [shape: bf16[1808,128], index: 3, kind: output, shape index: {}]  }
   0x1   :  { %s9637_s14 = smov 0  }
   0x2 LB: > { %s9649_s15 = sadd.s32 4294967295, %s9546_s14   ;;  %s9652_s16 = sadd.s32 1, %s9546_s14   ;;  %s9546_s14 = sphi %s9637_s14, %s12014_s14   ;;  %s9542_s13 = sphi %s9635_s13, %s12013_s13   ;;  %s9538_s12 = sphi %s9633_s12, %s12012_s12  }
   0x3   : > { %s17_s17 = ssub.s32 %s9546_s14, %s9652_s16  ;;  %s20_s18 = sadd.s32 1, %s9542_s13 }
   0x4   : > { %p18_p0 = scmp.eq.s32.totalorder %s17_s17, 0  ;;  %p27_p1 = scmp.ne.s32.totalorder %s9542_s13, %s9538_s12 }
   0x5   : > { %p28_p2 = scmp.eq.s32.totalorder %s9546_s14, 0  ;;  %p99_p3 = scmp.eq.s32.totalorder %s9649_s15, 1 }
   0x6   : > { %s9662_s19 = scalar_select %p18_p0, %s9542_s13, %s20_s18  }
   0x7   : > { %p29_p4 = por %p28_p2, %p27_p1  ;;  %p9664_p5 = por %p99_p3, %p27_p1 }
   0x8   : > { %p7073_p6 = scmp.ge.s32.totalorder %s9546_s14, 2 }
   0xa   : > { %127 = sbr.rel (%p7073_p6) target bundleno = 119 (0x77), region = 24 }
  0x11   : > { %130 = sbr.rel (!%p29_p4) target bundleno = 119 (0x77), region = 28  ;;  %s132_s21 = sand.u32 (%p29_p4), 1, %s9542_s13  }
  0x12   : > { %s7075_s22 = sshll.u32 (%p29_p4), %s9546_s14, 7  ;;  %s7074_s23 = sshll.u32 (%p29_p4), %s132_s21, 11 }
  0x13   : > { %s136_s24 = ssub.s32 (%p29_p4), 226, %s7075_s22  ;;  %s7752_s25 = sshll.u32 (%p29_p4), %s9546_s14, 9 }
  0x14   : > { %p137_p7 = scmp.lt.s32.totalorder (%p29_p4), %s136_s24, 128  ;;  %s9677_s28 = scalar_lea.vmem (%p29_p4), %s11577_s0, %s7752_s25  }
  0x15   : > { %s9680_s30 = scalar_lea.vmem (%p29_p4), [#allocation2], %s7074_s23  }
  0x18   : > { %s12016_s24 = smov (!%p137_p7, %s136_s24), 128 }
  0x19   : > { %s7076_s29 = sshll.u32 %s12016_s24, 8 }
  0x1a   : > { %p7079_p8 = scmp.eq.s32.totalorder %s7076_s29, 0 }
  0x1b   : > { %s9683_s4 = sshrl.u32 (!%p7079_p8), %s12016_s24, 4 }
  0x1c   : > { %145 = sbr.rel (%p7079_p8) target bundleno = 119 (0x77), region = 32  ;;  %p7080_p9 = scmp.le.s32.totalorder (!%p7079_p8), %s9683_s4, 0 }
  0x23   : > { %6999 = sbr.rel (%p7080_p9) target bundleno = 94 (0x5e), region = 193  ;;  %s11582_s5 = smov (!%p7080_p9), %s9680_s30 }
  0x24   : > { %s11583_s6 = smov (!%p7080_p9), %s9677_s28  ;;  %s9692_s7 = smov (!%p7080_p9), 0  }
  0x25   : > { %s9694_s8 = smov (!%p7080_p9), 0  }
  0x2a LB: >> { %v161_v0 = vld [vmem:[%s9554_s6] sm:$0xf]  ;;  %v163_v1 = vld [vmem:[%s9554_s6 + $0x4] sm:$0xf]  ;;  %v165_v2 = vld [vmem:[%s9554_s6 + $0x8] sm:$0xf]  ;;  %s9562_s8 = sphi %s9694_s8, %s155_s8   ;;  %s9558_s7 = sphi %s9692_s7, %s11584_s7   ;;  %s9554_s6 = sphi %s11583_s6, %s294_s6   ;;  %s9550_s5 = sphi %s11582_s5, %s295_s5  }
  0x2b   : >> { %162 = vst [vmem:[%s9550_s5] sm:$0xf] %v161_v0  ;;  %164 = vst [vmem:[%s9550_s5 + $0x4] sm:$0xf] %v163_v1  ;;  %v167_v3 = vld [vmem:[%s9554_s6 + $0xc] sm:$0xf]  ;;  %s289_s9 = sadd.s32 1, %s9558_s7 }
  0x2c   : >> { %166 = vst [vmem:[%s9550_s5 + $0x8] sm:$0xf] %v165_v2  ;;  %v169_v4 = vld [vmem:[%s9554_s6 + $0x10] sm:$0xf]  ;;  %v171_v5 = vld [vmem:[%s9554_s6 + $0x14] sm:$0xf]  ;;  %p290_p10 = scmp.ge.s32.totalorder %s289_s9, %s9683_s4 }
  0x2d   : >> { %168 = vst [vmem:[%s9550_s5 + $0xc] sm:$0xf] %v167_v3  ;;  %170 = vst [vmem:[%s9550_s5 + $0x10] sm:$0xf] %v169_v4  ;;  %v173_v6 = vld [vmem:[%s9554_s6 + $0x18] sm:$0xf] }
  0x2e   : >> { %172 = vst [vmem:[%s9550_s5 + $0x14] sm:$0xf] %v171_v5  ;;  %v175_v7 = vld [vmem:[%s9554_s6 + $0x1c] sm:$0xf]  ;;  %v177_v8 = vld [vmem:[%s9554_s6 + $0x20] sm:$0xf] }
  0x2f   : >> { %174 = vst [vmem:[%s9550_s5 + $0x18] sm:$0xf] %v173_v6  ;;  %176 = vst [vmem:[%s9550_s5 + $0x1c] sm:$0xf] %v175_v7  ;;  %v179_v9 = vld [vmem:[%s9554_s6 + $0x24] sm:$0xf] }
  0x30   : >> { %178 = vst [vmem:[%s9550_s5 + $0x20] sm:$0xf] %v177_v8  ;;  %v181_v10 = vld [vmem:[%s9554_s6 + $0x28] sm:$0xf]  ;;  %v183_v11 = vld [vmem:[%s9554_s6 + $0x2c] sm:$0xf] }
  0x31   : >> { %180 = vst [vmem:[%s9550_s5 + $0x24] sm:$0xf] %v179_v9  ;;  %182 = vst [vmem:[%s9550_s5 + $0x28] sm:$0xf] %v181_v10  ;;  %v185_v12 = vld [vmem:[%s9554_s6 + $0x30] sm:$0xf] }
  0x32   : >> { %184 = vst [vmem:[%s9550_s5 + $0x2c] sm:$0xf] %v183_v11  ;;  %v187_v13 = vld [vmem:[%s9554_s6 + $0x34] sm:$0xf]  ;;  %v189_v14 = vld [vmem:[%s9554_s6 + $0x38] sm:$0xf] }
  0x33   : >> { %186 = vst [vmem:[%s9550_s5 + $0x30] sm:$0xf] %v185_v12  ;;  %188 = vst [vmem:[%s9550_s5 + $0x34] sm:$0xf] %v187_v13  ;;  %v191_v15 = vld [vmem:[%s9554_s6 + $0x3c] sm:$0xf] }
  0x34   : >> { %190 = vst [vmem:[%s9550_s5 + $0x38] sm:$0xf] %v189_v14  ;;  %v193_v16 = vld [vmem:[%s9554_s6 + $0x388] sm:$0xf]  ;;  %v195_v17 = vld [vmem:[%s9554_s6 + $0x38c] sm:$0xf] }
  0x35   : >> { %192 = vst [vmem:[%s9550_s5 + $0x3c] sm:$0xf] %v191_v15  ;;  %194 = vst [vmem:[%s9550_s5 + $0x200] sm:$0xf] %v193_v16  ;;  %v197_v18 = vld [vmem:[%s9554_s6 + $0x390] sm:$0xf] }
  0x36   : >> { %196 = vst [vmem:[%s9550_s5 + $0x204] sm:$0xf] %v195_v17  ;;  %v199_v19 = vld [vmem:[%s9554_s6 + $0x394] sm:$0xf]  ;;  %v201_v20 = vld [vmem:[%s9554_s6 + $0x398] sm:$0xf] }
  0x37   : >> { %198 = vst [vmem:[%s9550_s5 + $0x208] sm:$0xf] %v197_v18  ;;  %200 = vst [vmem:[%s9550_s5 + $0x20c] sm:$0xf] %v199_v19  ;;  %v203_v21 = vld [vmem:[%s9554_s6 + $0x39c] sm:$0xf] }
  0x38   : >> { %202 = vst [vmem:[%s9550_s5 + $0x210] sm:$0xf] %v201_v20  ;;  %v205_v22 = vld [vmem:[%s9554_s6 + $0x3a0] sm:$0xf]  ;;  %v207_v23 = vld [vmem:[%s9554_s6 + $0x3a4] sm:$0xf] }
  0x39   : >> { %204 = vst [vmem:[%s9550_s5 + $0x214] sm:$0xf] %v203_v21  ;;  %206 = vst [vmem:[%s9550_s5 + $0x218] sm:$0xf] %v205_v22  ;;  %v209_v24 = vld [vmem:[%s9554_s6 + $0x3a8] sm:$0xf] }
  0x3a   : >> { %208 = vst [vmem:[%s9550_s5 + $0x21c] sm:$0xf] %v207_v23  ;;  %v211_v25 = vld [vmem:[%s9554_s6 + $0x3ac] sm:$0xf]  ;;  %v213_v26 = vld [vmem:[%s9554_s6 + $0x3b0] sm:$0xf] }
  0x3b   : >> { %210 = vst [vmem:[%s9550_s5 + $0x220] sm:$0xf] %v209_v24  ;;  %212 = vst [vmem:[%s9550_s5 + $0x224] sm:$0xf] %v211_v25  ;;  %v215_v27 = vld [vmem:[%s9554_s6 + $0x3b4] sm:$0xf] }
  0x3c   : >> { %214 = vst [vmem:[%s9550_s5 + $0x228] sm:$0xf] %v213_v26  ;;  %v217_v28 = vld [vmem:[%s9554_s6 + $0x3b8] sm:$0xf]  ;;  %v219_v29 = vld [vmem:[%s9554_s6 + $0x3bc] sm:$0xf] }
  0x3d   : >> { %216 = vst [vmem:[%s9550_s5 + $0x22c] sm:$0xf] %v215_v27  ;;  %218 = vst [vmem:[%s9550_s5 + $0x230] sm:$0xf] %v217_v28  ;;  %v221_v30 = vld [vmem:[%s9554_s6 + $0x3c0] sm:$0xf] }
  0x3e   : >> { %220 = vst [vmem:[%s9550_s5 + $0x234] sm:$0xf] %v219_v29  ;;  %v223_v31 = vld [vmem:[%s9554_s6 + $0x3c4] sm:$0xf]  ;;  %v225_v32 = vld [vmem:[%s9554_s6 + $0x710] sm:$0xf] }
  0x3f   : >> { %222 = vst [vmem:[%s9550_s5 + $0x238] sm:$0xf] %v221_v30  ;;  %224 = vst [vmem:[%s9550_s5 + $0x23c] sm:$0xf] %v223_v31  ;;  %v227_v33 = vld [vmem:[%s9554_s6 + $0x714] sm:$0xf] }
  0x40   : >> { %226 = vst [vmem:[%s9550_s5 + $0x400] sm:$0xf] %v225_v32  ;;  %v229_v34 = vld [vmem:[%s9554_s6 + $0x718] sm:$0xf]  ;;  %v231_v35 = vld [vmem:[%s9554_s6 + $0x71c] sm:$0xf] }
  0x41   : >> { %228 = vst [vmem:[%s9550_s5 + $0x404] sm:$0xf] %v227_v33  ;;  %230 = vst [vmem:[%s9550_s5 + $0x408] sm:$0xf] %v229_v34  ;;  %v233_v36 = vld [vmem:[%s9554_s6 + $0x720] sm:$0xf] }
  0x42   : >> { %232 = vst [vmem:[%s9550_s5 + $0x40c] sm:$0xf] %v231_v35  ;;  %v235_v37 = vld [vmem:[%s9554_s6 + $0x724] sm:$0xf]  ;;  %v237_v38 = vld [vmem:[%s9554_s6 + $0x728] sm:$0xf] }
  0x43   : >> { %234 = vst [vmem:[%s9550_s5 + $0x410] sm:$0xf] %v233_v36  ;;  %236 = vst [vmem:[%s9550_s5 + $0x414] sm:$0xf] %v235_v37  ;;  %v239_v39 = vld [vmem:[%s9554_s6 + $0x72c] sm:$0xf] }
  0x44   : >> { %238 = vst [vmem:[%s9550_s5 + $0x418] sm:$0xf] %v237_v38  ;;  %v241_v40 = vld [vmem:[%s9554_s6 + $0x730] sm:$0xf]  ;;  %v243_v41 = vld [vmem:[%s9554_s6 + $0x734] sm:$0xf] }
  0x45   : >> { %240 = vst [vmem:[%s9550_s5 + $0x41c] sm:$0xf] %v239_v39  ;;  %242 = vst [vmem:[%s9550_s5 + $0x420] sm:$0xf] %v241_v40  ;;  %v245_v42 = vld [vmem:[%s9554_s6 + $0x738] sm:$0xf] }
  0x46   : >> { %244 = vst [vmem:[%s9550_s5 + $0x424] sm:$0xf] %v243_v41  ;;  %v247_v43 = vld [vmem:[%s9554_s6 + $0x73c] sm:$0xf]  ;;  %v249_v44 = vld [vmem:[%s9554_s6 + $0x740] sm:$0xf] }
  0x47   : >> { %246 = vst [vmem:[%s9550_s5 + $0x428] sm:$0xf] %v245_v42  ;;  %248 = vst [vmem:[%s9550_s5 + $0x42c] sm:$0xf] %v247_v43  ;;  %v251_v45 = vld [vmem:[%s9554_s6 + $0x744] sm:$0xf] }
  0x48   : >> { %250 = vst [vmem:[%s9550_s5 + $0x430] sm:$0xf] %v249_v44  ;;  %v253_v46 = vld [vmem:[%s9554_s6 + $0x748] sm:$0xf]  ;;  %v255_v47 = vld [vmem:[%s9554_s6 + $0x74c] sm:$0xf] }
  0x49   : >> { %252 = vst [vmem:[%s9550_s5 + $0x434] sm:$0xf] %v251_v45  ;;  %254 = vst [vmem:[%s9550_s5 + $0x438] sm:$0xf] %v253_v46  ;;  %v257_v48 = vld [vmem:[%s9554_s6 + $0xa98] sm:$0xf] }
  0x4a   : >> { %256 = vst [vmem:[%s9550_s5 + $0x43c] sm:$0xf] %v255_v47  ;;  %v259_v49 = vld [vmem:[%s9554_s6 + $0xa9c] sm:$0xf]  ;;  %v261_v50 = vld [vmem:[%s9554_s6 + $0xaa0] sm:$0xf] }
  0x4b   : >> { %258 = vst [vmem:[%s9550_s5 + $0x600] sm:$0xf] %v257_v48  ;;  %260 = vst [vmem:[%s9550_s5 + $0x604] sm:$0xf] %v259_v49  ;;  %v263_v51 = vld [vmem:[%s9554_s6 + $0xaa4] sm:$0xf] }
  0x4c   : >> { %262 = vst [vmem:[%s9550_s5 + $0x608] sm:$0xf] %v261_v50  ;;  %v265_v52 = vld [vmem:[%s9554_s6 + $0xaa8] sm:$0xf]  ;;  %v267_v53 = vld [vmem:[%s9554_s6 + $0xaac] sm:$0xf] }
  0x4d   : >> { %264 = vst [vmem:[%s9550_s5 + $0x60c] sm:$0xf] %v263_v51  ;;  %266 = vst [vmem:[%s9550_s5 + $0x610] sm:$0xf] %v265_v52  ;;  %v269_v54 = vld [vmem:[%s9554_s6 + $0xab0] sm:$0xf] }
  0x4e   : >> { %268 = vst [vmem:[%s9550_s5 + $0x614] sm:$0xf] %v267_v53  ;;  %v271_v55 = vld [vmem:[%s9554_s6 + $0xab4] sm:$0xf]  ;;  %v273_v56 = vld [vmem:[%s9554_s6 + $0xab8] sm:$0xf] }
  0x4f   : >> { %270 = vst [vmem:[%s9550_s5 + $0x618] sm:$0xf] %v269_v54  ;;  %272 = vst [vmem:[%s9550_s5 + $0x61c] sm:$0xf] %v271_v55  ;;  %v275_v57 = vld [vmem:[%s9554_s6 + $0xabc] sm:$0xf] }
  0x50   : >> { %274 = vst [vmem:[%s9550_s5 + $0x620] sm:$0xf] %v273_v56  ;;  %v277_v58 = vld [vmem:[%s9554_s6 + $0xac0] sm:$0xf]  ;;  %v279_v59 = vld [vmem:[%s9554_s6 + $0xac4] sm:$0xf] }
  0x51   : >> { %276 = vst [vmem:[%s9550_s5 + $0x624] sm:$0xf] %v275_v57  ;;  %278 = vst [vmem:[%s9550_s5 + $0x628] sm:$0xf] %v277_v58  ;;  %v281_v60 = vld [vmem:[%s9554_s6 + $0xac8] sm:$0xf] }
  0x52   : >> { %280 = vst [vmem:[%s9550_s5 + $0x62c] sm:$0xf] %v279_v59  ;;  %v283_v61 = vld [vmem:[%s9554_s6 + $0xacc] sm:$0xf]  ;;  %v285_v62 = vld [vmem:[%s9554_s6 + $0xad0] sm:$0xf] }
  0x53   : >> { %282 = vst [vmem:[%s9550_s5 + $0x630] sm:$0xf] %v281_v60  ;;  %284 = vst [vmem:[%s9550_s5 + $0x634] sm:$0xf] %v283_v61  ;;  %v287_v63 = vld [vmem:[%s9554_s6 + $0xad4] sm:$0xf] }
  0x54   : >> { %286 = vst [vmem:[%s9550_s5 + $0x638] sm:$0xf] %v285_v62  ;;  %288 = vst [vmem:[%s9550_s5 + $0x63c] sm:$0xf] %v287_v63  ;;  %s12018_s9 = smov (%p290_p10, %s289_s9), 0  ;;  %s155_s8 = sadd.s32 1, %s9562_s8  }
  0x55   : >> { %s7081_s10 = sshll.u32 %s12018_s9, 6  ;;  %p154_p11 = scmp.ge.s32.totalorder %s155_s8, %s9683_s4 }
  0x56   : >> { %s294_s6 = scalar_lea.vmem %s9677_s28, %s7081_s10   ;;  %s295_s5 = scalar_lea.vmem %s9680_s30, %s7081_s10 [#allocation2]  }
  0x57   : >> { %s11584_s7 = smov %s12018_s9  ;;  %157 = sbr.rel (!%p154_p11) target bundleno = 42 (0x2a), region = 199 }
  0x5e PF: > { %s9851_s11 = sand.u32 15, %s12016_s24   ;;  %s7753_s17 = sshll.u32 %s9683_s4, 6 }
  0x5f   : > { %s9855_s18 = scalar_lea.vmem %s9677_s28, %s7753_s17   ;;  %s9858_s21 = scalar_lea.vmem %s9680_s30, %s7753_s17 [#allocation2]  }
  0x60   : > { %p7086_p12 = scmp.le.s32.totalorder %s9851_s11, 0 }
  0x61   : > { %s11585_s22 = smov (!%p7086_p12), %s9858_s21  ;;  %s11586_s23 = smov (!%p7086_p12), %s9855_s18 }
  0x62   : > { %7013 = sbr.rel (%p7086_p12) target bundleno = 119 (0x77), region = 204  ;;  %s9572_s25 = smov (!%p7086_p12), 0  }
  0x63   : > { %s9576_s26 = smov (!%p7086_p12), 0  }
  0x69 LB: >> { %v312_v0 = vld [vmem:[%s9570_s23] sm:$0xf]  ;;  %v314_v1 = vld [vmem:[%s9570_s23 + $0x388] sm:$0xf]  ;;  %v316_v2 = vld [vmem:[%s9570_s23 + $0x710] sm:$0xf]  ;;  %s9578_s26 = sphi %s9576_s26, %s306_s26   ;;  %s9574_s25 = sphi %s9572_s25, %s9573_s25   ;;  %s9570_s23 = sphi %s11586_s23, %s325_s23   ;;  %s9566_s22 = sphi %s11585_s22, %s326_s22  }
  0x6a   : >> { %313 = vst [vmem:[%s9566_s22] sm:$0xf] %v312_v0  ;;  %315 = vst [vmem:[%s9566_s22 + $0x200] sm:$0xf] %v314_v1  ;;  %v318_v3 = vld [vmem:[%s9570_s23 + $0xa98] sm:$0xf]  ;;  %s320_s24 = sadd.s32 1, %s9574_s25 }
  0x6b   : >> { %317 = vst [vmem:[%s9566_s22 + $0x400] sm:$0xf] %v316_v2  ;;  %319 = vst [vmem:[%s9566_s22 + $0x600] sm:$0xf] %v318_v3  ;;  %p321_p13 = scmp.ge.s32.totalorder %s320_s24, %s9851_s11  ;;  %s306_s26 = sadd.s32 1, %s9578_s26  }
  0x6c   : >> { %p305_p0 = scmp.ge.s32.totalorder %s306_s26, %s9851_s11 }
  0x6d   : >> { %s12020_s24 = smov (%p321_p13, %s320_s24), 0 }
  0x6e   : >> { %s7087_s27 = sshll.u32 %s12020_s24, 2  ;;  %s9573_s25 = smov %s12020_s24  }
  0x6f   : >> { %s325_s23 = scalar_lea.vmem %s9855_s18, %s7087_s27   ;;  %s326_s22 = scalar_lea.vmem %s9858_s21, %s7087_s27 [#allocation2]  }
  0x70   : > { %308 = sbr.rel (!%p305_p0) target bundleno = 105 (0x69), region = 210 }
  0x77 PF: > { %p7089_p1 = scmp.ge.s32.totalorder %s9546_s14, 1  ;;  %p548_p2 = scmp.lt.s32.totalorder %s9546_s14, 3 }
  0x79   : > { %p549_p3 = pnand %p7089_p1, %p548_p2 }
  0x7b   : > { %552 = sbr.rel (%p549_p3) target bundleno = 961 (0x3c1), region = 90 }
  0x82   : > { %v9200_v4 = vld [vmem:[%s11578_s1] sm:$0xff]   ;;  %vm3164_vm0 = vcmask 1043456   ;;  %v9201_v5 = vld [vmem:[%s11578_s1 + $0x8] sm:$0x1f]   ;;  %vm3165_vm1 = vcmask 1044480   ;;  %s555_s5 = sand.u32 1, %s9538_s12  }
  0x83   : > { %8527 = vmatprep.subr.bf16.mxu0 %v9200_v4  ;;  %9043 = vmatprep.subr.bf16.mxu1 %v9200_v4  ;;  %v9612_v6 = vmov 65535   ;;  %s7090_s14 = sshll.u32 %s555_s5, 11  ;;  %vm2395_vm2 = vcmask 203776   ;;  %s10898_s9 = sshll.u32 %s555_s5, 9 }
  0x84   : > { %8528 = vmatpush3.bf16.msra.mxu0 %v9200_v4  ;;  %9045 = vmatpush3.bf16.msra.mxu1 %v9200_v4  ;;  %v3166_v7 = vsel %vm3164_vm0, 4294967295, %v9612_v6  ;;  %s9888_s6 = scalar_lea.vmem [#allocation2], %s7090_s14  ;;  %s10920_s12 = scalar_lea.vmem [#allocation3], %s10898_s9  }
  0x85   : > { %v3167_v8 = vsel %vm3165_vm1, %v3166_v7, 0  ;;  %v9202_v10 = vld [vmem:[%s9888_s6] sm:$0xff]   ;;  %v9204_v12 = vld [vmem:[%s9888_s6 + $0x8] sm:$0xff]   ;;  %v9206_v14 = vld [vmem:[%s9888_s6 + $0x10] sm:$0xff]   ;;  %s7736_s21 = sshll.u32 (%p9664_p5), %s9649_s15, 7  ;;  %s7883_s22 = sshll.u32 (%p9664_p5), %s9649_s15, 9 }
  0x86   : > { %v3169_v9 = vand.u32 %v9201_v5, %v3167_v8  ;;  %v9203_v11 = vld [vmem:[%s9888_s6 + $0x400] sm:$0xff]   ;;  %v9205_v13 = vld [vmem:[%s9888_s6 + $0x408] sm:$0xff]   ;;  %8531 = vmatprep.mubr.msk.bf16.mxu0 %vm2395_vm2, %v9202_v10  ;;  %v9207_v15 = vld [vmem:[%s9888_s6 + $0x410] sm:$0xff]   ;;  %s6547_s23 = ssub.s32 (%p9664_p5), 226, %s7736_s21  ;;  %s11385_s24 = scalar_lea.vmem (%p9664_p5), %s11580_s3, %s7883_s22  }
  0x87   : > { %8787 = vmatprep.mubr.msk.bf16.mxu1 %vm2395_vm2, %v9203_v11  ;;  %v9208_v16 = vld [vmem:[%s9888_s6 + $0x18] sm:$0xff]   ;;  %v9210_v18 = vld [vmem:[%s9888_s6 + $0x20] sm:$0xff]   ;;  %v9212_v20 = vld [vmem:[%s9888_s6 + $0x28] sm:$0xff]   ;;  %p6548_p4 = scmp.lt.s32.totalorder (%p9664_p5), %s6547_s23, 128 }
  0x88   : > { %8529 = vmatprep.subr.bf16.mxu0 %v3169_v9  ;;  %9044 = vmatprep.subr.bf16.mxu1 %v3169_v9  ;;  %v9209_v17 = vld [vmem:[%s9888_s6 + $0x418] sm:$0xff]   ;;  %v9211_v19 = vld [vmem:[%s9888_s6 + $0x420] sm:$0xff]   ;;  %v9213_v21 = vld [vmem:[%s9888_s6 + $0x428] sm:$0xff]  }
  0x89   : > { %8530 = vmatpush3.bf16.msra.mxu0 %v3169_v9  ;;  %9046 = vmatpush3.bf16.msra.mxu1 %v3169_v9  ;;  %v9214_v22 = vld [vmem:[%s9888_s6 + $0x30] sm:$0xff]   ;;  %v9216_v24 = vld [vmem:[%s9888_s6 + $0x38] sm:$0xff]   ;;  %v9218_v26 = vld [vmem:[%s9888_s6 + $0x40] sm:$0xff]  }
  0x8a   : > { %v9215_v23 = vld [vmem:[%s9888_s6 + $0x430] sm:$0xff]   ;;  %v9217_v25 = vld [vmem:[%s9888_s6 + $0x438] sm:$0xff]   ;;  %v9219_v27 = vld [vmem:[%s9888_s6 + $0x440] sm:$0xff]  }
  0x8b   : > { %v9220_v28 = vld [vmem:[%s9888_s6 + $0x48] sm:$0xff]   ;;  %v9222_v30 = vld [vmem:[%s9888_s6 + $0x50] sm:$0xff]   ;;  %v9224_v32 = vld [vmem:[%s9888_s6 + $0x58] sm:$0xff]  }
  0x8c   : > { %8532 = vmatmul.mubr.msk.bf16.vlgmr.msra.gmra.mrb[0].mxu0 %vm2395_vm2, %v9204_v12  ;;  %8788 = vmatmul.mubr.msk.bf16.vlgmr.msra.gmra.mrb[0].mxu1 %vm2395_vm2, %v9205_v13  ;;  %v9221_v29 = vld [vmem:[%s9888_s6 + $0x448] sm:$0xff]   ;;  %v9223_v31 = vld [vmem:[%s9888_s6 + $0x450] sm:$0xff]   ;;  %v9225_v33 = vld [vmem:[%s9888_s6 + $0x458] sm:$0xff]  }
  0x8d   : > { %8535 = vmatprep.mubr.msk.bf16.mxu0 %vm2395_vm2, %v9206_v14  ;;  %8791 = vmatprep.mubr.msk.bf16.mxu1 %vm2395_vm2, %v9207_v15  ;;  %v9226_v34 = vld [vmem:[%s9888_s6 + $0x60] sm:$0xff]   ;;  %v9228_v36 = vld [vmem:[%s9888_s6 + $0x68] sm:$0xff]   ;;  %v9230_v38 = vld [vmem:[%s9888_s6 + $0x70] sm:$0xff]  }
  0x8e   : > { %v9227_v35 = vld [vmem:[%s9888_s6 + $0x460] sm:$0xff]   ;;  %v9229_v37 = vld [vmem:[%s9888_s6 + $0x468] sm:$0xff]   ;;  %v9231_v39 = vld [vmem:[%s9888_s6 + $0x470] sm:$0xff]  }
  0x8f   : > { %v9232_v40 = vld [vmem:[%s9888_s6 + $0x78] sm:$0xff]   ;;  %v9234_v42 = vld [vmem:[%s9888_s6 + $0x80] sm:$0xff]   ;;  %v9236_v44 = vld [vmem:[%s9888_s6 + $0x88] sm:$0xff]  }
  0x90   : > { %v9233_v41 = vld [vmem:[%s9888_s6 + $0x478] sm:$0xff]   ;;  %v9235_v43 = vld [vmem:[%s9888_s6 + $0x480] sm:$0xff]   ;;  %v9237_v45 = vld [vmem:[%s9888_s6 + $0x488] sm:$0xff]  }
  0x91   : > { %v9238_v46 = vld [vmem:[%s9888_s6 + $0x90] sm:$0xff]   ;;  %v9240_v48 = vld [vmem:[%s9888_s6 + $0x98] sm:$0xff]   ;;  %v9242_v50 = vld [vmem:[%s9888_s6 + $0xa0] sm:$0xff]  }
  0x92   : > { %v9239_v47 = vld [vmem:[%s9888_s6 + $0x490] sm:$0xff]   ;;  %v9241_v49 = vld [vmem:[%s9888_s6 + $0x498] sm:$0xff]   ;;  %v9243_v51 = vld [vmem:[%s9888_s6 + $0x4a0] sm:$0xff]  }
  0x93   : > { %v9244_v52 = vld [vmem:[%s9888_s6 + $0xa8] sm:$0xff]   ;;  %v9246_v54 = vld [vmem:[%s9888_s6 + $0xb0] sm:$0xff]   ;;  %v9248_v56 = vld [vmem:[%s9888_s6 + $0xb8] sm:$0xff]  }
  0x94   : > { %8536 = vmatmul.mubr.msk.bf16.gmra.mrb[4].mxu0 %vm2395_vm2, %v9208_v16  ;;  %8792 = vmatmul.mubr.msk.bf16.gmra.mrb[4].mxu1 %vm2395_vm2, %v9209_v17  ;;  %v9245_v53 = vld [vmem:[%s9888_s6 + $0x4a8] sm:$0xff]   ;;  %v9247_v55 = vld [vmem:[%s9888_s6 + $0x4b0] sm:$0xff]   ;;  %v9249_v57 = vld [vmem:[%s9888_s6 + $0x4b8] sm:$0xff]  }
  0x95   : > { %8539 = vmatprep.mubr.msk.bf16.mxu0 %vm2395_vm2, %v9210_v18  ;;  %8795 = vmatprep.mubr.msk.bf16.mxu1 %vm2395_vm2, %v9211_v19  ;;  %v9250_v58 = vld [vmem:[%s9888_s6 + $0xc0] sm:$0xff]   ;;  %v9252_v60 = vld [vmem:[%s9888_s6 + $0xc8] sm:$0xff]   ;;  %v9254_v62 = vld [vmem:[%s9888_s6 + $0xd0] sm:$0xff]  }
  0x96   : > { %v9251_v59 = vld [vmem:[%s9888_s6 + $0x4c0] sm:$0xff]   ;;  %v9253_v61 = vld [vmem:[%s9888_s6 + $0x4c8] sm:$0xff]   ;;  %v9255_v63 = vld [vmem:[%s9888_s6 + $0x4d0] sm:$0xff]  }
  0x97   : > { %v9256_v0 = vld [vmem:[%s9888_s6 + $0xd8] sm:$0xff]   ;;  %v9258_v2 = vld [vmem:[%s9888_s6 + $0xe0] sm:$0xff]   ;;  %v9260_v4 = vld [vmem:[%s9888_s6 + $0xe8] sm:$0xff]  }
  0x98   : > { %v9257_v1 = vld [vmem:[%s9888_s6 + $0x4d8] sm:$0xff]   ;;  %v9259_v3 = vld [vmem:[%s9888_s6 + $0x4e0] sm:$0xff]   ;;  %v9261_v5 = vld [vmem:[%s9888_s6 + $0x4e8] sm:$0xff]  }
  0x99   : > { %v9262_v6 = vld [vmem:[%s9888_s6 + $0xf0] sm:$0xff]   ;;  %v9264_v8 = vld [vmem:[%s9888_s6 + $0xf8] sm:$0xff]   ;;  %v9266_v10 = vld [vmem:[%s9888_s6 + $0x100] sm:$0xff]  }
  0x9a   : > { %v9263_v7 = vld [vmem:[%s9888_s6 + $0x4f0] sm:$0xff]   ;;  %v9265_v9 = vld [vmem:[%s9888_s6 + $0x4f8] sm:$0xff]   ;;  %v9267_v11 = vld [vmem:[%s9888_s6 + $0x500] sm:$0xff]  }
  0x9b   : > { %v9268_v12 = vld [vmem:[%s9888_s6 + $0x108] sm:$0xff]   ;;  %v9270_v14 = vld [vmem:[%s9888_s6 + $0x110] sm:$0xff]   ;;  %v9272_v16 = vld [vmem:[%s9888_s6 + $0x118] sm:$0xff]  }
  0x9c   : > { %8540 = vmatmul.mubr.msk.bf16.gmra.mrb[8].mxu0 %vm2395_vm2, %v9212_v20  ;;  %8796 = vmatmul.mubr.msk.bf16.gmra.mrb[8].mxu1 %vm2395_vm2, %v9213_v21  ;;  %v9269_v13 = vld [vmem:[%s9888_s6 + $0x508] sm:$0xff]   ;;  %v9271_v15 = vld [vmem:[%s9888_s6 + $0x510] sm:$0xff]   ;;  %v9273_v17 = vld [vmem:[%s9888_s6 + $0x518] sm:$0xff]  }
  0x9d   : > { %8543 = vmatprep.mubr.msk.bf16.mxu0 %vm2395_vm2, %v9214_v22  ;;  %8799 = vmatprep.mubr.msk.bf16.mxu1 %vm2395_vm2, %v9215_v23  ;;  %v9274_v18 = vld [vmem:[%s9888_s6 + $0x120] sm:$0xff]   ;;  %v9276_v20 = vld [vmem:[%s9888_s6 + $0x128] sm:$0xff]   ;;  %v9278_v22 = vld [vmem:[%s9888_s6 + $0x130] sm:$0xff]  }
  0x9e   : > { %v9275_v19 = vld [vmem:[%s9888_s6 + $0x520] sm:$0xff]   ;;  %v9277_v21 = vld [vmem:[%s9888_s6 + $0x528] sm:$0xff]   ;;  %v9279_v23 = vld [vmem:[%s9888_s6 + $0x530] sm:$0xff]  }
  0xa4   : > { %8544 = vmatmul.mubr.msk.bf16.gmra.mrb[12].mxu0 %vm2395_vm2, %v9216_v24  ;;  %8800 = vmatmul.mubr.msk.bf16.gmra.mrb[12].mxu1 %vm2395_vm2, %v9217_v25  ;;  %v9280_v24 = vld [vmem:[%s9888_s6 + $0x138] sm:$0xff]  }
  0xa5   : > { %8547 = vmatprep.mubr.msk.bf16.mxu0 %vm2395_vm2, %v9218_v26  ;;  %8803 = vmatprep.mubr.msk.bf16.mxu1 %vm2395_vm2, %v9219_v27  ;;  %v9281_v25 = vld [vmem:[%s9888_s6 + $0x538] sm:$0xff]   ;;  %v9282_v26 = vld [vmem:[%s9888_s6 + $0x140] sm:$0xff]  }
  0xa6   : > { %v9283_v27 = vld [vmem:[%s9888_s6 + $0x540] sm:$0xff]  }
  0xac   : > { %8548 = vmatmul.mubr.msk.bf16.gmra.mrb[16].mxu0 %vm2395_vm2, %v9220_v28  ;;  %8804 = vmatmul.mubr.msk.bf16.gmra.mrb[16].mxu1 %vm2395_vm2, %v9221_v29  ;;  %v9284_v28 = vld [vmem:[%s9888_s6 + $0x148] sm:$0xff]  }
  0xad   : > { %8551 = vmatprep.mubr.msk.bf16.mxu0 %vm2395_vm2, %v9222_v30  ;;  %8807 = vmatprep.mubr.msk.bf16.mxu1 %vm2395_vm2, %v9223_v31  ;;  %v9285_v29 = vld [vmem:[%s9888_s6 + $0x548] sm:$0xff]   ;;  %v9286_v30 = vld [vmem:[%s9888_s6 + $0x150] sm:$0xff]  }
  0xae   : > { %v9287_v31 = vld [vmem:[%s9888_s6 + $0x550] sm:$0xff]  }
  0xb4   : > { %8552 = vmatmul.mubr.msk.bf16.gmra.mrb[20].mxu0 %vm2395_vm2, %v9224_v32  ;;  %8808 = vmatmul.mubr.msk.bf16.gmra.mrb[20].mxu1 %vm2395_vm2, %v9225_v33  ;;  %v9288_v32 = vld [vmem:[%s9888_s6 + $0x158] sm:$0xff]  }
  0xb5   : > { %8555 = vmatprep.mubr.msk.bf16.mxu0 %vm2395_vm2, %v9226_v34  ;;  %8811 = vmatprep.mubr.msk.bf16.mxu1 %vm2395_vm2, %v9227_v35  ;;  %v9289_v33 = vld [vmem:[%s9888_s6 + $0x558] sm:$0xff]   ;;  %v9290_v34 = vld [vmem:[%s9888_s6 + $0x160] sm:$0xff]  }
  0xb6   : > { %v9291_v35 = vld [vmem:[%s9888_s6 + $0x560] sm:$0xff]  }
  0xbc   : > { %8556 = vmatmul.mubr.msk.bf16.gmra.mrb[24].mxu0 %vm2395_vm2, %v9228_v36  ;;  %8812 = vmatmul.mubr.msk.bf16.gmra.mrb[24].mxu1 %vm2395_vm2, %v9229_v37  ;;  %v9292_v36 = vld [vmem:[%s9888_s6 + $0x168] sm:$0xff]  }
  0xbd   : > { %8559 = vmatprep.mubr.msk.bf16.mxu0 %vm2395_vm2, %v9230_v38  ;;  %8815 = vmatprep.mubr.msk.bf16.mxu1 %vm2395_vm2, %v9231_v39  ;;  %v9293_v37 = vld [vmem:[%s9888_s6 + $0x568] sm:$0xff]   ;;  %v9294_v38 = vld [vmem:[%s9888_s6 + $0x170] sm:$0xff]  }
  0xbe   : > { %v9295_v39 = vld [vmem:[%s9888_s6 + $0x570] sm:$0xff]  }
  0xc4   : > { %8560 = vmatmul.mubr.msk.bf16.gmra.mrb[28].mxu0 %vm2395_vm2, %v9232_v40  ;;  %8816 = vmatmul.mubr.msk.bf16.gmra.mrb[28].mxu1 %vm2395_vm2, %v9233_v41  ;;  %v9296_v40 = vld [vmem:[%s9888_s6 + $0x178] sm:$0xff]  }
  0xc5   : > { %8563 = vmatprep.mubr.msk.bf16.mxu0 %vm2395_vm2, %v9234_v42  ;;  %8819 = vmatprep.mubr.msk.bf16.mxu1 %vm2395_vm2, %v9235_v43  ;;  %v9297_v41 = vld [vmem:[%s9888_s6 + $0x578] sm:$0xff]   ;;  %v9298_v42 = vld [vmem:[%s9888_s6 + $0x180] sm:$0xff]  }
  0xc6   : > { %v9299_v43 = vld [vmem:[%s9888_s6 + $0x580] sm:$0xff]  }
  0xcc   : > { %8564 = vmatmul.mubr.msk.bf16.gmra.mrb[32].mxu0 %vm2395_vm2, %v9236_v44  ;;  %8820 = vmatmul.mubr.msk.bf16.gmra.mrb[32].mxu1 %vm2395_vm2, %v9237_v45  ;;  %v9300_v44 = vld [vmem:[%s9888_s6 + $0x188] sm:$0xff]  }
  0xcd   : > { %8567 = vmatprep.mubr.msk.bf16.mxu0 %vm2395_vm2, %v9238_v46  ;;  %8823 = vmatprep.mubr.msk.bf16.mxu1 %vm2395_vm2, %v9239_v47  ;;  %v9301_v45 = vld [vmem:[%s9888_s6 + $0x588] sm:$0xff]   ;;  %v9302_v46 = vld [vmem:[%s9888_s6 + $0x190] sm:$0xff]  }
  0xce   : > { %v9303_v47 = vld [vmem:[%s9888_s6 + $0x590] sm:$0xff]  }
  0xd4   : > { %8568 = vmatmul.mubr.msk.bf16.gmra.mrb[36].mxu0 %vm2395_vm2, %v9240_v48  ;;  %8824 = vmatmul.mubr.msk.bf16.gmra.mrb[36].mxu1 %vm2395_vm2, %v9241_v49  ;;  %v9304_v48 = vld [vmem:[%s9888_s6 + $0x198] sm:$0xff]  }
  0xd5   : > { %8571 = vmatprep.mubr.msk.bf16.mxu0 %vm2395_vm2, %v9242_v50  ;;  %8827 = vmatprep.mubr.msk.bf16.mxu1 %vm2395_vm2, %v9243_v51  ;;  %v9305_v49 = vld [vmem:[%s9888_s6 + $0x598] sm:$0xff]   ;;  %v9306_v50 = vld [vmem:[%s9888_s6 + $0x1a0] sm:$0xff]  }
  0xd6   : > { %v9307_v51 = vld [vmem:[%s9888_s6 + $0x5a0] sm:$0xff]  }
  0xdc   : > { %8572 = vmatmul.mubr.msk.bf16.gmra.mrb[40].mxu0 %vm2395_vm2, %v9244_v52  ;;  %8828 = vmatmul.mubr.msk.bf16.gmra.mrb[40].mxu1 %vm2395_vm2, %v9245_v53  ;;  %v9308_v52 = vld [vmem:[%s9888_s6 + $0x1a8] sm:$0xff]  }
  0xdd   : > { %8575 = vmatprep.mubr.msk.bf16.mxu0 %vm2395_vm2, %v9246_v54  ;;  %8831 = vmatprep.mubr.msk.bf16.mxu1 %vm2395_vm2, %v9247_v55  ;;  %v9309_v53 = vld [vmem:[%s9888_s6 + $0x5a8] sm:$0xff]   ;;  %v9310_v54 = vld [vmem:[%s9888_s6 + $0x1b0] sm:$0xff]  }
  0xde   : > { %v9311_v55 = vld [vmem:[%s9888_s6 + $0x5b0] sm:$0xff]  }
  0xe4   : > { %8576 = vmatmul.mubr.msk.bf16.gmra.mrb[44].mxu0 %vm2395_vm2, %v9248_v56  ;;  %8832 = vmatmul.mubr.msk.bf16.gmra.mrb[44].mxu1 %vm2395_vm2, %v9249_v57  ;;  %v9312_v56 = vld [vmem:[%s9888_s6 + $0x1b8] sm:$0xff]  }
  0xe5   : > { %8579 = vmatprep.mubr.msk.bf16.mxu0 %vm2395_vm2, %v9250_v58  ;;  %8835 = vmatprep.mubr.msk.bf16.mxu1 %vm2395_vm2, %v9251_v59  ;;  %v9313_v57 = vld [vmem:[%s9888_s6 + $0x5b8] sm:$0xff]  }
  0xec   : > { %8580 = vmatmul.mubr.msk.bf16.gmra.mrb[48].mxu0 %vm2395_vm2, %v9252_v60  ;;  %8836 = vmatmul.mubr.msk.bf16.gmra.mrb[48].mxu1 %vm2395_vm2, %v9253_v61 }
  0xed   : > { %8583 = vmatprep.mubr.msk.bf16.mxu0 %vm2395_vm2, %v9254_v62  ;;  %8839 = vmatprep.mubr.msk.bf16.mxu1 %vm2395_vm2, %v9255_v63 }
  0xf4   : > { %8584 = vmatmul.mubr.msk.bf16.gmra.mrb[52].mxu0 %vm2395_vm2, %v9256_v0  ;;  %8840 = vmatmul.mubr.msk.bf16.gmra.mrb[52].mxu1 %vm2395_vm2, %v9257_v1  ;;  %v9314_v0 = vld [vmem:[%s9888_s6 + $0x1c0] sm:$0xff]  }
  0xf5   : > { %8587 = vmatprep.mubr.msk.bf16.mxu0 %vm2395_vm2, %v9258_v2  ;;  %8843 = vmatprep.mubr.msk.bf16.mxu1 %vm2395_vm2, %v9259_v3  ;;  %v9315_v1 = vld [vmem:[%s9888_s6 + $0x5c0] sm:$0xff]  }
  0xfc   : > { %8588 = vmatmul.mubr.msk.bf16.gmra.mrb[56].mxu0 %vm2395_vm2, %v9260_v4  ;;  %8844 = vmatmul.mubr.msk.bf16.gmra.mrb[56].mxu1 %vm2395_vm2, %v9261_v5  ;;  %v9316_v4 = vld [vmem:[%s9888_s6 + $0x1c8] sm:$0xff]  }
  0xfd   : > { %8591 = vmatprep.mubr.msk.bf16.mxu0 %vm2395_vm2, %v9262_v6  ;;  %8847 = vmatprep.mubr.msk.bf16.mxu1 %vm2395_vm2, %v9263_v7  ;;  %v9317_v5 = vld [vmem:[%s9888_s6 + $0x5c8] sm:$0xff]  }
 0x104   : > { %8592 = vmatmul.mubr.msk.bf16.gmra.mrb[60].mxu0 %vm2395_vm2, %v9264_v8  ;;  %8848 = vmatmul.mubr.msk.bf16.gmra.mrb[60].mxu1 %vm2395_vm2, %v9265_v9 }
 0x105   : > { %8595 = vmatprep.mubr.msk.bf16.mxu0 %vm2395_vm2, %v9266_v10  ;;  %8851 = vmatprep.mubr.msk.bf16.mxu1 %vm2395_vm2, %v9267_v11 }
 0x10c   : > { %8596 = vmatmul.mubr.msk.bf16.gmra.mrb[64].mxu0 %vm2395_vm2, %v9268_v12  ;;  %8852 = vmatmul.mubr.msk.bf16.gmra.mrb[64].mxu1 %vm2395_vm2, %v9269_v13  ;;  %v9318_v12 = vld [vmem:[%s9888_s6 + $0x1d0] sm:$0xff]  }
 0x10d   : > { %8599 = vmatprep.mubr.msk.bf16.mxu0 %vm2395_vm2, %v9270_v14  ;;  %8855 = vmatprep.mubr.msk.bf16.mxu1 %vm2395_vm2, %v9271_v15  ;;  %v9319_v13 = vld [vmem:[%s9888_s6 + $0x5d0] sm:$0xff]  }
 0x114   : > { %8600 = vmatmul.mubr.msk.bf16.gmra.mrb[68].mxu0 %vm2395_vm2, %v9272_v16  ;;  %8856 = vmatmul.mubr.msk.bf16.gmra.mrb[68].mxu1 %vm2395_vm2, %v9273_v17 }
 0x115   : > { %8603 = vmatprep.mubr.msk.bf16.mxu0 %vm2395_vm2, %v9274_v18  ;;  %8859 = vmatprep.mubr.msk.bf16.mxu1 %vm2395_vm2, %v9275_v19 }
 0x11c   : > { %8604 = vmatmul.mubr.msk.bf16.gmra.mrb[72].mxu0 %vm2395_vm2, %v9276_v20  ;;  %8860 = vmatmul.mubr.msk.bf16.gmra.mrb[72].mxu1 %vm2395_vm2, %v9277_v21  ;;  %v9320_v20 = vld [vmem:[%s9888_s6 + $0x1d8] sm:$0xff]  }
 0x11d   : > { %8607 = vmatprep.mubr.msk.bf16.mxu0 %vm2395_vm2, %v9278_v22  ;;  %8863 = vmatprep.mubr.msk.bf16.mxu1 %vm2395_vm2, %v9279_v23  ;;  %v9321_v21 = vld [vmem:[%s9888_s6 + $0x5d8] sm:$0xff]  }
 0x124   : > { %8608 = vmatmul.mubr.msk.bf16.gmra.mrb[76].mxu0 %vm2395_vm2, %v9280_v24  ;;  %8864 = vmatmul.mubr.msk.bf16.gmra.mrb[76].mxu1 %vm2395_vm2, %v9281_v25  ;;  %v9322_v24 = vld [vmem:[%s9888_s6 + $0x1e0] sm:$0xff]  }
 0x125   : > { %8611 = vmatprep.mubr.msk.bf16.mxu0 %vm2395_vm2, %v9282_v26  ;;  %8867 = vmatprep.mubr.msk.bf16.mxu1 %vm2395_vm2, %v9283_v27  ;;  %v9323_v25 = vld [vmem:[%s9888_s6 + $0x5e0] sm:$0xff]  }
 0x12c   : > { %8612 = vmatmul.mubr.msk.bf16.gmra.mrb[80].mxu0 %vm2395_vm2, %v9284_v28  ;;  %8868 = vmatmul.mubr.msk.bf16.gmra.mrb[80].mxu1 %vm2395_vm2, %v9285_v29 }
 0x12d   : > { %8615 = vmatprep.mubr.msk.bf16.mxu0 %vm2395_vm2, %v9286_v30  ;;  %8871 = vmatprep.mubr.msk.bf16.mxu1 %vm2395_vm2, %v9287_v31 }
 0x134   : > { %8616 = vmatmul.mubr.msk.bf16.gmra.mrb[84].mxu0 %vm2395_vm2, %v9288_v32  ;;  %8872 = vmatmul.mubr.msk.bf16.gmra.mrb[84].mxu1 %vm2395_vm2, %v9289_v33  ;;  %v9324_v32 = vld [vmem:[%s9888_s6 + $0x1e8] sm:$0xff]  }
 0x135   : > { %8619 = vmatprep.mubr.msk.bf16.mxu0 %vm2395_vm2, %v9290_v34  ;;  %8875 = vmatprep.mubr.msk.bf16.mxu1 %vm2395_vm2, %v9291_v35  ;;  %v9325_v33 = vld [vmem:[%s9888_s6 + $0x5e8] sm:$0xff]  }
 0x13c   : > { %8620 = vmatmul.mubr.msk.bf16.gmra.mrb[88].mxu0 %vm2395_vm2, %v9292_v36  ;;  %8876 = vmatmul.mubr.msk.bf16.gmra.mrb[88].mxu1 %vm2395_vm2, %v9293_v37  ;;  %v9326_v36 = vld [vmem:[%s9888_s6 + $0x1f0] sm:$0xff]  }
 0x13d   : > { %8623 = vmatprep.mubr.msk.bf16.mxu0 %vm2395_vm2, %v9294_v38  ;;  %8879 = vmatprep.mubr.msk.bf16.mxu1 %vm2395_vm2, %v9295_v39  ;;  %v9327_v37 = vld [vmem:[%s9888_s6 + $0x5f0] sm:$0xff]  }
 0x144   : > { %8624 = vmatmul.mubr.msk.bf16.gmra.mrb[92].mxu0 %vm2395_vm2, %v9296_v40  ;;  %8880 = vmatmul.mubr.msk.bf16.gmra.mrb[92].mxu1 %vm2395_vm2, %v9297_v41 }
 0x145   : > { %8627 = vmatprep.mubr.msk.bf16.mxu0 %vm2395_vm2, %v9298_v42  ;;  %8883 = vmatprep.mubr.msk.bf16.mxu1 %vm2395_vm2, %v9299_v43 }
 0x14c   : > { %8628 = vmatmul.mubr.msk.bf16.gmra.mrb[96].mxu0 %vm2395_vm2, %v9300_v44  ;;  %8884 = vmatmul.mubr.msk.bf16.gmra.mrb[96].mxu1 %vm2395_vm2, %v9301_v45  ;;  %v9328_v44 = vld [vmem:[%s9888_s6 + $0x1f8] sm:$0xff]  }
 0x14d   : > { %8631 = vmatprep.mubr.msk.bf16.mxu0 %vm2395_vm2, %v9302_v46  ;;  %8887 = vmatprep.mubr.msk.bf16.mxu1 %vm2395_vm2, %v9303_v47  ;;  %v9329_v45 = vld [vmem:[%s9888_s6 + $0x5f8] sm:$0xff]  }
 0x154   : > { %8632 = vmatmul.mubr.msk.bf16.gmra.mrb[100].mxu0 %vm2395_vm2, %v9304_v48  ;;  %8888 = vmatmul.mubr.msk.bf16.gmra.mrb[100].mxu1 %vm2395_vm2, %v9305_v49  ;;  %v9330_v48 = vld [vmem:[%s9888_s6 + $0x200] sm:$0xff]  }
 0x155   : > { %8635 = vmatprep.mubr.msk.bf16.mxu0 %vm2395_vm2, %v9306_v50  ;;  %8891 = vmatprep.mubr.msk.bf16.mxu1 %vm2395_vm2, %v9307_v51  ;;  %v9331_v49 = vld [vmem:[%s9888_s6 + $0x600] sm:$0xff]  }
 0x15c   : > { %8636 = vmatmul.mubr.msk.bf16.gmra.mrb[104].mxu0 %vm2395_vm2, %v9308_v52  ;;  %8892 = vmatmul.mubr.msk.bf16.gmra.mrb[104].mxu1 %vm2395_vm2, %v9309_v53 }
 0x15d   : > { %8639 = vmatprep.mubr.msk.bf16.mxu0 %vm2395_vm2, %v9310_v54  ;;  %8895 = vmatprep.mubr.msk.bf16.mxu1 %vm2395_vm2, %v9311_v55 }
 0x15f   : > { %v10112_v58 = vpop.f32.mrb[0].mxu0  ;;  %v10114_v59 = vpop.f32.mrb[0].mxu1 }
 0x160   : > { %v10116_v60 = vpop.f32.mrb[1].mxu0  ;;  %v10118_v61 = vpop.f32.mrb[1].mxu1 }
 0x161   : > { %v10120_v62 = vpop.f32.mrb[2].mxu0  ;;  %v10122_v63 = vpop.f32.mrb[2].mxu1 }
 0x162   : > { %v10126_v2 = vpop.f32.mrb[3].mxu0  ;;  %v10128_v3 = vpop.f32.mrb[3].mxu1 }
 0x164   : > { %8640 = vmatmul.mubr.msk.bf16.gmra.mrb[108].mxu0 %vm2395_vm2, %v9312_v56  ;;  %8896 = vmatmul.mubr.msk.bf16.gmra.mrb[108].mxu1 %vm2395_vm2, %v9313_v57  ;;  %v9332_v56 = vld [vmem:[%s9888_s6 + $0x208] sm:$0xff]  }
 0x165   : > { %8643 = vmatprep.mubr.msk.bf16.mxu0 %vm2395_vm2, %v9314_v0  ;;  %8899 = vmatprep.mubr.msk.bf16.mxu1 %vm2395_vm2, %v9315_v1  ;;  %v9333_v57 = vld [vmem:[%s9888_s6 + $0x608] sm:$0xff]  }
 0x167   : > { %v10136_v6 = vpop.f32.mrb[4].mxu0  ;;  %v10138_v7 = vpop.f32.mrb[4].mxu1 }
 0x168   : > { %v10140_v8 = vpop.f32.mrb[5].mxu0  ;;  %v10142_v9 = vpop.f32.mrb[5].mxu1 }
 0x169   : > { %v10144_v10 = vpop.f32.mrb[6].mxu0  ;;  %v10146_v11 = vpop.f32.mrb[6].mxu1 }
 0x16a   : > { %v10150_v14 = vpop.f32.mrb[7].mxu0  ;;  %v10152_v15 = vpop.f32.mrb[7].mxu1 }
 0x16c   : > { %8644 = vmatmul.mubr.msk.bf16.gmra.mrb[112].mxu0 %vm2395_vm2, %v9316_v4  ;;  %8900 = vmatmul.mubr.msk.bf16.gmra.mrb[112].mxu1 %vm2395_vm2, %v9317_v5  ;;  %v9334_v4 = vld [vmem:[%s9888_s6 + $0x210] sm:$0xff]  }
 0x16d   : > { %8647 = vmatprep.mubr.msk.bf16.mxu0 %vm2395_vm2, %v9318_v12  ;;  %8903 = vmatprep.mubr.msk.bf16.mxu1 %vm2395_vm2, %v9319_v13  ;;  %v9335_v5 = vld [vmem:[%s9888_s6 + $0x610] sm:$0xff]  }
 0x16f   : > { %v10158_v16 = vpop.f32.mrb[8].mxu0  ;;  %v10160_v17 = vpop.f32.mrb[8].mxu1 }
 0x170   : > { %v10162_v18 = vpop.f32.mrb[9].mxu0  ;;  %v10164_v19 = vpop.f32.mrb[9].mxu1 }
 0x171   : > { %v10168_v22 = vpop.f32.mrb[10].mxu0  ;;  %v10170_v23 = vpop.f32.mrb[10].mxu1 }
 0x172   : > { %v10174_v26 = vpop.f32.mrb[11].mxu0  ;;  %v10176_v27 = vpop.f32.mrb[11].mxu1 }
 0x174   : > { %8648 = vmatmul.mubr.msk.bf16.gmra.mrb[116].mxu0 %vm2395_vm2, %v9320_v20  ;;  %8904 = vmatmul.mubr.msk.bf16.gmra.mrb[116].mxu1 %vm2395_vm2, %v9321_v21 }
 0x175   : > { %8651 = vmatprep.mubr.msk.bf16.mxu0 %vm2395_vm2, %v9322_v24  ;;  %8907 = vmatprep.mubr.msk.bf16.mxu1 %vm2395_vm2, %v9323_v25 }
 0x177   : > { %v10182_v28 = vpop.f32.mrb[12].mxu0  ;;  %v10184_v29 = vpop.f32.mrb[12].mxu1 }
 0x178   : > { %v10186_v30 = vpop.f32.mrb[13].mxu0  ;;  %v10188_v31 = vpop.f32.mrb[13].mxu1 }
 0x179   : > { %v10192_v34 = vpop.f32.mrb[14].mxu0  ;;  %v10194_v35 = vpop.f32.mrb[14].mxu1 }
 0x17a   : > { %v10198_v38 = vpop.f32.mrb[15].mxu0  ;;  %v10200_v39 = vpop.f32.mrb[15].mxu1 }
 0x17c   : > { %8652 = vmatmul.mubr.msk.bf16.gmra.mrb[120].mxu0 %vm2395_vm2, %v9324_v32  ;;  %8908 = vmatmul.mubr.msk.bf16.gmra.mrb[120].mxu1 %vm2395_vm2, %v9325_v33  ;;  %v9336_v32 = vld [vmem:[%s9888_s6 + $0x218] sm:$0xff]  }
 0x17d   : > { %8655 = vmatprep.mubr.msk.bf16.mxu0 %vm2395_vm2, %v9326_v36  ;;  %8911 = vmatprep.mubr.msk.bf16.mxu1 %vm2395_vm2, %v9327_v37  ;;  %v9337_v33 = vld [vmem:[%s9888_s6 + $0x618] sm:$0xff]  }
 0x17f   : > { %v10206_v40 = vpop.f32.mrb[16].mxu0  ;;  %v10208_v41 = vpop.f32.mrb[16].mxu1 }
 0x180   : > { %v10210_v42 = vpop.f32.mrb[17].mxu0  ;;  %v10212_v43 = vpop.f32.mrb[17].mxu1 }
 0x181   : > { %v10216_v46 = vpop.f32.mrb[18].mxu0  ;;  %v10218_v47 = vpop.f32.mrb[18].mxu1 }
 0x182   : > { %v10222_v50 = vpop.f32.mrb[19].mxu0  ;;  %v10224_v51 = vpop.f32.mrb[19].mxu1 }
 0x184   : > { %8656 = vmatmul.mubr.msk.bf16.gmra.mrb[124].mxu0 %vm2395_vm2, %v9328_v44  ;;  %8912 = vmatmul.mubr.msk.bf16.gmra.mrb[124].mxu1 %vm2395_vm2, %v9329_v45  ;;  %v9338_v44 = vld [vmem:[%s9888_s6 + $0x220] sm:$0xff]  }
 0x185   : > { %8659 = vmatprep.mubr.msk.bf16.mxu0 %vm2395_vm2, %v9330_v48  ;;  %8915 = vmatprep.mubr.msk.bf16.mxu1 %vm2395_vm2, %v9331_v49  ;;  %v9339_v45 = vld [vmem:[%s9888_s6 + $0x620] sm:$0xff]  }
 0x187   : > { %v10230_v52 = vpop.f32.mrb[20].mxu0  ;;  %v10232_v53 = vpop.f32.mrb[20].mxu1 }
 0x188   : > { %v10234_v54 = vpop.f32.mrb[21].mxu0  ;;  %v10236_v55 = vpop.f32.mrb[21].mxu1 }
 0x189   : > { %v10240_v0 = vpop.f32.mrb[22].mxu0  ;;  %v10242_v1 = vpop.f32.mrb[22].mxu1 }
 0x18a   : > { %11587 = vst [vmem:[#allocation4_spill] sm:$0xff] %v10242_v1  ;;  %v10246_v12 = vpop.f32.mrb[23].mxu0  ;;  %v10248_v13 = vpop.f32.mrb[23].mxu1 }
 0x18b   : > { %11588 = vst [vmem:[#allocation5_spill] sm:$0xff] %v10246_v12  ;;  %11589 = vst [vmem:[#allocation6_spill] sm:$0xff] %v10248_v13 }
 0x18c   : > { %8660 = vmatmul.mubr.msk.bf16.gmra.mrb[128].mxu0 %vm2395_vm2, %v9332_v56  ;;  %8916 = vmatmul.mubr.msk.bf16.gmra.mrb[128].mxu1 %vm2395_vm2, %v9333_v57 }
 0x18d   : > { %8663 = vmatprep.mubr.msk.bf16.mxu0 %vm2395_vm2, %v9334_v4  ;;  %8919 = vmatprep.mubr.msk.bf16.mxu1 %vm2395_vm2, %v9335_v5 }
 0x18f   : > { %v10254_v20 = vpop.f32.mrb[24].mxu0  ;;  %v10256_v21 = vpop.f32.mrb[24].mxu1 }
 0x190   : > { %11590 = vst [vmem:[#allocation7_spill] sm:$0xff] %v10254_v20  ;;  %11591 = vst [vmem:[#allocation8_spill] sm:$0xff] %v10256_v21  ;;  %v10258_v24 = vpop.f32.mrb[25].mxu0  ;;  %v10260_v25 = vpop.f32.mrb[25].mxu1 }
 0x191   : > { %11592 = vst [vmem:[#allocation9_spill] sm:$0xff] %v10258_v24  ;;  %11593 = vst [vmem:[#allocation10_spill] sm:$0xff] %v10260_v25  ;;  %v10264_v36 = vpop.f32.mrb[26].mxu0  ;;  %v10266_v37 = vpop.f32.mrb[26].mxu1  ;;  %v9442_v24 = vld [vmem:[%s9888_s6 + $0x3c0] sm:$0xff]  }
 0x192   : > { %11594 = vst [vmem:[#allocation11_spill] sm:$0xff] %v10264_v36  ;;  %11595 = vst [vmem:[#allocation12_spill] sm:$0xff] %v10266_v37  ;;  %v10270_v48 = vpop.f32.mrb[27].mxu0  ;;  %v10272_v49 = vpop.f32.mrb[27].mxu1  ;;  %v9340_v37 = vld [vmem:[%s9888_s6 + $0x228] sm:$0xff]  }
 0x193   : > { %11596 = vst [vmem:[#allocation13_spill] sm:$0xff] %v10270_v48  ;;  %11597 = vst [vmem:[#allocation14_spill] sm:$0xff] %v10272_v49  ;;  %v9341_v48 = vld [vmem:[%s9888_s6 + $0x628] sm:$0xff]  }
 0x194   : > { %8664 = vmatmul.mubr.msk.bf16.gmra.mrb[132].mxu0 %vm2395_vm2, %v9336_v32  ;;  %8920 = vmatmul.mubr.msk.bf16.gmra.mrb[132].mxu1 %vm2395_vm2, %v9337_v33  ;;  %v9342_v33 = vld [vmem:[%s9888_s6 + $0x230] sm:$0xff]  }
 0x195   : > { %8667 = vmatprep.mubr.msk.bf16.mxu0 %vm2395_vm2, %v9338_v44  ;;  %8923 = vmatprep.mubr.msk.bf16.mxu1 %vm2395_vm2, %v9339_v45  ;;  %v9343_v44 = vld [vmem:[%s9888_s6 + $0x630] sm:$0xff]  }
 0x197   : > { %v10278_v56 = vpop.f32.mrb[28].mxu0  ;;  %v10280_v57 = vpop.f32.mrb[28].mxu1 }
 0x198   : > { %11598 = vst [vmem:[#allocation15_spill] sm:$0xff] %v10278_v56  ;;  %11599 = vst [vmem:[#allocation16_spill] sm:$0xff] %v10280_v57  ;;  %v10282_v4 = vpop.f32.mrb[29].mxu0  ;;  %v10284_v5 = vpop.f32.mrb[29].mxu1  ;;  %v9344_v57 = vld [vmem:[%s9888_s6 + $0x238] sm:$0xff]  }
 0x199   : > { %11600 = vst [vmem:[#allocation17_spill] sm:$0xff] %v10282_v4  ;;  %11601 = vst [vmem:[#allocation18_spill] sm:$0xff] %v10284_v5  ;;  %v10288_v49 = vpop.f32.mrb[30].mxu0  ;;  %v10290_v32 = vpop.f32.mrb[30].mxu1 }
 0x19a   : > { %11602 = vst [vmem:[#allocation19_spill] sm:$0xff] %v10288_v49  ;;  %11603 = vst [vmem:[#allocation20_spill] sm:$0xff] %v10290_v32  ;;  %v10294_v45 = vpop.f32.mrb[31].mxu0  ;;  %v10296_v56 = vpop.f32.mrb[31].mxu1 }
 0x19b   : > { %11604 = vst [vmem:[#allocation21_spill] sm:$0xff] %v10294_v45  ;;  %11605 = vst [vmem:[#allocation22_spill] sm:$0xff] %v10296_v56  ;;  %v9345_v45 = vld [vmem:[%s9888_s6 + $0x638] sm:$0xff]  }
 0x19c   : > { %8668 = vmatmul.mubr.msk.bf16.gmra.mrb[136].mxu0 %vm2395_vm2, %v9340_v37  ;;  %8924 = vmatmul.mubr.msk.bf16.gmra.mrb[136].mxu1 %vm2395_vm2, %v9341_v48  ;;  %v9346_v48 = vld [vmem:[%s9888_s6 + $0x240] sm:$0xff]  }
 0x19d   : > { %8671 = vmatprep.mubr.msk.bf16.mxu0 %vm2395_vm2, %v9342_v33  ;;  %8927 = vmatprep.mubr.msk.bf16.mxu1 %vm2395_vm2, %v9343_v44  ;;  %v9347_v33 = vld [vmem:[%s9888_s6 + $0x640] sm:$0xff]  }
 0x19f   : > { %v10302_v5 = vpop.f32.mrb[32].mxu0  ;;  %v10304_v49 = vpop.f32.mrb[32].mxu1 }
 0x1a0   : > { %11606 = vst [vmem:[#allocation23_spill] sm:$0xff] %v10302_v5  ;;  %11607 = vst [vmem:[#allocation24_spill] sm:$0xff] %v10304_v49  ;;  %v10306_v32 = vpop.f32.mrb[33].mxu0  ;;  %v10308_v4 = vpop.f32.mrb[33].mxu1  ;;  %v9348_v49 = vld [vmem:[%s9888_s6 + $0x248] sm:$0xff]  }
 0x1a1   : > { %11608 = vst [vmem:[#allocation25_spill] sm:$0xff] %v10306_v32  ;;  %11609 = vst [vmem:[#allocation26_spill] sm:$0xff] %v10308_v4  ;;  %v10312_v56 = vpop.f32.mrb[34].mxu0  ;;  %v10314_v37 = vpop.f32.mrb[34].mxu1 }
 0x1a2   : > { %11610 = vst [vmem:[#allocation27_spill] sm:$0xff] %v10312_v56  ;;  %11611 = vst [vmem:[#allocation28_spill] sm:$0xff] %v10314_v37  ;;  %v10318_v44 = vpop.f32.mrb[35].mxu0  ;;  %v10320_v5 = vpop.f32.mrb[35].mxu1 }
 0x1a3   : > { %11612 = vst [vmem:[#allocation29_spill] sm:$0xff] %v10318_v44  ;;  %11613 = vst [vmem:[#allocation30_spill] sm:$0xff] %v10320_v5  ;;  %v9349_v44 = vld [vmem:[%s9888_s6 + $0x648] sm:$0xff]  }
 0x1a4   : > { %8672 = vmatmul.mubr.msk.bf16.gmra.mrb[140].mxu0 %vm2395_vm2, %v9344_v57  ;;  %8928 = vmatmul.mubr.msk.bf16.gmra.mrb[140].mxu1 %vm2395_vm2, %v9345_v45  ;;  %v9350_v45 = vld [vmem:[%s9888_s6 + $0x250] sm:$0xff]  }
 0x1a5   : > { %8675 = vmatprep.mubr.msk.bf16.mxu0 %vm2395_vm2, %v9346_v48  ;;  %8931 = vmatprep.mubr.msk.bf16.mxu1 %vm2395_vm2, %v9347_v33  ;;  %v9351_v48 = vld [vmem:[%s9888_s6 + $0x650] sm:$0xff]  }
 0x1a7   : > { %v10326_v4 = vpop.f32.mrb[36].mxu0  ;;  %v10328_v56 = vpop.f32.mrb[36].mxu1 }
 0x1a8   : > { %11614 = vst [vmem:[#allocation31_spill] sm:$0xff] %v10326_v4  ;;  %11615 = vst [vmem:[#allocation32_spill] sm:$0xff] %v10328_v56  ;;  %v10330_v37 = vpop.f32.mrb[37].mxu0  ;;  %v10332_v32 = vpop.f32.mrb[37].mxu1  ;;  %v9352_v56 = vld [vmem:[%s9888_s6 + $0x258] sm:$0xff]  }
 0x1a9   : > { %11616 = vst [vmem:[#allocation33_spill] sm:$0xff] %v10330_v37  ;;  %11617 = vst [vmem:[#allocation34_spill] sm:$0xff] %v10332_v32  ;;  %v10336_v5 = vpop.f32.mrb[38].mxu0  ;;  %v10338_v57 = vpop.f32.mrb[38].mxu1 }
 0x1aa   : > { %11618 = vst [vmem:[#allocation35_spill] sm:$0xff] %v10336_v5  ;;  %11619 = vst [vmem:[#allocation36_spill] sm:$0xff] %v10338_v57  ;;  %v10342_v33 = vpop.f32.mrb[39].mxu0  ;;  %v10344_v4 = vpop.f32.mrb[39].mxu1 }
 0x1ab   : > { %11620 = vst [vmem:[#allocation37_spill] sm:$0xff] %v10342_v33  ;;  %11621 = vst [vmem:[#allocation38_spill] sm:$0xff] %v10344_v4  ;;  %v9353_v33 = vld [vmem:[%s9888_s6 + $0x658] sm:$0xff]  }
 0x1ac   : > { %8676 = vmatmul.mubr.msk.bf16.gmra.mrb[144].mxu0 %vm2395_vm2, %v9348_v49  ;;  %8932 = vmatmul.mubr.msk.bf16.gmra.mrb[144].mxu1 %vm2395_vm2, %v9349_v44  ;;  %v9354_v44 = vld [vmem:[%s9888_s6 + $0x260] sm:$0xff]  }
 0x1ad   : > { %8679 = vmatprep.mubr.msk.bf16.mxu0 %vm2395_vm2, %v9350_v45  ;;  %8935 = vmatprep.mubr.msk.bf16.mxu1 %vm2395_vm2, %v9351_v48  ;;  %v9355_v45 = vld [vmem:[%s9888_s6 + $0x660] sm:$0xff]  }
 0x1af   : > { %v10350_v32 = vpop.f32.mrb[40].mxu0  ;;  %v10352_v5 = vpop.f32.mrb[40].mxu1 }
 0x1b0   : > { %11622 = vst [vmem:[#allocation39_spill] sm:$0xff] %v10350_v32  ;;  %11623 = vst [vmem:[#allocation40_spill] sm:$0xff] %v10352_v5  ;;  %v10354_v57 = vpop.f32.mrb[41].mxu0  ;;  %v10356_v37 = vpop.f32.mrb[41].mxu1  ;;  %v9356_v5 = vld [vmem:[%s9888_s6 + $0x268] sm:$0xff]  }
 0x1b1   : > { %11624 = vst [vmem:[#allocation41_spill] sm:$0xff] %v10354_v57  ;;  %11625 = vst [vmem:[#allocation42_spill] sm:$0xff] %v10356_v37  ;;  %v10360_v4 = vpop.f32.mrb[42].mxu0  ;;  %v10362_v49 = vpop.f32.mrb[42].mxu1 }
 0x1b2   : > { %11626 = vst [vmem:[#allocation43_spill] sm:$0xff] %v10360_v4  ;;  %11627 = vst [vmem:[#allocation44_spill] sm:$0xff] %v10362_v49  ;;  %v10366_v48 = vpop.f32.mrb[43].mxu0  ;;  %v10368_v32 = vpop.f32.mrb[43].mxu1 }
 0x1b3   : > { %11628 = vst [vmem:[#allocation45_spill] sm:$0xff] %v10366_v48  ;;  %11629 = vst [vmem:[#allocation46_spill] sm:$0xff] %v10368_v32  ;;  %v9357_v48 = vld [vmem:[%s9888_s6 + $0x668] sm:$0xff]  }
 0x1b4   : > { %8680 = vmatmul.mubr.msk.bf16.gmra.mrb[148].mxu0 %vm2395_vm2, %v9352_v56  ;;  %8936 = vmatmul.mubr.msk.bf16.gmra.mrb[148].mxu1 %vm2395_vm2, %v9353_v33  ;;  %v9358_v33 = vld [vmem:[%s9888_s6 + $0x270] sm:$0xff]  }
 0x1b5   : > { %8683 = vmatprep.mubr.msk.bf16.mxu0 %vm2395_vm2, %v9354_v44  ;;  %8939 = vmatprep.mubr.msk.bf16.mxu1 %vm2395_vm2, %v9355_v45  ;;  %v9359_v44 = vld [vmem:[%s9888_s6 + $0x670] sm:$0xff]  }
 0x1b7   : > { %v10374_v37 = vpop.f32.mrb[44].mxu0  ;;  %v10376_v4 = vpop.f32.mrb[44].mxu1 }
 0x1b8   : > { %11630 = vst [vmem:[#allocation47_spill] sm:$0xff] %v10374_v37  ;;  %11631 = vst [vmem:[#allocation48_spill] sm:$0xff] %v10376_v4  ;;  %v10378_v49 = vpop.f32.mrb[45].mxu0  ;;  %v10380_v57 = vpop.f32.mrb[45].mxu1  ;;  %v9360_v4 = vld [vmem:[%s9888_s6 + $0x278] sm:$0xff]  }
 0x1b9   : > { %11632 = vst [vmem:[#allocation49_spill] sm:$0xff] %v10378_v49  ;;  %11633 = vst [vmem:[#allocation50_spill] sm:$0xff] %v10380_v57  ;;  %v10384_v32 = vpop.f32.mrb[46].mxu0  ;;  %v10386_v56 = vpop.f32.mrb[46].mxu1 }
 0x1ba   : > { %11634 = vst [vmem:[#allocation51_spill] sm:$0xff] %v10384_v32  ;;  %11635 = vst [vmem:[#allocation52_spill] sm:$0xff] %v10386_v56  ;;  %v10390_v45 = vpop.f32.mrb[47].mxu0  ;;  %v10392_v37 = vpop.f32.mrb[47].mxu1 }
 0x1bb   : > { %11636 = vst [vmem:[#allocation53_spill] sm:$0xff] %v10390_v45  ;;  %11637 = vst [vmem:[#allocation54_spill] sm:$0xff] %v10392_v37  ;;  %v9361_v45 = vld [vmem:[%s9888_s6 + $0x678] sm:$0xff]  }
 0x1bc   : > { %8684 = vmatmul.mubr.msk.bf16.gmra.mrb[152].mxu0 %vm2395_vm2, %v9356_v5  ;;  %8940 = vmatmul.mubr.msk.bf16.gmra.mrb[152].mxu1 %vm2395_vm2, %v9357_v48  ;;  %v9362_v48 = vld [vmem:[%s9888_s6 + $0x280] sm:$0xff]  }
 0x1bd   : > { %8687 = vmatprep.mubr.msk.bf16.mxu0 %vm2395_vm2, %v9358_v33  ;;  %8943 = vmatprep.mubr.msk.bf16.mxu1 %vm2395_vm2, %v9359_v44  ;;  %v9363_v33 = vld [vmem:[%s9888_s6 + $0x680] sm:$0xff]  }
 0x1bf   : > { %v10398_v57 = vpop.f32.mrb[48].mxu0  ;;  %v10400_v32 = vpop.f32.mrb[48].mxu1 }
 0x1c0   : > { %11638 = vst [vmem:[#allocation55_spill] sm:$0xff] %v10398_v57  ;;  %11639 = vst [vmem:[#allocation56_spill] sm:$0xff] %v10400_v32  ;;  %v10402_v56 = vpop.f32.mrb[49].mxu0  ;;  %v10404_v49 = vpop.f32.mrb[49].mxu1  ;;  %v9364_v32 = vld [vmem:[%s9888_s6 + $0x288] sm:$0xff]  }
 0x1c1   : > { %11640 = vst [vmem:[#allocation57_spill] sm:$0xff] %v10402_v56  ;;  %11641 = vst [vmem:[#allocation58_spill] sm:$0xff] %v10404_v49  ;;  %v10408_v37 = vpop.f32.mrb[50].mxu0  ;;  %v10410_v5 = vpop.f32.mrb[50].mxu1 }
 0x1c2   : > { %11642 = vst [vmem:[#allocation59_spill] sm:$0xff] %v10408_v37  ;;  %11643 = vst [vmem:[#allocation60_spill] sm:$0xff] %v10410_v5  ;;  %v10414_v44 = vpop.f32.mrb[51].mxu0  ;;  %v10416_v57 = vpop.f32.mrb[51].mxu1 }
 0x1c3   : > { %11644 = vst [vmem:[#allocation61_spill] sm:$0xff] %v10414_v44  ;;  %11645 = vst [vmem:[#allocation62_spill] sm:$0xff] %v10416_v57  ;;  %v9365_v44 = vld [vmem:[%s9888_s6 + $0x688] sm:$0xff]  }
 0x1c4   : > { %8688 = vmatmul.mubr.msk.bf16.gmra.mrb[156].mxu0 %vm2395_vm2, %v9360_v4  ;;  %8944 = vmatmul.mubr.msk.bf16.gmra.mrb[156].mxu1 %vm2395_vm2, %v9361_v45  ;;  %v9366_v45 = vld [vmem:[%s9888_s6 + $0x290] sm:$0xff]  }
 0x1c5   : > { %8691 = vmatprep.mubr.msk.bf16.mxu0 %vm2395_vm2, %v9362_v48  ;;  %8947 = vmatprep.mubr.msk.bf16.mxu1 %vm2395_vm2, %v9363_v33  ;;  %v9367_v48 = vld [vmem:[%s9888_s6 + $0x690] sm:$0xff]  }
 0x1c7   : > { %v10422_v49 = vpop.f32.mrb[52].mxu0  ;;  %v10424_v37 = vpop.f32.mrb[52].mxu1 }
 0x1c8   : > { %11646 = vst [vmem:[#allocation63_spill] sm:$0xff] %v10422_v49  ;;  %11647 = vst [vmem:[#allocation64_spill] sm:$0xff] %v10424_v37  ;;  %v10426_v5 = vpop.f32.mrb[53].mxu0  ;;  %v10428_v56 = vpop.f32.mrb[53].mxu1  ;;  %v9368_v37 = vld [vmem:[%s9888_s6 + $0x298] sm:$0xff]  }
 0x1c9   : > { %11648 = vst [vmem:[#allocation65_spill] sm:$0xff] %v10426_v5  ;;  %11649 = vst [vmem:[#allocation66_spill] sm:$0xff] %v10428_v56  ;;  %v10432_v57 = vpop.f32.mrb[54].mxu0  ;;  %v10434_v4 = vpop.f32.mrb[54].mxu1 }
 0x1ca   : > { %11650 = vst [vmem:[#allocation67_spill] sm:$0xff] %v10432_v57  ;;  %11651 = vst [vmem:[#allocation68_spill] sm:$0xff] %v10434_v4  ;;  %v10438_v33 = vpop.f32.mrb[55].mxu0  ;;  %v10440_v49 = vpop.f32.mrb[55].mxu1 }
 0x1cb   : > { %11652 = vst [vmem:[#allocation69_spill] sm:$0xff] %v10438_v33  ;;  %11653 = vst [vmem:[#allocation70_spill] sm:$0xff] %v10440_v49  ;;  %v9369_v33 = vld [vmem:[%s9888_s6 + $0x698] sm:$0xff]  }
 0x1cc   : > { %8692 = vmatmul.mubr.msk.bf16.gmra.mrb[160].mxu0 %vm2395_vm2, %v9364_v32  ;;  %8948 = vmatmul.mubr.msk.bf16.gmra.mrb[160].mxu1 %vm2395_vm2, %v9365_v44  ;;  %v9370_v44 = vld [vmem:[%s9888_s6 + $0x2a0] sm:$0xff]  }
 0x1cd   : > { %8695 = vmatprep.mubr.msk.bf16.mxu0 %vm2395_vm2, %v9366_v45  ;;  %8951 = vmatprep.mubr.msk.bf16.mxu1 %vm2395_vm2, %v9367_v48  ;;  %v9371_v45 = vld [vmem:[%s9888_s6 + $0x6a0] sm:$0xff]  }
 0x1cf   : > { %v10446_v56 = vpop.f32.mrb[56].mxu0  ;;  %v10448_v57 = vpop.f32.mrb[56].mxu1 }
 0x1d0   : > { %11654 = vst [vmem:[#allocation71_spill] sm:$0xff] %v10446_v56  ;;  %11655 = vst [vmem:[#allocation72_spill] sm:$0xff] %v10448_v57  ;;  %v10450_v4 = vpop.f32.mrb[57].mxu0  ;;  %v10452_v5 = vpop.f32.mrb[57].mxu1  ;;  %v9372_v57 = vld [vmem:[%s9888_s6 + $0x2a8] sm:$0xff]  }
 0x1d1   : > { %11656 = vst [vmem:[#allocation73_spill] sm:$0xff] %v10450_v4  ;;  %11657 = vst [vmem:[#allocation74_spill] sm:$0xff] %v10452_v5  ;;  %v10456_v49 = vpop.f32.mrb[58].mxu0  ;;  %v10458_v32 = vpop.f32.mrb[58].mxu1 }
 0x1d2   : > { %11658 = vst [vmem:[#allocation75_spill] sm:$0xff] %v10456_v49  ;;  %11659 = vst [vmem:[#allocation76_spill] sm:$0xff] %v10458_v32  ;;  %v10462_v48 = vpop.f32.mrb[59].mxu0  ;;  %v10464_v56 = vpop.f32.mrb[59].mxu1 }
 0x1d3   : > { %11660 = vst [vmem:[#allocation77_spill] sm:$0xff] %v10462_v48  ;;  %11661 = vst [vmem:[#allocation78_spill] sm:$0xff] %v10464_v56  ;;  %v9373_v48 = vld [vmem:[%s9888_s6 + $0x6a8] sm:$0xff]  }
 0x1d4   : > { %8696 = vmatmul.mubr.msk.bf16.gmra.mrb[164].mxu0 %vm2395_vm2, %v9368_v37  ;;  %8952 = vmatmul.mubr.msk.bf16.gmra.mrb[164].mxu1 %vm2395_vm2, %v9369_v33  ;;  %v9374_v33 = vld [vmem:[%s9888_s6 + $0x2b0] sm:$0xff]  }
 0x1d5   : > { %8699 = vmatprep.mubr.msk.bf16.mxu0 %vm2395_vm2, %v9370_v44  ;;  %8955 = vmatprep.mubr.msk.bf16.mxu1 %vm2395_vm2, %v9371_v45  ;;  %v9375_v44 = vld [vmem:[%s9888_s6 + $0x6b0] sm:$0xff]  }
 0x1d7   : > { %v10470_v5 = vpop.f32.mrb[60].mxu0  ;;  %v10472_v49 = vpop.f32.mrb[60].mxu1 }
 0x1d8   : > { %11662 = vst [vmem:[#allocation79_spill] sm:$0xff] %v10470_v5  ;;  %11663 = vst [vmem:[#allocation80_spill] sm:$0xff] %v10472_v49  ;;  %v10474_v32 = vpop.f32.mrb[61].mxu0  ;;  %v10476_v4 = vpop.f32.mrb[61].mxu1  ;;  %v9376_v49 = vld [vmem:[%s9888_s6 + $0x2b8] sm:$0xff]  }
 0x1d9   : > { %11664 = vst [vmem:[#allocation81_spill] sm:$0xff] %v10474_v32  ;;  %11665 = vst [vmem:[#allocation82_spill] sm:$0xff] %v10476_v4  ;;  %v10480_v56 = vpop.f32.mrb[62].mxu0  ;;  %v10482_v37 = vpop.f32.mrb[62].mxu1 }
 0x1da   : > { %11666 = vst [vmem:[#allocation83_spill] sm:$0xff] %v10480_v56  ;;  %11667 = vst [vmem:[#allocation84_spill] sm:$0xff] %v10482_v37  ;;  %v10486_v45 = vpop.f32.mrb[63].mxu0  ;;  %v10488_v5 = vpop.f32.mrb[63].mxu1 }
 0x1db   : > { %11668 = vst [vmem:[#allocation85_spill] sm:$0xff] %v10486_v45  ;;  %11669 = vst [vmem:[#allocation86_spill] sm:$0xff] %v10488_v5  ;;  %v9377_v45 = vld [vmem:[%s9888_s6 + $0x6b8] sm:$0xff]  }
 0x1dc   : > { %8700 = vmatmul.mubr.msk.bf16.gmra.mrb[168].mxu0 %vm2395_vm2, %v9372_v57  ;;  %8956 = vmatmul.mubr.msk.bf16.gmra.mrb[168].mxu1 %vm2395_vm2, %v9373_v48  ;;  %v9378_v48 = vld [vmem:[%s9888_s6 + $0x2c0] sm:$0xff]  }
 0x1dd   : > { %8703 = vmatprep.mubr.msk.bf16.mxu0 %vm2395_vm2, %v9374_v33  ;;  %8959 = vmatprep.mubr.msk.bf16.mxu1 %vm2395_vm2, %v9375_v44  ;;  %v9379_v33 = vld [vmem:[%s9888_s6 + $0x6c0] sm:$0xff]  }
 0x1df   : > { %v10494_v4 = vpop.f32.mrb[64].mxu0  ;;  %v10496_v56 = vpop.f32.mrb[64].mxu1 }
 0x1e0   : > { %11670 = vst [vmem:[#allocation87_spill] sm:$0xff] %v10494_v4  ;;  %11671 = vst [vmem:[#allocation88_spill] sm:$0xff] %v10496_v56  ;;  %v10498_v37 = vpop.f32.mrb[65].mxu0  ;;  %v10500_v32 = vpop.f32.mrb[65].mxu1  ;;  %v9380_v56 = vld [vmem:[%s9888_s6 + $0x2c8] sm:$0xff]  }
 0x1e1   : > { %11672 = vst [vmem:[#allocation89_spill] sm:$0xff] %v10498_v37  ;;  %11673 = vst [vmem:[#allocation90_spill] sm:$0xff] %v10500_v32  ;;  %v10504_v5 = vpop.f32.mrb[66].mxu0  ;;  %v10506_v57 = vpop.f32.mrb[66].mxu1 }
 0x1e2   : > { %11674 = vst [vmem:[#allocation91_spill] sm:$0xff] %v10504_v5  ;;  %11675 = vst [vmem:[#allocation92_spill] sm:$0xff] %v10506_v57  ;;  %v10510_v44 = vpop.f32.mrb[67].mxu0  ;;  %v10512_v4 = vpop.f32.mrb[67].mxu1 }
 0x1e3   : > { %11676 = vst [vmem:[#allocation93_spill] sm:$0xff] %v10510_v44  ;;  %11677 = vst [vmem:[#allocation94_spill] sm:$0xff] %v10512_v4  ;;  %v9381_v44 = vld [vmem:[%s9888_s6 + $0x6c8] sm:$0xff]  }
 0x1e4   : > { %8704 = vmatmul.mubr.msk.bf16.gmra.mrb[172].mxu0 %vm2395_vm2, %v9376_v49  ;;  %8960 = vmatmul.mubr.msk.bf16.gmra.mrb[172].mxu1 %vm2395_vm2, %v9377_v45  ;;  %v9382_v45 = vld [vmem:[%s9888_s6 + $0x2d0] sm:$0xff]  }
 0x1e5   : > { %8707 = vmatprep.mubr.msk.bf16.mxu0 %vm2395_vm2, %v9378_v48  ;;  %8963 = vmatprep.mubr.msk.bf16.mxu1 %vm2395_vm2, %v9379_v33  ;;  %v9383_v48 = vld [vmem:[%s9888_s6 + $0x6d0] sm:$0xff]  }
 0x1e7   : > { %v10518_v32 = vpop.f32.mrb[68].mxu0  ;;  %v10520_v5 = vpop.f32.mrb[68].mxu1 }
 0x1e8   : > { %11678 = vst [vmem:[#allocation95_spill] sm:$0xff] %v10518_v32  ;;  %11679 = vst [vmem:[#allocation96_spill] sm:$0xff] %v10520_v5  ;;  %v10522_v57 = vpop.f32.mrb[69].mxu0  ;;  %v10524_v37 = vpop.f32.mrb[69].mxu1  ;;  %v9384_v5 = vld [vmem:[%s9888_s6 + $0x2d8] sm:$0xff]  }
 0x1e9   : > { %11680 = vst [vmem:[#allocation97_spill] sm:$0xff] %v10522_v57  ;;  %11681 = vst [vmem:[#allocation98_spill] sm:$0xff] %v10524_v37  ;;  %v10528_v4 = vpop.f32.mrb[70].mxu0  ;;  %v10530_v49 = vpop.f32.mrb[70].mxu1 }
 0x1ea   : > { %11682 = vst [vmem:[#allocation99_spill] sm:$0xff] %v10528_v4  ;;  %11683 = vst [vmem:[#allocation100_spill] sm:$0xff] %v10530_v49  ;;  %v10534_v33 = vpop.f32.mrb[71].mxu0  ;;  %v10536_v32 = vpop.f32.mrb[71].mxu1 }
 0x1eb   : > { %11684 = vst [vmem:[#allocation101_spill] sm:$0xff] %v10534_v33  ;;  %11685 = vst [vmem:[#allocation102_spill] sm:$0xff] %v10536_v32  ;;  %v9385_v33 = vld [vmem:[%s9888_s6 + $0x6d8] sm:$0xff]  }
 0x1ec   : > { %8708 = vmatmul.mubr.msk.bf16.gmra.mrb[176].mxu0 %vm2395_vm2, %v9380_v56  ;;  %8964 = vmatmul.mubr.msk.bf16.gmra.mrb[176].mxu1 %vm2395_vm2, %v9381_v44  ;;  %v9386_v44 = vld [vmem:[%s9888_s6 + $0x2e0] sm:$0xff]  }
 0x1ed   : > { %8711 = vmatprep.mubr.msk.bf16.mxu0 %vm2395_vm2, %v9382_v45  ;;  %8967 = vmatprep.mubr.msk.bf16.mxu1 %vm2395_vm2, %v9383_v48  ;;  %v9387_v45 = vld [vmem:[%s9888_s6 + $0x6e0] sm:$0xff]  }
 0x1ef   : > { %v10542_v37 = vpop.f32.mrb[72].mxu0  ;;  %v10544_v4 = vpop.f32.mrb[72].mxu1 }
 0x1f0   : > { %11686 = vst [vmem:[#allocation103_spill] sm:$0xff] %v10542_v37  ;;  %11687 = vst [vmem:[#allocation104_spill] sm:$0xff] %v10544_v4  ;;  %v10546_v49 = vpop.f32.mrb[73].mxu0  ;;  %v10548_v57 = vpop.f32.mrb[73].mxu1  ;;  %v9388_v4 = vld [vmem:[%s9888_s6 + $0x2e8] sm:$0xff]  }
 0x1f1   : > { %11688 = vst [vmem:[#allocation105_spill] sm:$0xff] %v10546_v49  ;;  %11689 = vst [vmem:[#allocation106_spill] sm:$0xff] %v10548_v57  ;;  %v10552_v32 = vpop.f32.mrb[74].mxu0  ;;  %v10554_v56 = vpop.f32.mrb[74].mxu1 }
 0x1f2   : > { %11690 = vst [vmem:[#allocation107_spill] sm:$0xff] %v10552_v32  ;;  %11691 = vst [vmem:[#allocation108_spill] sm:$0xff] %v10554_v56  ;;  %v10558_v48 = vpop.f32.mrb[75].mxu0  ;;  %v10560_v37 = vpop.f32.mrb[75].mxu1 }
 0x1f3   : > { %11692 = vst [vmem:[#allocation109_spill] sm:$0xff] %v10558_v48  ;;  %11693 = vst [vmem:[#allocation110_spill] sm:$0xff] %v10560_v37  ;;  %v9389_v48 = vld [vmem:[%s9888_s6 + $0x6e8] sm:$0xff]  }
 0x1f4   : > { %8712 = vmatmul.mubr.msk.bf16.gmra.mrb[180].mxu0 %vm2395_vm2, %v9384_v5  ;;  %8968 = vmatmul.mubr.msk.bf16.gmra.mrb[180].mxu1 %vm2395_vm2, %v9385_v33  ;;  %v9390_v33 = vld [vmem:[%s9888_s6 + $0x2f0] sm:$0xff]  }
 0x1f5   : > { %8715 = vmatprep.mubr.msk.bf16.mxu0 %vm2395_vm2, %v9386_v44  ;;  %8971 = vmatprep.mubr.msk.bf16.mxu1 %vm2395_vm2, %v9387_v45  ;;  %v9391_v44 = vld [vmem:[%s9888_s6 + $0x6f0] sm:$0xff]  }
 0x1f7   : > { %v10566_v57 = vpop.f32.mrb[76].mxu0  ;;  %v10568_v32 = vpop.f32.mrb[76].mxu1 }
 0x1f8   : > { %11694 = vst [vmem:[#allocation111_spill] sm:$0xff] %v10566_v57  ;;  %11695 = vst [vmem:[#allocation112_spill] sm:$0xff] %v10568_v32  ;;  %v10570_v56 = vpop.f32.mrb[77].mxu0  ;;  %v10572_v49 = vpop.f32.mrb[77].mxu1  ;;  %v9392_v32 = vld [vmem:[%s9888_s6 + $0x2f8] sm:$0xff]  }
 0x1f9   : > { %11696 = vst [vmem:[#allocation113_spill] sm:$0xff] %v10570_v56  ;;  %11697 = vst [vmem:[#allocation114_spill] sm:$0xff] %v10572_v49  ;;  %v10576_v37 = vpop.f32.mrb[78].mxu0  ;;  %v10578_v5 = vpop.f32.mrb[78].mxu1 }
 0x1fa   : > { %11698 = vst [vmem:[#allocation115_spill] sm:$0xff] %v10576_v37  ;;  %11699 = vst [vmem:[#allocation116_spill] sm:$0xff] %v10578_v5  ;;  %v10582_v45 = vpop.f32.mrb[79].mxu0  ;;  %v10584_v57 = vpop.f32.mrb[79].mxu1 }
 0x1fb   : > { %11700 = vst [vmem:[#allocation117_spill] sm:$0xff] %v10582_v45  ;;  %11701 = vst [vmem:[#allocation118_spill] sm:$0xff] %v10584_v57  ;;  %v9393_v45 = vld [vmem:[%s9888_s6 + $0x6f8] sm:$0xff]  }
 0x1fc   : > { %8716 = vmatmul.mubr.msk.bf16.gmra.mrb[184].mxu0 %vm2395_vm2, %v9388_v4  ;;  %8972 = vmatmul.mubr.msk.bf16.gmra.mrb[184].mxu1 %vm2395_vm2, %v9389_v48  ;;  %v9394_v48 = vld [vmem:[%s9888_s6 + $0x300] sm:$0xff]  }
 0x1fd   : > { %8719 = vmatprep.mubr.msk.bf16.mxu0 %vm2395_vm2, %v9390_v33  ;;  %8975 = vmatprep.mubr.msk.bf16.mxu1 %vm2395_vm2, %v9391_v44  ;;  %v9395_v33 = vld [vmem:[%s9888_s6 + $0x700] sm:$0xff]  }
 0x1ff   : > { %v10590_v49 = vpop.f32.mrb[80].mxu0  ;;  %v10592_v37 = vpop.f32.mrb[80].mxu1 }
 0x200   : > { %11702 = vst [vmem:[#allocation119_spill] sm:$0xff] %v10590_v49  ;;  %11703 = vst [vmem:[#allocation120_spill] sm:$0xff] %v10592_v37  ;;  %v10594_v5 = vpop.f32.mrb[81].mxu0  ;;  %v10596_v56 = vpop.f32.mrb[81].mxu1  ;;  %v9396_v37 = vld [vmem:[%s9888_s6 + $0x308] sm:$0xff]  }
 0x201   : > { %11704 = vst [vmem:[#allocation121_spill] sm:$0xff] %v10594_v5  ;;  %11705 = vst [vmem:[#allocation122_spill] sm:$0xff] %v10596_v56  ;;  %v10600_v57 = vpop.f32.mrb[82].mxu0  ;;  %v10602_v4 = vpop.f32.mrb[82].mxu1 }
 0x202   : > { %11706 = vst [vmem:[#allocation123_spill] sm:$0xff] %v10600_v57  ;;  %11707 = vst [vmem:[#allocation124_spill] sm:$0xff] %v10602_v4  ;;  %v10606_v44 = vpop.f32.mrb[83].mxu0  ;;  %v10608_v49 = vpop.f32.mrb[83].mxu1 }
 0x203   : > { %11708 = vst [vmem:[#allocation125_spill] sm:$0xff] %v10606_v44  ;;  %11709 = vst [vmem:[#allocation126_spill] sm:$0xff] %v10608_v49  ;;  %v9397_v44 = vld [vmem:[%s9888_s6 + $0x708] sm:$0xff]  }
 0x204   : > { %8720 = vmatmul.mubr.msk.bf16.gmra.mrb[188].mxu0 %vm2395_vm2, %v9392_v32  ;;  %8976 = vmatmul.mubr.msk.bf16.gmra.mrb[188].mxu1 %vm2395_vm2, %v9393_v45  ;;  %v9398_v45 = vld [vmem:[%s9888_s6 + $0x310] sm:$0xff]  }
 0x205   : > { %8723 = vmatprep.mubr.msk.bf16.mxu0 %vm2395_vm2, %v9394_v48  ;;  %8979 = vmatprep.mubr.msk.bf16.mxu1 %vm2395_vm2, %v9395_v33  ;;  %v9399_v48 = vld [vmem:[%s9888_s6 + $0x710] sm:$0xff]  }
 0x207   : > { %v10614_v56 = vpop.f32.mrb[84].mxu0  ;;  %v10616_v57 = vpop.f32.mrb[84].mxu1 }
 0x208   : > { %11710 = vst [vmem:[#allocation127_spill] sm:$0xff] %v10614_v56  ;;  %11711 = vst [vmem:[#allocation128_spill] sm:$0xff] %v10616_v57  ;;  %v10618_v4 = vpop.f32.mrb[85].mxu0  ;;  %v10620_v5 = vpop.f32.mrb[85].mxu1  ;;  %v9400_v57 = vld [vmem:[%s9888_s6 + $0x318] sm:$0xff]  }
 0x209   : > { %11712 = vst [vmem:[#allocation129_spill] sm:$0xff] %v10618_v4  ;;  %11713 = vst [vmem:[#allocation130_spill] sm:$0xff] %v10620_v5  ;;  %v10624_v49 = vpop.f32.mrb[86].mxu0  ;;  %v10626_v32 = vpop.f32.mrb[86].mxu1 }
 0x20a   : > { %11714 = vst [vmem:[#allocation131_spill] sm:$0xff] %v10624_v49  ;;  %11715 = vst [vmem:[#allocation132_spill] sm:$0xff] %v10626_v32  ;;  %v10630_v33 = vpop.f32.mrb[87].mxu0  ;;  %v10632_v56 = vpop.f32.mrb[87].mxu1 }
 0x20b   : > { %11716 = vst [vmem:[#allocation133_spill] sm:$0xff] %v10630_v33  ;;  %11717 = vst [vmem:[#allocation134_spill] sm:$0xff] %v10632_v56  ;;  %v9401_v33 = vld [vmem:[%s9888_s6 + $0x718] sm:$0xff]  }
 0x20c   : > { %8724 = vmatmul.mubr.msk.bf16.gmra.mrb[192].mxu0 %vm2395_vm2, %v9396_v37  ;;  %8980 = vmatmul.mubr.msk.bf16.gmra.mrb[192].mxu1 %vm2395_vm2, %v9397_v44  ;;  %v9402_v44 = vld [vmem:[%s9888_s6 + $0x320] sm:$0xff]  }
 0x20d   : > { %8727 = vmatprep.mubr.msk.bf16.mxu0 %vm2395_vm2, %v9398_v45  ;;  %8983 = vmatprep.mubr.msk.bf16.mxu1 %vm2395_vm2, %v9399_v48  ;;  %v9403_v45 = vld [vmem:[%s9888_s6 + $0x720] sm:$0xff]  }
 0x20f   : > { %v10638_v5 = vpop.f32.mrb[88].mxu0  ;;  %v10640_v49 = vpop.f32.mrb[88].mxu1 }
 0x210   : > { %11718 = vst [vmem:[#allocation135_spill] sm:$0xff] %v10638_v5  ;;  %11719 = vst [vmem:[#allocation136_spill] sm:$0xff] %v10640_v49  ;;  %v10642_v32 = vpop.f32.mrb[89].mxu0  ;;  %v10644_v4 = vpop.f32.mrb[89].mxu1  ;;  %v9404_v49 = vld [vmem:[%s9888_s6 + $0x328] sm:$0xff]  }
 0x211   : > { %11720 = vst [vmem:[#allocation137_spill] sm:$0xff] %v10642_v32  ;;  %11721 = vst [vmem:[#allocation138_spill] sm:$0xff] %v10644_v4  ;;  %v10648_v56 = vpop.f32.mrb[90].mxu0  ;;  %v10650_v37 = vpop.f32.mrb[90].mxu1 }
 0x212   : > { %11722 = vst [vmem:[#allocation139_spill] sm:$0xff] %v10648_v56  ;;  %11723 = vst [vmem:[#allocation140_spill] sm:$0xff] %v10650_v37  ;;  %v10654_v48 = vpop.f32.mrb[91].mxu0  ;;  %v10656_v5 = vpop.f32.mrb[91].mxu1 }
 0x213   : > { %11724 = vst [vmem:[#allocation141_spill] sm:$0xff] %v10654_v48  ;;  %11725 = vst [vmem:[#allocation142_spill] sm:$0xff] %v10656_v5  ;;  %v9405_v48 = vld [vmem:[%s9888_s6 + $0x728] sm:$0xff]  }
 0x214   : > { %8728 = vmatmul.mubr.msk.bf16.gmra.mrb[196].mxu0 %vm2395_vm2, %v9400_v57  ;;  %8984 = vmatmul.mubr.msk.bf16.gmra.mrb[196].mxu1 %vm2395_vm2, %v9401_v33  ;;  %v9406_v33 = vld [vmem:[%s9888_s6 + $0x330] sm:$0xff]  }
 0x215   : > { %8731 = vmatprep.mubr.msk.bf16.mxu0 %vm2395_vm2, %v9402_v44  ;;  %8987 = vmatprep.mubr.msk.bf16.mxu1 %vm2395_vm2, %v9403_v45  ;;  %v9407_v44 = vld [vmem:[%s9888_s6 + $0x730] sm:$0xff]  }
 0x217   : > { %v10662_v4 = vpop.f32.mrb[92].mxu0  ;;  %v10664_v56 = vpop.f32.mrb[92].mxu1 }
 0x218   : > { %11726 = vst [vmem:[#allocation143_spill] sm:$0xff] %v10662_v4  ;;  %11727 = vst [vmem:[#allocation144_spill] sm:$0xff] %v10664_v56  ;;  %v10666_v37 = vpop.f32.mrb[93].mxu0  ;;  %v10668_v32 = vpop.f32.mrb[93].mxu1  ;;  %v9408_v56 = vld [vmem:[%s9888_s6 + $0x338] sm:$0xff]  }
 0x219   : > { %11728 = vst [vmem:[#allocation145_spill] sm:$0xff] %v10666_v37  ;;  %11729 = vst [vmem:[#allocation146_spill] sm:$0xff] %v10668_v32  ;;  %v10672_v5 = vpop.f32.mrb[94].mxu0  ;;  %v10674_v57 = vpop.f32.mrb[94].mxu1 }
 0x21a   : > { %11730 = vst [vmem:[#allocation147_spill] sm:$0xff] %v10672_v5  ;;  %11731 = vst [vmem:[#allocation148_spill] sm:$0xff] %v10674_v57  ;;  %v10678_v45 = vpop.f32.mrb[95].mxu0  ;;  %v10680_v4 = vpop.f32.mrb[95].mxu1 }
 0x21b   : > { %11732 = vst [vmem:[#allocation149_spill] sm:$0xff] %v10678_v45  ;;  %11733 = vst [vmem:[#allocation150_spill] sm:$0xff] %v10680_v4  ;;  %v9409_v45 = vld [vmem:[%s9888_s6 + $0x738] sm:$0xff]  }
 0x21c   : > { %8732 = vmatmul.mubr.msk.bf16.gmra.mrb[200].mxu0 %vm2395_vm2, %v9404_v49  ;;  %8988 = vmatmul.mubr.msk.bf16.gmra.mrb[200].mxu1 %vm2395_vm2, %v9405_v48  ;;  %v9410_v48 = vld [vmem:[%s9888_s6 + $0x340] sm:$0xff]  }
 0x21d   : > { %8735 = vmatprep.mubr.msk.bf16.mxu0 %vm2395_vm2, %v9406_v33  ;;  %8991 = vmatprep.mubr.msk.bf16.mxu1 %vm2395_vm2, %v9407_v44  ;;  %v9411_v33 = vld [vmem:[%s9888_s6 + $0x740] sm:$0xff]  }
 0x21f   : > { %v10686_v32 = vpop.f32.mrb[96].mxu0  ;;  %v10688_v5 = vpop.f32.mrb[96].mxu1 }
 0x220   : > { %11734 = vst [vmem:[#allocation151_spill] sm:$0xff] %v10686_v32  ;;  %11735 = vst [vmem:[#allocation152_spill] sm:$0xff] %v10688_v5  ;;  %v10690_v57 = vpop.f32.mrb[97].mxu0  ;;  %v10692_v37 = vpop.f32.mrb[97].mxu1  ;;  %v9412_v5 = vld [vmem:[%s9888_s6 + $0x348] sm:$0xff]  }
 0x221   : > { %11736 = vst [vmem:[#allocation153_spill] sm:$0xff] %v10690_v57  ;;  %11737 = vst [vmem:[#allocation154_spill] sm:$0xff] %v10692_v37  ;;  %v10696_v4 = vpop.f32.mrb[98].mxu0  ;;  %v10698_v49 = vpop.f32.mrb[98].mxu1 }
 0x222   : > { %11738 = vst [vmem:[#allocation155_spill] sm:$0xff] %v10696_v4  ;;  %11739 = vst [vmem:[#allocation156_spill] sm:$0xff] %v10698_v49  ;;  %v10702_v44 = vpop.f32.mrb[99].mxu0  ;;  %v10704_v32 = vpop.f32.mrb[99].mxu1 }
 0x223   : > { %11740 = vst [vmem:[#allocation157_spill] sm:$0xff] %v10702_v44  ;;  %11741 = vst [vmem:[#allocation158_spill] sm:$0xff] %v10704_v32  ;;  %v9413_v44 = vld [vmem:[%s9888_s6 + $0x748] sm:$0xff]  }
 0x224   : > { %8736 = vmatmul.mubr.msk.bf16.gmra.mrb[204].mxu0 %vm2395_vm2, %v9408_v56  ;;  %8992 = vmatmul.mubr.msk.bf16.gmra.mrb[204].mxu1 %vm2395_vm2, %v9409_v45  ;;  %v9414_v45 = vld [vmem:[%s9888_s6 + $0x350] sm:$0xff]  }
 0x225   : > { %8739 = vmatprep.mubr.msk.bf16.mxu0 %vm2395_vm2, %v9410_v48  ;;  %8995 = vmatprep.mubr.msk.bf16.mxu1 %vm2395_vm2, %v9411_v33  ;;  %v9415_v48 = vld [vmem:[%s9888_s6 + $0x750] sm:$0xff]  }
 0x227   : > { %v10710_v37 = vpop.f32.mrb[100].mxu0  ;;  %v10712_v4 = vpop.f32.mrb[100].mxu1 }
 0x228   : > { %11742 = vst [vmem:[#allocation159_spill] sm:$0xff] %v10710_v37  ;;  %11743 = vst [vmem:[#allocation160_spill] sm:$0xff] %v10712_v4  ;;  %v10714_v49 = vpop.f32.mrb[101].mxu0  ;;  %v10716_v57 = vpop.f32.mrb[101].mxu1  ;;  %v9416_v4 = vld [vmem:[%s9888_s6 + $0x358] sm:$0xff]  }
 0x229   : > { %11744 = vst [vmem:[#allocation161_spill] sm:$0xff] %v10714_v49  ;;  %11745 = vst [vmem:[#allocation162_spill] sm:$0xff] %v10716_v57  ;;  %v10720_v32 = vpop.f32.mrb[102].mxu0  ;;  %v10722_v56 = vpop.f32.mrb[102].mxu1 }
 0x22a   : > { %11746 = vst [vmem:[#allocation163_spill] sm:$0xff] %v10720_v32  ;;  %11747 = vst [vmem:[#allocation164_spill] sm:$0xff] %v10722_v56  ;;  %v10726_v33 = vpop.f32.mrb[103].mxu0  ;;  %v10728_v37 = vpop.f32.mrb[103].mxu1 }
 0x22b   : > { %11748 = vst [vmem:[#allocation165_spill] sm:$0xff] %v10726_v33  ;;  %11749 = vst [vmem:[#allocation166_spill] sm:$0xff] %v10728_v37  ;;  %v9417_v33 = vld [vmem:[%s9888_s6 + $0x758] sm:$0xff]  }
 0x22c   : > { %8740 = vmatmul.mubr.msk.bf16.gmra.mrb[208].mxu0 %vm2395_vm2, %v9412_v5  ;;  %8996 = vmatmul.mubr.msk.bf16.gmra.mrb[208].mxu1 %vm2395_vm2, %v9413_v44  ;;  %v9418_v44 = vld [vmem:[%s9888_s6 + $0x360] sm:$0xff]  }
 0x22d   : > { %8743 = vmatprep.mubr.msk.bf16.mxu0 %vm2395_vm2, %v9414_v45  ;;  %8999 = vmatprep.mubr.msk.bf16.mxu1 %vm2395_vm2, %v9415_v48  ;;  %v9419_v45 = vld [vmem:[%s9888_s6 + $0x760] sm:$0xff]  }
 0x22f   : > { %v10734_v57 = vpop.f32.mrb[104].mxu0  ;;  %v10736_v32 = vpop.f32.mrb[104].mxu1 }
 0x230   : > { %11750 = vst [vmem:[#allocation167_spill] sm:$0xff] %v10734_v57  ;;  %11751 = vst [vmem:[#allocation168_spill] sm:$0xff] %v10736_v32  ;;  %v10738_v56 = vpop.f32.mrb[105].mxu0  ;;  %v10740_v49 = vpop.f32.mrb[105].mxu1  ;;  %v9420_v32 = vld [vmem:[%s9888_s6 + $0x368] sm:$0xff]  }
 0x231   : > { %11752 = vst [vmem:[#allocation169_spill] sm:$0xff] %v10738_v56  ;;  %11753 = vst [vmem:[#allocation170_spill] sm:$0xff] %v10740_v49  ;;  %v10744_v37 = vpop.f32.mrb[106].mxu0  ;;  %v10746_v5 = vpop.f32.mrb[106].mxu1 }
 0x232   : > { %11754 = vst [vmem:[#allocation171_spill] sm:$0xff] %v10744_v37  ;;  %11755 = vst [vmem:[#allocation172_spill] sm:$0xff] %v10746_v5  ;;  %v10750_v48 = vpop.f32.mrb[107].mxu0  ;;  %v10752_v57 = vpop.f32.mrb[107].mxu1 }
 0x233   : > { %11756 = vst [vmem:[#allocation173_spill] sm:$0xff] %v10750_v48  ;;  %11757 = vst [vmem:[#allocation174_spill] sm:$0xff] %v10752_v57  ;;  %v9421_v48 = vld [vmem:[%s9888_s6 + $0x768] sm:$0xff]  }
 0x234   : > { %8744 = vmatmul.mubr.msk.bf16.gmra.mrb[212].mxu0 %vm2395_vm2, %v9416_v4  ;;  %9000 = vmatmul.mubr.msk.bf16.gmra.mrb[212].mxu1 %vm2395_vm2, %v9417_v33  ;;  %v9422_v33 = vld [vmem:[%s9888_s6 + $0x370] sm:$0xff]  }
 0x235   : > { %8747 = vmatprep.mubr.msk.bf16.mxu0 %vm2395_vm2, %v9418_v44  ;;  %9003 = vmatprep.mubr.msk.bf16.mxu1 %vm2395_vm2, %v9419_v45  ;;  %v9423_v44 = vld [vmem:[%s9888_s6 + $0x770] sm:$0xff]  }
 0x237   : > { %v10758_v49 = vpop.f32.mrb[108].mxu0  ;;  %v10760_v37 = vpop.f32.mrb[108].mxu1 }
 0x238   : > { %11758 = vst [vmem:[#allocation175_spill] sm:$0xff] %v10758_v49  ;;  %11759 = vst [vmem:[#allocation176_spill] sm:$0xff] %v10760_v37  ;;  %v10762_v5 = vpop.f32.mrb[109].mxu0  ;;  %v10764_v56 = vpop.f32.mrb[109].mxu1  ;;  %v9424_v37 = vld [vmem:[%s9888_s6 + $0x378] sm:$0xff]  }
 0x239   : > { %11760 = vst [vmem:[#allocation177_spill] sm:$0xff] %v10762_v5  ;;  %11761 = vst [vmem:[#allocation178_spill] sm:$0xff] %v10764_v56  ;;  %v10768_v57 = vpop.f32.mrb[110].mxu0  ;;  %v10770_v4 = vpop.f32.mrb[110].mxu1 }
 0x23a   : > { %11762 = vst [vmem:[#allocation179_spill] sm:$0xff] %v10768_v57  ;;  %11763 = vst [vmem:[#allocation180_spill] sm:$0xff] %v10770_v4  ;;  %v10774_v45 = vpop.f32.mrb[111].mxu0  ;;  %v10776_v49 = vpop.f32.mrb[111].mxu1 }
 0x23b   : > { %11764 = vst [vmem:[#allocation181_spill] sm:$0xff] %v10774_v45  ;;  %11765 = vst [vmem:[#allocation182_spill] sm:$0xff] %v10776_v49  ;;  %v9425_v45 = vld [vmem:[%s9888_s6 + $0x778] sm:$0xff]  }
 0x23c   : > { %8748 = vmatmul.mubr.msk.bf16.gmra.mrb[216].mxu0 %vm2395_vm2, %v9420_v32  ;;  %9004 = vmatmul.mubr.msk.bf16.gmra.mrb[216].mxu1 %vm2395_vm2, %v9421_v48  ;;  %v9426_v48 = vld [vmem:[%s9888_s6 + $0x380] sm:$0xff]  }
 0x23d   : > { %8751 = vmatprep.mubr.msk.bf16.mxu0 %vm2395_vm2, %v9422_v33  ;;  %9007 = vmatprep.mubr.msk.bf16.mxu1 %vm2395_vm2, %v9423_v44  ;;  %v9427_v33 = vld [vmem:[%s9888_s6 + $0x780] sm:$0xff]  }
 0x23f   : > { %v10782_v56 = vpop.f32.mrb[112].mxu0  ;;  %v10784_v57 = vpop.f32.mrb[112].mxu1 }
 0x240   : > { %11766 = vst [vmem:[#allocation183_spill] sm:$0xff] %v10782_v56  ;;  %11767 = vst [vmem:[#allocation184_spill] sm:$0xff] %v10784_v57  ;;  %v10786_v4 = vpop.f32.mrb[113].mxu0  ;;  %v10788_v5 = vpop.f32.mrb[113].mxu1  ;;  %v9428_v57 = vld [vmem:[%s9888_s6 + $0x388] sm:$0xff]  }
 0x241   : > { %11768 = vst [vmem:[#allocation185_spill] sm:$0xff] %v10786_v4  ;;  %11769 = vst [vmem:[#allocation186_spill] sm:$0xff] %v10788_v5  ;;  %v10792_v49 = vpop.f32.mrb[114].mxu0  ;;  %v10794_v32 = vpop.f32.mrb[114].mxu1 }
 0x242   : > { %11770 = vst [vmem:[#allocation187_spill] sm:$0xff] %v10792_v49  ;;  %11771 = vst [vmem:[#allocation188_spill] sm:$0xff] %v10794_v32  ;;  %v10798_v44 = vpop.f32.mrb[115].mxu0  ;;  %v10800_v56 = vpop.f32.mrb[115].mxu1 }
 0x243   : > { %11772 = vst [vmem:[#allocation189_spill] sm:$0xff] %v10798_v44  ;;  %11773 = vst [vmem:[#allocation190_spill] sm:$0xff] %v10800_v56  ;;  %v9429_v44 = vld [vmem:[%s9888_s6 + $0x788] sm:$0xff]  }
 0x244   : > { %8752 = vmatmul.mubr.msk.bf16.gmra.mrb[220].mxu0 %vm2395_vm2, %v9424_v37  ;;  %9008 = vmatmul.mubr.msk.bf16.gmra.mrb[220].mxu1 %vm2395_vm2, %v9425_v45  ;;  %v9430_v45 = vld [vmem:[%s9888_s6 + $0x390] sm:$0xff]  }
 0x245   : > { %8755 = vmatprep.mubr.msk.bf16.mxu0 %vm2395_vm2, %v9426_v48  ;;  %9011 = vmatprep.mubr.msk.bf16.mxu1 %vm2395_vm2, %v9427_v33  ;;  %v9431_v48 = vld [vmem:[%s9888_s6 + $0x790] sm:$0xff]  }
 0x247   : > { %v10806_v5 = vpop.f32.mrb[116].mxu0  ;;  %v10808_v49 = vpop.f32.mrb[116].mxu1 }
 0x248   : > { %11774 = vst [vmem:[#allocation191_spill] sm:$0xff] %v10806_v5  ;;  %11775 = vst [vmem:[#allocation192_spill] sm:$0xff] %v10808_v49  ;;  %v10810_v32 = vpop.f32.mrb[117].mxu0  ;;  %v10812_v4 = vpop.f32.mrb[117].mxu1  ;;  %v9432_v49 = vld [vmem:[%s9888_s6 + $0x398] sm:$0xff]  }
 0x249   : > { %11776 = vst [vmem:[#allocation193_spill] sm:$0xff] %v10810_v32  ;;  %11777 = vst [vmem:[#allocation194_spill] sm:$0xff] %v10812_v4  ;;  %v10816_v56 = vpop.f32.mrb[118].mxu0  ;;  %v10818_v37 = vpop.f32.mrb[118].mxu1 }
 0x24a   : > { %11778 = vst [vmem:[#allocation195_spill] sm:$0xff] %v10816_v56  ;;  %11779 = vst [vmem:[#allocation196_spill] sm:$0xff] %v10818_v37  ;;  %v10822_v33 = vpop.f32.mrb[119].mxu0  ;;  %v10824_v5 = vpop.f32.mrb[119].mxu1 }
 0x24b   : > { %11780 = vst [vmem:[#allocation197_spill] sm:$0xff] %v10822_v33  ;;  %11781 = vst [vmem:[#allocation198_spill] sm:$0xff] %v10824_v5  ;;  %v9433_v33 = vld [vmem:[%s9888_s6 + $0x798] sm:$0xff]  }
 0x24c   : > { %8756 = vmatmul.mubr.msk.bf16.gmra.mrb[224].mxu0 %vm2395_vm2, %v9428_v57  ;;  %9012 = vmatmul.mubr.msk.bf16.gmra.mrb[224].mxu1 %vm2395_vm2, %v9429_v44  ;;  %v9434_v44 = vld [vmem:[%s9888_s6 + $0x3a0] sm:$0xff]  }
 0x24d   : > { %8759 = vmatprep.mubr.msk.bf16.mxu0 %vm2395_vm2, %v9430_v45  ;;  %9015 = vmatprep.mubr.msk.bf16.mxu1 %vm2395_vm2, %v9431_v48  ;;  %v9435_v45 = vld [vmem:[%s9888_s6 + $0x7a0] sm:$0xff]  }
 0x24f   : > { %v10830_v4 = vpop.f32.mrb[120].mxu0  ;;  %v10832_v56 = vpop.f32.mrb[120].mxu1 }
 0x250   : > { %11782 = vst [vmem:[#allocation199_spill] sm:$0xff] %v10830_v4  ;;  %11783 = vst [vmem:[#allocation200_spill] sm:$0xff] %v10832_v56  ;;  %v10834_v37 = vpop.f32.mrb[121].mxu0  ;;  %v10836_v32 = vpop.f32.mrb[121].mxu1  ;;  %v9436_v56 = vld [vmem:[%s9888_s6 + $0x3a8] sm:$0xff]  }
 0x251   : > { %11784 = vst [vmem:[#allocation201_spill] sm:$0xff] %v10834_v37  ;;  %11785 = vst [vmem:[#allocation202_spill] sm:$0xff] %v10836_v32  ;;  %v10840_v5 = vpop.f32.mrb[122].mxu0  ;;  %v10842_v57 = vpop.f32.mrb[122].mxu1 }
 0x252   : > { %11786 = vst [vmem:[#allocation203_spill] sm:$0xff] %v10840_v5  ;;  %11787 = vst [vmem:[#allocation204_spill] sm:$0xff] %v10842_v57  ;;  %v10846_v48 = vpop.f32.mrb[123].mxu0  ;;  %v10848_v4 = vpop.f32.mrb[123].mxu1 }
 0x253   : > { %11788 = vst [vmem:[#allocation205_spill] sm:$0xff] %v10846_v48  ;;  %11789 = vst [vmem:[#allocation206_spill] sm:$0xff] %v10848_v4  ;;  %v9437_v48 = vld [vmem:[%s9888_s6 + $0x7a8] sm:$0xff]  }
 0x254   : > { %8760 = vmatmul.mubr.msk.bf16.gmra.mrb[228].mxu0 %vm2395_vm2, %v9432_v49  ;;  %9016 = vmatmul.mubr.msk.bf16.gmra.mrb[228].mxu1 %vm2395_vm2, %v9433_v33  ;;  %v9438_v33 = vld [vmem:[%s9888_s6 + $0x3b0] sm:$0xff]  }
 0x255   : > { %8763 = vmatprep.mubr.msk.bf16.mxu0 %vm2395_vm2, %v9434_v44  ;;  %9019 = vmatprep.mubr.msk.bf16.mxu1 %vm2395_vm2, %v9435_v45  ;;  %v9439_v44 = vld [vmem:[%s9888_s6 + $0x7b0] sm:$0xff]  }
 0x257   : > { %v10854_v32 = vpop.f32.mrb[124].mxu0  ;;  %v10856_v5 = vpop.f32.mrb[124].mxu1 }
 0x258   : > { %11790 = vst [vmem:[#allocation207_spill] sm:$0xff] %v10854_v32  ;;  %11791 = vst [vmem:[#allocation208_spill] sm:$0xff] %v10856_v5  ;;  %v10858_v57 = vpop.f32.mrb[125].mxu0  ;;  %v10860_v37 = vpop.f32.mrb[125].mxu1  ;;  %v9440_v32 = vld [vmem:[%s9888_s6 + $0x3b8] sm:$0xff]  }
 0x259   : > { %11792 = vst [vmem:[#allocation209_spill] sm:$0xff] %v10858_v57  ;;  %11793 = vst [vmem:[#allocation210_spill] sm:$0xff] %v10860_v37  ;;  %v10864_v36 = vpop.f32.mrb[126].mxu0  ;;  %v10866_v49 = vpop.f32.mrb[126].mxu1 }
 0x25a   : > { %11794 = vst [vmem:[#allocation211_spill] sm:$0xff] %v10864_v36  ;;  %11795 = vst [vmem:[#allocation212_spill] sm:$0xff] %v10866_v49  ;;  %v10870_v4 = vpop.f32.mrb[127].mxu0  ;;  %v10872_v45 = vpop.f32.mrb[127].mxu1 }
 0x25b   : > { %11796 = vst [vmem:[#allocation213_spill] sm:$0xff] %v10870_v4  ;;  %11797 = vst [vmem:[#allocation214_spill] sm:$0xff] %v10872_v45  ;;  %v9441_v45 = vld [vmem:[%s9888_s6 + $0x7b8] sm:$0xff]  }
 0x25c   : > { %8764 = vmatmul.mubr.msk.bf16.gmra.mrb[232].mxu0 %vm2395_vm2, %v9436_v56  ;;  %9020 = vmatmul.mubr.msk.bf16.gmra.mrb[232].mxu1 %vm2395_vm2, %v9437_v48  ;;  %v10885_v56 = vld [vmem:[%s11579_s2] ss:$0 sm:$0xff] }
 0x25d   : > { %8767 = vmatprep.mubr.msk.bf16.mxu0 %vm2395_vm2, %v9438_v33  ;;  %9023 = vmatprep.mubr.msk.bf16.mxu1 %vm2395_vm2, %v9439_v44 }
 0x25f   : > { %v8661_v36 = vpop.f32.mrb[128].mxu0  ;;  %v8917_v37 = vpop.f32.mrb[128].mxu1 }
 0x260   : > { %v5254_v49 = vmax.f32 %v10112_v58, %v8661_v36  ;;  %v5382_v57 = vmax.f32 %v10114_v59, %v8917_v37  ;;  %v3717_v5 = vpop.f32.mrb[129].mxu0  ;;  %v4741_v4 = vpop.f32.mrb[129].mxu1  ;;  %v9443_v58 = vld [vmem:[%s9888_s6 + $0x7c0] sm:$0xff]  }
 0x261   : > { %v5252_v48 = vmax.f32 %v10116_v60, %v3717_v5  ;;  %v5380_v33 = vmax.f32 %v10118_v61, %v4741_v4  ;;  %v8662_v44 = vpop.f32.mrb[130].mxu0  ;;  %v8918_v25 = vpop.f32.mrb[130].mxu1 }
 0x262   : > { %v5510_v36 = vmax.f32 %v5254_v49, %v5382_v57  ;;  %v5255_v59 = vmax.f32 %v10120_v62, %v8662_v44  ;;  %v5383_v37 = vmax.f32 %v10122_v63, %v8918_v25  ;;  %v3720_v21 = vpop.f32.mrb[131].mxu0  ;;  %v4744_v20 = vpop.f32.mrb[131].mxu1 }
 0x263   : > { %v5508_v13 = vmax.f32 %v5252_v48, %v5380_v33  ;;  %v5253_v12 = vmax.f32 %v10126_v2, %v3720_v21  ;;  %v5381_v1 = vmax.f32 %v10128_v3, %v4744_v20 }
 0x264   : > { %v5645_v60 = vadd.f32 %v10885_v56, %v5510_v36  ;;  %v5511_v61 = vmax.f32 %v5255_v59, %v5383_v37  ;;  %8768 = vmatmul.mubr.msk.bf16.gmra.mrb[236].mxu0 %vm2395_vm2, %v9440_v32  ;;  %9024 = vmatmul.mubr.msk.bf16.gmra.mrb[236].mxu1 %vm2395_vm2, %v9441_v45  ;;  %v9447_v36 = vld [vmem:[%s9888_s6 + $0x7d0] sm:$0xff]  }
 0x265   : > { %v5643_v62 = vadd.f32 %v10885_v56, %v5508_v13  ;;  %v5509_v63 = vmax.f32 %v5253_v12, %v5381_v1  ;;  %8771 = vmatprep.mubr.msk.bf16.mxu0 %vm2395_vm2, %v9442_v24  ;;  %9027 = vmatprep.mubr.msk.bf16.mxu1 %vm2395_vm2, %v9443_v58  ;;  %v9444_v12 = vld [vmem:[%s9888_s6 + $0x3c8] sm:$0xff]   ;;  %v9446_v58 = vld [vmem:[%s9888_s6 + $0x3d0] sm:$0xff]  }
 0x266   : > { %v5646_v2 = vadd.f32 %v10885_v56, %v5511_v61  ;;  %v5773_v25 = vmax.f32 %v5645_v60, 0.0  ;;  %v9445_v24 = vld [vmem:[%s9888_s6 + $0x7c8] sm:$0xff]  }
 0x267   : > { %v5644_v3 = vadd.f32 %v10885_v56, %v5509_v63  ;;  %v8665_v20 = vpop.f32.mrb[132].mxu0  ;;  %v8921_v21 = vpop.f32.mrb[132].mxu1  ;;  %v5771_v57 = vmax.f32 %v5643_v62, 0.0 }
 0x268   : > { %v5774_v5 = vmax.f32 %v5646_v2, 0.0  ;;  %v5258_v4 = vmax.f32 %v10136_v6, %v8665_v20  ;;  %v5386_v32 = vmax.f32 %v10138_v7, %v8921_v21  ;;  %v3733_v13 = vpop.f32.mrb[133].mxu0  ;;  %v4757_v1 = vpop.f32.mrb[133].mxu1 }
 0x269   : > { %v5772_v49 = vmax.f32 %v5644_v3, 0.0  ;;  %v5256_v45 = vmax.f32 %v10140_v8, %v3733_v13  ;;  %v5384_v48 = vmax.f32 %v10142_v9, %v4757_v1  ;;  %v8666_v33 = vpop.f32.mrb[134].mxu0  ;;  %v8922_v44 = vpop.f32.mrb[134].mxu1 }
 0x26a   : > { %v7894_v59 = vpack.c.bf16 %v5774_v5, %v5773_v25  ;;  %v5514_v37 = vmax.f32 %v5258_v4, %v5386_v32  ;;  %v5259_v6 = vmax.f32 %v10144_v10, %v8666_v33  ;;  %v5387_v7 = vmax.f32 %v10146_v11, %v8922_v44  ;;  %v3736_v60 = vpop.f32.mrb[135].mxu0  ;;  %v4760_v61 = vpop.f32.mrb[135].mxu1 }
 0x26b   : > { %v7889_v63 = vpack.c.bf16 %v5772_v49, %v5771_v57  ;;  %v5512_v62 = vmax.f32 %v5256_v45, %v5384_v48  ;;  %v5257_v2 = vmax.f32 %v10150_v14, %v3736_v60  ;;  %v5385_v8 = vmax.f32 %v10152_v15, %v4760_v61 }
 0x26c   : > { %8206 = vst [vmem:[%s10920_s12 + $0x8] sm:$0xff] %v7894_v59   ;;  %v5649_v9 = vadd.f32 %v10885_v56, %v5514_v37  ;;  %v5515_v3 = vmax.f32 %v5259_v6, %v5387_v7  ;;  %8772 = vmatmul.mubr.msk.bf16.gmra.mrb[240].mxu0 %vm2395_vm2, %v9444_v12  ;;  %9028 = vmatmul.mubr.msk.bf16.gmra.mrb[240].mxu1 %vm2395_vm2, %v9445_v24  ;;  %v9448_v12 = vld [vmem:[%s9888_s6 + $0x3d8] sm:$0xff]  }
 0x26d   : > { %7890 = vst [vmem:[%s10920_s12] sm:$0xff] %v7889_v63   ;;  %v5647_v10 = vadd.f32 %v10885_v56, %v5512_v62  ;;  %v5513_v11 = vmax.f32 %v5257_v2, %v5385_v8  ;;  %8775 = vmatprep.mubr.msk.bf16.mxu0 %vm2395_vm2, %v9446_v58  ;;  %9031 = vmatprep.mubr.msk.bf16.mxu1 %vm2395_vm2, %v9447_v36  ;;  %v9449_v24 = vld [vmem:[%s9888_s6 + $0x7d8] sm:$0xff]   ;;  %v9450_v58 = vld [vmem:[%s9888_s6 + $0x3e0] sm:$0xff]  }
 0x26e   : > { %v5650_v14 = vadd.f32 %v10885_v56, %v5515_v3  ;;  %v5777_v25 = vmax.f32 %v5649_v9, 0.0  ;;  %v9451_v36 = vld [vmem:[%s9888_s6 + $0x7e0] sm:$0xff]  }
 0x26f   : > { %v5648_v15 = vadd.f32 %v10885_v56, %v5513_v11  ;;  %v8669_v20 = vpop.f32.mrb[136].mxu0  ;;  %v8925_v21 = vpop.f32.mrb[136].mxu1  ;;  %v5775_v57 = vmax.f32 %v5647_v10, 0.0 }
 0x270   : > { %v5778_v5 = vmax.f32 %v5650_v14, 0.0  ;;  %v5262_v4 = vmax.f32 %v10158_v16, %v8669_v20  ;;  %v5390_v32 = vmax.f32 %v10160_v17, %v8925_v21  ;;  %v3749_v13 = vpop.f32.mrb[137].mxu0  ;;  %v4773_v1 = vpop.f32.mrb[137].mxu1  ;;  %v9452_v20 = vld [vmem:[%s9888_s6 + $0x3e8] sm:$0xff]  }
 0x271   : > { %v5776_v49 = vmax.f32 %v5648_v15, 0.0  ;;  %v5260_v45 = vmax.f32 %v10162_v18, %v3749_v13  ;;  %v5388_v48 = vmax.f32 %v10164_v19, %v4773_v1  ;;  %v8670_v33 = vpop.f32.mrb[138].mxu0  ;;  %v8926_v44 = vpop.f32.mrb[138].mxu1  ;;  %v9453_v21 = vld [vmem:[%s9888_s6 + $0x7e8] sm:$0xff]  }
 0x272   : > { %v7904_v59 = vpack.c.bf16 %v5778_v5, %v5777_v25  ;;  %v5518_v16 = vmax.f32 %v5262_v4, %v5390_v32  ;;  %v5263_v17 = vmax.f32 %v10168_v22, %v8670_v33  ;;  %v5391_v37 = vmax.f32 %v10170_v23, %v8926_v44  ;;  %v3752_v6 = vpop.f32.mrb[139].mxu0  ;;  %v4776_v7 = vpop.f32.mrb[139].mxu1 }
 0x273   : > { %v7899_v60 = vpack.c.bf16 %v5776_v49, %v5775_v57  ;;  %v5516_v61 = vmax.f32 %v5260_v45, %v5388_v48  ;;  %v5261_v18 = vmax.f32 %v10174_v26, %v3752_v6  ;;  %v5389_v63 = vmax.f32 %v10176_v27, %v4776_v7 }
 0x274   : > { %8208 = vst [vmem:[%s10920_s12 + $0x18] sm:$0xff] %v7904_v59   ;;  %v5653_v19 = vadd.f32 %v10885_v56, %v5518_v16  ;;  %v5519_v62 = vmax.f32 %v5263_v17, %v5391_v37  ;;  %8776 = vmatmul.mubr.msk.bf16.gmra.mrb[244].mxu0 %vm2395_vm2, %v9448_v12  ;;  %9032 = vmatmul.mubr.msk.bf16.gmra.mrb[244].mxu1 %vm2395_vm2, %v9449_v24  ;;  %v9454_v12 = vld [vmem:[%s9888_s6 + $0x3f0] sm:$0xff]  }
 0x275   : > { %8207 = vst [vmem:[%s10920_s12 + $0x10] sm:$0xff] %v7899_v60   ;;  %v5651_v22 = vadd.f32 %v10885_v56, %v5516_v61  ;;  %v5517_v23 = vmax.f32 %v5261_v18, %v5389_v63  ;;  %8779 = vmatprep.mubr.msk.bf16.mxu0 %vm2395_vm2, %v9450_v58  ;;  %9035 = vmatprep.mubr.msk.bf16.mxu1 %vm2395_vm2, %v9451_v36  ;;  %v9455_v24 = vld [vmem:[%s9888_s6 + $0x7f0] sm:$0xff]   ;;  %v9456_v18 = vld [vmem:[%s9888_s6 + $0x3f8] sm:$0xff]  }
 0x276   : > { %v5654_v26 = vadd.f32 %v10885_v56, %v5519_v62  ;;  %v5781_v9 = vmax.f32 %v5653_v19, 0.0  ;;  %v9457_v63 = vld [vmem:[%s9888_s6 + $0x7f8] sm:$0xff]  }
 0x277   : > { %v5652_v27 = vadd.f32 %v10885_v56, %v5517_v23  ;;  %v8673_v2 = vpop.f32.mrb[140].mxu0  ;;  %v8929_v8 = vpop.f32.mrb[140].mxu1  ;;  %v5779_v25 = vmax.f32 %v5651_v22, 0.0 }
 0x278   : > { %v5782_v3 = vmax.f32 %v5654_v26, 0.0  ;;  %v5266_v10 = vmax.f32 %v10182_v28, %v8673_v2  ;;  %v5394_v11 = vmax.f32 %v10184_v29, %v8929_v8  ;;  %v3765_v14 = vpop.f32.mrb[141].mxu0  ;;  %v4789_v15 = vpop.f32.mrb[141].mxu1 }
 0x279   : > { %v5780_v5 = vmax.f32 %v5652_v27, 0.0  ;;  %v5264_v4 = vmax.f32 %v10186_v30, %v3765_v14  ;;  %v5392_v32 = vmax.f32 %v10188_v31, %v4789_v15  ;;  %v8674_v13 = vpop.f32.mrb[142].mxu0  ;;  %v8930_v1 = vpop.f32.mrb[142].mxu1 }
 0x27a   : > { %v7914_v57 = vpack.c.bf16 %v5782_v3, %v5781_v9  ;;  %v5522_v28 = vmax.f32 %v5266_v10, %v5394_v11  ;;  %v5267_v29 = vmax.f32 %v10192_v34, %v8674_v13  ;;  %v5395_v49 = vmax.f32 %v10194_v35, %v8930_v1  ;;  %v3768_v45 = vpop.f32.mrb[143].mxu0  ;;  %v4792_v48 = vpop.f32.mrb[143].mxu1 }
 0x27b   : > { %v7909_v33 = vpack.c.bf16 %v5780_v5, %v5779_v25  ;;  %v5520_v44 = vmax.f32 %v5264_v4, %v5392_v32  ;;  %v5265_v30 = vmax.f32 %v10198_v38, %v3768_v45  ;;  %v5393_v58 = vmax.f32 %v10200_v39, %v4792_v48 }
 0x27c   : > { %8210 = vst [vmem:[%s10920_s12 + $0x28] sm:$0xff] %v7914_v57   ;;  %v5657_v31 = vadd.f32 %v10885_v56, %v5522_v28  ;;  %v5523_v36 = vmax.f32 %v5267_v29, %v5395_v49  ;;  %8780 = vmatmul.mubr.msk.bf16.gmra.mrb[248].mxu0 %vm2395_vm2, %v9452_v20  ;;  %9036 = vmatmul.mubr.msk.bf16.gmra.mrb[248].mxu1 %vm2395_vm2, %v9453_v21 }
 0x27d   : > { %8209 = vst [vmem:[%s10920_s12 + $0x20] sm:$0xff] %v7909_v33   ;;  %v5655_v34 = vadd.f32 %v10885_v56, %v5520_v44  ;;  %v5521_v35 = vmax.f32 %v5265_v30, %v5393_v58  ;;  %8783 = vmatprep.mubr.msk.bf16.mxu0 %vm2395_vm2, %v9454_v12  ;;  %9039 = vmatprep.mubr.msk.bf16.mxu1 %vm2395_vm2, %v9455_v24  ;;  %v11798_v44 = vld [vmem:[#allocation4_spill] sm:$0xff] }
 0x27e   : > { %v5658_v38 = vadd.f32 %v10885_v56, %v5523_v36  ;;  %v5785_v17 = vmax.f32 %v5657_v31, 0.0  ;;  %v11799_v36 = vld [vmem:[#allocation5_spill] sm:$0xff] }
 0x27f   : > { %v5656_v39 = vadd.f32 %v10885_v56, %v5521_v35  ;;  %v8677_v59 = vpop.f32.mrb[144].mxu0  ;;  %v8933_v16 = vpop.f32.mrb[144].mxu1  ;;  %v5783_v19 = vmax.f32 %v5655_v34, 0.0  ;;  %v11800_v35 = vld [vmem:[#allocation6_spill] sm:$0xff] }
 0x280   : > { %v5786_v37 = vmax.f32 %v5658_v38, 0.0  ;;  %v5270_v6 = vmax.f32 %v10206_v40, %v8677_v59  ;;  %v5398_v7 = vmax.f32 %v10208_v41, %v8933_v16  ;;  %v3781_v60 = vpop.f32.mrb[145].mxu0  ;;  %v4805_v61 = vpop.f32.mrb[145].mxu1 }
 0x281   : > { %v5784_v62 = vmax.f32 %v5656_v39, 0.0  ;;  %v5268_v22 = vmax.f32 %v10210_v42, %v3781_v60  ;;  %v5396_v23 = vmax.f32 %v10212_v43, %v4805_v61  ;;  %v8678_v26 = vpop.f32.mrb[146].mxu0  ;;  %v8934_v27 = vpop.f32.mrb[146].mxu1  ;;  %v11801_v60 = vld [vmem:[#allocation7_spill] sm:$0xff] }
 0x282   : > { %v7924_v2 = vpack.c.bf16 %v5786_v37, %v5785_v17  ;;  %v5526_v8 = vmax.f32 %v5270_v6, %v5398_v7  ;;  %v5271_v40 = vmax.f32 %v10216_v46, %v8678_v26  ;;  %v5399_v41 = vmax.f32 %v10218_v47, %v8934_v27  ;;  %v3784_v9 = vpop.f32.mrb[147].mxu0  ;;  %v4808_v3 = vpop.f32.mrb[147].mxu1  ;;  %v11803_v26 = vld [vmem:[#allocation9_spill] sm:$0xff] }
 0x283   : > { %v7919_v10 = vpack.c.bf16 %v5784_v62, %v5783_v19  ;;  %v5524_v11 = vmax.f32 %v5268_v22, %v5396_v23  ;;  %v5269_v14 = vmax.f32 %v10222_v50, %v3784_v9  ;;  %v5397_v15 = vmax.f32 %v10224_v51, %v4808_v3 }
 0x284   : > { %8212 = vst [vmem:[%s10920_s12 + $0x38] sm:$0xff] %v7924_v2   ;;  %v5661_v42 = vadd.f32 %v10885_v56, %v5526_v8  ;;  %v5527_v43 = vmax.f32 %v5271_v40, %v5399_v41  ;;  %8784 = vmatmul.mubr.msk.bf16.gmra.mrb[252].mxu0 %vm2395_vm2, %v9456_v18  ;;  %9040 = vmatmul.mubr.msk.bf16.gmra.mrb[252].mxu1 %vm2395_vm2, %v9457_v63  ;;  %v11802_v18 = vld [vmem:[#allocation8_spill] sm:$0xff]  ;;  %v11804_v2 = vld [vmem:[#allocation10_spill] sm:$0xff] }
 0x285   : > { %8211 = vst [vmem:[%s10920_s12 + $0x30] sm:$0xff] %v7919_v10   ;;  %v5659_v46 = vadd.f32 %v10885_v56, %v5524_v11  ;;  %v5525_v47 = vmax.f32 %v5269_v14, %v5397_v15  ;;  %v11805_v10 = vld [vmem:[#allocation11_spill] sm:$0xff]  ;;  %v11806_v14 = vld [vmem:[#allocation12_spill] sm:$0xff] }
 0x286   : > { %v5662_v20 = vadd.f32 %v10885_v56, %v5527_v43  ;;  %v5789_v5 = vmax.f32 %v5661_v42, 0.0 }
 0x287   : > { %v5660_v21 = vadd.f32 %v10885_v56, %v5525_v47  ;;  %v8681_v25 = vpop.f32.mrb[148].mxu0  ;;  %v8937_v50 = vpop.f32.mrb[148].mxu1  ;;  %v5787_v12 = vmax.f32 %v5659_v46, 0.0 }
 0x288   : > { %v5790_v51 = vmax.f32 %v5662_v20, 0.0  ;;  %v5274_v4 = vmax.f32 %v10230_v52, %v8681_v25  ;;  %v5402_v32 = vmax.f32 %v10232_v53, %v8937_v50  ;;  %v3797_v13 = vpop.f32.mrb[149].mxu0  ;;  %v4821_v1 = vpop.f32.mrb[149].mxu1  ;;  %v11807_v20 = vld [vmem:[#allocation13_spill] sm:$0xff]  ;;  %v11808_v25 = vld [vmem:[#allocation14_spill] sm:$0xff] }
 0x289   : > { %v5788_v24 = vmax.f32 %v5660_v21, 0.0  ;;  %v5272_v57 = vmax.f32 %v10234_v54, %v3797_v13  ;;  %v5400_v28 = vmax.f32 %v10236_v55, %v4821_v1  ;;  %v8682_v29 = vpop.f32.mrb[150].mxu0  ;;  %v8938_v49 = vpop.f32.mrb[150].mxu1 }
 0x28a   : > { %v7934_v45 = vpack.c.bf16 %v5790_v51, %v5789_v5  ;;  %v5530_v48 = vmax.f32 %v5274_v4, %v5402_v32  ;;  %v5275_v33 = vmax.f32 %v10240_v0, %v8682_v29  ;;  %v5403_v52 = vmax.f32 %v11798_v44, %v8938_v49  ;;  %v3800_v30 = vpop.f32.mrb[151].mxu0  ;;  %v4824_v53 = vpop.f32.mrb[151].mxu1  ;;  %v11809_v29 = vld [vmem:[#allocation15_spill] sm:$0xff] }
 0x28b   : > { %v7929_v58 = vpack.c.bf16 %v5788_v24, %v5787_v12  ;;  %v5528_v31 = vmax.f32 %v5272_v57, %v5400_v28  ;;  %v5273_v34 = vmax.f32 %v11799_v36, %v3800_v30  ;;  %v5401_v38 = vmax.f32 %v11800_v35, %v4824_v53  ;;  %v11811_v53 = vld [vmem:[#allocation17_spill] sm:$0xff] }
 0x28c   : > { %8214 = vst [vmem:[%s10920_s12 + $0x48] sm:$0xff] %v7934_v45   ;;  %v5665_v54 = vadd.f32 %v10885_v56, %v5530_v48  ;;  %v5531_v55 = vmax.f32 %v5275_v33, %v5403_v52  ;;  %v11810_v45 = vld [vmem:[#allocation16_spill] sm:$0xff] }
 0x28d   : > { %8213 = vst [vmem:[%s10920_s12 + $0x40] sm:$0xff] %v7929_v58   ;;  %v5663_v39 = vadd.f32 %v10885_v56, %v5528_v31  ;;  %v5529_v59 = vmax.f32 %v5273_v34, %v5401_v38  ;;  %v11812_v31 = vld [vmem:[#allocation18_spill] sm:$0xff] }
 0x28e   : > { %v5666_v0 = vadd.f32 %v10885_v56, %v5531_v55  ;;  %v5793_v6 = vmax.f32 %v5665_v54, 0.0  ;;  %v11813_v55 = vld [vmem:[#allocation19_spill] sm:$0xff] }
 0x28f   : > { %v5664_v16 = vadd.f32 %v10885_v56, %v5529_v59  ;;  %v8685_v17 = vpop.f32.mrb[152].mxu0  ;;  %v8941_v37 = vpop.f32.mrb[152].mxu1  ;;  %v5791_v22 = vmax.f32 %v5663_v39, 0.0  ;;  %v11814_v59 = vld [vmem:[#allocation20_spill] sm:$0xff] }
 0x290   : > { %v5794_v7 = vmax.f32 %v5666_v0, 0.0  ;;  %v5278_v61 = vmax.f32 %v11801_v60, %v8685_v17  ;;  %v5406_v63 = vmax.f32 %v11802_v18, %v8941_v37  ;;  %v3813_v19 = vpop.f32.mrb[153].mxu0  ;;  %v4837_v62 = vpop.f32.mrb[153].mxu1 }
 0x291   : > { %v5792_v23 = vmax.f32 %v5664_v16, 0.0  ;;  %v5276_v27 = vmax.f32 %v11803_v26, %v3813_v19  ;;  %v5404_v8 = vmax.f32 %v11804_v2, %v4837_v62  ;;  %v8686_v40 = vpop.f32.mrb[154].mxu0  ;;  %v8942_v41 = vpop.f32.mrb[154].mxu1 }
 0x292   : > { %v7944_v9 = vpack.c.bf16 %v5794_v7, %v5793_v6  ;;  %v5534_v3 = vmax.f32 %v5278_v61, %v5406_v63  ;;  %v5279_v11 = vmax.f32 %v11805_v10, %v8686_v40  ;;  %v5407_v15 = vmax.f32 %v11806_v14, %v8942_v41  ;;  %v3816_v42 = vpop.f32.mrb[155].mxu0  ;;  %v4840_v43 = vpop.f32.mrb[155].mxu1  ;;  %v11815_v7 = vld [vmem:[#allocation21_spill] sm:$0xff]  ;;  %v11816_v61 = vld [vmem:[#allocation22_spill] sm:$0xff]  ;;  %v11817_v41 = vld [vmem:[#allocation23_spill] sm:$0xff] }
 0x293   : > { %v7939_v46 = vpack.c.bf16 %v5792_v23, %v5791_v22  ;;  %v5532_v47 = vmax.f32 %v5276_v27, %v5404_v8  ;;  %v5277_v21 = vmax.f32 %v11807_v20, %v3816_v42  ;;  %v5405_v50 = vmax.f32 %v11808_v25, %v4840_v43  ;;  %v11819_v43 = vld [vmem:[#allocation25_spill] sm:$0xff] }
 0x294   : > { %8216 = vst [vmem:[%s10920_s12 + $0x58] sm:$0xff] %v7944_v9   ;;  %v5669_v5 = vadd.f32 %v10885_v56, %v5534_v3  ;;  %v5535_v51 = vmax.f32 %v5279_v11, %v5407_v15  ;;  %v11818_v3 = vld [vmem:[#allocation24_spill] sm:$0xff] }
 0x295   : > { %8215 = vst [vmem:[%s10920_s12 + $0x50] sm:$0xff] %v7939_v46   ;;  %v5667_v4 = vadd.f32 %v10885_v56, %v5532_v47  ;;  %v5533_v32 = vmax.f32 %v5277_v21, %v5405_v50  ;;  %v11820_v47 = vld [vmem:[#allocation26_spill] sm:$0xff] }
 0x296   : > { %v5670_v13 = vadd.f32 %v10885_v56, %v5535_v51  ;;  %v5797_v57 = vmax.f32 %v5669_v5, 0.0  ;;  %v11821_v51 = vld [vmem:[#allocation27_spill] sm:$0xff] }
 0x297   : > { %v5668_v1 = vadd.f32 %v10885_v56, %v5533_v32  ;;  %v8689_v12 = vpop.f32.mrb[156].mxu0  ;;  %v8945_v24 = vpop.f32.mrb[156].mxu1  ;;  %v5795_v52 = vmax.f32 %v5667_v4, 0.0  ;;  %v11822_v32 = vld [vmem:[#allocation28_spill] sm:$0xff] }
 0x298   : > { %v5798_v28 = vmax.f32 %v5670_v13, 0.0  ;;  %v5282_v49 = vmax.f32 %v11809_v29, %v8689_v12  ;;  %v5410_v48 = vmax.f32 %v11810_v45, %v8945_v24  ;;  %v3829_v33 = vpop.f32.mrb[157].mxu0  ;;  %v4853_v44 = vpop.f32.mrb[157].mxu1 }
 0x299   : > { %v5796_v30 = vmax.f32 %v5668_v1, 0.0  ;;  %v5280_v58 = vmax.f32 %v11811_v53, %v3829_v33  ;;  %v5408_v36 = vmax.f32 %v11812_v31, %v4853_v44  ;;  %v8690_v34 = vpop.f32.mrb[158].mxu0  ;;  %v8946_v35 = vpop.f32.mrb[158].mxu1 }
 0x29a   : > { %v7954_v38 = vpack.c.bf16 %v5798_v28, %v5797_v57  ;;  %v5538_v54 = vmax.f32 %v5282_v49, %v5410_v48  ;;  %v5283_v39 = vmax.f32 %v11813_v55, %v8690_v34  ;;  %v5411_v0 = vmax.f32 %v11814_v59, %v8946_v35  ;;  %v3832_v16 = vpop.f32.mrb[159].mxu0  ;;  %v4856_v17 = vpop.f32.mrb[159].mxu1  ;;  %v11823_v28 = vld [vmem:[#allocation29_spill] sm:$0xff]  ;;  %v11824_v49 = vld [vmem:[#allocation30_spill] sm:$0xff]  ;;  %v11825_v35 = vld [vmem:[#allocation31_spill] sm:$0xff] }
 0x29b   : > { %v7949_v37 = vpack.c.bf16 %v5796_v30, %v5795_v52  ;;  %v5536_v6 = vmax.f32 %v5280_v58, %v5408_v36  ;;  %v5281_v60 = vmax.f32 %v11815_v7, %v3832_v16  ;;  %v5409_v18 = vmax.f32 %v11816_v61, %v4856_v17  ;;  %v11827_v17 = vld [vmem:[#allocation33_spill] sm:$0xff] }
 0x29c   : > { %8218 = vst [vmem:[%s10920_s12 + $0x68] sm:$0xff] %v7954_v38   ;;  %v5673_v63 = vadd.f32 %v10885_v56, %v5538_v54  ;;  %v5539_v19 = vmax.f32 %v5283_v39, %v5411_v0  ;;  %v11826_v54 = vld [vmem:[#allocation32_spill] sm:$0xff] }
 0x29d   : > { %8217 = vst [vmem:[%s10920_s12 + $0x60] sm:$0xff] %v7949_v37   ;;  %v5671_v62 = vadd.f32 %v10885_v56, %v5536_v6  ;;  %v5537_v22 = vmax.f32 %v5281_v60, %v5409_v18  ;;  %v11828_v6 = vld [vmem:[#allocation34_spill] sm:$0xff] }
 0x29e   : > { %v5674_v23 = vadd.f32 %v10885_v56, %v5539_v19  ;;  %v5801_v8 = vmax.f32 %v5673_v63, 0.0  ;;  %v11829_v19 = vld [vmem:[#allocation35_spill] sm:$0xff] }
 0x29f   : > { %v5672_v26 = vadd.f32 %v10885_v56, %v5537_v22  ;;  %v8693_v27 = vpop.f32.mrb[160].mxu0  ;;  %v8949_v2 = vpop.f32.mrb[160].mxu1  ;;  %v5799_v15 = vmax.f32 %v5671_v62, 0.0  ;;  %v11830_v22 = vld [vmem:[#allocation36_spill] sm:$0xff] }
 0x2a0   : > { %v5802_v40 = vmax.f32 %v5674_v23, 0.0  ;;  %v5286_v9 = vmax.f32 %v11817_v41, %v8693_v27  ;;  %v5414_v10 = vmax.f32 %v11818_v3, %v8949_v2  ;;  %v3845_v11 = vpop.f32.mrb[161].mxu0  ;;  %v4869_v14 = vpop.f32.mrb[161].mxu1 }
 0x2a1   : > { %v5800_v42 = vmax.f32 %v5672_v26, 0.0  ;;  %v5284_v46 = vmax.f32 %v11819_v43, %v3845_v11  ;;  %v5412_v20 = vmax.f32 %v11820_v47, %v4869_v14  ;;  %v8694_v21 = vpop.f32.mrb[162].mxu0  ;;  %v8950_v25 = vpop.f32.mrb[162].mxu1 }
 0x2a2   : > { %v7964_v50 = vpack.c.bf16 %v5802_v40, %v5801_v8  ;;  %v5542_v5 = vmax.f32 %v5286_v9, %v5414_v10  ;;  %v5287_v4 = vmax.f32 %v11821_v51, %v8694_v21  ;;  %v5415_v13 = vmax.f32 %v11822_v32, %v8950_v25  ;;  %v3848_v1 = vpop.f32.mrb[163].mxu0  ;;  %v4872_v12 = vpop.f32.mrb[163].mxu1  ;;  %v11831_v40 = vld [vmem:[#allocation37_spill] sm:$0xff]  ;;  %v11832_v9 = vld [vmem:[#allocation38_spill] sm:$0xff]  ;;  %v11833_v25 = vld [vmem:[#allocation39_spill] sm:$0xff] }
 0x2a3   : > { %v7959_v24 = vpack.c.bf16 %v5800_v42, %v5799_v15  ;;  %v5540_v57 = vmax.f32 %v5284_v46, %v5412_v20  ;;  %v5285_v29 = vmax.f32 %v11823_v28, %v3848_v1  ;;  %v5413_v45 = vmax.f32 %v11824_v49, %v4872_v12  ;;  %v11835_v12 = vld [vmem:[#allocation41_spill] sm:$0xff] }
 0x2a4   : > { %8220 = vst [vmem:[%s10920_s12 + $0x78] sm:$0xff] %v7964_v50   ;;  %v5677_v48 = vadd.f32 %v10885_v56, %v5542_v5  ;;  %v5543_v33 = vmax.f32 %v5287_v4, %v5415_v13  ;;  %v11834_v5 = vld [vmem:[#allocation40_spill] sm:$0xff] }
 0x2a5   : > { %8219 = vst [vmem:[%s10920_s12 + $0x70] sm:$0xff] %v7959_v24   ;;  %v5675_v44 = vadd.f32 %v10885_v56, %v5540_v57  ;;  %v5541_v52 = vmax.f32 %v5285_v29, %v5413_v45  ;;  %v11836_v57 = vld [vmem:[#allocation42_spill] sm:$0xff] }
 0x2a6   : > { %v5678_v30 = vadd.f32 %v10885_v56, %v5543_v33  ;;  %v5805_v36 = vmax.f32 %v5677_v48, 0.0  ;;  %v11837_v33 = vld [vmem:[#allocation43_spill] sm:$0xff] }
 0x2a7   : > { %v5676_v53 = vadd.f32 %v10885_v56, %v5541_v52  ;;  %v8697_v58 = vpop.f32.mrb[164].mxu0  ;;  %v8953_v31 = vpop.f32.mrb[164].mxu1  ;;  %v5803_v0 = vmax.f32 %v5675_v44, 0.0  ;;  %v11838_v52 = vld [vmem:[#allocation44_spill] sm:$0xff] }
 0x2a8   : > { %v5806_v34 = vmax.f32 %v5678_v30, 0.0  ;;  %v5290_v38 = vmax.f32 %v11825_v35, %v8697_v58  ;;  %v5418_v55 = vmax.f32 %v11826_v54, %v8953_v31  ;;  %v3861_v39 = vpop.f32.mrb[165].mxu0  ;;  %v4885_v59 = vpop.f32.mrb[165].mxu1 }
 0x2a9   : > { %v5804_v16 = vmax.f32 %v5676_v53, 0.0  ;;  %v5288_v37 = vmax.f32 %v11827_v17, %v3861_v39  ;;  %v5416_v7 = vmax.f32 %v11828_v6, %v4885_v59  ;;  %v8698_v60 = vpop.f32.mrb[166].mxu0  ;;  %v8954_v61 = vpop.f32.mrb[166].mxu1 }
 0x2aa   : > { %v7974_v18 = vpack.c.bf16 %v5806_v34, %v5805_v36  ;;  %v5546_v63 = vmax.f32 %v5290_v38, %v5418_v55  ;;  %v5291_v62 = vmax.f32 %v11829_v19, %v8698_v60  ;;  %v5419_v23 = vmax.f32 %v11830_v22, %v8954_v61  ;;  %v3864_v26 = vpop.f32.mrb[167].mxu0  ;;  %v4888_v27 = vpop.f32.mrb[167].mxu1  ;;  %v11839_v34 = vld [vmem:[#allocation45_spill] sm:$0xff]  ;;  %v11840_v38 = vld [vmem:[#allocation46_spill] sm:$0xff]  ;;  %v11841_v61 = vld [vmem:[#allocation47_spill] sm:$0xff] }
 0x2ab   : > { %v7969_v2 = vpack.c.bf16 %v5804_v16, %v5803_v0  ;;  %v5544_v8 = vmax.f32 %v5288_v37, %v5416_v7  ;;  %v5289_v41 = vmax.f32 %v11831_v40, %v3864_v26  ;;  %v5417_v3 = vmax.f32 %v11832_v9, %v4888_v27  ;;  %v11843_v27 = vld [vmem:[#allocation49_spill] sm:$0xff] }
 0x2ac   : > { %8222 = vst [vmem:[%s10920_s12 + $0x88] sm:$0xff] %v7974_v18   ;;  %v5681_v10 = vadd.f32 %v10885_v56, %v5546_v63  ;;  %v5547_v11 = vmax.f32 %v5291_v62, %v5419_v23  ;;  %v11842_v63 = vld [vmem:[#allocation48_spill] sm:$0xff] }
 0x2ad   : > { %8221 = vst [vmem:[%s10920_s12 + $0x80] sm:$0xff] %v7969_v2   ;;  %v5679_v14 = vadd.f32 %v10885_v56, %v5544_v8  ;;  %v5545_v15 = vmax.f32 %v5289_v41, %v5417_v3  ;;  %v11844_v8 = vld [vmem:[#allocation50_spill] sm:$0xff] }
 0x2ae   : > { %v5682_v42 = vadd.f32 %v10885_v56, %v5547_v11  ;;  %v5809_v20 = vmax.f32 %v5681_v10, 0.0  ;;  %v11845_v11 = vld [vmem:[#allocation51_spill] sm:$0xff] }
 0x2af   : > { %v5680_v43 = vadd.f32 %v10885_v56, %v5545_v15  ;;  %v8701_v46 = vpop.f32.mrb[168].mxu0  ;;  %v8957_v47 = vpop.f32.mrb[168].mxu1  ;;  %v5807_v13 = vmax.f32 %v5679_v14, 0.0  ;;  %v11846_v15 = vld [vmem:[#allocation52_spill] sm:$0xff] }
 0x2b0   : > { %v5810_v21 = vmax.f32 %v5682_v42, 0.0  ;;  %v5294_v50 = vmax.f32 %v11833_v25, %v8701_v46  ;;  %v5422_v51 = vmax.f32 %v11834_v5, %v8957_v47  ;;  %v3877_v4 = vpop.f32.mrb[169].mxu0  ;;  %v4901_v32 = vpop.f32.mrb[169].mxu1 }
 0x2b1   : > { %v5808_v1 = vmax.f32 %v5680_v43, 0.0  ;;  %v5292_v24 = vmax.f32 %v11835_v12, %v3877_v4  ;;  %v5420_v28 = vmax.f32 %v11836_v57, %v4901_v32  ;;  %v8702_v29 = vpop.f32.mrb[170].mxu0  ;;  %v8958_v49 = vpop.f32.mrb[170].mxu1 }
 0x2b2   : > { %v7984_v45 = vpack.c.bf16 %v5810_v21, %v5809_v20  ;;  %v5550_v48 = vmax.f32 %v5294_v50, %v5422_v51  ;;  %v5295_v44 = vmax.f32 %v11837_v33, %v8702_v29  ;;  %v5423_v30 = vmax.f32 %v11838_v52, %v8958_v49  ;;  %v3880_v53 = vpop.f32.mrb[171].mxu0  ;;  %v4904_v58 = vpop.f32.mrb[171].mxu1  ;;  %v11847_v21 = vld [vmem:[#allocation53_spill] sm:$0xff]  ;;  %v11848_v50 = vld [vmem:[#allocation54_spill] sm:$0xff]  ;;  %v11849_v49 = vld [vmem:[#allocation55_spill] sm:$0xff] }
 0x2b3   : > { %v7979_v31 = vpack.c.bf16 %v5808_v1, %v5807_v13  ;;  %v5548_v36 = vmax.f32 %v5292_v24, %v5420_v28  ;;  %v5293_v35 = vmax.f32 %v11839_v34, %v3880_v53  ;;  %v5421_v54 = vmax.f32 %v11840_v38, %v4904_v58  ;;  %v11851_v58 = vld [vmem:[#allocation57_spill] sm:$0xff] }
 0x2b4   : > { %8224 = vst [vmem:[%s10920_s12 + $0x98] sm:$0xff] %v7984_v45   ;;  %v5685_v55 = vadd.f32 %v10885_v56, %v5550_v48  ;;  %v5551_v39 = vmax.f32 %v5295_v44, %v5423_v30  ;;  %v11850_v48 = vld [vmem:[#allocation56_spill] sm:$0xff] }
 0x2b5   : > { %8223 = vst [vmem:[%s10920_s12 + $0x90] sm:$0xff] %v7979_v31   ;;  %v5683_v59 = vadd.f32 %v10885_v56, %v5548_v36  ;;  %v5549_v0 = vmax.f32 %v5293_v35, %v5421_v54  ;;  %v11852_v36 = vld [vmem:[#allocation58_spill] sm:$0xff] }
 0x2b6   : > { %v5686_v16 = vadd.f32 %v10885_v56, %v5551_v39  ;;  %v5813_v7 = vmax.f32 %v5685_v55, 0.0  ;;  %v11853_v39 = vld [vmem:[#allocation59_spill] sm:$0xff] }
 0x2b7   : > { %v5684_v17 = vadd.f32 %v10885_v56, %v5549_v0  ;;  %v8705_v37 = vpop.f32.mrb[172].mxu0  ;;  %v8961_v6 = vpop.f32.mrb[172].mxu1  ;;  %v5811_v23 = vmax.f32 %v5683_v59, 0.0  ;;  %v11854_v0 = vld [vmem:[#allocation60_spill] sm:$0xff] }
 0x2b8   : > { %v5814_v60 = vmax.f32 %v5686_v16, 0.0  ;;  %v5298_v18 = vmax.f32 %v11841_v61, %v8705_v37  ;;  %v5426_v19 = vmax.f32 %v11842_v63, %v8961_v6  ;;  %v3893_v62 = vpop.f32.mrb[173].mxu0  ;;  %v4917_v22 = vpop.f32.mrb[173].mxu1 }
 0x2b9   : > { %v5812_v26 = vmax.f32 %v5684_v17, 0.0  ;;  %v5296_v2 = vmax.f32 %v11843_v27, %v3893_v62  ;;  %v5424_v40 = vmax.f32 %v11844_v8, %v4917_v22  ;;  %v8706_v41 = vpop.f32.mrb[174].mxu0  ;;  %v8962_v9 = vpop.f32.mrb[174].mxu1 }
 0x2ba   : > { %v7994_v3 = vpack.c.bf16 %v5814_v60, %v5813_v7  ;;  %v5554_v10 = vmax.f32 %v5298_v18, %v5426_v19  ;;  %v5299_v14 = vmax.f32 %v11845_v11, %v8706_v41  ;;  %v5427_v42 = vmax.f32 %v11846_v15, %v8962_v9  ;;  %v3896_v43 = vpop.f32.mrb[175].mxu0  ;;  %v4920_v46 = vpop.f32.mrb[175].mxu1  ;;  %v11855_v60 = vld [vmem:[#allocation61_spill] sm:$0xff]  ;;  %v11856_v18 = vld [vmem:[#allocation62_spill] sm:$0xff]  ;;  %v11857_v9 = vld [vmem:[#allocation63_spill] sm:$0xff] }
 0x2bb   : > { %v7989_v47 = vpack.c.bf16 %v5812_v26, %v5811_v23  ;;  %v5552_v20 = vmax.f32 %v5296_v2, %v5424_v40  ;;  %v5297_v25 = vmax.f32 %v11847_v21, %v3896_v43  ;;  %v5425_v5 = vmax.f32 %v11848_v50, %v4920_v46  ;;  %v11859_v46 = vld [vmem:[#allocation65_spill] sm:$0xff] }
 0x2bc   : > { %8226 = vst [vmem:[%s10920_s12 + $0xa8] sm:$0xff] %v7994_v3   ;;  %v5689_v51 = vadd.f32 %v10885_v56, %v5554_v10  ;;  %v5555_v4 = vmax.f32 %v5299_v14, %v5427_v42  ;;  %v11858_v10 = vld [vmem:[#allocation64_spill] sm:$0xff] }
 0x2bd   : > { %8225 = vst [vmem:[%s10920_s12 + $0xa0] sm:$0xff] %v7989_v47   ;;  %v5687_v32 = vadd.f32 %v10885_v56, %v5552_v20  ;;  %v5553_v13 = vmax.f32 %v5297_v25, %v5425_v5  ;;  %v11860_v20 = vld [vmem:[#allocation66_spill] sm:$0xff] }
 0x2be   : > { %v5690_v1 = vadd.f32 %v10885_v56, %v5555_v4  ;;  %v5817_v28 = vmax.f32 %v5689_v51, 0.0  ;;  %v11861_v4 = vld [vmem:[#allocation67_spill] sm:$0xff] }
 0x2bf   : > { %v5688_v12 = vadd.f32 %v10885_v56, %v5553_v13  ;;  %v8709_v24 = vpop.f32.mrb[176].mxu0  ;;  %v8965_v57 = vpop.f32.mrb[176].mxu1  ;;  %v5815_v30 = vmax.f32 %v5687_v32, 0.0  ;;  %v11862_v13 = vld [vmem:[#allocation68_spill] sm:$0xff] }
 0x2c0   : > { %v5818_v29 = vmax.f32 %v5690_v1, 0.0  ;;  %v5302_v45 = vmax.f32 %v11849_v49, %v8709_v24  ;;  %v5430_v33 = vmax.f32 %v11850_v48, %v8965_v57  ;;  %v3909_v44 = vpop.f32.mrb[177].mxu0  ;;  %v4933_v52 = vpop.f32.mrb[177].mxu1 }
 0x2c1   : > { %v5816_v53 = vmax.f32 %v5688_v12, 0.0  ;;  %v5300_v31 = vmax.f32 %v11851_v58, %v3909_v44  ;;  %v5428_v34 = vmax.f32 %v11852_v36, %v4933_v52  ;;  %v8710_v35 = vpop.f32.mrb[178].mxu0  ;;  %v8966_v38 = vpop.f32.mrb[178].mxu1 }
 0x2c2   : > { %v8004_v54 = vpack.c.bf16 %v5818_v29, %v5817_v28  ;;  %v5558_v55 = vmax.f32 %v5302_v45, %v5430_v33  ;;  %v5303_v59 = vmax.f32 %v11853_v39, %v8710_v35  ;;  %v5431_v16 = vmax.f32 %v11854_v0, %v8966_v38  ;;  %v3912_v17 = vpop.f32.mrb[179].mxu0  ;;  %v4936_v37 = vpop.f32.mrb[179].mxu1  ;;  %v11863_v29 = vld [vmem:[#allocation69_spill] sm:$0xff]  ;;  %v11864_v45 = vld [vmem:[#allocation70_spill] sm:$0xff]  ;;  %v11865_v38 = vld [vmem:[#allocation71_spill] sm:$0xff] }
 0x2c3   : > { %v7999_v6 = vpack.c.bf16 %v5816_v53, %v5815_v30  ;;  %v5556_v7 = vmax.f32 %v5300_v31, %v5428_v34  ;;  %v5301_v61 = vmax.f32 %v11855_v60, %v3912_v17  ;;  %v5429_v63 = vmax.f32 %v11856_v18, %v4936_v37  ;;  %v11867_v37 = vld [vmem:[#allocation73_spill] sm:$0xff] }
 0x2c4   : > { %8228 = vst [vmem:[%s10920_s12 + $0xb8] sm:$0xff] %v8004_v54   ;;  %v5693_v19 = vadd.f32 %v10885_v56, %v5558_v55  ;;  %v5559_v62 = vmax.f32 %v5303_v59, %v5431_v16  ;;  %v11866_v55 = vld [vmem:[#allocation72_spill] sm:$0xff] }
 0x2c5   : > { %8227 = vst [vmem:[%s10920_s12 + $0xb0] sm:$0xff] %v7999_v6   ;;  %v5691_v22 = vadd.f32 %v10885_v56, %v5556_v7  ;;  %v5557_v23 = vmax.f32 %v5301_v61, %v5429_v63  ;;  %v11868_v7 = vld [vmem:[#allocation74_spill] sm:$0xff] }
 0x2c6   : > { %v5694_v26 = vadd.f32 %v10885_v56, %v5559_v62  ;;  %v5821_v40 = vmax.f32 %v5693_v19, 0.0  ;;  %v11869_v62 = vld [vmem:[#allocation75_spill] sm:$0xff] }
 0x2c7   : > { %v5692_v27 = vadd.f32 %v10885_v56, %v5557_v23  ;;  %v8713_v2 = vpop.f32.mrb[180].mxu0  ;;  %v8969_v8 = vpop.f32.mrb[180].mxu1  ;;  %v5819_v42 = vmax.f32 %v5691_v22, 0.0  ;;  %v11870_v23 = vld [vmem:[#allocation76_spill] sm:$0xff] }
 0x2c8   : > { %v5822_v41 = vmax.f32 %v5694_v26, 0.0  ;;  %v5306_v3 = vmax.f32 %v11857_v9, %v8713_v2  ;;  %v5434_v11 = vmax.f32 %v11858_v10, %v8969_v8  ;;  %v3925_v14 = vpop.f32.mrb[181].mxu0  ;;  %v4949_v15 = vpop.f32.mrb[181].mxu1 }
 0x2c9   : > { %v5820_v43 = vmax.f32 %v5692_v27, 0.0  ;;  %v5304_v47 = vmax.f32 %v11859_v46, %v3925_v14  ;;  %v5432_v21 = vmax.f32 %v11860_v20, %v4949_v15  ;;  %v8714_v25 = vpop.f32.mrb[182].mxu0  ;;  %v8970_v50 = vpop.f32.mrb[182].mxu1 }
 0x2ca   : > { %v8014_v5 = vpack.c.bf16 %v5822_v41, %v5821_v40  ;;  %v5562_v51 = vmax.f32 %v5306_v3, %v5434_v11  ;;  %v5307_v32 = vmax.f32 %v11861_v4, %v8714_v25  ;;  %v5435_v1 = vmax.f32 %v11862_v13, %v8970_v50  ;;  %v3928_v12 = vpop.f32.mrb[183].mxu0  ;;  %v4952_v24 = vpop.f32.mrb[183].mxu1  ;;  %v11871_v41 = vld [vmem:[#allocation77_spill] sm:$0xff]  ;;  %v11872_v3 = vld [vmem:[#allocation78_spill] sm:$0xff]  ;;  %v11873_v50 = vld [vmem:[#allocation79_spill] sm:$0xff] }
 0x2cb   : > { %v8009_v57 = vpack.c.bf16 %v5820_v43, %v5819_v42  ;;  %v5560_v28 = vmax.f32 %v5304_v47, %v5432_v21  ;;  %v5305_v49 = vmax.f32 %v11863_v29, %v3928_v12  ;;  %v5433_v48 = vmax.f32 %v11864_v45, %v4952_v24  ;;  %v11875_v24 = vld [vmem:[#allocation81_spill] sm:$0xff] }
 0x2cc   : > { %8230 = vst [vmem:[%s10920_s12 + $0xc8] sm:$0xff] %v8014_v5   ;;  %v5697_v33 = vadd.f32 %v10885_v56, %v5562_v51  ;;  %v5563_v44 = vmax.f32 %v5307_v32, %v5435_v1  ;;  %v11874_v51 = vld [vmem:[#allocation80_spill] sm:$0xff] }
 0x2cd   : > { %8229 = vst [vmem:[%s10920_s12 + $0xc0] sm:$0xff] %v8009_v57   ;;  %v5695_v52 = vadd.f32 %v10885_v56, %v5560_v28  ;;  %v5561_v30 = vmax.f32 %v5305_v49, %v5433_v48  ;;  %v11876_v28 = vld [vmem:[#allocation82_spill] sm:$0xff] }
 0x2ce   : > { %v5698_v53 = vadd.f32 %v10885_v56, %v5563_v44  ;;  %v5825_v34 = vmax.f32 %v5697_v33, 0.0  ;;  %v11877_v33 = vld [vmem:[#allocation83_spill] sm:$0xff] }
 0x2cf   : > { %v5696_v58 = vadd.f32 %v10885_v56, %v5561_v30  ;;  %v8717_v31 = vpop.f32.mrb[184].mxu0  ;;  %v8973_v36 = vpop.f32.mrb[184].mxu1  ;;  %v5823_v16 = vmax.f32 %v5695_v52, 0.0  ;;  %v11878_v52 = vld [vmem:[#allocation84_spill] sm:$0xff] }
 0x2d0   : > { %v5826_v35 = vmax.f32 %v5698_v53, 0.0  ;;  %v5310_v54 = vmax.f32 %v11865_v38, %v8717_v31  ;;  %v5438_v39 = vmax.f32 %v11866_v55, %v8973_v36  ;;  %v3941_v59 = vpop.f32.mrb[185].mxu0  ;;  %v4965_v0 = vpop.f32.mrb[185].mxu1  ;;  %v11880_v38 = vld [vmem:[#allocation86_spill] sm:$0xff]  ;;  %v11146_v55 = vld [vmem:[%s11579_s2] ss:$0 sm:$0xff] }
 0x2d1   : > { %v5824_v17 = vmax.f32 %v5696_v58, 0.0  ;;  %v5308_v6 = vmax.f32 %v11867_v37, %v3941_v59  ;;  %v5436_v60 = vmax.f32 %v11868_v7, %v4965_v0  ;;  %v8718_v61 = vpop.f32.mrb[186].mxu0  ;;  %v8974_v18 = vpop.f32.mrb[186].mxu1 }
 0x2d2   : > { %v8024_v63 = vpack.c.bf16 %v5826_v35, %v5825_v34  ;;  %v5566_v19 = vmax.f32 %v5310_v54, %v5438_v39  ;;  %v5311_v22 = vmax.f32 %v11869_v62, %v8718_v61  ;;  %v5439_v26 = vmax.f32 %v11870_v23, %v8974_v18  ;;  %v3944_v27 = vpop.f32.mrb[187].mxu0  ;;  %v4968_v2 = vpop.f32.mrb[187].mxu1  ;;  %v11879_v34 = vld [vmem:[#allocation85_spill] sm:$0xff]  ;;  %v11881_v18 = vld [vmem:[#allocation87_spill] sm:$0xff] }
 0x2d3   : > { %v8019_v8 = vpack.c.bf16 %v5824_v17, %v5823_v16  ;;  %v5564_v40 = vmax.f32 %v5308_v6, %v5436_v60  ;;  %v5309_v9 = vmax.f32 %v11871_v41, %v3944_v27  ;;  %v5437_v10 = vmax.f32 %v11872_v3, %v4968_v2  ;;  %v11883_v2 = vld [vmem:[#allocation89_spill] sm:$0xff] }
 0x2d4   : > { %8232 = vst [vmem:[%s10920_s12 + $0xd8] sm:$0xff] %v8024_v63   ;;  %v5701_v11 = vadd.f32 %v10885_v56, %v5566_v19  ;;  %v5567_v14 = vmax.f32 %v5311_v22, %v5439_v26  ;;  %v11882_v19 = vld [vmem:[#allocation88_spill] sm:$0xff] }
 0x2d5   : > { %8231 = vst [vmem:[%s10920_s12 + $0xd0] sm:$0xff] %v8019_v8   ;;  %v5699_v15 = vadd.f32 %v10885_v56, %v5564_v40  ;;  %v5565_v42 = vmax.f32 %v5309_v9, %v5437_v10  ;;  %v11884_v40 = vld [vmem:[#allocation90_spill] sm:$0xff] }
 0x2d6   : > { %v5702_v43 = vadd.f32 %v10885_v56, %v5567_v14  ;;  %v5829_v21 = vmax.f32 %v5701_v11, 0.0  ;;  %v11885_v14 = vld [vmem:[#allocation91_spill] sm:$0xff] }
 0x2d7   : > { %v5700_v46 = vadd.f32 %v10885_v56, %v5565_v42  ;;  %v8721_v47 = vpop.f32.mrb[188].mxu0  ;;  %v8977_v20 = vpop.f32.mrb[188].mxu1  ;;  %v5827_v1 = vmax.f32 %v5699_v15, 0.0  ;;  %v11886_v42 = vld [vmem:[#allocation92_spill] sm:$0xff] }
 0x2d8   : > { %v5830_v25 = vmax.f32 %v5702_v43, 0.0  ;;  %v5314_v5 = vmax.f32 %v11873_v50, %v8721_v47  ;;  %v5442_v4 = vmax.f32 %v11874_v51, %v8977_v20  ;;  %v3957_v32 = vpop.f32.mrb[189].mxu0  ;;  %v4981_v13 = vpop.f32.mrb[189].mxu1 }
 0x2d9   : > { %v5828_v12 = vmax.f32 %v5700_v46, 0.0  ;;  %v5312_v57 = vmax.f32 %v11875_v24, %v3957_v32  ;;  %v5440_v29 = vmax.f32 %v11876_v28, %v4981_v13  ;;  %v8722_v49 = vpop.f32.mrb[190].mxu0  ;;  %v8978_v56 = vpop.f32.mrb[190].mxu1 }
 0x2da   : > { %v8034_v45 = vpack.c.bf16 %v5830_v25, %v5829_v21  ;;  %v5570_v48 = vmax.f32 %v5314_v5, %v5442_v4  ;;  %v5315_v44 = vmax.f32 %v11877_v33, %v8722_v49  ;;  %v5443_v30 = vmax.f32 %v11878_v52, %v8978_v56  ;;  %v3960_v53 = vpop.f32.mrb[191].mxu0  ;;  %v4984_v58 = vpop.f32.mrb[191].mxu1  ;;  %v11887_v25 = vld [vmem:[#allocation93_spill] sm:$0xff]  ;;  %v11888_v5 = vld [vmem:[#allocation94_spill] sm:$0xff]  ;;  %v11889_v56 = vld [vmem:[#allocation95_spill] sm:$0xff] }
 0x2db   : > { %v8029_v31 = vpack.c.bf16 %v5828_v12, %v5827_v1  ;;  %v5568_v36 = vmax.f32 %v5312_v57, %v5440_v29  ;;  %v5313_v35 = vmax.f32 %v11879_v34, %v3960_v53  ;;  %v5441_v54 = vmax.f32 %v11880_v38, %v4984_v58  ;;  %v11891_v58 = vld [vmem:[#allocation97_spill] sm:$0xff] }
 0x2dc   : > { %8234 = vst [vmem:[%s10920_s12 + $0xe8] sm:$0xff] %v8034_v45   ;;  %v5705_v39 = vadd.f32 %v11146_v55, %v5570_v48  ;;  %v5571_v59 = vmax.f32 %v5315_v44, %v5443_v30  ;;  %v11890_v48 = vld [vmem:[#allocation96_spill] sm:$0xff] }
 0x2dd   : > { %8233 = vst [vmem:[%s10920_s12 + $0xe0] sm:$0xff] %v8029_v31   ;;  %v5703_v0 = vadd.f32 %v11146_v55, %v5568_v36  ;;  %v5569_v16 = vmax.f32 %v5313_v35, %v5441_v54  ;;  %v11892_v36 = vld [vmem:[#allocation98_spill] sm:$0xff] }
 0x2de   : > { %v5706_v17 = vadd.f32 %v11146_v55, %v5571_v59  ;;  %v5833_v60 = vmax.f32 %v5705_v39, 0.0  ;;  %v11893_v59 = vld [vmem:[#allocation99_spill] sm:$0xff] }
 0x2df   : > { %v5704_v37 = vadd.f32 %v11146_v55, %v5569_v16  ;;  %v8725_v6 = vpop.f32.mrb[192].mxu0  ;;  %v8981_v7 = vpop.f32.mrb[192].mxu1  ;;  %v5831_v26 = vmax.f32 %v5703_v0, 0.0  ;;  %v11894_v16 = vld [vmem:[#allocation100_spill] sm:$0xff] }
 0x2e0   : > { %v5834_v61 = vmax.f32 %v5706_v17, 0.0  ;;  %v5318_v63 = vmax.f32 %v11881_v18, %v8725_v6  ;;  %v5446_v62 = vmax.f32 %v11882_v19, %v8981_v7  ;;  %v3973_v22 = vpop.f32.mrb[193].mxu0  ;;  %v4997_v23 = vpop.f32.mrb[193].mxu1 }
 0x2e1   : > { %v5832_v27 = vmax.f32 %v5704_v37, 0.0  ;;  %v5316_v8 = vmax.f32 %v11883_v2, %v3973_v22  ;;  %v5444_v41 = vmax.f32 %v11884_v40, %v4997_v23  ;;  %v8726_v9 = vpop.f32.mrb[194].mxu0  ;;  %v8982_v3 = vpop.f32.mrb[194].mxu1 }
 0x2e2   : > { %v8044_v10 = vpack.c.bf16 %v5834_v61, %v5833_v60  ;;  %v5574_v11 = vmax.f32 %v5318_v63, %v5446_v62  ;;  %v5319_v15 = vmax.f32 %v11885_v14, %v8726_v9  ;;  %v5447_v43 = vmax.f32 %v11886_v42, %v8982_v3  ;;  %v3976_v46 = vpop.f32.mrb[195].mxu0  ;;  %v5000_v47 = vpop.f32.mrb[195].mxu1  ;;  %v11895_v61 = vld [vmem:[#allocation101_spill] sm:$0xff]  ;;  %v11896_v63 = vld [vmem:[#allocation102_spill] sm:$0xff]  ;;  %v11897_v3 = vld [vmem:[#allocation103_spill] sm:$0xff] }
 0x2e3   : > { %v8039_v20 = vpack.c.bf16 %v5832_v27, %v5831_v26  ;;  %v5572_v21 = vmax.f32 %v5316_v8, %v5444_v41  ;;  %v5317_v50 = vmax.f32 %v11887_v25, %v3976_v46  ;;  %v5445_v51 = vmax.f32 %v11888_v5, %v5000_v47  ;;  %v11899_v47 = vld [vmem:[#allocation105_spill] sm:$0xff] }
 0x2e4   : > { %8236 = vst [vmem:[%s10920_s12 + $0xf8] sm:$0xff] %v8044_v10   ;;  %v5709_v4 = vadd.f32 %v11146_v55, %v5574_v11  ;;  %v5575_v32 = vmax.f32 %v5319_v15, %v5447_v43  ;;  %v11898_v11 = vld [vmem:[#allocation104_spill] sm:$0xff] }
 0x2e5   : > { %8235 = vst [vmem:[%s10920_s12 + $0xf0] sm:$0xff] %v8039_v20   ;;  %v5707_v13 = vadd.f32 %v11146_v55, %v5572_v21  ;;  %v5573_v1 = vmax.f32 %v5317_v50, %v5445_v51  ;;  %v11900_v21 = vld [vmem:[#allocation106_spill] sm:$0xff] }
 0x2e6   : > { %v5710_v12 = vadd.f32 %v11146_v55, %v5575_v32  ;;  %v5837_v29 = vmax.f32 %v5709_v4, 0.0  ;;  %v11901_v32 = vld [vmem:[#allocation107_spill] sm:$0xff] }
 0x2e7   : > { %v5708_v24 = vadd.f32 %v11146_v55, %v5573_v1  ;;  %v8729_v57 = vpop.f32.mrb[196].mxu0  ;;  %v8985_v28 = vpop.f32.mrb[196].mxu1  ;;  %v5835_v30 = vmax.f32 %v5707_v13, 0.0  ;;  %v11902_v1 = vld [vmem:[#allocation108_spill] sm:$0xff] }
 0x2e8   : > { %v5838_v49 = vmax.f32 %v5710_v12, 0.0  ;;  %v5322_v45 = vmax.f32 %v11889_v56, %v8729_v57  ;;  %v5450_v33 = vmax.f32 %v11890_v48, %v8985_v28  ;;  %v3989_v44 = vpop.f32.mrb[197].mxu0  ;;  %v5013_v52 = vpop.f32.mrb[197].mxu1 }
 0x2e9   : > { %v5836_v53 = vmax.f32 %v5708_v24, 0.0  ;;  %v5320_v31 = vmax.f32 %v11891_v58, %v3989_v44  ;;  %v5448_v34 = vmax.f32 %v11892_v36, %v5013_v52  ;;  %v8730_v35 = vpop.f32.mrb[198].mxu0  ;;  %v8986_v38 = vpop.f32.mrb[198].mxu1 }
 0x2ea   : > { %v8054_v54 = vpack.c.bf16 %v5838_v49, %v5837_v29  ;;  %v5578_v39 = vmax.f32 %v5322_v45, %v5450_v33  ;;  %v5323_v0 = vmax.f32 %v11893_v59, %v8730_v35  ;;  %v5451_v17 = vmax.f32 %v11894_v16, %v8986_v38  ;;  %v3992_v37 = vpop.f32.mrb[199].mxu0  ;;  %v5016_v6 = vpop.f32.mrb[199].mxu1  ;;  %v11903_v49 = vld [vmem:[#allocation109_spill] sm:$0xff]  ;;  %v11904_v45 = vld [vmem:[#allocation110_spill] sm:$0xff]  ;;  %v11905_v38 = vld [vmem:[#allocation111_spill] sm:$0xff] }
 0x2eb   : > { %v8049_v7 = vpack.c.bf16 %v5836_v53, %v5835_v30  ;;  %v5576_v60 = vmax.f32 %v5320_v31, %v5448_v34  ;;  %v5321_v18 = vmax.f32 %v11895_v61, %v3992_v37  ;;  %v5449_v19 = vmax.f32 %v11896_v63, %v5016_v6  ;;  %v11907_v6 = vld [vmem:[#allocation113_spill] sm:$0xff] }
 0x2ec   : > { %8238 = vst [vmem:[%s10920_s12 + $0x108] sm:$0xff] %v8054_v54   ;;  %v5713_v62 = vadd.f32 %v11146_v55, %v5578_v39  ;;  %v5579_v22 = vmax.f32 %v5323_v0, %v5451_v17  ;;  %v11906_v39 = vld [vmem:[#allocation112_spill] sm:$0xff] }
 0x2ed   : > { %8237 = vst [vmem:[%s10920_s12 + $0x100] sm:$0xff] %v8049_v7   ;;  %v5711_v23 = vadd.f32 %v11146_v55, %v5576_v60  ;;  %v5577_v26 = vmax.f32 %v5321_v18, %v5449_v19  ;;  %v11908_v60 = vld [vmem:[#allocation114_spill] sm:$0xff] }
 0x2ee   : > { %v5714_v27 = vadd.f32 %v11146_v55, %v5579_v22  ;;  %v5841_v41 = vmax.f32 %v5713_v62, 0.0  ;;  %v11909_v22 = vld [vmem:[#allocation115_spill] sm:$0xff] }
 0x2ef   : > { %v5712_v2 = vadd.f32 %v11146_v55, %v5577_v26  ;;  %v8733_v8 = vpop.f32.mrb[200].mxu0  ;;  %v8989_v40 = vpop.f32.mrb[200].mxu1  ;;  %v5839_v43 = vmax.f32 %v5711_v23, 0.0  ;;  %v11910_v26 = vld [vmem:[#allocation116_spill] sm:$0xff] }
 0x2f0   : > { %v5842_v9 = vmax.f32 %v5714_v27, 0.0  ;;  %v5326_v10 = vmax.f32 %v11897_v3, %v8733_v8  ;;  %v5454_v14 = vmax.f32 %v11898_v11, %v8989_v40  ;;  %v4005_v15 = vpop.f32.mrb[201].mxu0  ;;  %v5029_v42 = vpop.f32.mrb[201].mxu1 }
 0x2f1   : > { %v5840_v46 = vmax.f32 %v5712_v2, 0.0  ;;  %v5324_v20 = vmax.f32 %v11899_v47, %v4005_v15  ;;  %v5452_v25 = vmax.f32 %v11900_v21, %v5029_v42  ;;  %v8734_v50 = vpop.f32.mrb[202].mxu0  ;;  %v8990_v5 = vpop.f32.mrb[202].mxu1 }
 0x2f2   : > { %v8064_v51 = vpack.c.bf16 %v5842_v9, %v5841_v41  ;;  %v5582_v4 = vmax.f32 %v5326_v10, %v5454_v14  ;;  %v5327_v13 = vmax.f32 %v11901_v32, %v8734_v50  ;;  %v5455_v12 = vmax.f32 %v11902_v1, %v8990_v5  ;;  %v4008_v24 = vpop.f32.mrb[203].mxu0  ;;  %v5032_v57 = vpop.f32.mrb[203].mxu1  ;;  %v11911_v9 = vld [vmem:[#allocation117_spill] sm:$0xff]  ;;  %v11912_v10 = vld [vmem:[#allocation118_spill] sm:$0xff]  ;;  %v11913_v5 = vld [vmem:[#allocation119_spill] sm:$0xff] }
 0x2f3   : > { %v8059_v28 = vpack.c.bf16 %v5840_v46, %v5839_v43  ;;  %v5580_v29 = vmax.f32 %v5324_v20, %v5452_v25  ;;  %v5325_v56 = vmax.f32 %v11903_v49, %v4008_v24  ;;  %v5453_v48 = vmax.f32 %v11904_v45, %v5032_v57  ;;  %v11915_v57 = vld [vmem:[#allocation121_spill] sm:$0xff] }
 0x2f4   : > { %8240 = vst [vmem:[%s10920_s12 + $0x118] sm:$0xff] %v8064_v51   ;;  %v5717_v33 = vadd.f32 %v11146_v55, %v5582_v4  ;;  %v5583_v44 = vmax.f32 %v5327_v13, %v5455_v12  ;;  %v11914_v4 = vld [vmem:[#allocation120_spill] sm:$0xff] }
 0x2f5   : > { %8239 = vst [vmem:[%s10920_s12 + $0x110] sm:$0xff] %v8059_v28   ;;  %v5715_v52 = vadd.f32 %v11146_v55, %v5580_v29  ;;  %v5581_v30 = vmax.f32 %v5325_v56, %v5453_v48  ;;  %v11916_v29 = vld [vmem:[#allocation122_spill] sm:$0xff] }
 0x2f6   : > { %v5718_v53 = vadd.f32 %v11146_v55, %v5583_v44  ;;  %v5845_v34 = vmax.f32 %v5717_v33, 0.0  ;;  %v11917_v44 = vld [vmem:[#allocation123_spill] sm:$0xff] }
 0x2f7   : > { %v5716_v58 = vadd.f32 %v11146_v55, %v5581_v30  ;;  %v8737_v31 = vpop.f32.mrb[204].mxu0  ;;  %v8993_v36 = vpop.f32.mrb[204].mxu1  ;;  %v5843_v17 = vmax.f32 %v5715_v52, 0.0  ;;  %v11918_v30 = vld [vmem:[#allocation124_spill] sm:$0xff] }
 0x2f8   : > { %v5846_v35 = vmax.f32 %v5718_v53, 0.0  ;;  %v5330_v54 = vmax.f32 %v11905_v38, %v8737_v31  ;;  %v5458_v59 = vmax.f32 %v11906_v39, %v8993_v36  ;;  %v4021_v0 = vpop.f32.mrb[205].mxu0  ;;  %v5045_v16 = vpop.f32.mrb[205].mxu1 }
 0x2f9   : > { %v5844_v37 = vmax.f32 %v5716_v58, 0.0  ;;  %v5328_v7 = vmax.f32 %v11907_v6, %v4021_v0  ;;  %v5456_v61 = vmax.f32 %v11908_v60, %v5045_v16  ;;  %v8738_v18 = vpop.f32.mrb[206].mxu0  ;;  %v8994_v63 = vpop.f32.mrb[206].mxu1 }
 0x2fa   : > { %v8074_v19 = vpack.c.bf16 %v5846_v35, %v5845_v34  ;;  %v5586_v62 = vmax.f32 %v5330_v54, %v5458_v59  ;;  %v5331_v23 = vmax.f32 %v11909_v22, %v8738_v18  ;;  %v5459_v27 = vmax.f32 %v11910_v26, %v8994_v63  ;;  %v4024_v2 = vpop.f32.mrb[207].mxu0  ;;  %v5048_v8 = vpop.f32.mrb[207].mxu1  ;;  %v11919_v35 = vld [vmem:[#allocation125_spill] sm:$0xff]  ;;  %v11920_v54 = vld [vmem:[#allocation126_spill] sm:$0xff]  ;;  %v11921_v63 = vld [vmem:[#allocation127_spill] sm:$0xff] }
 0x2fb   : > { %v8069_v40 = vpack.c.bf16 %v5844_v37, %v5843_v17  ;;  %v5584_v41 = vmax.f32 %v5328_v7, %v5456_v61  ;;  %v5329_v3 = vmax.f32 %v11911_v9, %v4024_v2  ;;  %v5457_v11 = vmax.f32 %v11912_v10, %v5048_v8  ;;  %v11923_v8 = vld [vmem:[#allocation129_spill] sm:$0xff] }
 0x2fc   : > { %8242 = vst [vmem:[%s10920_s12 + $0x128] sm:$0xff] %v8074_v19   ;;  %v5721_v14 = vadd.f32 %v11146_v55, %v5586_v62  ;;  %v5587_v15 = vmax.f32 %v5331_v23, %v5459_v27  ;;  %v11922_v62 = vld [vmem:[#allocation128_spill] sm:$0xff] }
 0x2fd   : > { %8241 = vst [vmem:[%s10920_s12 + $0x120] sm:$0xff] %v8069_v40   ;;  %v5719_v42 = vadd.f32 %v11146_v55, %v5584_v41  ;;  %v5585_v43 = vmax.f32 %v5329_v3, %v5457_v11  ;;  %v11924_v41 = vld [vmem:[#allocation130_spill] sm:$0xff] }
 0x2fe   : > { %v5722_v46 = vadd.f32 %v11146_v55, %v5587_v15  ;;  %v5849_v25 = vmax.f32 %v5721_v14, 0.0  ;;  %v11925_v15 = vld [vmem:[#allocation131_spill] sm:$0xff] }
 0x2ff   : > { %v5720_v47 = vadd.f32 %v11146_v55, %v5585_v43  ;;  %v8741_v20 = vpop.f32.mrb[208].mxu0  ;;  %v8997_v21 = vpop.f32.mrb[208].mxu1  ;;  %v5847_v12 = vmax.f32 %v5719_v42, 0.0  ;;  %v11926_v43 = vld [vmem:[#allocation132_spill] sm:$0xff] }
 0x300   : > { %v5850_v50 = vmax.f32 %v5722_v46, 0.0  ;;  %v5334_v51 = vmax.f32 %v11913_v5, %v8741_v20  ;;  %v5462_v32 = vmax.f32 %v11914_v4, %v8997_v21  ;;  %v4037_v13 = vpop.f32.mrb[209].mxu0  ;;  %v5061_v1 = vpop.f32.mrb[209].mxu1 }
 0x301   : > { %v5848_v24 = vmax.f32 %v5720_v47, 0.0  ;;  %v5332_v28 = vmax.f32 %v11915_v57, %v4037_v13  ;;  %v5460_v49 = vmax.f32 %v11916_v29, %v5061_v1  ;;  %v8742_v56 = vpop.f32.mrb[210].mxu0  ;;  %v8998_v45 = vpop.f32.mrb[210].mxu1 }
 0x302   : > { %v8084_v48 = vpack.c.bf16 %v5850_v50, %v5849_v25  ;;  %v5590_v33 = vmax.f32 %v5334_v51, %v5462_v32  ;;  %v5335_v52 = vmax.f32 %v11917_v44, %v8742_v56  ;;  %v5463_v53 = vmax.f32 %v11918_v30, %v8998_v45  ;;  %v4040_v58 = vpop.f32.mrb[211].mxu0  ;;  %v5064_v31 = vpop.f32.mrb[211].mxu1  ;;  %v11927_v50 = vld [vmem:[#allocation133_spill] sm:$0xff]  ;;  %v11928_v51 = vld [vmem:[#allocation134_spill] sm:$0xff]  ;;  %v11929_v45 = vld [vmem:[#allocation135_spill] sm:$0xff] }
 0x303   : > { %v8079_v36 = vpack.c.bf16 %v5848_v24, %v5847_v12  ;;  %v5588_v34 = vmax.f32 %v5332_v28, %v5460_v49  ;;  %v5333_v38 = vmax.f32 %v11919_v35, %v4040_v58  ;;  %v5461_v39 = vmax.f32 %v11920_v54, %v5064_v31  ;;  %v11931_v31 = vld [vmem:[#allocation137_spill] sm:$0xff] }
 0x304   : > { %8244 = vst [vmem:[%s10920_s12 + $0x138] sm:$0xff] %v8084_v48   ;;  %v5725_v59 = vadd.f32 %v11146_v55, %v5590_v33  ;;  %v5591_v0 = vmax.f32 %v5335_v52, %v5463_v53  ;;  %v11930_v33 = vld [vmem:[#allocation136_spill] sm:$0xff] }
 0x305   : > { %8243 = vst [vmem:[%s10920_s12 + $0x130] sm:$0xff] %v8079_v36   ;;  %v5723_v16 = vadd.f32 %v11146_v55, %v5588_v34  ;;  %v5589_v17 = vmax.f32 %v5333_v38, %v5461_v39  ;;  %v11932_v34 = vld [vmem:[#allocation138_spill] sm:$0xff] }
 0x306   : > { %v5726_v37 = vadd.f32 %v11146_v55, %v5591_v0  ;;  %v5853_v61 = vmax.f32 %v5725_v59, 0.0  ;;  %v11933_v0 = vld [vmem:[#allocation139_spill] sm:$0xff] }
 0x307   : > { %v5724_v6 = vadd.f32 %v11146_v55, %v5589_v17  ;;  %v8745_v7 = vpop.f32.mrb[212].mxu0  ;;  %v9001_v60 = vpop.f32.mrb[212].mxu1  ;;  %v5851_v27 = vmax.f32 %v5723_v16, 0.0  ;;  %v11934_v17 = vld [vmem:[#allocation140_spill] sm:$0xff] }
 0x308   : > { %v5854_v18 = vmax.f32 %v5726_v37, 0.0  ;;  %v5338_v19 = vmax.f32 %v11921_v63, %v8745_v7  ;;  %v5466_v22 = vmax.f32 %v11922_v62, %v9001_v60  ;;  %v4053_v23 = vpop.f32.mrb[213].mxu0  ;;  %v5077_v26 = vpop.f32.mrb[213].mxu1 }
 0x309   : > { %v5852_v2 = vmax.f32 %v5724_v6, 0.0  ;;  %v5336_v40 = vmax.f32 %v11923_v8, %v4053_v23  ;;  %v5464_v9 = vmax.f32 %v11924_v41, %v5077_v26  ;;  %v8746_v3 = vpop.f32.mrb[214].mxu0  ;;  %v9002_v10 = vpop.f32.mrb[214].mxu1 }
 0x30a   : > { %v8094_v11 = vpack.c.bf16 %v5854_v18, %v5853_v61  ;;  %v5594_v14 = vmax.f32 %v5338_v19, %v5466_v22  ;;  %v5339_v42 = vmax.f32 %v11925_v15, %v8746_v3  ;;  %v5467_v46 = vmax.f32 %v11926_v43, %v9002_v10  ;;  %v4056_v47 = vpop.f32.mrb[215].mxu0  ;;  %v5080_v20 = vpop.f32.mrb[215].mxu1  ;;  %v11935_v18 = vld [vmem:[#allocation141_spill] sm:$0xff]  ;;  %v11936_v19 = vld [vmem:[#allocation142_spill] sm:$0xff]  ;;  %v11937_v10 = vld [vmem:[#allocation143_spill] sm:$0xff] }
 0x30b   : > { %v8089_v21 = vpack.c.bf16 %v5852_v2, %v5851_v27  ;;  %v5592_v25 = vmax.f32 %v5336_v40, %v5464_v9  ;;  %v5337_v5 = vmax.f32 %v11927_v50, %v4056_v47  ;;  %v5465_v4 = vmax.f32 %v11928_v51, %v5080_v20  ;;  %v11939_v20 = vld [vmem:[#allocation145_spill] sm:$0xff] }
 0x30c   : > { %8246 = vst [vmem:[%s10920_s12 + $0x148] sm:$0xff] %v8094_v11   ;;  %v5729_v32 = vadd.f32 %v11146_v55, %v5594_v14  ;;  %v5595_v13 = vmax.f32 %v5339_v42, %v5467_v46  ;;  %v11938_v14 = vld [vmem:[#allocation144_spill] sm:$0xff] }
 0x30d   : > { %8245 = vst [vmem:[%s10920_s12 + $0x140] sm:$0xff] %v8089_v21   ;;  %v5727_v1 = vadd.f32 %v11146_v55, %v5592_v25  ;;  %v5593_v12 = vmax.f32 %v5337_v5, %v5465_v4  ;;  %v11940_v25 = vld [vmem:[#allocation146_spill] sm:$0xff] }
 0x30e   : > { %v5730_v24 = vadd.f32 %v11146_v55, %v5595_v13  ;;  %v5857_v49 = vmax.f32 %v5729_v32, 0.0  ;;  %v11941_v13 = vld [vmem:[#allocation147_spill] sm:$0xff] }
 0x30f   : > { %v5728_v57 = vadd.f32 %v11146_v55, %v5593_v12  ;;  %v8749_v28 = vpop.f32.mrb[216].mxu0  ;;  %v9005_v29 = vpop.f32.mrb[216].mxu1  ;;  %v5855_v53 = vmax.f32 %v5727_v1, 0.0  ;;  %v11942_v12 = vld [vmem:[#allocation148_spill] sm:$0xff] }
 0x310   : > { %v5858_v56 = vmax.f32 %v5730_v24, 0.0  ;;  %v5342_v48 = vmax.f32 %v11929_v45, %v8749_v28  ;;  %v5470_v44 = vmax.f32 %v11930_v33, %v9005_v29  ;;  %v4069_v52 = vpop.f32.mrb[217].mxu0  ;;  %v5093_v30 = vpop.f32.mrb[217].mxu1 }
 0x311   : > { %v5856_v58 = vmax.f32 %v5728_v57, 0.0  ;;  %v5340_v36 = vmax.f32 %v11931_v31, %v4069_v52  ;;  %v5468_v35 = vmax.f32 %v11932_v34, %v5093_v30  ;;  %v8750_v38 = vpop.f32.mrb[218].mxu0  ;;  %v9006_v54 = vpop.f32.mrb[218].mxu1 }
 0x312   : > { %v8104_v39 = vpack.c.bf16 %v5858_v56, %v5857_v49  ;;  %v5598_v59 = vmax.f32 %v5342_v48, %v5470_v44  ;;  %v5343_v16 = vmax.f32 %v11933_v0, %v8750_v38  ;;  %v5471_v37 = vmax.f32 %v11934_v17, %v9006_v54  ;;  %v4072_v6 = vpop.f32.mrb[219].mxu0  ;;  %v5096_v7 = vpop.f32.mrb[219].mxu1  ;;  %v11943_v56 = vld [vmem:[#allocation149_spill] sm:$0xff]  ;;  %v11944_v48 = vld [vmem:[#allocation150_spill] sm:$0xff]  ;;  %v11945_v54 = vld [vmem:[#allocation151_spill] sm:$0xff] }
 0x313   : > { %v8099_v60 = vpack.c.bf16 %v5856_v58, %v5855_v53  ;;  %v5596_v61 = vmax.f32 %v5340_v36, %v5468_v35  ;;  %v5341_v63 = vmax.f32 %v11935_v18, %v4072_v6  ;;  %v5469_v62 = vmax.f32 %v11936_v19, %v5096_v7  ;;  %v11947_v7 = vld [vmem:[#allocation153_spill] sm:$0xff] }
 0x314   : > { %8248 = vst [vmem:[%s10920_s12 + $0x158] sm:$0xff] %v8104_v39   ;;  %v5733_v22 = vadd.f32 %v11146_v55, %v5598_v59  ;;  %v5599_v23 = vmax.f32 %v5343_v16, %v5471_v37  ;;  %v11946_v59 = vld [vmem:[#allocation152_spill] sm:$0xff] }
 0x315   : > { %8247 = vst [vmem:[%s10920_s12 + $0x150] sm:$0xff] %v8099_v60   ;;  %v5731_v26 = vadd.f32 %v11146_v55, %v5596_v61  ;;  %v5597_v27 = vmax.f32 %v5341_v63, %v5469_v62  ;;  %v11948_v61 = vld [vmem:[#allocation154_spill] sm:$0xff] }
 0x316   : > { %v5734_v2 = vadd.f32 %v11146_v55, %v5599_v23  ;;  %v5861_v9 = vmax.f32 %v5733_v22, 0.0  ;;  %v11949_v23 = vld [vmem:[#allocation155_spill] sm:$0xff] }
 0x317   : > { %v5732_v8 = vadd.f32 %v11146_v55, %v5597_v27  ;;  %v8753_v40 = vpop.f32.mrb[220].mxu0  ;;  %v9009_v41 = vpop.f32.mrb[220].mxu1  ;;  %v5859_v46 = vmax.f32 %v5731_v26, 0.0  ;;  %v11950_v27 = vld [vmem:[#allocation156_spill] sm:$0xff] }
 0x318   : > { %v5862_v3 = vmax.f32 %v5734_v2, 0.0  ;;  %v5346_v11 = vmax.f32 %v11937_v10, %v8753_v40  ;;  %v5474_v15 = vmax.f32 %v11938_v14, %v9009_v41  ;;  %v4085_v42 = vpop.f32.mrb[221].mxu0  ;;  %v5109_v43 = vpop.f32.mrb[221].mxu1 }
 0x319   : > { %v5860_v47 = vmax.f32 %v5732_v8, 0.0  ;;  %v5344_v21 = vmax.f32 %v11939_v20, %v4085_v42  ;;  %v5472_v50 = vmax.f32 %v11940_v25, %v5109_v43  ;;  %v8754_v5 = vpop.f32.mrb[222].mxu0  ;;  %v9010_v51 = vpop.f32.mrb[222].mxu1 }
 0x31a   : > { %v8114_v4 = vpack.c.bf16 %v5862_v3, %v5861_v9  ;;  %v5602_v32 = vmax.f32 %v5346_v11, %v5474_v15  ;;  %v5347_v1 = vmax.f32 %v11941_v13, %v8754_v5  ;;  %v5475_v24 = vmax.f32 %v11942_v12, %v9010_v51  ;;  %v4088_v57 = vpop.f32.mrb[223].mxu0  ;;  %v5112_v28 = vpop.f32.mrb[223].mxu1  ;;  %v11951_v3 = vld [vmem:[#allocation157_spill] sm:$0xff]  ;;  %v11952_v11 = vld [vmem:[#allocation158_spill] sm:$0xff]  ;;  %v11953_v51 = vld [vmem:[#allocation159_spill] sm:$0xff] }
 0x31b   : > { %v8109_v29 = vpack.c.bf16 %v5860_v47, %v5859_v46  ;;  %v5600_v49 = vmax.f32 %v5344_v21, %v5472_v50  ;;  %v5345_v45 = vmax.f32 %v11943_v56, %v4088_v57  ;;  %v5473_v33 = vmax.f32 %v11944_v48, %v5112_v28  ;;  %v11955_v28 = vld [vmem:[#allocation161_spill] sm:$0xff] }
 0x31c   : > { %8250 = vst [vmem:[%s10920_s12 + $0x168] sm:$0xff] %v8114_v4   ;;  %v5737_v44 = vadd.f32 %v11146_v55, %v5602_v32  ;;  %v5603_v52 = vmax.f32 %v5347_v1, %v5475_v24  ;;  %v11954_v32 = vld [vmem:[#allocation160_spill] sm:$0xff] }
 0x31d   : > { %8249 = vst [vmem:[%s10920_s12 + $0x160] sm:$0xff] %v8109_v29   ;;  %v5735_v30 = vadd.f32 %v11146_v55, %v5600_v49  ;;  %v5601_v53 = vmax.f32 %v5345_v45, %v5473_v33  ;;  %v11956_v49 = vld [vmem:[#allocation162_spill] sm:$0xff] }
 0x31e   : > { %v5738_v58 = vadd.f32 %v11146_v55, %v5603_v52  ;;  %v5865_v35 = vmax.f32 %v5737_v44, 0.0  ;;  %v11957_v52 = vld [vmem:[#allocation163_spill] sm:$0xff] }
 0x31f   : > { %v5736_v31 = vadd.f32 %v11146_v55, %v5601_v53  ;;  %v8757_v36 = vpop.f32.mrb[224].mxu0  ;;  %v9013_v34 = vpop.f32.mrb[224].mxu1  ;;  %v5863_v37 = vmax.f32 %v5735_v30, 0.0  ;;  %v11958_v53 = vld [vmem:[#allocation164_spill] sm:$0xff] }
 0x320   : > { %v5866_v38 = vmax.f32 %v5738_v58, 0.0  ;;  %v5350_v39 = vmax.f32 %v11945_v54, %v8757_v36  ;;  %v5478_v0 = vmax.f32 %v11946_v59, %v9013_v34  ;;  %v4101_v16 = vpop.f32.mrb[225].mxu0  ;;  %v5125_v17 = vpop.f32.mrb[225].mxu1 }
 0x321   : > { %v5864_v6 = vmax.f32 %v5736_v31, 0.0  ;;  %v5348_v60 = vmax.f32 %v11947_v7, %v4101_v16  ;;  %v5476_v18 = vmax.f32 %v11948_v61, %v5125_v17  ;;  %v8758_v63 = vpop.f32.mrb[226].mxu0  ;;  %v9014_v19 = vpop.f32.mrb[226].mxu1 }
 0x322   : > { %v8124_v62 = vpack.c.bf16 %v5866_v38, %v5865_v35  ;;  %v5606_v22 = vmax.f32 %v5350_v39, %v5478_v0  ;;  %v5351_v26 = vmax.f32 %v11949_v23, %v8758_v63  ;;  %v5479_v2 = vmax.f32 %v11950_v27, %v9014_v19  ;;  %v4104_v8 = vpop.f32.mrb[227].mxu0  ;;  %v5128_v40 = vpop.f32.mrb[227].mxu1  ;;  %v11959_v38 = vld [vmem:[#allocation165_spill] sm:$0xff]  ;;  %v11960_v39 = vld [vmem:[#allocation166_spill] sm:$0xff]  ;;  %v11961_v19 = vld [vmem:[#allocation167_spill] sm:$0xff] }
 0x323   : > { %v8119_v41 = vpack.c.bf16 %v5864_v6, %v5863_v37  ;;  %v5604_v9 = vmax.f32 %v5348_v60, %v5476_v18  ;;  %v5349_v10 = vmax.f32 %v11951_v3, %v4104_v8  ;;  %v5477_v14 = vmax.f32 %v11952_v11, %v5128_v40  ;;  %v11963_v40 = vld [vmem:[#allocation169_spill] sm:$0xff] }
 0x324   : > { %8252 = vst [vmem:[%s10920_s12 + $0x178] sm:$0xff] %v8124_v62   ;;  %v5741_v15 = vadd.f32 %v11146_v55, %v5606_v22  ;;  %v5607_v42 = vmax.f32 %v5351_v26, %v5479_v2  ;;  %v11962_v22 = vld [vmem:[#allocation168_spill] sm:$0xff] }
 0x325   : > { %8251 = vst [vmem:[%s10920_s12 + $0x170] sm:$0xff] %v8119_v41   ;;  %v5739_v43 = vadd.f32 %v11146_v55, %v5604_v9  ;;  %v5605_v46 = vmax.f32 %v5349_v10, %v5477_v14  ;;  %v11964_v9 = vld [vmem:[#allocation170_spill] sm:$0xff] }
 0x326   : > { %v5742_v47 = vadd.f32 %v11146_v55, %v5607_v42  ;;  %v5869_v50 = vmax.f32 %v5741_v15, 0.0  ;;  %v11965_v42 = vld [vmem:[#allocation171_spill] sm:$0xff] }
 0x327   : > { %v5740_v20 = vadd.f32 %v11146_v55, %v5605_v46  ;;  %v8761_v21 = vpop.f32.mrb[228].mxu0  ;;  %v9017_v25 = vpop.f32.mrb[228].mxu1  ;;  %v5867_v24 = vmax.f32 %v5739_v43, 0.0  ;;  %v11966_v46 = vld [vmem:[#allocation172_spill] sm:$0xff] }
 0x328   : > { %v5870_v5 = vmax.f32 %v5742_v47, 0.0  ;;  %v5354_v4 = vmax.f32 %v11953_v51, %v8761_v21  ;;  %v5482_v13 = vmax.f32 %v11954_v32, %v9017_v25  ;;  %v4117_v1 = vpop.f32.mrb[229].mxu0  ;;  %v5141_v12 = vpop.f32.mrb[229].mxu1 }
 0x329   : > { %v5868_v57 = vmax.f32 %v5740_v20, 0.0  ;;  %v5352_v29 = vmax.f32 %v11955_v28, %v4117_v1  ;;  %v5480_v56 = vmax.f32 %v11956_v49, %v5141_v12  ;;  %v8762_v45 = vpop.f32.mrb[230].mxu0  ;;  %v9018_v48 = vpop.f32.mrb[230].mxu1 }
 0x32a   : > { %v8134_v33 = vpack.c.bf16 %v5870_v5, %v5869_v50  ;;  %v5610_v44 = vmax.f32 %v5354_v4, %v5482_v13  ;;  %v5355_v30 = vmax.f32 %v11957_v52, %v8762_v45  ;;  %v5483_v58 = vmax.f32 %v11958_v53, %v9018_v48  ;;  %v4120_v31 = vpop.f32.mrb[231].mxu0  ;;  %v5144_v36 = vpop.f32.mrb[231].mxu1  ;;  %v11967_v5 = vld [vmem:[#allocation173_spill] sm:$0xff]  ;;  %v11968_v4 = vld [vmem:[#allocation174_spill] sm:$0xff]  ;;  %v11969_v48 = vld [vmem:[#allocation175_spill] sm:$0xff] }
 0x32b   : > { %v8129_v34 = vpack.c.bf16 %v5868_v57, %v5867_v24  ;;  %v5608_v35 = vmax.f32 %v5352_v29, %v5480_v56  ;;  %v5353_v54 = vmax.f32 %v11959_v38, %v4120_v31  ;;  %v5481_v59 = vmax.f32 %v11960_v39, %v5144_v36  ;;  %v11971_v36 = vld [vmem:[#allocation177_spill] sm:$0xff] }
 0x32c   : > { %8254 = vst [vmem:[%s10920_s12 + $0x188] sm:$0xff] %v8134_v33   ;;  %v5745_v0 = vadd.f32 %v11146_v55, %v5610_v44  ;;  %v5611_v16 = vmax.f32 %v5355_v30, %v5483_v58  ;;  %v11970_v44 = vld [vmem:[#allocation176_spill] sm:$0xff] }
 0x32d   : > { %8253 = vst [vmem:[%s10920_s12 + $0x180] sm:$0xff] %v8129_v34   ;;  %v5743_v17 = vadd.f32 %v11146_v55, %v5608_v35  ;;  %v5609_v37 = vmax.f32 %v5353_v54, %v5481_v59  ;;  %v11972_v35 = vld [vmem:[#allocation178_spill] sm:$0xff] }
 0x32e   : > { %v5746_v6 = vadd.f32 %v11146_v55, %v5611_v16  ;;  %v5873_v18 = vmax.f32 %v5745_v0, 0.0  ;;  %v11973_v16 = vld [vmem:[#allocation179_spill] sm:$0xff] }
 0x32f   : > { %v5744_v7 = vadd.f32 %v11146_v55, %v5609_v37  ;;  %v8765_v60 = vpop.f32.mrb[232].mxu0  ;;  %v9021_v61 = vpop.f32.mrb[232].mxu1  ;;  %v5871_v2 = vmax.f32 %v5743_v17, 0.0  ;;  %v11974_v37 = vld [vmem:[#allocation180_spill] sm:$0xff] }
 0x330   : > { %v5874_v63 = vmax.f32 %v5746_v6, 0.0  ;;  %v5358_v62 = vmax.f32 %v11961_v19, %v8765_v60  ;;  %v5486_v23 = vmax.f32 %v11962_v22, %v9021_v61  ;;  %v4133_v26 = vpop.f32.mrb[233].mxu0  ;;  %v5157_v27 = vpop.f32.mrb[233].mxu1 }
 0x331   : > { %v5872_v8 = vmax.f32 %v5744_v7, 0.0  ;;  %v5356_v41 = vmax.f32 %v11963_v40, %v4133_v26  ;;  %v5484_v3 = vmax.f32 %v11964_v9, %v5157_v27  ;;  %v8766_v10 = vpop.f32.mrb[234].mxu0  ;;  %v9022_v11 = vpop.f32.mrb[234].mxu1 }
 0x332   : > { %v8144_v14 = vpack.c.bf16 %v5874_v63, %v5873_v18  ;;  %v5614_v15 = vmax.f32 %v5358_v62, %v5486_v23  ;;  %v5359_v43 = vmax.f32 %v11965_v42, %v8766_v10  ;;  %v5487_v47 = vmax.f32 %v11966_v46, %v9022_v11  ;;  %v4136_v20 = vpop.f32.mrb[235].mxu0  ;;  %v5160_v21 = vpop.f32.mrb[235].mxu1  ;;  %v11975_v63 = vld [vmem:[#allocation181_spill] sm:$0xff]  ;;  %v11976_v62 = vld [vmem:[#allocation182_spill] sm:$0xff]  ;;  %v11977_v11 = vld [vmem:[#allocation183_spill] sm:$0xff] }
 0x333   : > { %v8139_v25 = vpack.c.bf16 %v5872_v8, %v5871_v2  ;;  %v5612_v50 = vmax.f32 %v5356_v41, %v5484_v3  ;;  %v5357_v51 = vmax.f32 %v11967_v5, %v4136_v20  ;;  %v5485_v32 = vmax.f32 %v11968_v4, %v5160_v21  ;;  %v11979_v21 = vld [vmem:[#allocation185_spill] sm:$0xff] }
 0x334   : > { %8256 = vst [vmem:[%s10920_s12 + $0x198] sm:$0xff] %v8144_v14   ;;  %v5749_v13 = vadd.f32 %v11146_v55, %v5614_v15  ;;  %v5615_v1 = vmax.f32 %v5359_v43, %v5487_v47  ;;  %v11978_v15 = vld [vmem:[#allocation184_spill] sm:$0xff] }
 0x335   : > { %8255 = vst [vmem:[%s10920_s12 + $0x190] sm:$0xff] %v8139_v25   ;;  %v5747_v12 = vadd.f32 %v11146_v55, %v5612_v50  ;;  %v5613_v24 = vmax.f32 %v5357_v51, %v5485_v32  ;;  %v11980_v50 = vld [vmem:[#allocation186_spill] sm:$0xff] }
 0x336   : > { %v5750_v57 = vadd.f32 %v11146_v55, %v5615_v1  ;;  %v5877_v56 = vmax.f32 %v5749_v13, 0.0  ;;  %v11981_v1 = vld [vmem:[#allocation187_spill] sm:$0xff] }
 0x337   : > { %v5748_v28 = vadd.f32 %v11146_v55, %v5613_v24  ;;  %v8769_v29 = vpop.f32.mrb[236].mxu0  ;;  %v9025_v49 = vpop.f32.mrb[236].mxu1  ;;  %v5875_v58 = vmax.f32 %v5747_v12, 0.0  ;;  %v11982_v24 = vld [vmem:[#allocation188_spill] sm:$0xff] }
 0x338   : > { %v5878_v45 = vmax.f32 %v5750_v57, 0.0  ;;  %v5362_v33 = vmax.f32 %v11969_v48, %v8769_v29  ;;  %v5490_v52 = vmax.f32 %v11970_v44, %v9025_v49  ;;  %v4149_v30 = vpop.f32.mrb[237].mxu0  ;;  %v5173_v53 = vpop.f32.mrb[237].mxu1 }
 0x339   : > { %v5876_v31 = vmax.f32 %v5748_v28, 0.0  ;;  %v5360_v34 = vmax.f32 %v11971_v36, %v4149_v30  ;;  %v5488_v38 = vmax.f32 %v11972_v35, %v5173_v53  ;;  %v8770_v54 = vpop.f32.mrb[238].mxu0  ;;  %v9026_v39 = vpop.f32.mrb[238].mxu1 }
 0x33a   : > { %v8154_v59 = vpack.c.bf16 %v5878_v45, %v5877_v56  ;;  %v5618_v0 = vmax.f32 %v5362_v33, %v5490_v52  ;;  %v5363_v17 = vmax.f32 %v11973_v16, %v8770_v54  ;;  %v5491_v6 = vmax.f32 %v11974_v37, %v9026_v39  ;;  %v4152_v7 = vpop.f32.mrb[239].mxu0  ;;  %v5176_v60 = vpop.f32.mrb[239].mxu1  ;;  %v11983_v45 = vld [vmem:[#allocation189_spill] sm:$0xff]  ;;  %v11984_v33 = vld [vmem:[#allocation190_spill] sm:$0xff]  ;;  %v11985_v39 = vld [vmem:[#allocation191_spill] sm:$0xff] }
 0x33b   : > { %v8149_v61 = vpack.c.bf16 %v5876_v31, %v5875_v58  ;;  %v5616_v18 = vmax.f32 %v5360_v34, %v5488_v38  ;;  %v5361_v19 = vmax.f32 %v11975_v63, %v4152_v7  ;;  %v5489_v22 = vmax.f32 %v11976_v62, %v5176_v60  ;;  %v11987_v60 = vld [vmem:[#allocation193_spill] sm:$0xff] }
 0x33c   : > { %8258 = vst [vmem:[%s10920_s12 + $0x1a8] sm:$0xff] %v8154_v59   ;;  %v5753_v23 = vadd.f32 %v11146_v55, %v5618_v0  ;;  %v5619_v26 = vmax.f32 %v5363_v17, %v5491_v6  ;;  %v11986_v0 = vld [vmem:[#allocation192_spill] sm:$0xff] }
 0x33d   : > { %8257 = vst [vmem:[%s10920_s12 + $0x1a0] sm:$0xff] %v8149_v61   ;;  %v5751_v27 = vadd.f32 %v11146_v55, %v5616_v18  ;;  %v5617_v2 = vmax.f32 %v5361_v19, %v5489_v22  ;;  %v11988_v18 = vld [vmem:[#allocation194_spill] sm:$0xff] }
 0x33e   : > { %v5754_v8 = vadd.f32 %v11146_v55, %v5619_v26  ;;  %v5881_v3 = vmax.f32 %v5753_v23, 0.0  ;;  %v11989_v26 = vld [vmem:[#allocation195_spill] sm:$0xff] }
 0x33f   : > { %v5752_v40 = vadd.f32 %v11146_v55, %v5617_v2  ;;  %v8773_v41 = vpop.f32.mrb[240].mxu0  ;;  %v9029_v9 = vpop.f32.mrb[240].mxu1  ;;  %v5879_v47 = vmax.f32 %v5751_v27, 0.0  ;;  %v11990_v2 = vld [vmem:[#allocation196_spill] sm:$0xff] }
 0x340   : > { %v5882_v10 = vmax.f32 %v5754_v8, 0.0  ;;  %v5366_v14 = vmax.f32 %v11977_v11, %v8773_v41  ;;  %v5494_v42 = vmax.f32 %v11978_v15, %v9029_v9  ;;  %v4165_v43 = vpop.f32.mrb[241].mxu0  ;;  %v5189_v46 = vpop.f32.mrb[241].mxu1 }
 0x341   : > { %v5880_v20 = vmax.f32 %v5752_v40, 0.0  ;;  %v5364_v25 = vmax.f32 %v11979_v21, %v4165_v43  ;;  %v5492_v5 = vmax.f32 %v11980_v50, %v5189_v46  ;;  %v8774_v51 = vpop.f32.mrb[242].mxu0  ;;  %v9030_v4 = vpop.f32.mrb[242].mxu1 }
 0x342   : > { %v8164_v32 = vpack.c.bf16 %v5882_v10, %v5881_v3  ;;  %v5622_v13 = vmax.f32 %v5366_v14, %v5494_v42  ;;  %v5367_v12 = vmax.f32 %v11981_v1, %v8774_v51  ;;  %v5495_v57 = vmax.f32 %v11982_v24, %v9030_v4  ;;  %v4168_v28 = vpop.f32.mrb[243].mxu0  ;;  %v5192_v29 = vpop.f32.mrb[243].mxu1  ;;  %v11991_v10 = vld [vmem:[#allocation197_spill] sm:$0xff]  ;;  %v11992_v14 = vld [vmem:[#allocation198_spill] sm:$0xff]  ;;  %v11993_v4 = vld [vmem:[#allocation199_spill] sm:$0xff] }
 0x343   : > { %v8159_v49 = vpack.c.bf16 %v5880_v20, %v5879_v47  ;;  %v5620_v56 = vmax.f32 %v5364_v25, %v5492_v5  ;;  %v5365_v48 = vmax.f32 %v11983_v45, %v4168_v28  ;;  %v5493_v44 = vmax.f32 %v11984_v33, %v5192_v29  ;;  %v11995_v29 = vld [vmem:[#allocation201_spill] sm:$0xff] }
 0x344   : > { %8260 = vst [vmem:[%s10920_s12 + $0x1b8] sm:$0xff] %v8164_v32   ;;  %v5757_v52 = vadd.f32 %v11146_v55, %v5622_v13  ;;  %v5623_v30 = vmax.f32 %v5367_v12, %v5495_v57  ;;  %v11994_v13 = vld [vmem:[#allocation200_spill] sm:$0xff] }
 0x345   : > { %8259 = vst [vmem:[%s10920_s12 + $0x1b0] sm:$0xff] %v8159_v49   ;;  %v5755_v53 = vadd.f32 %v11146_v55, %v5620_v56  ;;  %v5621_v58 = vmax.f32 %v5365_v48, %v5493_v44  ;;  %v11996_v56 = vld [vmem:[#allocation202_spill] sm:$0xff] }
 0x346   : > { %v5758_v31 = vadd.f32 %v11146_v55, %v5623_v30  ;;  %v5885_v38 = vmax.f32 %v5757_v52, 0.0  ;;  %v11997_v30 = vld [vmem:[#allocation203_spill] sm:$0xff] }
 0x347   : > { %v5756_v36 = vadd.f32 %v11146_v55, %v5621_v58  ;;  %v8777_v34 = vpop.f32.mrb[244].mxu0  ;;  %v9033_v35 = vpop.f32.mrb[244].mxu1  ;;  %v5883_v6 = vmax.f32 %v5755_v53, 0.0  ;;  %v11998_v58 = vld [vmem:[#allocation204_spill] sm:$0xff] }
 0x348   : > { %v5886_v54 = vmax.f32 %v5758_v31, 0.0  ;;  %v5370_v59 = vmax.f32 %v11985_v39, %v8777_v34  ;;  %v5498_v16 = vmax.f32 %v11986_v0, %v9033_v35  ;;  %v4181_v17 = vpop.f32.mrb[245].mxu0  ;;  %v5205_v37 = vpop.f32.mrb[245].mxu1 }
 0x349   : > { %v5884_v7 = vmax.f32 %v5756_v36, 0.0  ;;  %v5368_v61 = vmax.f32 %v11987_v60, %v4181_v17  ;;  %v5496_v63 = vmax.f32 %v11988_v18, %v5205_v37  ;;  %v8778_v19 = vpop.f32.mrb[246].mxu0  ;;  %v9034_v62 = vpop.f32.mrb[246].mxu1 }
 0x34a   : > { %v8174_v22 = vpack.c.bf16 %v5886_v54, %v5885_v38  ;;  %v5626_v23 = vmax.f32 %v5370_v59, %v5498_v16  ;;  %v5371_v27 = vmax.f32 %v11989_v26, %v8778_v19  ;;  %v5499_v8 = vmax.f32 %v11990_v2, %v9034_v62  ;;  %v4184_v40 = vpop.f32.mrb[247].mxu0  ;;  %v5208_v41 = vpop.f32.mrb[247].mxu1  ;;  %v11999_v54 = vld [vmem:[#allocation205_spill] sm:$0xff]  ;;  %v12000_v59 = vld [vmem:[#allocation206_spill] sm:$0xff]  ;;  %v12001_v62 = vld [vmem:[#allocation207_spill] sm:$0xff] }
 0x34b   : > { %v8169_v9 = vpack.c.bf16 %v5884_v7, %v5883_v6  ;;  %v5624_v3 = vmax.f32 %v5368_v61, %v5496_v63  ;;  %v5369_v11 = vmax.f32 %v11991_v10, %v4184_v40  ;;  %v5497_v15 = vmax.f32 %v11992_v14, %v5208_v41  ;;  %v12003_v41 = vld [vmem:[#allocation209_spill] sm:$0xff] }
 0x34c   : > { %8262 = vst [vmem:[%s10920_s12 + $0x1c8] sm:$0xff] %v8174_v22   ;;  %v5761_v42 = vadd.f32 %v11146_v55, %v5626_v23  ;;  %v5627_v43 = vmax.f32 %v5371_v27, %v5499_v8  ;;  %v12002_v23 = vld [vmem:[#allocation208_spill] sm:$0xff] }
 0x34d   : > { %8261 = vst [vmem:[%s10920_s12 + $0x1c0] sm:$0xff] %v8169_v9   ;;  %v5759_v46 = vadd.f32 %v11146_v55, %v5624_v3  ;;  %v5625_v47 = vmax.f32 %v5369_v11, %v5497_v15  ;;  %v12004_v3 = vld [vmem:[#allocation210_spill] sm:$0xff] }
 0x34e   : > { %v5762_v20 = vadd.f32 %v11146_v55, %v5627_v43  ;;  %v5889_v5 = vmax.f32 %v5761_v42, 0.0  ;;  %v12005_v42 = vld [vmem:[#allocation211_spill] sm:$0xff] }
 0x34f   : > { %v5760_v21 = vadd.f32 %v11146_v55, %v5625_v47  ;;  %v8781_v25 = vpop.f32.mrb[248].mxu0  ;;  %v9037_v50 = vpop.f32.mrb[248].mxu1  ;;  %v5887_v57 = vmax.f32 %v5759_v46, 0.0  ;;  %v12006_v46 = vld [vmem:[#allocation212_spill] sm:$0xff] }
 0x350   : > { %v5890_v51 = vmax.f32 %v5762_v20, 0.0  ;;  %v5374_v32 = vmax.f32 %v11993_v4, %v8781_v25  ;;  %v5502_v1 = vmax.f32 %v11994_v13, %v9037_v50  ;;  %v4197_v12 = vpop.f32.mrb[249].mxu0  ;;  %v5221_v24 = vpop.f32.mrb[249].mxu1  ;;  %v12008_v4 = vld [vmem:[#allocation214_spill] sm:$0xff]  ;;  %v9459_v13 = vld [vmem:[%s11579_s2] ss:$0 sm:$0xff] }
 0x351   : > { %v5888_v28 = vmax.f32 %v5760_v21, 0.0  ;;  %v5372_v49 = vmax.f32 %v11995_v29, %v4197_v12  ;;  %v5500_v45 = vmax.f32 %v11996_v56, %v5221_v24  ;;  %v8782_v48 = vpop.f32.mrb[250].mxu0  ;;  %v9038_v33 = vpop.f32.mrb[250].mxu1 }
 0x352   : > { %v8184_v44 = vpack.c.bf16 %v5890_v51, %v5889_v5  ;;  %v5630_v52 = vmax.f32 %v5374_v32, %v5502_v1  ;;  %v5375_v53 = vmax.f32 %v11997_v30, %v8782_v48  ;;  %v5503_v31 = vmax.f32 %v11998_v58, %v9038_v33  ;;  %v4200_v36 = vpop.f32.mrb[251].mxu0  ;;  %v5224_v34 = vpop.f32.mrb[251].mxu1  ;;  %v12007_v5 = vld [vmem:[#allocation213_spill] sm:$0xff] }
 0x353   : > { %v8179_v35 = vpack.c.bf16 %v5888_v28, %v5887_v57  ;;  %v5628_v38 = vmax.f32 %v5372_v49, %v5500_v45  ;;  %v5373_v39 = vmax.f32 %v11999_v54, %v4200_v36  ;;  %v5501_v0 = vmax.f32 %v12000_v59, %v5224_v34 }
 0x354   : > { %8264 = vst [vmem:[%s10920_s12 + $0x1d8] sm:$0xff] %v8184_v44   ;;  %v5765_v16 = vadd.f32 %v11146_v55, %v5630_v52  ;;  %v5631_v17 = vmax.f32 %v5375_v53, %v5503_v31 }
 0x355   : > { %8263 = vst [vmem:[%s10920_s12 + $0x1d0] sm:$0xff] %v8179_v35   ;;  %v5763_v37 = vadd.f32 %v11146_v55, %v5628_v38  ;;  %v5629_v6 = vmax.f32 %v5373_v39, %v5501_v0 }
 0x356   : > { %v5766_v7 = vadd.f32 %v11146_v55, %v5631_v17  ;;  %v5893_v63 = vmax.f32 %v5765_v16, 0.0 }
 0x357   : > { %v5764_v60 = vadd.f32 %v11146_v55, %v5629_v6  ;;  %v8785_v61 = vpop.f32.mrb[252].mxu0  ;;  %v9041_v18 = vpop.f32.mrb[252].mxu1  ;;  %v5891_v8 = vmax.f32 %v5763_v37, 0.0 }
 0x358   : > { %v5894_v19 = vmax.f32 %v5766_v7, 0.0  ;;  %v5378_v22 = vmax.f32 %v12001_v62, %v8785_v61  ;;  %v5506_v26 = vmax.f32 %v12002_v23, %v9041_v18  ;;  %v4213_v27 = vpop.f32.mrb[253].mxu0  ;;  %v5237_v2 = vpop.f32.mrb[253].mxu1 }
 0x359   : > { %v5892_v40 = vmax.f32 %v5764_v60, 0.0  ;;  %v5376_v9 = vmax.f32 %v12003_v41, %v4213_v27  ;;  %v5504_v10 = vmax.f32 %v12004_v3, %v5237_v2  ;;  %v8786_v11 = vpop.f32.mrb[254].mxu0  ;;  %v9042_v55 = vpop.f32.mrb[254].mxu1 }
 0x35a   : > { %v8194_v14 = vpack.c.bf16 %v5894_v19, %v5893_v63  ;;  %v5634_v15 = vmax.f32 %v5378_v22, %v5506_v26  ;;  %v5379_v43 = vmax.f32 %v12005_v42, %v8786_v11  ;;  %v5507_v47 = vmax.f32 %v12006_v46, %v9042_v55  ;;  %v4216_v20 = vpop.f32.mrb[255].mxu0  ;;  %v5240_v21 = vpop.f32.mrb[255].mxu1 }
 0x35b   : > { %v8189_v25 = vpack.c.bf16 %v5892_v40, %v5891_v8  ;;  %v5632_v50 = vmax.f32 %v5376_v9, %v5504_v10  ;;  %v5377_v51 = vmax.f32 %v12007_v5, %v4216_v20  ;;  %v5505_v32 = vmax.f32 %v12008_v4, %v5240_v21 }
 0x35c   : > { %8266 = vst [vmem:[%s10920_s12 + $0x1e8] sm:$0xff] %v8194_v14   ;;  %v5769_v1 = vadd.f32 %v9459_v13, %v5634_v15  ;;  %v5635_v12 = vmax.f32 %v5379_v43, %v5507_v47 }
 0x35d   : > { %8265 = vst [vmem:[%s10920_s12 + $0x1e0] sm:$0xff] %v8189_v25   ;;  %v5767_v24 = vadd.f32 %v9459_v13, %v5632_v50  ;;  %v5633_v57 = vmax.f32 %v5377_v51, %v5505_v32 }
 0x35e   : > { %v5770_v28 = vadd.f32 %v9459_v13, %v5635_v12  ;;  %v5897_v49 = vmax.f32 %v5769_v1, 0.0 }
 0x35f   : > { %v5768_v29 = vadd.f32 %v9459_v13, %v5633_v57  ;;  %v5895_v45 = vmax.f32 %v5767_v24, 0.0  ;;  %6545 = sbr.rel (!%p9664_p5) target bundleno = 961 (0x3c1), region = 98 }
 0x360   : > { %v5898_v56 = vmax.f32 %v5770_v28, 0.0 }
 0x361   : > { %v5896_v48 = vmax.f32 %v5768_v29, 0.0 }
 0x362   : > { %v8204_v33 = vpack.c.bf16 %v5898_v56, %v5897_v49 }
 0x363   : > { %v8199_v44 = vpack.c.bf16 %v5896_v48, %v5895_v45 }
 0x364   : > { %8268 = vst [vmem:[%s10920_s12 + $0x1f8] sm:$0xff] %v8204_v33  }
 0x365   : > { %8267 = vst [vmem:[%s10920_s12 + $0x1f0] sm:$0xff] %v8199_v44  }
 0x366   : > { %s12022_s23 = smov (!%p6548_p4, %s6547_s23), 128 }
 0x367   : > { %s7737_s27 = sshll.u32 %s12022_s23, 6 }
 0x368   : > { %p7740_p6 = scmp.eq.s32.totalorder %s7737_s27, 0 }
 0x369   : > { %s11391_s20 = sshrl.u32 (!%p7740_p6), %s12022_s23, 6 }
 0x36a   : > { %6556 = sbr.rel (%p7740_p6) target bundleno = 961 (0x3c1), region = 102  ;;  %p7741_p5 = scmp.le.s32.totalorder (!%p7740_p6), %s11391_s20, 0 }
 0x371   : > { %7027 = sbr.rel (%p7741_p5) target bundleno = 940 (0x3ac), region = 215  ;;  %s12009_s15 = smov (!%p7741_p5), %s11385_s24 }
 0x372   : > { %s12010_s28 = smov (!%p7741_p5), %s10920_s12  ;;  %s11400_s29 = smov (!%p7741_p5), 0  }
 0x373   : > { %s11402_s30 = smov (!%p7741_p5), 0  }
 0x378 LB: >> { %v6572_v52 = vld [vmem:[%s9586_s28] sm:$0xf]  ;;  %v6574_v30 = vld [vmem:[%s9586_s28 + $0x4] sm:$0xf]  ;;  %v6576_v53 = vld [vmem:[%s9586_s28 + $0x8] sm:$0xf]  ;;  %s9594_s30 = sphi %s11402_s30, %s6566_s30   ;;  %s9590_s29 = sphi %s11400_s29, %s12011_s29   ;;  %s9586_s28 = sphi %s12010_s28, %s6705_s28   ;;  %s9582_s15 = sphi %s12009_s15, %s6706_s15  }
 0x379   : >> { %6573 = vst [vmem:[%s9582_s15] sm:$0xf] %v6572_v52  ;;  %6575 = vst [vmem:[%s9582_s15 + $0x4] sm:$0xf] %v6574_v30  ;;  %v6578_v58 = vld [vmem:[%s9586_s28 + $0xc] sm:$0xf]  ;;  %s6700_s4 = sadd.s32 1, %s9590_s29 }
 0x37a   : >> { %6577 = vst [vmem:[%s9582_s15 + $0x8] sm:$0xf] %v6576_v53  ;;  %v6580_v31 = vld [vmem:[%s9586_s28 + $0x10] sm:$0xf]  ;;  %v6582_v36 = vld [vmem:[%s9586_s28 + $0x14] sm:$0xf]  ;;  %p6701_p7 = scmp.ge.s32.totalorder %s6700_s4, %s11391_s20 }
 0x37b   : >> { %6579 = vst [vmem:[%s9582_s15 + $0xc] sm:$0xf] %v6578_v58  ;;  %6581 = vst [vmem:[%s9582_s15 + $0x10] sm:$0xf] %v6580_v31  ;;  %v6584_v34 = vld [vmem:[%s9586_s28 + $0x18] sm:$0xf] }
 0x37c   : >> { %6583 = vst [vmem:[%s9582_s15 + $0x14] sm:$0xf] %v6582_v36  ;;  %v6586_v35 = vld [vmem:[%s9586_s28 + $0x1c] sm:$0xf]  ;;  %v6588_v38 = vld [vmem:[%s9586_s28 + $0x20] sm:$0xf] }
 0x37d   : >> { %6585 = vst [vmem:[%s9582_s15 + $0x18] sm:$0xf] %v6584_v34  ;;  %6587 = vst [vmem:[%s9582_s15 + $0x1c] sm:$0xf] %v6586_v35  ;;  %v6590_v54 = vld [vmem:[%s9586_s28 + $0x24] sm:$0xf] }
 0x37e   : >> { %6589 = vst [vmem:[%s9582_s15 + $0x20] sm:$0xf] %v6588_v38  ;;  %v6592_v39 = vld [vmem:[%s9586_s28 + $0x28] sm:$0xf]  ;;  %v6594_v59 = vld [vmem:[%s9586_s28 + $0x2c] sm:$0xf] }
 0x37f   : >> { %6591 = vst [vmem:[%s9582_s15 + $0x24] sm:$0xf] %v6590_v54  ;;  %6593 = vst [vmem:[%s9582_s15 + $0x28] sm:$0xf] %v6592_v39  ;;  %v6596_v0 = vld [vmem:[%s9586_s28 + $0x30] sm:$0xf] }
 0x380   : >> { %6595 = vst [vmem:[%s9582_s15 + $0x2c] sm:$0xf] %v6594_v59  ;;  %v6598_v16 = vld [vmem:[%s9586_s28 + $0x34] sm:$0xf]  ;;  %v6600_v17 = vld [vmem:[%s9586_s28 + $0x38] sm:$0xf] }
 0x381   : >> { %6597 = vst [vmem:[%s9582_s15 + $0x30] sm:$0xf] %v6596_v0  ;;  %6599 = vst [vmem:[%s9582_s15 + $0x34] sm:$0xf] %v6598_v16  ;;  %v6602_v37 = vld [vmem:[%s9586_s28 + $0x3c] sm:$0xf] }
 0x382   : >> { %6601 = vst [vmem:[%s9582_s15 + $0x38] sm:$0xf] %v6600_v17  ;;  %v6604_v6 = vld [vmem:[%s9586_s28 + $0x40] sm:$0xf]  ;;  %v6606_v7 = vld [vmem:[%s9586_s28 + $0x44] sm:$0xf] }
 0x383   : >> { %6603 = vst [vmem:[%s9582_s15 + $0x3c] sm:$0xf] %v6602_v37  ;;  %6605 = vst [vmem:[%s9582_s15 + $0x40] sm:$0xf] %v6604_v6  ;;  %v6608_v60 = vld [vmem:[%s9586_s28 + $0x48] sm:$0xf] }
 0x384   : >> { %6607 = vst [vmem:[%s9582_s15 + $0x44] sm:$0xf] %v6606_v7  ;;  %v6610_v61 = vld [vmem:[%s9586_s28 + $0x4c] sm:$0xf]  ;;  %v6612_v18 = vld [vmem:[%s9586_s28 + $0x50] sm:$0xf] }
 0x385   : >> { %6609 = vst [vmem:[%s9582_s15 + $0x48] sm:$0xf] %v6608_v60  ;;  %6611 = vst [vmem:[%s9582_s15 + $0x4c] sm:$0xf] %v6610_v61  ;;  %v6614_v63 = vld [vmem:[%s9586_s28 + $0x54] sm:$0xf] }
 0x386   : >> { %6613 = vst [vmem:[%s9582_s15 + $0x50] sm:$0xf] %v6612_v18  ;;  %v6616_v19 = vld [vmem:[%s9586_s28 + $0x58] sm:$0xf]  ;;  %v6618_v62 = vld [vmem:[%s9586_s28 + $0x5c] sm:$0xf] }
 0x387   : >> { %6615 = vst [vmem:[%s9582_s15 + $0x54] sm:$0xf] %v6614_v63  ;;  %6617 = vst [vmem:[%s9582_s15 + $0x58] sm:$0xf] %v6616_v19  ;;  %v6620_v22 = vld [vmem:[%s9586_s28 + $0x60] sm:$0xf] }
 0x388   : >> { %6619 = vst [vmem:[%s9582_s15 + $0x5c] sm:$0xf] %v6618_v62  ;;  %v6622_v23 = vld [vmem:[%s9586_s28 + $0x64] sm:$0xf]  ;;  %v6624_v26 = vld [vmem:[%s9586_s28 + $0x68] sm:$0xf] }
 0x389   : >> { %6621 = vst [vmem:[%s9582_s15 + $0x60] sm:$0xf] %v6620_v22  ;;  %6623 = vst [vmem:[%s9582_s15 + $0x64] sm:$0xf] %v6622_v23  ;;  %v6626_v27 = vld [vmem:[%s9586_s28 + $0x6c] sm:$0xf] }
 0x38a   : >> { %6625 = vst [vmem:[%s9582_s15 + $0x68] sm:$0xf] %v6624_v26  ;;  %v6628_v2 = vld [vmem:[%s9586_s28 + $0x70] sm:$0xf]  ;;  %v6630_v8 = vld [vmem:[%s9586_s28 + $0x74] sm:$0xf] }
 0x38b   : >> { %6627 = vst [vmem:[%s9582_s15 + $0x6c] sm:$0xf] %v6626_v27  ;;  %6629 = vst [vmem:[%s9582_s15 + $0x70] sm:$0xf] %v6628_v2  ;;  %v6632_v40 = vld [vmem:[%s9586_s28 + $0x78] sm:$0xf] }
 0x38c   : >> { %6631 = vst [vmem:[%s9582_s15 + $0x74] sm:$0xf] %v6630_v8  ;;  %v6634_v41 = vld [vmem:[%s9586_s28 + $0x7c] sm:$0xf]  ;;  %v6636_v9 = vld [vmem:[%s9586_s28 + $0x80] sm:$0xf] }
 0x38d   : >> { %6633 = vst [vmem:[%s9582_s15 + $0x78] sm:$0xf] %v6632_v40  ;;  %6635 = vst [vmem:[%s9582_s15 + $0x7c] sm:$0xf] %v6634_v41  ;;  %v6638_v3 = vld [vmem:[%s9586_s28 + $0x84] sm:$0xf] }
 0x38e   : >> { %6637 = vst [vmem:[%s9582_s15 + $0x80] sm:$0xf] %v6636_v9  ;;  %v6640_v10 = vld [vmem:[%s9586_s28 + $0x88] sm:$0xf]  ;;  %v6642_v11 = vld [vmem:[%s9586_s28 + $0x8c] sm:$0xf] }
 0x38f   : >> { %6639 = vst [vmem:[%s9582_s15 + $0x84] sm:$0xf] %v6638_v3  ;;  %6641 = vst [vmem:[%s9582_s15 + $0x88] sm:$0xf] %v6640_v10  ;;  %v6644_v55 = vld [vmem:[%s9586_s28 + $0x90] sm:$0xf] }
 0x390   : >> { %6643 = vst [vmem:[%s9582_s15 + $0x8c] sm:$0xf] %v6642_v11  ;;  %v6646_v14 = vld [vmem:[%s9586_s28 + $0x94] sm:$0xf]  ;;  %v6648_v15 = vld [vmem:[%s9586_s28 + $0x98] sm:$0xf] }
 0x391   : >> { %6645 = vst [vmem:[%s9582_s15 + $0x90] sm:$0xf] %v6644_v55  ;;  %6647 = vst [vmem:[%s9582_s15 + $0x94] sm:$0xf] %v6646_v14  ;;  %v6650_v42 = vld [vmem:[%s9586_s28 + $0x9c] sm:$0xf] }
 0x392   : >> { %6649 = vst [vmem:[%s9582_s15 + $0x98] sm:$0xf] %v6648_v15  ;;  %v6652_v43 = vld [vmem:[%s9586_s28 + $0xa0] sm:$0xf]  ;;  %v6654_v46 = vld [vmem:[%s9586_s28 + $0xa4] sm:$0xf] }
 0x393   : >> { %6651 = vst [vmem:[%s9582_s15 + $0x9c] sm:$0xf] %v6650_v42  ;;  %6653 = vst [vmem:[%s9582_s15 + $0xa0] sm:$0xf] %v6652_v43  ;;  %v6656_v47 = vld [vmem:[%s9586_s28 + $0xa8] sm:$0xf] }
 0x394   : >> { %6655 = vst [vmem:[%s9582_s15 + $0xa4] sm:$0xf] %v6654_v46  ;;  %v6658_v20 = vld [vmem:[%s9586_s28 + $0xac] sm:$0xf]  ;;  %v6660_v21 = vld [vmem:[%s9586_s28 + $0xb0] sm:$0xf] }
 0x395   : >> { %6657 = vst [vmem:[%s9582_s15 + $0xa8] sm:$0xf] %v6656_v47  ;;  %6659 = vst [vmem:[%s9582_s15 + $0xac] sm:$0xf] %v6658_v20  ;;  %v6662_v25 = vld [vmem:[%s9586_s28 + $0xb4] sm:$0xf] }
 0x396   : >> { %6661 = vst [vmem:[%s9582_s15 + $0xb0] sm:$0xf] %v6660_v21  ;;  %v6664_v50 = vld [vmem:[%s9586_s28 + $0xb8] sm:$0xf]  ;;  %v6666_v5 = vld [vmem:[%s9586_s28 + $0xbc] sm:$0xf] }
 0x397   : >> { %6663 = vst [vmem:[%s9582_s15 + $0xb4] sm:$0xf] %v6662_v25  ;;  %6665 = vst [vmem:[%s9582_s15 + $0xb8] sm:$0xf] %v6664_v50  ;;  %v6668_v51 = vld [vmem:[%s9586_s28 + $0xc0] sm:$0xf] }
 0x398   : >> { %6667 = vst [vmem:[%s9582_s15 + $0xbc] sm:$0xf] %v6666_v5  ;;  %v6670_v4 = vld [vmem:[%s9586_s28 + $0xc4] sm:$0xf]  ;;  %v6672_v32 = vld [vmem:[%s9586_s28 + $0xc8] sm:$0xf] }
 0x399   : >> { %6669 = vst [vmem:[%s9582_s15 + $0xc0] sm:$0xf] %v6668_v51  ;;  %6671 = vst [vmem:[%s9582_s15 + $0xc4] sm:$0xf] %v6670_v4  ;;  %v6674_v13 = vld [vmem:[%s9586_s28 + $0xcc] sm:$0xf] }
 0x39a   : >> { %6673 = vst [vmem:[%s9582_s15 + $0xc8] sm:$0xf] %v6672_v32  ;;  %v6676_v1 = vld [vmem:[%s9586_s28 + $0xd0] sm:$0xf]  ;;  %v6678_v12 = vld [vmem:[%s9586_s28 + $0xd4] sm:$0xf] }
 0x39b   : >> { %6675 = vst [vmem:[%s9582_s15 + $0xcc] sm:$0xf] %v6674_v13  ;;  %6677 = vst [vmem:[%s9582_s15 + $0xd0] sm:$0xf] %v6676_v1  ;;  %v6680_v24 = vld [vmem:[%s9586_s28 + $0xd8] sm:$0xf] }
 0x39c   : >> { %6679 = vst [vmem:[%s9582_s15 + $0xd4] sm:$0xf] %v6678_v12  ;;  %v6682_v57 = vld [vmem:[%s9586_s28 + $0xdc] sm:$0xf]  ;;  %v6684_v28 = vld [vmem:[%s9586_s28 + $0xe0] sm:$0xf] }
 0x39d   : >> { %6681 = vst [vmem:[%s9582_s15 + $0xd8] sm:$0xf] %v6680_v24  ;;  %6683 = vst [vmem:[%s9582_s15 + $0xdc] sm:$0xf] %v6682_v57  ;;  %v6686_v29 = vld [vmem:[%s9586_s28 + $0xe4] sm:$0xf] }
 0x39e   : >> { %6685 = vst [vmem:[%s9582_s15 + $0xe0] sm:$0xf] %v6684_v28  ;;  %v6688_v49 = vld [vmem:[%s9586_s28 + $0xe8] sm:$0xf]  ;;  %v6690_v56 = vld [vmem:[%s9586_s28 + $0xec] sm:$0xf] }
 0x39f   : >> { %6687 = vst [vmem:[%s9582_s15 + $0xe4] sm:$0xf] %v6686_v29  ;;  %6689 = vst [vmem:[%s9582_s15 + $0xe8] sm:$0xf] %v6688_v49  ;;  %v6692_v45 = vld [vmem:[%s9586_s28 + $0xf0] sm:$0xf] }
 0x3a0   : >> { %6691 = vst [vmem:[%s9582_s15 + $0xec] sm:$0xf] %v6690_v56  ;;  %v6694_v48 = vld [vmem:[%s9586_s28 + $0xf4] sm:$0xf]  ;;  %v6696_v33 = vld [vmem:[%s9586_s28 + $0xf8] sm:$0xf] }
 0x3a1   : >> { %6693 = vst [vmem:[%s9582_s15 + $0xf0] sm:$0xf] %v6692_v45  ;;  %6695 = vst [vmem:[%s9582_s15 + $0xf4] sm:$0xf] %v6694_v48  ;;  %v6698_v44 = vld [vmem:[%s9586_s28 + $0xfc] sm:$0xf] }
 0x3a2   : >> { %6697 = vst [vmem:[%s9582_s15 + $0xf8] sm:$0xf] %v6696_v33  ;;  %6699 = vst [vmem:[%s9582_s15 + $0xfc] sm:$0xf] %v6698_v44  ;;  %s12024_s4 = smov (%p6701_p7, %s6700_s4), 0  ;;  %s6566_s30 = sadd.s32 1, %s9594_s30  }
 0x3a3   : >> { %s7742_s5 = sshll.u32 %s12024_s4, 8  ;;  %p6565_p8 = scmp.ge.s32.totalorder %s6566_s30, %s11391_s20 }
 0x3a4   : >> { %s6705_s28 = scalar_lea.vmem %s10920_s12, %s7742_s5 [#allocation3]   ;;  %s6706_s15 = scalar_lea.vmem %s11385_s24, %s7742_s5  }
 0x3a5   : >> { %s12011_s29 = smov %s12024_s4  ;;  %6568 = sbr.rel (!%p6565_p8) target bundleno = 888 (0x378), region = 221 }
 0x3ac PF: > { %s11559_s14 = sand.u32 63, %s12022_s23   ;;  %s7884_s6 = sshll.u32 %s11391_s20, 8 }
 0x3ad   : > { %s6711_s7 = scalar_lea.vmem %s10920_s12, %s7884_s6 [#allocation3]   ;;  %s6713_s8 = scalar_lea.vmem %s11385_s24, %s7884_s6  }
 0x3ae   : > { %p7747_p9 = scmp.le.s32.totalorder %s11559_s14, 0 }
 0x3af   : > { %s9596_s9 = smov (!%p7747_p9), %s6713_s8   ;;  %s9600_s10 = smov (!%p7747_p9), %s6711_s7  }
 0x3b0   : > { %7041 = sbr.rel (%p7747_p9) target bundleno = 961 (0x3c1), region = 226  ;;  %s9604_s11 = smov (!%p7747_p9), 0  }
 0x3b1   : > { %s9608_s17 = smov (!%p7747_p9), 0  }
 0x3b7 LB: >> { %v6723_v52 = vld [vmem:[%s9602_s10] sm:$0xf]  ;;  %s6725_s18 = sadd.s32 1, %s9606_s11  ;;  %s6717_s17 = sadd.s32 1, %s9610_s17   ;;  %s9610_s17 = sphi %s9608_s17, %s6717_s17   ;;  %s9606_s11 = sphi %s9604_s11, %s9605_s11   ;;  %s9602_s10 = sphi %s9600_s10, %s6730_s10   ;;  %s9598_s9 = sphi %s9596_s9, %s6731_s9  }
 0x3b8   : >> { %6724 = vst [vmem:[%s9598_s9] sm:$0xf] %v6723_v52  ;;  %p6726_p10 = scmp.ge.s32.totalorder %s6725_s18, %s11559_s14  ;;  %p6716_p11 = scmp.ge.s32.totalorder %s6717_s17, %s11559_s14 }
 0x3ba   : >> { %s12026_s18 = smov (%p6726_p10, %s6725_s18), 0  ;;  %6719 = sbr.rel (!%p6716_p11) target bundleno = 951 (0x3b7), region = 232 }
 0x3bb   : >> { %s7748_s12 = sshll.u32 %s12026_s18, 2  ;;  %s9605_s11 = smov %s12026_s18  }
 0x3bc   : >> { %s6730_s10 = scalar_lea.vmem %s6711_s7, %s7748_s12 [#allocation3]   ;;  %s6731_s9 = scalar_lea.vmem %s6713_s8, %s7748_s12  }
 0x3c1 PF: > { %p10_p12 = scmp.ge.s32.totalorder %s9652_s16, 4   ;;  %s12012_s12 = smov %s9542_s13 }
 0x3c2   : > { %s12013_s13 = smov %s9662_s19  ;;  %s12014_s14 = smov %s9652_s16 }
 0x3c3   :  { %12 = sbr.rel (!%p10_p12) target bundleno = 2 (0x2), region = 243 }

// kernel: mcadnnet_forward.5
= control target key start
LH: loop header
LB: loop body
LE: loop exit
PB: predicated region body
PF: predicated region fallthrough
CT: control target
= control target key end

     0   :  { %v3112_v0 = vmov 0   ;;  %s4120_s1 = inlined_call_operand.vmem [shape: bf16[256,128], index: 1, kind: input, shape index: {}]   ;;  %s4121_s0 = inlined_call_operand.vmem [shape: bf16[4,352,256], index: 0, kind: input, shape index: {}]   ;;  %s4122_s2 = inlined_call_operand.vmem [shape: f32[1,128], index: 2, kind: input, shape index: {}]   ;;  %s4123_s3 = inlined_call_operand.vmem [shape: bf16[352,128], index: 3, kind: output, shape index: {}]  }
   0x1   :  { %1199 = vmatprep.subr.bf16.mxu0 %v3112_v0  ;;  %2799 = vmatprep.subr.bf16.mxu1 %v3112_v0  ;;  %v2832_v1 = vld [vmem:[%s4120_s1] sm:$0xff]   ;;  %v2833_v2 = vld [vmem:[%s4120_s1 + $0x8] sm:$0xff]   ;;  %v2834_v3 = vld [vmem:[%s4120_s1 + $0x10] sm:$0xff]  }
   0x2   :  { %1200 = vmatpush1.bf16.msra.mxu0 %v2832_v1  ;;  %2815 = vmatpush1.bf16.msra.mxu1 %v2832_v1  ;;  %v2835_v4 = vld [vmem:[%s4120_s1 + $0x18] sm:$0xff]   ;;  %v2836_v5 = vld [vmem:[%s4120_s1 + $0x20] sm:$0xff]   ;;  %v2837_v7 = vld [vmem:[%s4120_s1 + $0x28] sm:$0xff]  }
   0x3   :  { %1201 = vmatprep.subr.bf16.mxu0 %v3112_v0  ;;  %2800 = vmatprep.subr.bf16.mxu1 %v3112_v0  ;;  %v2850_v6 = vld [vmem:[%s4121_s0 + $0x4] ss:$8 sps:$4 sm:$0xff]   ;;  %v2838_v9 = vld [vmem:[%s4120_s1 + $0x30] sm:$0xff]   ;;  %v2839_v10 = vld [vmem:[%s4120_s1 + $0x38] sm:$0xff]  }
   0x4   :  { %v2853_v8 = vld [vmem:[%s4121_s0 + $0x2c4] ss:$8 sps:$4 sm:$0xff]   ;;  %1231 = vmatprep.mubr.bf16.mxu0 %v2850_v6  ;;  %v2842_v13 = vld [vmem:[%s4120_s1 + $0x50] sm:$0xff]   ;;  %v2843_v14 = vld [vmem:[%s4120_s1 + $0x58] sm:$0xff]  }
   0x5   :  { %1583 = vmatprep.mubr.bf16.mxu1 %v2853_v8  ;;  %v2840_v11 = vld [vmem:[%s4120_s1 + $0x40] sm:$0xff]   ;;  %v2841_v12 = vld [vmem:[%s4120_s1 + $0x48] sm:$0xff]   ;;  %v2846_v17 = vld [vmem:[%s4120_s1 + $0x70] sm:$0xff]  }
   0x6   :  { %1202 = vmatpush1.bf16.msra.mxu0 %v2833_v2  ;;  %2816 = vmatpush1.bf16.msra.mxu1 %v2833_v2  ;;  %v2844_v15 = vld [vmem:[%s4120_s1 + $0x60] sm:$0xff]   ;;  %v2845_v16 = vld [vmem:[%s4120_s1 + $0x68] sm:$0xff]   ;;  %v2847_v18 = vld [vmem:[%s4120_s1 + $0x78] sm:$0xff]  }
   0x7   :  { %1203 = vmatprep.subr.bf16.mxu0 %v3112_v0  ;;  %2801 = vmatprep.subr.bf16.mxu1 %v3112_v0  ;;  %v2848_v19 = vld [vmem:[%s4121_s0] ss:$8 sps:$4 sm:$0xff]   ;;  %v2854_v21 = vld [vmem:[%s4121_s0 + $0x14] ss:$8 sps:$4 sm:$0xff]   ;;  %v2858_v23 = vld [vmem:[%s4121_s0 + $0x10] ss:$8 sps:$4 sm:$0xff]  }
   0x8   :  { %v2851_v20 = vld [vmem:[%s4121_s0 + $0x2c0] ss:$8 sps:$4 sm:$0xff]   ;;  %v2856_v22 = vld [vmem:[%s4121_s0 + $0x2d4] ss:$8 sps:$4 sm:$0xff]   ;;  %v2859_v24 = vld [vmem:[%s4121_s0 + $0x2d0] ss:$8 sps:$4 sm:$0xff]  }
   0x9   :  { %v2860_v25 = vld [vmem:[%s4121_s0 + $0x24] ss:$8 sps:$4 sm:$0xff]   ;;  %v2864_v27 = vld [vmem:[%s4121_s0 + $0x20] ss:$8 sps:$4 sm:$0xff]   ;;  %v2866_v29 = vld [vmem:[%s4121_s0 + $0x34] ss:$8 sps:$4 sm:$0xff]  }
   0xa   :  { %1204 = vmatpush1.bf16.msra.mxu0 %v2834_v3  ;;  %2817 = vmatpush1.bf16.msra.mxu1 %v2834_v3  ;;  %v2862_v26 = vld [vmem:[%s4121_s0 + $0x2e4] ss:$8 sps:$4 sm:$0xff]   ;;  %v2865_v28 = vld [vmem:[%s4121_s0 + $0x2e0] ss:$8 sps:$4 sm:$0xff]   ;;  %v2868_v30 = vld [vmem:[%s4121_s0 + $0x2f4] ss:$8 sps:$4 sm:$0xff]  }
   0xb   :  { %1205 = vmatprep.subr.bf16.mxu0 %v3112_v0  ;;  %2802 = vmatprep.subr.bf16.mxu1 %v3112_v0  ;;  %v2870_v31 = vld [vmem:[%s4121_s0 + $0x30] ss:$8 sps:$4 sm:$0xff]   ;;  %v2872_v33 = vld [vmem:[%s4121_s0 + $0x44] ss:$8 sps:$4 sm:$0xff]   ;;  %v2876_v35 = vld [vmem:[%s4121_s0 + $0x40] ss:$8 sps:$4 sm:$0xff]  }
   0xc   :  { %v2871_v32 = vld [vmem:[%s4121_s0 + $0x2f0] ss:$8 sps:$4 sm:$0xff]   ;;  %v2874_v34 = vld [vmem:[%s4121_s0 + $0x304] ss:$8 sps:$4 sm:$0xff]   ;;  %v2877_v36 = vld [vmem:[%s4121_s0 + $0x300] ss:$8 sps:$4 sm:$0xff]  }
   0xd   :  { %v2878_v37 = vld [vmem:[%s4121_s0 + $0x54] ss:$8 sps:$4 sm:$0xff]   ;;  %v2882_v39 = vld [vmem:[%s4121_s0 + $0x50] ss:$8 sps:$4 sm:$0xff]   ;;  %v2884_v41 = vld [vmem:[%s4121_s0 + $0x64] ss:$8 sps:$4 sm:$0xff]  }
   0xe   :  { %1206 = vmatpush1.bf16.msra.mxu0 %v2835_v4  ;;  %2818 = vmatpush1.bf16.msra.mxu1 %v2835_v4  ;;  %v2880_v38 = vld [vmem:[%s4121_s0 + $0x314] ss:$8 sps:$4 sm:$0xff]   ;;  %v2883_v40 = vld [vmem:[%s4121_s0 + $0x310] ss:$8 sps:$4 sm:$0xff]   ;;  %v2886_v42 = vld [vmem:[%s4121_s0 + $0x324] ss:$8 sps:$4 sm:$0xff]  }
   0xf   :  { %1207 = vmatprep.subr.bf16.mxu0 %v3112_v0  ;;  %2803 = vmatprep.subr.bf16.mxu1 %v3112_v0  ;;  %v2888_v43 = vld [vmem:[%s4121_s0 + $0x60] ss:$8 sps:$4 sm:$0xff]   ;;  %v2890_v45 = vld [vmem:[%s4121_s0 + $0x74] ss:$8 sps:$4 sm:$0xff]   ;;  %v2894_v47 = vld [vmem:[%s4121_s0 + $0x70] ss:$8 sps:$4 sm:$0xff]  }
  0x10   :  { %v2889_v44 = vld [vmem:[%s4121_s0 + $0x320] ss:$8 sps:$4 sm:$0xff]   ;;  %v2892_v46 = vld [vmem:[%s4121_s0 + $0x334] ss:$8 sps:$4 sm:$0xff]   ;;  %v2895_v48 = vld [vmem:[%s4121_s0 + $0x330] ss:$8 sps:$4 sm:$0xff]  }
  0x11   :  { %v2896_v49 = vld [vmem:[%s4121_s0 + $0x84] ss:$8 sps:$4 sm:$0xff]   ;;  %v2900_v51 = vld [vmem:[%s4121_s0 + $0x80] ss:$8 sps:$4 sm:$0xff]   ;;  %v2902_v53 = vld [vmem:[%s4121_s0 + $0x94] ss:$8 sps:$4 sm:$0xff]  }
  0x12   :  { %1208 = vmatpush1.bf16.msra.mxu0 %v2836_v5  ;;  %2819 = vmatpush1.bf16.msra.mxu1 %v2836_v5  ;;  %v2898_v50 = vld [vmem:[%s4121_s0 + $0x344] ss:$8 sps:$4 sm:$0xff]   ;;  %v2901_v52 = vld [vmem:[%s4121_s0 + $0x340] ss:$8 sps:$4 sm:$0xff]   ;;  %v2904_v54 = vld [vmem:[%s4121_s0 + $0x354] ss:$8 sps:$4 sm:$0xff]  }
  0x13   :  { %1209 = vmatprep.subr.bf16.mxu0 %v3112_v0  ;;  %2804 = vmatprep.subr.bf16.mxu1 %v3112_v0  ;;  %v2906_v55 = vld [vmem:[%s4121_s0 + $0x90] ss:$8 sps:$4 sm:$0xff]   ;;  %v2908_v57 = vld [vmem:[%s4121_s0 + $0xa4] ss:$8 sps:$4 sm:$0xff]   ;;  %v2912_v59 = vld [vmem:[%s4121_s0 + $0xa0] ss:$8 sps:$4 sm:$0xff]  }
  0x14   :  { %v2907_v56 = vld [vmem:[%s4121_s0 + $0x350] ss:$8 sps:$4 sm:$0xff]   ;;  %v2910_v58 = vld [vmem:[%s4121_s0 + $0x364] ss:$8 sps:$4 sm:$0xff]   ;;  %v2913_v60 = vld [vmem:[%s4121_s0 + $0x360] ss:$8 sps:$4 sm:$0xff]  }
  0x15   :  { %v2914_v61 = vld [vmem:[%s4121_s0 + $0xb4] ss:$8 sps:$4 sm:$0xff]   ;;  %v2918_v63 = vld [vmem:[%s4121_s0 + $0xb0] ss:$8 sps:$4 sm:$0xff]   ;;  %v2920_v1 = vld [vmem:[%s4121_s0 + $0xc4] ss:$8 sps:$4 sm:$0xff]  }
  0x16   :  { %1210 = vmatpush1.bf16.msra.mxu0 %v2837_v7  ;;  %2820 = vmatpush1.bf16.msra.mxu1 %v2837_v7  ;;  %v2916_v62 = vld [vmem:[%s4121_s0 + $0x374] ss:$8 sps:$4 sm:$0xff]   ;;  %v2922_v2 = vld [vmem:[%s4121_s0 + $0x384] ss:$8 sps:$4 sm:$0xff]   ;;  %v2924_v3 = vld [vmem:[%s4121_s0 + $0xc0] ss:$8 sps:$4 sm:$0xff]  }
  0x17   :  { %1211 = vmatprep.subr.bf16.mxu0 %v3112_v0  ;;  %2805 = vmatprep.subr.bf16.mxu1 %v3112_v0  ;;  %v2925_v4 = vld [vmem:[%s4121_s0 + $0x380] ss:$8 sps:$4 sm:$0xff]   ;;  %v2926_v5 = vld [vmem:[%s4121_s0 + $0xd4] ss:$8 sps:$4 sm:$0xff]   ;;  %v2930_v7 = vld [vmem:[%s4121_s0 + $0xd0] ss:$8 sps:$4 sm:$0xff]  }
  0x18   :  { %v2928_v6 = vld [vmem:[%s4121_s0 + $0x394] ss:$8 sps:$4 sm:$0xff]   ;;  %v2931_v8 = vld [vmem:[%s4121_s0 + $0x390] ss:$8 sps:$4 sm:$0xff]  }
  0x1a   :  { %1212 = vmatpush1.bf16.msra.mxu0 %v2838_v9  ;;  %2821 = vmatpush1.bf16.msra.mxu1 %v2838_v9  ;;  %v2932_v9 = vld [vmem:[%s4121_s0 + $0xe4] ss:$8 sps:$4 sm:$0xff]  }
  0x1b   :  { %1213 = vmatprep.subr.bf16.mxu0 %v3112_v0  ;;  %2806 = vmatprep.subr.bf16.mxu1 %v3112_v0 }
  0x1e   :  { %1214 = vmatpush1.bf16.msra.mxu0 %v2839_v10  ;;  %2822 = vmatpush1.bf16.msra.mxu1 %v2839_v10  ;;  %v2934_v10 = vld [vmem:[%s4121_s0 + $0x3a4] ss:$8 sps:$4 sm:$0xff]  }
  0x1f   :  { %1215 = vmatprep.subr.bf16.mxu0 %v3112_v0  ;;  %2807 = vmatprep.subr.bf16.mxu1 %v3112_v0 }
  0x22   :  { %1216 = vmatpush1.bf16.msra.mxu0 %v2840_v11  ;;  %2823 = vmatpush1.bf16.msra.mxu1 %v2840_v11  ;;  %v2936_v11 = vld [vmem:[%s4121_s0 + $0xe0] ss:$8 sps:$4 sm:$0xff]  }
  0x23   :  { %1217 = vmatprep.subr.bf16.mxu0 %v3112_v0  ;;  %2808 = vmatprep.subr.bf16.mxu1 %v3112_v0 }
  0x26   :  { %1218 = vmatpush1.bf16.msra.mxu0 %v2841_v12  ;;  %2824 = vmatpush1.bf16.msra.mxu1 %v2841_v12  ;;  %v2937_v12 = vld [vmem:[%s4121_s0 + $0x3a0] ss:$8 sps:$4 sm:$0xff]  }
  0x27   :  { %1219 = vmatprep.subr.bf16.mxu0 %v3112_v0  ;;  %2809 = vmatprep.subr.bf16.mxu1 %v3112_v0 }
  0x2a   :  { %1220 = vmatpush1.bf16.msra.mxu0 %v2842_v13  ;;  %2825 = vmatpush1.bf16.msra.mxu1 %v2842_v13  ;;  %v2938_v13 = vld [vmem:[%s4121_s0 + $0xf4] ss:$8 sps:$4 sm:$0xff]  }
  0x2b   :  { %1221 = vmatprep.subr.bf16.mxu0 %v3112_v0  ;;  %2810 = vmatprep.subr.bf16.mxu1 %v3112_v0 }
  0x2e   :  { %1222 = vmatpush1.bf16.msra.mxu0 %v2843_v14  ;;  %2826 = vmatpush1.bf16.msra.mxu1 %v2843_v14  ;;  %v2940_v14 = vld [vmem:[%s4121_s0 + $0x3b4] ss:$8 sps:$4 sm:$0xff]  }
  0x2f   :  { %1223 = vmatprep.subr.bf16.mxu0 %v3112_v0  ;;  %2811 = vmatprep.subr.bf16.mxu1 %v3112_v0 }
  0x32   :  { %1224 = vmatpush1.bf16.msra.mxu0 %v2844_v15  ;;  %2827 = vmatpush1.bf16.msra.mxu1 %v2844_v15  ;;  %v2942_v15 = vld [vmem:[%s4121_s0 + $0xf0] ss:$8 sps:$4 sm:$0xff]  }
  0x33   :  { %1225 = vmatprep.subr.bf16.mxu0 %v3112_v0  ;;  %2812 = vmatprep.subr.bf16.mxu1 %v3112_v0 }
  0x36   :  { %1226 = vmatpush1.bf16.msra.mxu0 %v2845_v16  ;;  %2828 = vmatpush1.bf16.msra.mxu1 %v2845_v16  ;;  %v2943_v16 = vld [vmem:[%s4121_s0 + $0x3b0] ss:$8 sps:$4 sm:$0xff]  }
  0x37   :  { %1227 = vmatprep.subr.bf16.mxu0 %v3112_v0  ;;  %2813 = vmatprep.subr.bf16.mxu1 %v3112_v0 }
  0x3a   :  { %1228 = vmatpush1.bf16.msra.mxu0 %v2846_v17  ;;  %2829 = vmatpush1.bf16.msra.mxu1 %v2846_v17  ;;  %v2944_v17 = vld [vmem:[%s4121_s0 + $0x104] ss:$8 sps:$4 sm:$0xff]  }
  0x3b   :  { %1229 = vmatprep.subr.bf16.mxu0 %v3112_v0  ;;  %2814 = vmatprep.subr.bf16.mxu1 %v3112_v0  ;;  %v2919_v0 = vld [vmem:[%s4121_s0 + $0x370] ss:$8 sps:$4 sm:$0xff]  }
  0x3e   :  { %1230 = vmatpush1.bf16.msra.mxu0 %v2847_v18  ;;  %2830 = vmatpush1.bf16.msra.mxu1 %v2847_v18  ;;  %v2946_v18 = vld [vmem:[%s4121_s0 + $0x3c4] ss:$8 sps:$4 sm:$0xff]  }
  0x41   :  { %1232 = vmatmul.mubr.bf16.vlgmr.msra.gmra.mrb[0].mxu0 %v2848_v19  ;;  %1584 = vmatmul.mubr.bf16.vlgmr.msra.gmra.mrb[0].mxu1 %v2851_v20  ;;  %v2948_v19 = vld [vmem:[%s4121_s0 + $0x100] ss:$8 sps:$4 sm:$0xff]  }
  0x42   :  { %1239 = vmatprep.mubr.bf16.mxu0 %v2854_v21  ;;  %1591 = vmatprep.mubr.bf16.mxu1 %v2856_v22  ;;  %v2949_v20 = vld [vmem:[%s4121_s0 + $0x3c0] ss:$8 sps:$4 sm:$0xff]   ;;  %v2950_v21 = vld [vmem:[%s4121_s0 + $0x114] ss:$8 sps:$4 sm:$0xff]  }
  0x43   :  { %v2952_v22 = vld [vmem:[%s4121_s0 + $0x3d4] ss:$8 sps:$4 sm:$0xff]  }
  0x49   :  { %1240 = vmatmul.mubr.bf16.gmra.mrb[4].mxu0 %v2858_v23  ;;  %1592 = vmatmul.mubr.bf16.gmra.mrb[4].mxu1 %v2859_v24  ;;  %v2954_v23 = vld [vmem:[%s4121_s0 + $0x110] ss:$8 sps:$4 sm:$0xff]  }
  0x4a   :  { %1247 = vmatprep.mubr.bf16.mxu0 %v2860_v25  ;;  %1599 = vmatprep.mubr.bf16.mxu1 %v2862_v26  ;;  %v2955_v24 = vld [vmem:[%s4121_s0 + $0x3d0] ss:$8 sps:$4 sm:$0xff]   ;;  %v2956_v25 = vld [vmem:[%s4121_s0 + $0x124] ss:$8 sps:$4 sm:$0xff]  }
  0x4b   :  { %v2958_v26 = vld [vmem:[%s4121_s0 + $0x3e4] ss:$8 sps:$4 sm:$0xff]  }
  0x51   :  { %1248 = vmatmul.mubr.bf16.gmra.mrb[8].mxu0 %v2864_v27  ;;  %1600 = vmatmul.mubr.bf16.gmra.mrb[8].mxu1 %v2865_v28  ;;  %v2960_v27 = vld [vmem:[%s4121_s0 + $0x120] ss:$8 sps:$4 sm:$0xff]  }
  0x52   :  { %1255 = vmatprep.mubr.bf16.mxu0 %v2866_v29  ;;  %1607 = vmatprep.mubr.bf16.mxu1 %v2868_v30  ;;  %v2961_v28 = vld [vmem:[%s4121_s0 + $0x3e0] ss:$8 sps:$4 sm:$0xff]   ;;  %v2962_v29 = vld [vmem:[%s4121_s0 + $0x134] ss:$8 sps:$4 sm:$0xff]  }
  0x53   :  { %v2964_v30 = vld [vmem:[%s4121_s0 + $0x3f4] ss:$8 sps:$4 sm:$0xff]  }
  0x59   :  { %1256 = vmatmul.mubr.bf16.gmra.mrb[12].mxu0 %v2870_v31  ;;  %1608 = vmatmul.mubr.bf16.gmra.mrb[12].mxu1 %v2871_v32  ;;  %v2966_v31 = vld [vmem:[%s4121_s0 + $0x130] ss:$8 sps:$4 sm:$0xff]  }
  0x5a   :  { %1263 = vmatprep.mubr.bf16.mxu0 %v2872_v33  ;;  %1615 = vmatprep.mubr.bf16.mxu1 %v2874_v34  ;;  %v2967_v32 = vld [vmem:[%s4121_s0 + $0x3f0] ss:$8 sps:$4 sm:$0xff]   ;;  %v2968_v33 = vld [vmem:[%s4121_s0 + $0x144] ss:$8 sps:$4 sm:$0xff]  }
  0x5b   :  { %v2970_v34 = vld [vmem:[%s4121_s0 + $0x404] ss:$8 sps:$4 sm:$0xff]  }
  0x61   :  { %1264 = vmatmul.mubr.bf16.gmra.mrb[16].mxu0 %v2876_v35  ;;  %1616 = vmatmul.mubr.bf16.gmra.mrb[16].mxu1 %v2877_v36  ;;  %v2972_v35 = vld [vmem:[%s4121_s0 + $0x140] ss:$8 sps:$4 sm:$0xff]  }
  0x62   :  { %1271 = vmatprep.mubr.bf16.mxu0 %v2878_v37  ;;  %1623 = vmatprep.mubr.bf16.mxu1 %v2880_v38  ;;  %v2973_v36 = vld [vmem:[%s4121_s0 + $0x400] ss:$8 sps:$4 sm:$0xff]   ;;  %v2974_v37 = vld [vmem:[%s4121_s0 + $0x154] ss:$8 sps:$4 sm:$0xff]  }
  0x63   :  { %v2976_v38 = vld [vmem:[%s4121_s0 + $0x414] ss:$8 sps:$4 sm:$0xff]  }
  0x69   :  { %1272 = vmatmul.mubr.bf16.gmra.mrb[20].mxu0 %v2882_v39  ;;  %1624 = vmatmul.mubr.bf16.gmra.mrb[20].mxu1 %v2883_v40  ;;  %v2978_v39 = vld [vmem:[%s4121_s0 + $0x150] ss:$8 sps:$4 sm:$0xff]  }
  0x6a   :  { %1279 = vmatprep.mubr.bf16.mxu0 %v2884_v41  ;;  %1631 = vmatprep.mubr.bf16.mxu1 %v2886_v42  ;;  %v2979_v40 = vld [vmem:[%s4121_s0 + $0x410] ss:$8 sps:$4 sm:$0xff]   ;;  %v2980_v41 = vld [vmem:[%s4121_s0 + $0x164] ss:$8 sps:$4 sm:$0xff]  }
  0x6b   :  { %v2982_v42 = vld [vmem:[%s4121_s0 + $0x424] ss:$8 sps:$4 sm:$0xff]  }
  0x71   :  { %1280 = vmatmul.mubr.bf16.gmra.mrb[24].mxu0 %v2888_v43  ;;  %1632 = vmatmul.mubr.bf16.gmra.mrb[24].mxu1 %v2889_v44  ;;  %v2984_v43 = vld [vmem:[%s4121_s0 + $0x160] ss:$8 sps:$4 sm:$0xff]  }
  0x72   :  { %1287 = vmatprep.mubr.bf16.mxu0 %v2890_v45  ;;  %1639 = vmatprep.mubr.bf16.mxu1 %v2892_v46  ;;  %v2985_v44 = vld [vmem:[%s4121_s0 + $0x420] ss:$8 sps:$4 sm:$0xff]   ;;  %v2986_v45 = vld [vmem:[%s4121_s0 + $0x174] ss:$8 sps:$4 sm:$0xff]  }
  0x73   :  { %v2988_v46 = vld [vmem:[%s4121_s0 + $0x434] ss:$8 sps:$4 sm:$0xff]  }
  0x79   :  { %1288 = vmatmul.mubr.bf16.gmra.mrb[28].mxu0 %v2894_v47  ;;  %1640 = vmatmul.mubr.bf16.gmra.mrb[28].mxu1 %v2895_v48  ;;  %v2990_v47 = vld [vmem:[%s4121_s0 + $0x170] ss:$8 sps:$4 sm:$0xff]  }
  0x7a   :  { %1295 = vmatprep.mubr.bf16.mxu0 %v2896_v49  ;;  %1647 = vmatprep.mubr.bf16.mxu1 %v2898_v50  ;;  %v2991_v48 = vld [vmem:[%s4121_s0 + $0x430] ss:$8 sps:$4 sm:$0xff]   ;;  %v2992_v49 = vld [vmem:[%s4121_s0 + $0x184] ss:$8 sps:$4 sm:$0xff]  }
  0x7b   :  { %v2994_v50 = vld [vmem:[%s4121_s0 + $0x444] ss:$8 sps:$4 sm:$0xff]  }
  0x81   :  { %1296 = vmatmul.mubr.bf16.gmra.mrb[32].mxu0 %v2900_v51  ;;  %1648 = vmatmul.mubr.bf16.gmra.mrb[32].mxu1 %v2901_v52  ;;  %v2996_v51 = vld [vmem:[%s4121_s0 + $0x180] ss:$8 sps:$4 sm:$0xff]  }
  0x82   :  { %1303 = vmatprep.mubr.bf16.mxu0 %v2902_v53  ;;  %1655 = vmatprep.mubr.bf16.mxu1 %v2904_v54  ;;  %v2997_v52 = vld [vmem:[%s4121_s0 + $0x440] ss:$8 sps:$4 sm:$0xff]   ;;  %v2998_v53 = vld [vmem:[%s4121_s0 + $0x194] ss:$8 sps:$4 sm:$0xff]  }
  0x83   :  { %v3000_v54 = vld [vmem:[%s4121_s0 + $0x454] ss:$8 sps:$4 sm:$0xff]  }
  0x89   :  { %1304 = vmatmul.mubr.bf16.gmra.mrb[36].mxu0 %v2906_v55  ;;  %1656 = vmatmul.mubr.bf16.gmra.mrb[36].mxu1 %v2907_v56  ;;  %v3002_v55 = vld [vmem:[%s4121_s0 + $0x190] ss:$8 sps:$4 sm:$0xff]  }
  0x8a   :  { %1311 = vmatprep.mubr.bf16.mxu0 %v2908_v57  ;;  %1663 = vmatprep.mubr.bf16.mxu1 %v2910_v58  ;;  %v3003_v56 = vld [vmem:[%s4121_s0 + $0x450] ss:$8 sps:$4 sm:$0xff]   ;;  %v3004_v57 = vld [vmem:[%s4121_s0 + $0x1a4] ss:$8 sps:$4 sm:$0xff]  }
  0x8b   :  { %v3006_v58 = vld [vmem:[%s4121_s0 + $0x464] ss:$8 sps:$4 sm:$0xff]  }
  0x91   :  { %1312 = vmatmul.mubr.bf16.gmra.mrb[40].mxu0 %v2912_v59  ;;  %1664 = vmatmul.mubr.bf16.gmra.mrb[40].mxu1 %v2913_v60  ;;  %v3008_v59 = vld [vmem:[%s4121_s0 + $0x1a0] ss:$8 sps:$4 sm:$0xff]  }
  0x92   :  { %1319 = vmatprep.mubr.bf16.mxu0 %v2914_v61  ;;  %1671 = vmatprep.mubr.bf16.mxu1 %v2916_v62  ;;  %v3009_v60 = vld [vmem:[%s4121_s0 + $0x460] ss:$8 sps:$4 sm:$0xff]   ;;  %v3010_v61 = vld [vmem:[%s4121_s0 + $0x1b4] ss:$8 sps:$4 sm:$0xff]  }
  0x93   :  { %v3012_v62 = vld [vmem:[%s4121_s0 + $0x474] ss:$8 sps:$4 sm:$0xff]  }
  0x99   :  { %1320 = vmatmul.mubr.bf16.gmra.mrb[44].mxu0 %v2918_v63  ;;  %1672 = vmatmul.mubr.bf16.gmra.mrb[44].mxu1 %v2919_v0 }
  0x9a   :  { %1327 = vmatprep.mubr.bf16.mxu0 %v2920_v1  ;;  %1679 = vmatprep.mubr.bf16.mxu1 %v2922_v2 }
  0xa1   :  { %1328 = vmatmul.mubr.bf16.gmra.mrb[48].mxu0 %v2924_v3  ;;  %1680 = vmatmul.mubr.bf16.gmra.mrb[48].mxu1 %v2925_v4  ;;  %v3014_v3 = vld [vmem:[%s4121_s0 + $0x1b0] ss:$8 sps:$4 sm:$0xff]  }
  0xa2   :  { %1335 = vmatprep.mubr.bf16.mxu0 %v2926_v5  ;;  %1687 = vmatprep.mubr.bf16.mxu1 %v2928_v6  ;;  %v3015_v4 = vld [vmem:[%s4121_s0 + $0x470] ss:$8 sps:$4 sm:$0xff]  }
  0xa9   :  { %1336 = vmatmul.mubr.bf16.gmra.mrb[52].mxu0 %v2930_v7  ;;  %1688 = vmatmul.mubr.bf16.gmra.mrb[52].mxu1 %v2931_v8  ;;  %v3016_v7 = vld [vmem:[%s4121_s0 + $0x1c4] ss:$8 sps:$4 sm:$0xff]  }
  0xaa   :  { %1343 = vmatprep.mubr.bf16.mxu0 %v2932_v9  ;;  %1695 = vmatprep.mubr.bf16.mxu1 %v2934_v10  ;;  %v3018_v8 = vld [vmem:[%s4121_s0 + $0x484] ss:$8 sps:$4 sm:$0xff]  }
  0xb1   :  { %1344 = vmatmul.mubr.bf16.gmra.mrb[56].mxu0 %v2936_v11  ;;  %1696 = vmatmul.mubr.bf16.gmra.mrb[56].mxu1 %v2937_v12 }
  0xb2   :  { %1351 = vmatprep.mubr.bf16.mxu0 %v2938_v13  ;;  %1703 = vmatprep.mubr.bf16.mxu1 %v2940_v14 }
  0xb9   :  { %1352 = vmatmul.mubr.bf16.gmra.mrb[60].mxu0 %v2942_v15  ;;  %1704 = vmatmul.mubr.bf16.gmra.mrb[60].mxu1 %v2943_v16  ;;  %v3020_v15 = vld [vmem:[%s4121_s0 + $0x1c0] ss:$8 sps:$4 sm:$0xff]  }
  0xba   :  { %1359 = vmatprep.mubr.bf16.mxu0 %v2944_v17  ;;  %1711 = vmatprep.mubr.bf16.mxu1 %v2946_v18  ;;  %v3021_v16 = vld [vmem:[%s4121_s0 + $0x480] ss:$8 sps:$4 sm:$0xff]  }
  0xc1   :  { %1360 = vmatmul.mubr.bf16.gmra.mrb[64].mxu0 %v2948_v19  ;;  %1712 = vmatmul.mubr.bf16.gmra.mrb[64].mxu1 %v2949_v20  ;;  %v3022_v19 = vld [vmem:[%s4121_s0 + $0x1d4] ss:$8 sps:$4 sm:$0xff]  }
  0xc2   :  { %1367 = vmatprep.mubr.bf16.mxu0 %v2950_v21  ;;  %1719 = vmatprep.mubr.bf16.mxu1 %v2952_v22  ;;  %v3024_v20 = vld [vmem:[%s4121_s0 + $0x494] ss:$8 sps:$4 sm:$0xff]  }
  0xc9   :  { %1368 = vmatmul.mubr.bf16.gmra.mrb[68].mxu0 %v2954_v23  ;;  %1720 = vmatmul.mubr.bf16.gmra.mrb[68].mxu1 %v2955_v24 }
  0xca   :  { %1375 = vmatprep.mubr.bf16.mxu0 %v2956_v25  ;;  %1727 = vmatprep.mubr.bf16.mxu1 %v2958_v26 }
  0xd1   :  { %1376 = vmatmul.mubr.bf16.gmra.mrb[72].mxu0 %v2960_v27  ;;  %1728 = vmatmul.mubr.bf16.gmra.mrb[72].mxu1 %v2961_v28  ;;  %v3026_v27 = vld [vmem:[%s4121_s0 + $0x1d0] ss:$8 sps:$4 sm:$0xff]  }
  0xd2   :  { %1383 = vmatprep.mubr.bf16.mxu0 %v2962_v29  ;;  %1735 = vmatprep.mubr.bf16.mxu1 %v2964_v30  ;;  %v3027_v28 = vld [vmem:[%s4121_s0 + $0x490] ss:$8 sps:$4 sm:$0xff]  }
  0xd9   :  { %1384 = vmatmul.mubr.bf16.gmra.mrb[76].mxu0 %v2966_v31  ;;  %1736 = vmatmul.mubr.bf16.gmra.mrb[76].mxu1 %v2967_v32  ;;  %v3028_v31 = vld [vmem:[%s4121_s0 + $0x1e4] ss:$8 sps:$4 sm:$0xff]  }
  0xda   :  { %1391 = vmatprep.mubr.bf16.mxu0 %v2968_v33  ;;  %1743 = vmatprep.mubr.bf16.mxu1 %v2970_v34  ;;  %v3030_v32 = vld [vmem:[%s4121_s0 + $0x4a4] ss:$8 sps:$4 sm:$0xff]  }
  0xe1   :  { %1392 = vmatmul.mubr.bf16.gmra.mrb[80].mxu0 %v2972_v35  ;;  %1744 = vmatmul.mubr.bf16.gmra.mrb[80].mxu1 %v2973_v36 }
  0xe2   :  { %1399 = vmatprep.mubr.bf16.mxu0 %v2974_v37  ;;  %1751 = vmatprep.mubr.bf16.mxu1 %v2976_v38 }
  0xe9   :  { %1400 = vmatmul.mubr.bf16.gmra.mrb[84].mxu0 %v2978_v39  ;;  %1752 = vmatmul.mubr.bf16.gmra.mrb[84].mxu1 %v2979_v40  ;;  %v3032_v39 = vld [vmem:[%s4121_s0 + $0x1e0] ss:$8 sps:$4 sm:$0xff]  }
  0xea   :  { %1407 = vmatprep.mubr.bf16.mxu0 %v2980_v41  ;;  %1759 = vmatprep.mubr.bf16.mxu1 %v2982_v42  ;;  %v3033_v40 = vld [vmem:[%s4121_s0 + $0x4a0] ss:$8 sps:$4 sm:$0xff]  }
  0xf1   :  { %1408 = vmatmul.mubr.bf16.gmra.mrb[88].mxu0 %v2984_v43  ;;  %1760 = vmatmul.mubr.bf16.gmra.mrb[88].mxu1 %v2985_v44  ;;  %v3034_v43 = vld [vmem:[%s4121_s0 + $0x1f4] ss:$8 sps:$4 sm:$0xff]  }
  0xf2   :  { %1415 = vmatprep.mubr.bf16.mxu0 %v2986_v45  ;;  %1767 = vmatprep.mubr.bf16.mxu1 %v2988_v46  ;;  %v3036_v44 = vld [vmem:[%s4121_s0 + $0x4b4] ss:$8 sps:$4 sm:$0xff]  }
  0xf9   :  { %1416 = vmatmul.mubr.bf16.gmra.mrb[92].mxu0 %v2990_v47  ;;  %1768 = vmatmul.mubr.bf16.gmra.mrb[92].mxu1 %v2991_v48 }
  0xfa   :  { %1423 = vmatprep.mubr.bf16.mxu0 %v2992_v49  ;;  %1775 = vmatprep.mubr.bf16.mxu1 %v2994_v50 }
 0x101   :  { %1424 = vmatmul.mubr.bf16.gmra.mrb[96].mxu0 %v2996_v51  ;;  %1776 = vmatmul.mubr.bf16.gmra.mrb[96].mxu1 %v2997_v52  ;;  %v3038_v51 = vld [vmem:[%s4121_s0 + $0x1f0] ss:$8 sps:$4 sm:$0xff]  }
 0x102   :  { %1431 = vmatprep.mubr.bf16.mxu0 %v2998_v53  ;;  %1783 = vmatprep.mubr.bf16.mxu1 %v3000_v54  ;;  %v3039_v52 = vld [vmem:[%s4121_s0 + $0x4b0] ss:$8 sps:$4 sm:$0xff]  }
 0x109   :  { %1432 = vmatmul.mubr.bf16.gmra.mrb[100].mxu0 %v3002_v55  ;;  %1784 = vmatmul.mubr.bf16.gmra.mrb[100].mxu1 %v3003_v56  ;;  %v3040_v55 = vld [vmem:[%s4121_s0 + $0x204] ss:$8 sps:$4 sm:$0xff]  }
 0x10a   :  { %1439 = vmatprep.mubr.bf16.mxu0 %v3004_v57  ;;  %1791 = vmatprep.mubr.bf16.mxu1 %v3006_v58  ;;  %v3042_v56 = vld [vmem:[%s4121_s0 + $0x4c4] ss:$8 sps:$4 sm:$0xff]  }
 0x111   :  { %1440 = vmatmul.mubr.bf16.gmra.mrb[104].mxu0 %v3008_v59  ;;  %1792 = vmatmul.mubr.bf16.gmra.mrb[104].mxu1 %v3009_v60 }
 0x112   :  { %1447 = vmatprep.mubr.bf16.mxu0 %v3010_v61  ;;  %1799 = vmatprep.mubr.bf16.mxu1 %v3012_v62 }
 0x114   :  { %v3543_v63 = vpop.f32.mrb[0].mxu0  ;;  %v3545_v0 = vpop.f32.mrb[0].mxu1 }
 0x115   :  { %v1235_v1 = vpop.f32.mrb[1].mxu0  ;;  %v1587_v2 = vpop.f32.mrb[1].mxu1 }
 0x116   :  { %v3553_v5 = vpop.f32.mrb[2].mxu0  ;;  %v3555_v6 = vpop.f32.mrb[2].mxu1  ;;  %v3044_v1 = vld [vmem:[%s4121_s0 + $0x200] ss:$8 sps:$4 sm:$0xff]  }
 0x117   :  { %v1238_v9 = vpop.f32.mrb[3].mxu0  ;;  %v1590_v10 = vpop.f32.mrb[3].mxu1  ;;  %v3045_v2 = vld [vmem:[%s4121_s0 + $0x4c0] ss:$8 sps:$4 sm:$0xff]  }
 0x119   :  { %1448 = vmatmul.mubr.bf16.gmra.mrb[108].mxu0 %v3014_v3  ;;  %1800 = vmatmul.mubr.bf16.gmra.mrb[108].mxu1 %v3015_v4 }
 0x11a   :  { %1455 = vmatprep.mubr.bf16.mxu0 %v3016_v7  ;;  %1807 = vmatprep.mubr.bf16.mxu1 %v3018_v8  ;;  %v3046_v7 = vld [vmem:[%s4121_s0 + $0x214] ss:$8 sps:$4 sm:$0xff]  }
 0x11b   :  { %v3048_v8 = vld [vmem:[%s4121_s0 + $0x4d4] ss:$8 sps:$4 sm:$0xff]  }
 0x11c   :  { %v3563_v11 = vpop.f32.mrb[4].mxu0  ;;  %v3565_v12 = vpop.f32.mrb[4].mxu1 }
 0x11d   :  { %v1243_v13 = vpop.f32.mrb[5].mxu0  ;;  %v1595_v14 = vpop.f32.mrb[5].mxu1 }
 0x11e   :  { %v3573_v17 = vpop.f32.mrb[6].mxu0  ;;  %v3575_v18 = vpop.f32.mrb[6].mxu1 }
 0x11f   :  { %v1246_v21 = vpop.f32.mrb[7].mxu0  ;;  %v1598_v22 = vpop.f32.mrb[7].mxu1 }
 0x121   :  { %1456 = vmatmul.mubr.bf16.gmra.mrb[112].mxu0 %v3020_v15  ;;  %1808 = vmatmul.mubr.bf16.gmra.mrb[112].mxu1 %v3021_v16 }
 0x122   :  { %1463 = vmatprep.mubr.bf16.mxu0 %v3022_v19  ;;  %1815 = vmatprep.mubr.bf16.mxu1 %v3024_v20  ;;  %v3050_v19 = vld [vmem:[%s4121_s0 + $0x210] ss:$8 sps:$4 sm:$0xff]  }
 0x123   :  { %v3051_v20 = vld [vmem:[%s4121_s0 + $0x4d0] ss:$8 sps:$4 sm:$0xff]  }
 0x124   :  { %v3583_v23 = vpop.f32.mrb[8].mxu0  ;;  %v3585_v24 = vpop.f32.mrb[8].mxu1 }
 0x125   :  { %v1251_v25 = vpop.f32.mrb[9].mxu0  ;;  %v1603_v26 = vpop.f32.mrb[9].mxu1 }
 0x126   :  { %v3593_v29 = vpop.f32.mrb[10].mxu0  ;;  %v3595_v30 = vpop.f32.mrb[10].mxu1  ;;  %v3052_v25 = vld [vmem:[%s4121_s0 + $0x224] ss:$8 sps:$4 sm:$0xff]  }
 0x127   :  { %v1254_v33 = vpop.f32.mrb[11].mxu0  ;;  %v1606_v34 = vpop.f32.mrb[11].mxu1  ;;  %v3054_v26 = vld [vmem:[%s4121_s0 + $0x4e4] ss:$8 sps:$4 sm:$0xff]  }
 0x129   :  { %1464 = vmatmul.mubr.bf16.gmra.mrb[116].mxu0 %v3026_v27  ;;  %1816 = vmatmul.mubr.bf16.gmra.mrb[116].mxu1 %v3027_v28 }
 0x12a   :  { %1471 = vmatprep.mubr.bf16.mxu0 %v3028_v31  ;;  %1823 = vmatprep.mubr.bf16.mxu1 %v3030_v32 }
 0x12c   :  { %v3603_v35 = vpop.f32.mrb[12].mxu0  ;;  %v3605_v36 = vpop.f32.mrb[12].mxu1 }
 0x12d   :  { %v1259_v37 = vpop.f32.mrb[13].mxu0  ;;  %v1611_v38 = vpop.f32.mrb[13].mxu1 }
 0x12e   :  { %v3613_v41 = vpop.f32.mrb[14].mxu0  ;;  %v3615_v42 = vpop.f32.mrb[14].mxu1  ;;  %v3056_v37 = vld [vmem:[%s4121_s0 + $0x220] ss:$8 sps:$4 sm:$0xff]  }
 0x12f   :  { %v1262_v45 = vpop.f32.mrb[15].mxu0  ;;  %v1614_v46 = vpop.f32.mrb[15].mxu1  ;;  %v3057_v38 = vld [vmem:[%s4121_s0 + $0x4e0] ss:$8 sps:$4 sm:$0xff]  }
 0x131   :  { %1472 = vmatmul.mubr.bf16.gmra.mrb[120].mxu0 %v3032_v39  ;;  %1824 = vmatmul.mubr.bf16.gmra.mrb[120].mxu1 %v3033_v40 }
 0x132   :  { %1479 = vmatprep.mubr.bf16.mxu0 %v3034_v43  ;;  %1831 = vmatprep.mubr.bf16.mxu1 %v3036_v44  ;;  %v3058_v43 = vld [vmem:[%s4121_s0 + $0x234] ss:$8 sps:$4 sm:$0xff]  }
 0x133   :  { %v3060_v44 = vld [vmem:[%s4121_s0 + $0x4f4] ss:$8 sps:$4 sm:$0xff]  }
 0x134   :  { %v3623_v47 = vpop.f32.mrb[16].mxu0  ;;  %v3625_v48 = vpop.f32.mrb[16].mxu1 }
 0x135   :  { %v1267_v49 = vpop.f32.mrb[17].mxu0  ;;  %v1619_v50 = vpop.f32.mrb[17].mxu1 }
 0x136   :  { %v3633_v53 = vpop.f32.mrb[18].mxu0  ;;  %v3635_v54 = vpop.f32.mrb[18].mxu1 }
 0x137   :  { %v1270_v57 = vpop.f32.mrb[19].mxu0  ;;  %v1622_v58 = vpop.f32.mrb[19].mxu1 }
 0x139   :  { %1480 = vmatmul.mubr.bf16.gmra.mrb[124].mxu0 %v3038_v51  ;;  %1832 = vmatmul.mubr.bf16.gmra.mrb[124].mxu1 %v3039_v52 }
 0x13a   :  { %1487 = vmatprep.mubr.bf16.mxu0 %v3040_v55  ;;  %1839 = vmatprep.mubr.bf16.mxu1 %v3042_v56  ;;  %v3062_v55 = vld [vmem:[%s4121_s0 + $0x230] ss:$8 sps:$4 sm:$0xff]  }
 0x13b   :  { %v3063_v56 = vld [vmem:[%s4121_s0 + $0x4f0] ss:$8 sps:$4 sm:$0xff]  }
 0x13c   :  { %v3643_v59 = vpop.f32.mrb[20].mxu0  ;;  %v3645_v60 = vpop.f32.mrb[20].mxu1 }
 0x13d   :  { %v1275_v61 = vpop.f32.mrb[21].mxu0  ;;  %v1627_v62 = vpop.f32.mrb[21].mxu1 }
 0x13e   :  { %v3653_v3 = vpop.f32.mrb[22].mxu0  ;;  %v3655_v4 = vpop.f32.mrb[22].mxu1  ;;  %v3064_v61 = vld [vmem:[%s4121_s0 + $0x244] ss:$8 sps:$4 sm:$0xff]  }
 0x13f   :  { %v1278_v9 = vpop.f32.mrb[23].mxu0  ;;  %v1630_v10 = vpop.f32.mrb[23].mxu1  ;;  %v3066_v62 = vld [vmem:[%s4121_s0 + $0x504] ss:$8 sps:$4 sm:$0xff]  }
 0x141   :  { %1488 = vmatmul.mubr.bf16.gmra.mrb[128].mxu0 %v3044_v1  ;;  %1840 = vmatmul.mubr.bf16.gmra.mrb[128].mxu1 %v3045_v2 }
 0x142   :  { %1495 = vmatprep.mubr.bf16.mxu0 %v3046_v7  ;;  %1847 = vmatprep.mubr.bf16.mxu1 %v3048_v8 }
 0x144   :  { %v3663_v13 = vpop.f32.mrb[24].mxu0  ;;  %v3665_v14 = vpop.f32.mrb[24].mxu1 }
 0x145   :  { %v1283_v15 = vpop.f32.mrb[25].mxu0  ;;  %v1635_v16 = vpop.f32.mrb[25].mxu1 }
 0x146   :  { %v3673_v21 = vpop.f32.mrb[26].mxu0  ;;  %v3675_v22 = vpop.f32.mrb[26].mxu1  ;;  %v3068_v15 = vld [vmem:[%s4121_s0 + $0x240] ss:$8 sps:$4 sm:$0xff]  }
 0x147   :  { %v1286_v27 = vpop.f32.mrb[27].mxu0  ;;  %v1638_v28 = vpop.f32.mrb[27].mxu1  ;;  %v3069_v16 = vld [vmem:[%s4121_s0 + $0x500] ss:$8 sps:$4 sm:$0xff]  }
 0x149   :  { %1496 = vmatmul.mubr.bf16.gmra.mrb[132].mxu0 %v3050_v19  ;;  %1848 = vmatmul.mubr.bf16.gmra.mrb[132].mxu1 %v3051_v20 }
 0x14a   :  { %1503 = vmatprep.mubr.bf16.mxu0 %v3052_v25  ;;  %1855 = vmatprep.mubr.bf16.mxu1 %v3054_v26  ;;  %v3070_v25 = vld [vmem:[%s4121_s0 + $0x254] ss:$8 sps:$4 sm:$0xff]  }
 0x14b   :  { %v3072_v26 = vld [vmem:[%s4121_s0 + $0x514] ss:$8 sps:$4 sm:$0xff]  }
 0x14c   :  { %v3683_v31 = vpop.f32.mrb[28].mxu0  ;;  %v3685_v32 = vpop.f32.mrb[28].mxu1 }
 0x14d   :  { %v1291_v33 = vpop.f32.mrb[29].mxu0  ;;  %v1643_v34 = vpop.f32.mrb[29].mxu1 }
 0x14e   :  { %v3693_v39 = vpop.f32.mrb[30].mxu0  ;;  %v3695_v40 = vpop.f32.mrb[30].mxu1 }
 0x14f   :  { %v1294_v45 = vpop.f32.mrb[31].mxu0  ;;  %v1646_v46 = vpop.f32.mrb[31].mxu1 }
 0x151   :  { %1504 = vmatmul.mubr.bf16.gmra.mrb[136].mxu0 %v3056_v37  ;;  %1856 = vmatmul.mubr.bf16.gmra.mrb[136].mxu1 %v3057_v38 }
 0x152   :  { %1511 = vmatprep.mubr.bf16.mxu0 %v3058_v43  ;;  %1863 = vmatprep.mubr.bf16.mxu1 %v3060_v44  ;;  %v3074_v43 = vld [vmem:[%s4121_s0 + $0x250] ss:$8 sps:$4 sm:$0xff]  }
 0x153   :  { %v3075_v44 = vld [vmem:[%s4121_s0 + $0x510] ss:$8 sps:$4 sm:$0xff]  }
 0x154   :  { %v3703_v49 = vpop.f32.mrb[32].mxu0  ;;  %v3705_v50 = vpop.f32.mrb[32].mxu1 }
 0x155   :  { %v1299_v51 = vpop.f32.mrb[33].mxu0  ;;  %v1651_v52 = vpop.f32.mrb[33].mxu1 }
 0x156   :  { %v3713_v57 = vpop.f32.mrb[34].mxu0  ;;  %v3715_v58 = vpop.f32.mrb[34].mxu1  ;;  %v3076_v51 = vld [vmem:[%s4121_s0 + $0x264] ss:$8 sps:$4 sm:$0xff]  }
 0x157   :  { %v1302_v1 = vpop.f32.mrb[35].mxu0  ;;  %v1654_v2 = vpop.f32.mrb[35].mxu1  ;;  %v3078_v52 = vld [vmem:[%s4121_s0 + $0x524] ss:$8 sps:$4 sm:$0xff]  }
 0x159   :  { %1512 = vmatmul.mubr.bf16.gmra.mrb[140].mxu0 %v3062_v55  ;;  %1864 = vmatmul.mubr.bf16.gmra.mrb[140].mxu1 %v3063_v56 }
 0x15a   :  { %1519 = vmatprep.mubr.bf16.mxu0 %v3064_v61  ;;  %1871 = vmatprep.mubr.bf16.mxu1 %v3066_v62 }
 0x15c   :  { %v3723_v7 = vpop.f32.mrb[36].mxu0  ;;  %v3725_v8 = vpop.f32.mrb[36].mxu1 }
 0x15d   :  { %v1307_v9 = vpop.f32.mrb[37].mxu0  ;;  %v1659_v10 = vpop.f32.mrb[37].mxu1 }
 0x15e   :  { %v3733_v19 = vpop.f32.mrb[38].mxu0  ;;  %v3735_v20 = vpop.f32.mrb[38].mxu1  ;;  %v3080_v9 = vld [vmem:[%s4121_s0 + $0x260] ss:$8 sps:$4 sm:$0xff]  }
 0x15f   :  { %v1310_v27 = vpop.f32.mrb[39].mxu0  ;;  %v1662_v28 = vpop.f32.mrb[39].mxu1  ;;  %v3081_v10 = vld [vmem:[%s4121_s0 + $0x520] ss:$8 sps:$4 sm:$0xff]  }
 0x161   :  { %1520 = vmatmul.mubr.bf16.gmra.mrb[144].mxu0 %v3068_v15  ;;  %1872 = vmatmul.mubr.bf16.gmra.mrb[144].mxu1 %v3069_v16 }
 0x162   :  { %1527 = vmatprep.mubr.bf16.mxu0 %v3070_v25  ;;  %1879 = vmatprep.mubr.bf16.mxu1 %v3072_v26  ;;  %v3082_v25 = vld [vmem:[%s4121_s0 + $0x274] ss:$8 sps:$4 sm:$0xff]  }
 0x163   :  { %v3084_v26 = vld [vmem:[%s4121_s0 + $0x534] ss:$8 sps:$4 sm:$0xff]  }
 0x164   :  { %v3743_v33 = vpop.f32.mrb[40].mxu0  ;;  %v3745_v34 = vpop.f32.mrb[40].mxu1 }
 0x165   :  { %v1315_v37 = vpop.f32.mrb[41].mxu0  ;;  %v1667_v38 = vpop.f32.mrb[41].mxu1 }
 0x166   :  { %v3753_v45 = vpop.f32.mrb[42].mxu0  ;;  %v3755_v46 = vpop.f32.mrb[42].mxu1 }
 0x167   :  { %v1318_v55 = vpop.f32.mrb[43].mxu0  ;;  %v1670_v56 = vpop.f32.mrb[43].mxu1 }
 0x169   :  { %1528 = vmatmul.mubr.bf16.gmra.mrb[148].mxu0 %v3074_v43  ;;  %1880 = vmatmul.mubr.bf16.gmra.mrb[148].mxu1 %v3075_v44 }
 0x16a   :  { %1535 = vmatprep.mubr.bf16.mxu0 %v3076_v51  ;;  %1887 = vmatprep.mubr.bf16.mxu1 %v3078_v52  ;;  %v3086_v51 = vld [vmem:[%s4121_s0 + $0x270] ss:$8 sps:$4 sm:$0xff]  }
 0x16b   :  { %v3087_v52 = vld [vmem:[%s4121_s0 + $0x530] ss:$8 sps:$4 sm:$0xff]  }
 0x16c   :  { %v3763_v61 = vpop.f32.mrb[44].mxu0  ;;  %v3765_v62 = vpop.f32.mrb[44].mxu1 }
 0x16d   :  { %v1323_v1 = vpop.f32.mrb[45].mxu0  ;;  %v1675_v2 = vpop.f32.mrb[45].mxu1 }
 0x16e   :  { %v3773_v15 = vpop.f32.mrb[46].mxu0  ;;  %v3775_v16 = vpop.f32.mrb[46].mxu1  ;;  %v3088_v1 = vld [vmem:[%s4121_s0 + $0x284] ss:$8 sps:$4 sm:$0xff]  }
 0x16f   :  { %4124 = vst [vmem:[#allocation2_spill] sm:$0xff] %v3775_v16  ;;  %v1326_v27 = vpop.f32.mrb[47].mxu0  ;;  %v1678_v28 = vpop.f32.mrb[47].mxu1  ;;  %v3090_v2 = vld [vmem:[%s4121_s0 + $0x544] ss:$8 sps:$4 sm:$0xff]  }
 0x171   :  { %1536 = vmatmul.mubr.bf16.gmra.mrb[152].mxu0 %v3080_v9  ;;  %1888 = vmatmul.mubr.bf16.gmra.mrb[152].mxu1 %v3081_v10 }
 0x172   :  { %1543 = vmatprep.mubr.bf16.mxu0 %v3082_v25  ;;  %1895 = vmatprep.mubr.bf16.mxu1 %v3084_v26 }
 0x174   :  { %v3783_v37 = vpop.f32.mrb[48].mxu0  ;;  %v3785_v38 = vpop.f32.mrb[48].mxu1 }
 0x175   :  { %4125 = vst [vmem:[#allocation3_spill] sm:$0xff] %v3783_v37  ;;  %4126 = vst [vmem:[#allocation4_spill] sm:$0xff] %v3785_v38  ;;  %v1331_v43 = vpop.f32.mrb[49].mxu0  ;;  %v1683_v44 = vpop.f32.mrb[49].mxu1 }
 0x176   :  { %v3793_v55 = vpop.f32.mrb[50].mxu0  ;;  %v3795_v56 = vpop.f32.mrb[50].mxu1  ;;  %v3092_v43 = vld [vmem:[%s4121_s0 + $0x280] ss:$8 sps:$4 sm:$0xff]  }
 0x177   :  { %4127 = vst [vmem:[#allocation5_spill] sm:$0xff] %v3793_v55  ;;  %4128 = vst [vmem:[#allocation6_spill] sm:$0xff] %v3795_v56  ;;  %v1334_v9 = vpop.f32.mrb[51].mxu0  ;;  %v1686_v10 = vpop.f32.mrb[51].mxu1  ;;  %v3093_v44 = vld [vmem:[%s4121_s0 + $0x540] ss:$8 sps:$4 sm:$0xff]  }
 0x179   :  { %1544 = vmatmul.mubr.bf16.gmra.mrb[156].mxu0 %v3086_v51  ;;  %1896 = vmatmul.mubr.bf16.gmra.mrb[156].mxu1 %v3087_v52  ;;  %v3094_v52 = vld [vmem:[%s4121_s0 + $0x294] ss:$8 sps:$4 sm:$0xff]  }
 0x17a   :  { %1551 = vmatprep.mubr.bf16.mxu0 %v3088_v1  ;;  %1903 = vmatprep.mubr.bf16.mxu1 %v3090_v2  ;;  %v3096_v1 = vld [vmem:[%s4121_s0 + $0x554] ss:$8 sps:$4 sm:$0xff]  }
 0x17c   :  { %v3803_v25 = vpop.f32.mrb[52].mxu0  ;;  %v3805_v26 = vpop.f32.mrb[52].mxu1 }
 0x17d   :  { %4129 = vst [vmem:[#allocation7_spill] sm:$0xff] %v3803_v25  ;;  %4130 = vst [vmem:[#allocation8_spill] sm:$0xff] %v3805_v26  ;;  %v1339_v27 = vpop.f32.mrb[53].mxu0  ;;  %v1691_v28 = vpop.f32.mrb[53].mxu1  ;;  %v3098_v26 = vld [vmem:[%s4121_s0 + $0x290] ss:$8 sps:$4 sm:$0xff]  }
 0x17e   :  { %v3813_v9 = vpop.f32.mrb[54].mxu0  ;;  %v3815_v51 = vpop.f32.mrb[54].mxu1  ;;  %v3099_v25 = vld [vmem:[%s4121_s0 + $0x550] ss:$8 sps:$4 sm:$0xff]  }
 0x17f   :  { %4131 = vst [vmem:[#allocation9_spill] sm:$0xff] %v3813_v9  ;;  %4132 = vst [vmem:[#allocation10_spill] sm:$0xff] %v3815_v51  ;;  %v1342_v2 = vpop.f32.mrb[55].mxu0  ;;  %v1694_v10 = vpop.f32.mrb[55].mxu1 }
 0x181   :  { %1552 = vmatmul.mubr.bf16.gmra.mrb[160].mxu0 %v3092_v43  ;;  %1904 = vmatmul.mubr.bf16.gmra.mrb[160].mxu1 %v3093_v44  ;;  %v3100_v44 = vld [vmem:[%s4121_s0 + $0x2a4] ss:$8 sps:$4 sm:$0xff]  }
 0x182   :  { %1559 = vmatprep.mubr.bf16.mxu0 %v3094_v52  ;;  %1911 = vmatprep.mubr.bf16.mxu1 %v3096_v1 }
 0x184   :  { %v3823_v27 = vpop.f32.mrb[56].mxu0  ;;  %v3825_v28 = vpop.f32.mrb[56].mxu1 }
 0x185   :  { %4133 = vst [vmem:[#allocation11_spill] sm:$0xff] %v3823_v27  ;;  %4134 = vst [vmem:[#allocation12_spill] sm:$0xff] %v3825_v28  ;;  %v1347_v9 = vpop.f32.mrb[57].mxu0  ;;  %v1699_v51 = vpop.f32.mrb[57].mxu1  ;;  %v3104_v28 = vld [vmem:[%s4121_s0 + $0x2a0] ss:$8 sps:$4 sm:$0xff]  }
 0x186   :  { %v3833_v2 = vpop.f32.mrb[58].mxu0  ;;  %v3835_v43 = vpop.f32.mrb[58].mxu1  ;;  %v3102_v9 = vld [vmem:[%s4121_s0 + $0x564] ss:$8 sps:$4 sm:$0xff]   ;;  %v3105_v27 = vld [vmem:[%s4121_s0 + $0x560] ss:$8 sps:$4 sm:$0xff]  }
 0x187   :  { %4135 = vst [vmem:[#allocation13_spill] sm:$0xff] %v3833_v2  ;;  %4136 = vst [vmem:[#allocation14_spill] sm:$0xff] %v3835_v43  ;;  %v1350_v51 = vpop.f32.mrb[59].mxu0  ;;  %v1702_v52 = vpop.f32.mrb[59].mxu1 }
 0x189   :  { %1560 = vmatmul.mubr.bf16.gmra.mrb[164].mxu0 %v3098_v26  ;;  %1912 = vmatmul.mubr.bf16.gmra.mrb[164].mxu1 %v3099_v25  ;;  %v3106_v25 = vld [vmem:[%s4121_s0 + $0x2b4] ss:$8 sps:$4 sm:$0xff]  }
 0x18a   :  { %1567 = vmatprep.mubr.bf16.mxu0 %v3100_v44  ;;  %1919 = vmatprep.mubr.bf16.mxu1 %v3102_v9 }
 0x18c   :  { %v3843_v1 = vpop.f32.mrb[60].mxu0  ;;  %v3845_v10 = vpop.f32.mrb[60].mxu1 }
 0x18d   :  { %4137 = vst [vmem:[#allocation15_spill] sm:$0xff] %v3843_v1  ;;  %4138 = vst [vmem:[#allocation16_spill] sm:$0xff] %v3845_v10  ;;  %v1355_v2 = vpop.f32.mrb[61].mxu0  ;;  %v1707_v43 = vpop.f32.mrb[61].mxu1  ;;  %v3110_v10 = vld [vmem:[%s4121_s0 + $0x2b0] ss:$8 sps:$4 sm:$0xff]  }
 0x18e   :  { %v3853_v51 = vpop.f32.mrb[62].mxu0  ;;  %v3855_v26 = vpop.f32.mrb[62].mxu1  ;;  %v3108_v2 = vld [vmem:[%s4121_s0 + $0x574] ss:$8 sps:$4 sm:$0xff]   ;;  %v3111_v1 = vld [vmem:[%s4121_s0 + $0x570] ss:$8 sps:$4 sm:$0xff]  }
 0x18f   :  { %4139 = vst [vmem:[#allocation17_spill] sm:$0xff] %v3853_v51  ;;  %4140 = vst [vmem:[#allocation18_spill] sm:$0xff] %v3855_v26  ;;  %v1358_v43 = vpop.f32.mrb[63].mxu0  ;;  %v1710_v44 = vpop.f32.mrb[63].mxu1 }
 0x191   :  { %1568 = vmatmul.mubr.bf16.gmra.mrb[168].mxu0 %v3104_v28  ;;  %1920 = vmatmul.mubr.bf16.gmra.mrb[168].mxu1 %v3105_v27 }
 0x192   :  { %1575 = vmatprep.mubr.bf16.mxu0 %v3106_v25  ;;  %1927 = vmatprep.mubr.bf16.mxu1 %v3108_v2 }
 0x194   :  { %v3863_v9 = vpop.f32.mrb[64].mxu0  ;;  %v3865_v52 = vpop.f32.mrb[64].mxu1 }
 0x195   :  { %4141 = vst [vmem:[#allocation19_spill] sm:$0xff] %v3863_v9  ;;  %4142 = vst [vmem:[#allocation20_spill] sm:$0xff] %v3865_v52  ;;  %v1363_v51 = vpop.f32.mrb[65].mxu0  ;;  %v1715_v26 = vpop.f32.mrb[65].mxu1 }
 0x196   :  { %v3873_v43 = vpop.f32.mrb[66].mxu0  ;;  %v3875_v28 = vpop.f32.mrb[66].mxu1 }
 0x197   :  { %4143 = vst [vmem:[#allocation21_spill] sm:$0xff] %v3873_v43  ;;  %4144 = vst [vmem:[#allocation22_spill] sm:$0xff] %v3875_v28  ;;  %v1366_v27 = vpop.f32.mrb[67].mxu0  ;;  %v1718_v25 = vpop.f32.mrb[67].mxu1 }
 0x199   :  { %1576 = vmatmul.mubr.bf16.gmra.mrb[172].mxu0 %v3110_v10  ;;  %1928 = vmatmul.mubr.bf16.gmra.mrb[172].mxu1 %v3111_v1 }
 0x19c   :  { %v3877_v2 = vpop.f32.mrb[68].mxu0  ;;  %v3879_v51 = vpop.f32.mrb[68].mxu1 }
 0x19d   :  { %4145 = vst [vmem:[#allocation23_spill] sm:$0xff] %v3877_v2  ;;  %4146 = vst [vmem:[#allocation24_spill] sm:$0xff] %v3879_v51  ;;  %v1371_v26 = vpop.f32.mrb[69].mxu0  ;;  %v1723_v44 = vpop.f32.mrb[69].mxu1 }
 0x19e   :  { %v3881_v52 = vpop.f32.mrb[70].mxu0  ;;  %v3883_v9 = vpop.f32.mrb[70].mxu1 }
 0x19f   :  { %4147 = vst [vmem:[#allocation25_spill] sm:$0xff] %v3881_v52  ;;  %4148 = vst [vmem:[#allocation26_spill] sm:$0xff] %v3883_v9  ;;  %v1374_v56 = vpop.f32.mrb[71].mxu0  ;;  %v1726_v55 = vpop.f32.mrb[71].mxu1 }
 0x1a4   :  { %v3885_v38 = vpop.f32.mrb[72].mxu0  ;;  %v3887_v43 = vpop.f32.mrb[72].mxu1 }
 0x1a5   :  { %4149 = vst [vmem:[#allocation27_spill] sm:$0xff] %v3885_v38  ;;  %4150 = vst [vmem:[#allocation28_spill] sm:$0xff] %v3887_v43  ;;  %v1379_v27 = vpop.f32.mrb[73].mxu0  ;;  %v1731_v25 = vpop.f32.mrb[73].mxu1 }
 0x1a6   :  { %v3889_v10 = vpop.f32.mrb[74].mxu0  ;;  %v3891_v1 = vpop.f32.mrb[74].mxu1 }
 0x1a7   :  { %4151 = vst [vmem:[#allocation29_spill] sm:$0xff] %v3889_v10  ;;  %4152 = vst [vmem:[#allocation30_spill] sm:$0xff] %v3891_v1  ;;  %v1382_v2 = vpop.f32.mrb[75].mxu0  ;;  %v1734_v51 = vpop.f32.mrb[75].mxu1 }
 0x1ac   :  { %v3893_v26 = vpop.f32.mrb[76].mxu0  ;;  %v3895_v44 = vpop.f32.mrb[76].mxu1 }
 0x1ad   :  { %4153 = vst [vmem:[#allocation31_spill] sm:$0xff] %v3893_v26  ;;  %4154 = vst [vmem:[#allocation32_spill] sm:$0xff] %v3895_v44  ;;  %v1387_v52 = vpop.f32.mrb[77].mxu0  ;;  %v1739_v9 = vpop.f32.mrb[77].mxu1 }
 0x1ae   :  { %v3897_v56 = vpop.f32.mrb[78].mxu0  ;;  %v3899_v55 = vpop.f32.mrb[78].mxu1 }
 0x1af   :  { %4155 = vst [vmem:[#allocation33_spill] sm:$0xff] %v3897_v56  ;;  %4156 = vst [vmem:[#allocation34_spill] sm:$0xff] %v3899_v55  ;;  %v1390_v38 = vpop.f32.mrb[79].mxu0  ;;  %v1742_v43 = vpop.f32.mrb[79].mxu1 }
 0x1b4   :  { %v3901_v27 = vpop.f32.mrb[80].mxu0  ;;  %v3903_v25 = vpop.f32.mrb[80].mxu1 }
 0x1b5   :  { %4157 = vst [vmem:[#allocation35_spill] sm:$0xff] %v3901_v27  ;;  %4158 = vst [vmem:[#allocation36_spill] sm:$0xff] %v3903_v25  ;;  %v1395_v10 = vpop.f32.mrb[81].mxu0  ;;  %v1747_v1 = vpop.f32.mrb[81].mxu1 }
 0x1b6   :  { %v3905_v2 = vpop.f32.mrb[82].mxu0  ;;  %v3907_v51 = vpop.f32.mrb[82].mxu1 }
 0x1b7   :  { %4159 = vst [vmem:[#allocation37_spill] sm:$0xff] %v3905_v2  ;;  %4160 = vst [vmem:[#allocation38_spill] sm:$0xff] %v3907_v51  ;;  %v1398_v26 = vpop.f32.mrb[83].mxu0  ;;  %v1750_v44 = vpop.f32.mrb[83].mxu1 }
 0x1bc   :  { %v3909_v52 = vpop.f32.mrb[84].mxu0  ;;  %v3911_v9 = vpop.f32.mrb[84].mxu1 }
 0x1bd   :  { %4161 = vst [vmem:[#allocation39_spill] sm:$0xff] %v3909_v52  ;;  %4162 = vst [vmem:[#allocation40_spill] sm:$0xff] %v3911_v9  ;;  %v1403_v56 = vpop.f32.mrb[85].mxu0  ;;  %v1755_v55 = vpop.f32.mrb[85].mxu1  ;;  %v3922_v9 = vld [vmem:[%s4122_s2] ss:$0 sm:$0xff] }
 0x1be   :  { %v3913_v38 = vpop.f32.mrb[86].mxu0  ;;  %v3915_v43 = vpop.f32.mrb[86].mxu1 }
 0x1bf   :  { %4163 = vst [vmem:[#allocation41_spill] sm:$0xff] %v3913_v38  ;;  %4164 = vst [vmem:[#allocation42_spill] sm:$0xff] %v3915_v43  ;;  %v1406_v27 = vpop.f32.mrb[87].mxu0  ;;  %v1758_v25 = vpop.f32.mrb[87].mxu1 }
 0x1c4   :  { %v1409_v10 = vpop.f32.mrb[88].mxu0  ;;  %v1761_v1 = vpop.f32.mrb[88].mxu1 }
 0x1c5   :  { %v1936_v2 = vmax.f32 %v3543_v63, %v1409_v10  ;;  %v1980_v51 = vmax.f32 %v3545_v0, %v1761_v1  ;;  %v1411_v26 = vpop.f32.mrb[89].mxu0  ;;  %v1763_v44 = vpop.f32.mrb[89].mxu1 }
 0x1c6   :  { %v1412_v56 = vpop.f32.mrb[90].mxu0  ;;  %v1764_v55 = vpop.f32.mrb[90].mxu1 }
 0x1c7   :  { %v2024_v38 = vmax.f32 %v1936_v2, %v1980_v51  ;;  %v1937_v43 = vmax.f32 %v3553_v5, %v1412_v56  ;;  %v1981_v27 = vmax.f32 %v3555_v6, %v1764_v55  ;;  %v1414_v25 = vpop.f32.mrb[91].mxu0  ;;  %v1766_v52 = vpop.f32.mrb[91].mxu1 }
 0x1c9   :  { %v2075_v63 = vadd.f32 %v3922_v9, %v2024_v38  ;;  %v2025_v10 = vmax.f32 %v1937_v43, %v1981_v27 }
 0x1cb   :  { %v2076_v0 = vadd.f32 %v3922_v9, %v2025_v10  ;;  %v2119_v44 = vmax.f32 %v2075_v63, 0.0 }
 0x1cc   :  { %v1417_v1 = vpop.f32.mrb[92].mxu0  ;;  %v1769_v26 = vpop.f32.mrb[92].mxu1 }
 0x1cd   :  { %v2120_v28 = vmax.f32 %v2076_v0, 0.0  ;;  %v1938_v37 = vmax.f32 %v3563_v11, %v1417_v1  ;;  %v1982_v16 = vmax.f32 %v3565_v12, %v1769_v26  ;;  %v1419_v2 = vpop.f32.mrb[93].mxu0  ;;  %v1771_v51 = vpop.f32.mrb[93].mxu1 }
 0x1ce   :  { %v1420_v5 = vpop.f32.mrb[94].mxu0  ;;  %v1772_v56 = vpop.f32.mrb[94].mxu1 }
 0x1cf   :  { %v2671_v6 = vpack.c.bf16 %v2120_v28, %v2119_v44  ;;  %v2026_v55 = vmax.f32 %v1938_v37, %v1982_v16  ;;  %v1939_v52 = vmax.f32 %v3573_v17, %v1420_v5  ;;  %v1983_v38 = vmax.f32 %v3575_v18, %v1772_v56  ;;  %v1422_v43 = vpop.f32.mrb[95].mxu0  ;;  %v1774_v27 = vpop.f32.mrb[95].mxu1 }
 0x1d1   :  { %2672 = vst [vmem:[%s4123_s3] sm:$0xff] %v2671_v6   ;;  %v2077_v11 = vadd.f32 %v3922_v9, %v2026_v55  ;;  %v2027_v25 = vmax.f32 %v1939_v52, %v1983_v38 }
 0x1d3   :  { %v2078_v12 = vadd.f32 %v3922_v9, %v2027_v25  ;;  %v2121_v0 = vmax.f32 %v2077_v11, 0.0 }
 0x1d4   :  { %v1425_v63 = vpop.f32.mrb[96].mxu0  ;;  %v1777_v10 = vpop.f32.mrb[96].mxu1 }
 0x1d5   :  { %v2122_v28 = vmax.f32 %v2078_v12, 0.0  ;;  %v1940_v16 = vmax.f32 %v3583_v23, %v1425_v63  ;;  %v1984_v17 = vmax.f32 %v3585_v24, %v1777_v10  ;;  %v1427_v18 = vpop.f32.mrb[97].mxu0  ;;  %v1779_v37 = vpop.f32.mrb[97].mxu1 }
 0x1d6   :  { %v1428_v1 = vpop.f32.mrb[98].mxu0  ;;  %v1780_v26 = vpop.f32.mrb[98].mxu1 }
 0x1d7   :  { %v2676_v44 = vpack.c.bf16 %v2122_v28, %v2121_v0  ;;  %v2028_v2 = vmax.f32 %v1940_v16, %v1984_v17  ;;  %v1941_v51 = vmax.f32 %v3593_v29, %v1428_v1  ;;  %v1985_v5 = vmax.f32 %v3595_v30, %v1780_v26  ;;  %v1430_v56 = vpop.f32.mrb[99].mxu0  ;;  %v1782_v6 = vpop.f32.mrb[99].mxu1 }
 0x1d9   :  { %2778 = vst [vmem:[%s4123_s3 + $0x8] sm:$0xff] %v2676_v44   ;;  %v2079_v23 = vadd.f32 %v3922_v9, %v2028_v2  ;;  %v2029_v55 = vmax.f32 %v1941_v51, %v1985_v5 }
 0x1db   :  { %v2080_v24 = vadd.f32 %v3922_v9, %v2029_v55  ;;  %v2123_v43 = vmax.f32 %v2079_v23, 0.0 }
 0x1dc   :  { %v1433_v52 = vpop.f32.mrb[100].mxu0  ;;  %v1785_v38 = vpop.f32.mrb[100].mxu1 }
 0x1dd   :  { %v2124_v27 = vmax.f32 %v2080_v24, 0.0  ;;  %v1942_v11 = vmax.f32 %v3603_v35, %v1433_v52  ;;  %v1986_v29 = vmax.f32 %v3605_v36, %v1785_v38  ;;  %v1435_v30 = vpop.f32.mrb[101].mxu0  ;;  %v1787_v25 = vpop.f32.mrb[101].mxu1 }
 0x1de   :  { %v1436_v12 = vpop.f32.mrb[102].mxu0  ;;  %v1788_v63 = vpop.f32.mrb[102].mxu1 }
 0x1df   :  { %v2681_v10 = vpack.c.bf16 %v2124_v27, %v2123_v43  ;;  %v2030_v0 = vmax.f32 %v1942_v11, %v1986_v29  ;;  %v1943_v28 = vmax.f32 %v3613_v41, %v1436_v12  ;;  %v1987_v16 = vmax.f32 %v3615_v42, %v1788_v63  ;;  %v1438_v17 = vpop.f32.mrb[103].mxu0  ;;  %v1790_v18 = vpop.f32.mrb[103].mxu1 }
 0x1e1   :  { %2779 = vst [vmem:[%s4123_s3 + $0x10] sm:$0xff] %v2681_v10   ;;  %v2081_v35 = vadd.f32 %v3922_v9, %v2030_v0  ;;  %v2031_v37 = vmax.f32 %v1943_v28, %v1987_v16 }
 0x1e3   :  { %v2082_v36 = vadd.f32 %v3922_v9, %v2031_v37  ;;  %v2125_v44 = vmax.f32 %v2081_v35, 0.0 }
 0x1e4   :  { %v1441_v1 = vpop.f32.mrb[104].mxu0  ;;  %v1793_v26 = vpop.f32.mrb[104].mxu1 }
 0x1e5   :  { %v2126_v2 = vmax.f32 %v2082_v36, 0.0  ;;  %v1944_v51 = vmax.f32 %v3623_v47, %v1441_v1  ;;  %v1988_v41 = vmax.f32 %v3625_v48, %v1793_v26  ;;  %v1443_v42 = vpop.f32.mrb[105].mxu0  ;;  %v1795_v5 = vpop.f32.mrb[105].mxu1 }
 0x1e6   :  { %v1444_v56 = vpop.f32.mrb[106].mxu0  ;;  %v1796_v6 = vpop.f32.mrb[106].mxu1 }
 0x1e7   :  { %v2686_v23 = vpack.c.bf16 %v2126_v2, %v2125_v44  ;;  %v2032_v55 = vmax.f32 %v1944_v51, %v1988_v41  ;;  %v1945_v24 = vmax.f32 %v3633_v53, %v1444_v56  ;;  %v1989_v52 = vmax.f32 %v3635_v54, %v1796_v6  ;;  %v1446_v38 = vpop.f32.mrb[107].mxu0  ;;  %v1798_v43 = vpop.f32.mrb[107].mxu1 }
 0x1e9   :  { %2780 = vst [vmem:[%s4123_s3 + $0x18] sm:$0xff] %v2686_v23   ;;  %v2083_v47 = vadd.f32 %v3922_v9, %v2032_v55  ;;  %v2033_v27 = vmax.f32 %v1945_v24, %v1989_v52 }
 0x1eb   :  { %v2084_v48 = vadd.f32 %v3922_v9, %v2033_v27  ;;  %v2127_v30 = vmax.f32 %v2083_v47, 0.0 }
 0x1ec   :  { %v1449_v11 = vpop.f32.mrb[108].mxu0  ;;  %v1801_v29 = vpop.f32.mrb[108].mxu1 }
 0x1ed   :  { %v2128_v25 = vmax.f32 %v2084_v48, 0.0  ;;  %v1946_v12 = vmax.f32 %v3643_v59, %v1449_v11  ;;  %v1990_v53 = vmax.f32 %v3645_v60, %v1801_v29  ;;  %v1451_v54 = vpop.f32.mrb[109].mxu0  ;;  %v1803_v63 = vpop.f32.mrb[109].mxu1 }
 0x1ee   :  { %v1452_v10 = vpop.f32.mrb[110].mxu0  ;;  %v1804_v0 = vpop.f32.mrb[110].mxu1 }
 0x1ef   :  { %v2691_v28 = vpack.c.bf16 %v2128_v25, %v2127_v30  ;;  %v2034_v16 = vmax.f32 %v1946_v12, %v1990_v53  ;;  %v1947_v17 = vmax.f32 %v3653_v3, %v1452_v10  ;;  %v1991_v18 = vmax.f32 %v3655_v4, %v1804_v0  ;;  %v1454_v35 = vpop.f32.mrb[111].mxu0  ;;  %v1806_v37 = vpop.f32.mrb[111].mxu1 }
 0x1f1   :  { %2781 = vst [vmem:[%s4123_s3 + $0x20] sm:$0xff] %v2691_v28   ;;  %v2085_v59 = vadd.f32 %v3922_v9, %v2034_v16  ;;  %v2035_v36 = vmax.f32 %v1947_v17, %v1991_v18 }
 0x1f3   :  { %v2086_v60 = vadd.f32 %v3922_v9, %v2035_v36  ;;  %v2129_v44 = vmax.f32 %v2085_v59, 0.0 }
 0x1f4   :  { %v1457_v1 = vpop.f32.mrb[112].mxu0  ;;  %v1809_v26 = vpop.f32.mrb[112].mxu1 }
 0x1f5   :  { %v2130_v2 = vmax.f32 %v2086_v60, 0.0  ;;  %v1948_v51 = vmax.f32 %v3663_v13, %v1457_v1  ;;  %v1992_v3 = vmax.f32 %v3665_v14, %v1809_v26  ;;  %v1459_v4 = vpop.f32.mrb[113].mxu0  ;;  %v1811_v41 = vpop.f32.mrb[113].mxu1 }
 0x1f6   :  { %v1460_v42 = vpop.f32.mrb[114].mxu0  ;;  %v1812_v5 = vpop.f32.mrb[114].mxu1 }
 0x1f7   :  { %v2696_v56 = vpack.c.bf16 %v2130_v2, %v2129_v44  ;;  %v2036_v6 = vmax.f32 %v1948_v51, %v1992_v3  ;;  %v1949_v23 = vmax.f32 %v3673_v21, %v1460_v42  ;;  %v1993_v55 = vmax.f32 %v3675_v22, %v1812_v5  ;;  %v1462_v24 = vpop.f32.mrb[115].mxu0  ;;  %v1814_v52 = vpop.f32.mrb[115].mxu1 }
 0x1f9   :  { %2782 = vst [vmem:[%s4123_s3 + $0x28] sm:$0xff] %v2696_v56   ;;  %v2087_v13 = vadd.f32 %v3922_v9, %v2036_v6  ;;  %v2037_v38 = vmax.f32 %v1949_v23, %v1993_v55 }
 0x1fb   :  { %v2088_v14 = vadd.f32 %v3922_v9, %v2037_v38  ;;  %v2131_v27 = vmax.f32 %v2087_v13, 0.0 }
 0x1fc   :  { %v1465_v43 = vpop.f32.mrb[116].mxu0  ;;  %v1817_v47 = vpop.f32.mrb[116].mxu1 }
 0x1fd   :  { %v2132_v48 = vmax.f32 %v2088_v14, 0.0  ;;  %v1950_v11 = vmax.f32 %v3683_v31, %v1465_v43  ;;  %v1994_v21 = vmax.f32 %v3685_v32, %v1817_v47  ;;  %v1467_v22 = vpop.f32.mrb[117].mxu0  ;;  %v1819_v29 = vpop.f32.mrb[117].mxu1 }
 0x1fe   :  { %v1468_v30 = vpop.f32.mrb[118].mxu0  ;;  %v1820_v25 = vpop.f32.mrb[118].mxu1 }
 0x1ff   :  { %v2701_v12 = vpack.c.bf16 %v2132_v48, %v2131_v27  ;;  %v2038_v53 = vmax.f32 %v1950_v11, %v1994_v21  ;;  %v1951_v54 = vmax.f32 %v3693_v39, %v1468_v30  ;;  %v1995_v63 = vmax.f32 %v3695_v40, %v1820_v25  ;;  %v1470_v10 = vpop.f32.mrb[119].mxu0  ;;  %v1822_v0 = vpop.f32.mrb[119].mxu1 }
 0x201   :  { %2783 = vst [vmem:[%s4123_s3 + $0x30] sm:$0xff] %v2701_v12   ;;  %v2089_v31 = vadd.f32 %v3922_v9, %v2038_v53  ;;  %v2039_v28 = vmax.f32 %v1951_v54, %v1995_v63 }
 0x203   :  { %v2090_v32 = vadd.f32 %v3922_v9, %v2039_v28  ;;  %v2133_v18 = vmax.f32 %v2089_v31, 0.0 }
 0x204   :  { %v1473_v16 = vpop.f32.mrb[120].mxu0  ;;  %v1825_v17 = vpop.f32.mrb[120].mxu1 }
 0x205   :  { %v2134_v35 = vmax.f32 %v2090_v32, 0.0  ;;  %v1952_v37 = vmax.f32 %v3703_v49, %v1473_v16  ;;  %v1996_v39 = vmax.f32 %v3705_v50, %v1825_v17  ;;  %v1475_v40 = vpop.f32.mrb[121].mxu0  ;;  %v1827_v59 = vpop.f32.mrb[121].mxu1 }
 0x206   :  { %v1476_v36 = vpop.f32.mrb[122].mxu0  ;;  %v1828_v60 = vpop.f32.mrb[122].mxu1 }
 0x207   :  { %v2706_v1 = vpack.c.bf16 %v2134_v35, %v2133_v18  ;;  %v2040_v26 = vmax.f32 %v1952_v37, %v1996_v39  ;;  %v1953_v44 = vmax.f32 %v3713_v57, %v1476_v36  ;;  %v1997_v2 = vmax.f32 %v3715_v58, %v1828_v60  ;;  %v1478_v51 = vpop.f32.mrb[123].mxu0  ;;  %v1830_v3 = vpop.f32.mrb[123].mxu1 }
 0x209   :  { %2784 = vst [vmem:[%s4123_s3 + $0x38] sm:$0xff] %v2706_v1   ;;  %v2091_v49 = vadd.f32 %v3922_v9, %v2040_v26  ;;  %v2041_v4 = vmax.f32 %v1953_v44, %v1997_v2  ;;  %v4165_v1 = vld [vmem:[#allocation2_spill] sm:$0xff] }
 0x20b   :  { %v2092_v50 = vadd.f32 %v3922_v9, %v2041_v4  ;;  %v2135_v5 = vmax.f32 %v2091_v49, 0.0 }
 0x20c   :  { %v1481_v41 = vpop.f32.mrb[124].mxu0  ;;  %v1833_v42 = vpop.f32.mrb[124].mxu1 }
 0x20d   :  { %v2136_v56 = vmax.f32 %v2092_v50, 0.0  ;;  %v1954_v6 = vmax.f32 %v3723_v7, %v1481_v41  ;;  %v1998_v57 = vmax.f32 %v3725_v8, %v1833_v42  ;;  %v1483_v58 = vpop.f32.mrb[125].mxu0  ;;  %v1835_v23 = vpop.f32.mrb[125].mxu1  ;;  %v4166_v41 = vld [vmem:[#allocation3_spill] sm:$0xff] }
 0x20e   :  { %v1484_v55 = vpop.f32.mrb[126].mxu0  ;;  %v1836_v24 = vpop.f32.mrb[126].mxu1 }
 0x20f   :  { %v2711_v52 = vpack.c.bf16 %v2136_v56, %v2135_v5  ;;  %v2042_v13 = vmax.f32 %v1954_v6, %v1998_v57  ;;  %v1955_v38 = vmax.f32 %v3733_v19, %v1484_v55  ;;  %v1999_v14 = vmax.f32 %v3735_v20, %v1836_v24  ;;  %v1486_v43 = vpop.f32.mrb[127].mxu0  ;;  %v1838_v47 = vpop.f32.mrb[127].mxu1  ;;  %v4168_v24 = vld [vmem:[#allocation5_spill] sm:$0xff] }
 0x211   :  { %2785 = vst [vmem:[%s4123_s3 + $0x40] sm:$0xff] %v2711_v52   ;;  %v2093_v7 = vadd.f32 %v3922_v9, %v2042_v13  ;;  %v2043_v27 = vmax.f32 %v1955_v38, %v1999_v14  ;;  %v4169_v13 = vld [vmem:[#allocation6_spill] sm:$0xff] }
 0x213   :  { %v2094_v8 = vadd.f32 %v3922_v9, %v2043_v27  ;;  %v2137_v21 = vmax.f32 %v2093_v7, 0.0 }
 0x214   :  { %v1489_v48 = vpop.f32.mrb[128].mxu0  ;;  %v1841_v11 = vpop.f32.mrb[128].mxu1 }
 0x215   :  { %v2138_v22 = vmax.f32 %v2094_v8, 0.0  ;;  %v1956_v29 = vmax.f32 %v3743_v33, %v1489_v48  ;;  %v2000_v19 = vmax.f32 %v3745_v34, %v1841_v11  ;;  %v1491_v20 = vpop.f32.mrb[129].mxu0  ;;  %v1843_v30 = vpop.f32.mrb[129].mxu1 }
 0x216   :  { %v1492_v25 = vpop.f32.mrb[130].mxu0  ;;  %v1844_v12 = vpop.f32.mrb[130].mxu1 }
 0x217   :  { %v2716_v53 = vpack.c.bf16 %v2138_v22, %v2137_v21  ;;  %v2044_v54 = vmax.f32 %v1956_v29, %v2000_v19  ;;  %v1957_v63 = vmax.f32 %v3753_v45, %v1492_v25  ;;  %v2001_v10 = vmax.f32 %v3755_v46, %v1844_v12  ;;  %v1494_v0 = vpop.f32.mrb[131].mxu0  ;;  %v1846_v31 = vpop.f32.mrb[131].mxu1  ;;  %v4170_v22 = vld [vmem:[#allocation7_spill] sm:$0xff]  ;;  %v4171_v19 = vld [vmem:[#allocation8_spill] sm:$0xff] }
 0x218   :  { %v4173_v31 = vld [vmem:[#allocation10_spill] sm:$0xff] }
 0x219   :  { %2786 = vst [vmem:[%s4123_s3 + $0x48] sm:$0xff] %v2716_v53   ;;  %v2095_v33 = vadd.f32 %v3922_v9, %v2044_v54  ;;  %v2045_v28 = vmax.f32 %v1957_v63, %v2001_v10  ;;  %v4172_v10 = vld [vmem:[#allocation9_spill] sm:$0xff] }
 0x21b   :  { %v2096_v34 = vadd.f32 %v3922_v9, %v2045_v28  ;;  %v2139_v17 = vmax.f32 %v2095_v33, 0.0 }
 0x21c   :  { %v1497_v32 = vpop.f32.mrb[132].mxu0  ;;  %v1849_v16 = vpop.f32.mrb[132].mxu1 }
 0x21d   :  { %v2140_v18 = vmax.f32 %v2096_v34, 0.0  ;;  %v1958_v35 = vmax.f32 %v3763_v61, %v1497_v32  ;;  %v2002_v45 = vmax.f32 %v3765_v62, %v1849_v16  ;;  %v1499_v46 = vpop.f32.mrb[133].mxu0  ;;  %v1851_v37 = vpop.f32.mrb[133].mxu1 }
 0x21e   :  { %v1500_v39 = vpop.f32.mrb[134].mxu0  ;;  %v1852_v40 = vpop.f32.mrb[134].mxu1  ;;  %v4174_v37 = vld [vmem:[#allocation11_spill] sm:$0xff] }
 0x21f   :  { %v2721_v59 = vpack.c.bf16 %v2140_v18, %v2139_v17  ;;  %v2046_v36 = vmax.f32 %v1958_v35, %v2002_v45  ;;  %v1959_v60 = vmax.f32 %v3773_v15, %v1500_v39  ;;  %v2003_v26 = vmax.f32 %v4165_v1, %v1852_v40  ;;  %v1502_v44 = vpop.f32.mrb[135].mxu0  ;;  %v1854_v2 = vpop.f32.mrb[135].mxu1  ;;  %v4167_v15 = vld [vmem:[#allocation4_spill] sm:$0xff] }
 0x220   :  { %v4175_v40 = vld [vmem:[#allocation12_spill] sm:$0xff] }
 0x221   :  { %2787 = vst [vmem:[%s4123_s3 + $0x50] sm:$0xff] %v2721_v59   ;;  %v2097_v61 = vadd.f32 %v3922_v9, %v2046_v36  ;;  %v2047_v51 = vmax.f32 %v1959_v60, %v2003_v26 }
 0x223   :  { %v2098_v62 = vadd.f32 %v3922_v9, %v2047_v51  ;;  %v2141_v4 = vmax.f32 %v2097_v61, 0.0  ;;  %v4176_v61 = vld [vmem:[#allocation13_spill] sm:$0xff] }
 0x224   :  { %v1505_v3 = vpop.f32.mrb[136].mxu0  ;;  %v1857_v49 = vpop.f32.mrb[136].mxu1 }
 0x225   :  { %v2142_v50 = vmax.f32 %v2098_v62, 0.0  ;;  %v1960_v42 = vmax.f32 %v4166_v41, %v1505_v3  ;;  %v2004_v5 = vmax.f32 %v4167_v15, %v1857_v49  ;;  %v1507_v56 = vpop.f32.mrb[137].mxu0  ;;  %v1859_v6 = vpop.f32.mrb[137].mxu1  ;;  %v4177_v62 = vld [vmem:[#allocation14_spill] sm:$0xff] }
 0x226   :  { %v1508_v57 = vpop.f32.mrb[138].mxu0  ;;  %v1860_v58 = vpop.f32.mrb[138].mxu1 }
 0x227   :  { %v2726_v23 = vpack.c.bf16 %v2142_v50, %v2141_v4  ;;  %v2048_v55 = vmax.f32 %v1960_v42, %v2004_v5  ;;  %v1961_v52 = vmax.f32 %v4168_v24, %v1508_v57  ;;  %v2005_v38 = vmax.f32 %v4169_v13, %v1860_v58  ;;  %v1510_v14 = vpop.f32.mrb[139].mxu0  ;;  %v1862_v43 = vpop.f32.mrb[139].mxu1  ;;  %v4178_v57 = vld [vmem:[#allocation15_spill] sm:$0xff] }
 0x229   :  { %2788 = vst [vmem:[%s4123_s3 + $0x58] sm:$0xff] %v2726_v23   ;;  %v2099_v47 = vadd.f32 %v3922_v9, %v2048_v55  ;;  %v2049_v7 = vmax.f32 %v1961_v52, %v2005_v38  ;;  %v4179_v23 = vld [vmem:[#allocation16_spill] sm:$0xff] }
 0x22b   :  { %v2100_v27 = vadd.f32 %v3922_v9, %v2049_v7  ;;  %v2143_v11 = vmax.f32 %v2099_v47, 0.0  ;;  %v4180_v47 = vld [vmem:[#allocation17_spill] sm:$0xff] }
 0x22c   :  { %v1513_v8 = vpop.f32.mrb[140].mxu0  ;;  %v1865_v48 = vpop.f32.mrb[140].mxu1 }
 0x22d   :  { %v2144_v21 = vmax.f32 %v2100_v27, 0.0  ;;  %v1962_v29 = vmax.f32 %v4170_v22, %v1513_v8  ;;  %v2006_v20 = vmax.f32 %v4171_v19, %v1865_v48  ;;  %v1515_v30 = vpop.f32.mrb[141].mxu0  ;;  %v1867_v25 = vpop.f32.mrb[141].mxu1  ;;  %v4181_v27 = vld [vmem:[#allocation18_spill] sm:$0xff] }
 0x22e   :  { %v1516_v12 = vpop.f32.mrb[142].mxu0  ;;  %v1868_v53 = vpop.f32.mrb[142].mxu1 }
 0x22f   :  { %v2731_v54 = vpack.c.bf16 %v2144_v21, %v2143_v11  ;;  %v2050_v63 = vmax.f32 %v1962_v29, %v2006_v20  ;;  %v1963_v0 = vmax.f32 %v4172_v10, %v1516_v12  ;;  %v2007_v33 = vmax.f32 %v4173_v31, %v1868_v53  ;;  %v1518_v28 = vpop.f32.mrb[143].mxu0  ;;  %v1870_v34 = vpop.f32.mrb[143].mxu1  ;;  %v4182_v12 = vld [vmem:[#allocation19_spill] sm:$0xff] }
 0x231   :  { %2789 = vst [vmem:[%s4123_s3 + $0x60] sm:$0xff] %v2731_v54   ;;  %v2101_v32 = vadd.f32 %v3922_v9, %v2050_v63  ;;  %v2051_v16 = vmax.f32 %v1963_v0, %v2007_v33  ;;  %v4183_v54 = vld [vmem:[#allocation20_spill] sm:$0xff] }
 0x233   :  { %v2102_v17 = vadd.f32 %v3922_v9, %v2051_v16  ;;  %v2145_v45 = vmax.f32 %v2101_v32, 0.0  ;;  %v4184_v32 = vld [vmem:[#allocation21_spill] sm:$0xff] }
 0x234   :  { %v1521_v18 = vpop.f32.mrb[144].mxu0  ;;  %v1873_v35 = vpop.f32.mrb[144].mxu1 }
 0x235   :  { %v2146_v46 = vmax.f32 %v2102_v17, 0.0  ;;  %v1964_v39 = vmax.f32 %v4174_v37, %v1521_v18  ;;  %v2008_v59 = vmax.f32 %v4175_v40, %v1873_v35  ;;  %v1523_v36 = vpop.f32.mrb[145].mxu0  ;;  %v1875_v60 = vpop.f32.mrb[145].mxu1  ;;  %v4185_v17 = vld [vmem:[#allocation22_spill] sm:$0xff] }
 0x236   :  { %v1524_v1 = vpop.f32.mrb[146].mxu0  ;;  %v1876_v26 = vpop.f32.mrb[146].mxu1 }
 0x237   :  { %v2736_v44 = vpack.c.bf16 %v2146_v46, %v2145_v45  ;;  %v2052_v2 = vmax.f32 %v1964_v39, %v2008_v59  ;;  %v1965_v51 = vmax.f32 %v4176_v61, %v1524_v1  ;;  %v2009_v3 = vmax.f32 %v4177_v62, %v1876_v26  ;;  %v1526_v49 = vpop.f32.mrb[147].mxu0  ;;  %v1878_v4 = vpop.f32.mrb[147].mxu1  ;;  %v4186_v1 = vld [vmem:[#allocation23_spill] sm:$0xff] }
 0x239   :  { %2790 = vst [vmem:[%s4123_s3 + $0x68] sm:$0xff] %v2736_v44   ;;  %v2103_v50 = vadd.f32 %v3922_v9, %v2052_v2  ;;  %v2053_v41 = vmax.f32 %v1965_v51, %v2009_v3  ;;  %v4187_v44 = vld [vmem:[#allocation24_spill] sm:$0xff] }
 0x23b   :  { %v2104_v42 = vadd.f32 %v3922_v9, %v2053_v41  ;;  %v2147_v56 = vmax.f32 %v2103_v50, 0.0  ;;  %v4188_v50 = vld [vmem:[#allocation25_spill] sm:$0xff] }
 0x23c   :  { %v1529_v15 = vpop.f32.mrb[148].mxu0  ;;  %v1881_v5 = vpop.f32.mrb[148].mxu1 }
 0x23d   :  { %v2148_v6 = vmax.f32 %v2104_v42, 0.0  ;;  %v1966_v58 = vmax.f32 %v4178_v57, %v1529_v15  ;;  %v2010_v55 = vmax.f32 %v4179_v23, %v1881_v5  ;;  %v1531_v24 = vpop.f32.mrb[149].mxu0  ;;  %v1883_v52 = vpop.f32.mrb[149].mxu1  ;;  %v4189_v42 = vld [vmem:[#allocation26_spill] sm:$0xff] }
 0x23e   :  { %v1532_v13 = vpop.f32.mrb[150].mxu0  ;;  %v1884_v38 = vpop.f32.mrb[150].mxu1 }
 0x23f   :  { %v2741_v14 = vpack.c.bf16 %v2148_v6, %v2147_v56  ;;  %v2054_v43 = vmax.f32 %v1966_v58, %v2010_v55  ;;  %v1967_v7 = vmax.f32 %v4180_v47, %v1532_v13  ;;  %v2011_v8 = vmax.f32 %v4181_v27, %v1884_v38  ;;  %v1534_v48 = vpop.f32.mrb[151].mxu0  ;;  %v1886_v11 = vpop.f32.mrb[151].mxu1  ;;  %v4190_v13 = vld [vmem:[#allocation27_spill] sm:$0xff] }
 0x241   :  { %2791 = vst [vmem:[%s4123_s3 + $0x70] sm:$0xff] %v2741_v14   ;;  %v2105_v21 = vadd.f32 %v3922_v9, %v2054_v43  ;;  %v2055_v22 = vmax.f32 %v1967_v7, %v2011_v8  ;;  %v4191_v14 = vld [vmem:[#allocation28_spill] sm:$0xff] }
 0x243   :  { %v2106_v29 = vadd.f32 %v3922_v9, %v2055_v22  ;;  %v2149_v30 = vmax.f32 %v2105_v21, 0.0  ;;  %v4192_v21 = vld [vmem:[#allocation29_spill] sm:$0xff] }
 0x244   :  { %v1537_v19 = vpop.f32.mrb[152].mxu0  ;;  %v1889_v20 = vpop.f32.mrb[152].mxu1 }
 0x245   :  { %v2150_v25 = vmax.f32 %v2106_v29, 0.0  ;;  %v1968_v53 = vmax.f32 %v4182_v12, %v1537_v19  ;;  %v2012_v63 = vmax.f32 %v4183_v54, %v1889_v20  ;;  %v1539_v10 = vpop.f32.mrb[153].mxu0  ;;  %v1891_v0 = vpop.f32.mrb[153].mxu1  ;;  %v4193_v29 = vld [vmem:[#allocation30_spill] sm:$0xff] }
 0x246   :  { %v1540_v31 = vpop.f32.mrb[154].mxu0  ;;  %v1892_v33 = vpop.f32.mrb[154].mxu1 }
 0x247   :  { %v2746_v28 = vpack.c.bf16 %v2150_v25, %v2149_v30  ;;  %v2056_v34 = vmax.f32 %v1968_v53, %v2012_v63  ;;  %v1969_v16 = vmax.f32 %v4184_v32, %v1540_v31  ;;  %v2013_v18 = vmax.f32 %v4185_v17, %v1892_v33  ;;  %v1542_v35 = vpop.f32.mrb[155].mxu0  ;;  %v1894_v45 = vpop.f32.mrb[155].mxu1  ;;  %v4194_v31 = vld [vmem:[#allocation31_spill] sm:$0xff] }
 0x249   :  { %2792 = vst [vmem:[%s4123_s3 + $0x78] sm:$0xff] %v2746_v28   ;;  %v2107_v46 = vadd.f32 %v3922_v9, %v2056_v34  ;;  %v2057_v37 = vmax.f32 %v1969_v16, %v2013_v18  ;;  %v4195_v28 = vld [vmem:[#allocation32_spill] sm:$0xff] }
 0x24b   :  { %v2108_v39 = vadd.f32 %v3922_v9, %v2057_v37  ;;  %v2151_v36 = vmax.f32 %v2107_v46, 0.0  ;;  %v4196_v46 = vld [vmem:[#allocation33_spill] sm:$0xff] }
 0x24c   :  { %v1545_v40 = vpop.f32.mrb[156].mxu0  ;;  %v1897_v59 = vpop.f32.mrb[156].mxu1 }
 0x24d   :  { %v2152_v60 = vmax.f32 %v2108_v39, 0.0  ;;  %v1970_v26 = vmax.f32 %v4186_v1, %v1545_v40  ;;  %v2014_v2 = vmax.f32 %v4187_v44, %v1897_v59  ;;  %v1547_v61 = vpop.f32.mrb[157].mxu0  ;;  %v1899_v51 = vpop.f32.mrb[157].mxu1  ;;  %v4197_v39 = vld [vmem:[#allocation34_spill] sm:$0xff] }
 0x24e   :  { %v1548_v62 = vpop.f32.mrb[158].mxu0  ;;  %v1900_v3 = vpop.f32.mrb[158].mxu1 }
 0x24f   :  { %v2751_v49 = vpack.c.bf16 %v2152_v60, %v2151_v36  ;;  %v2058_v4 = vmax.f32 %v1970_v26, %v2014_v2  ;;  %v1971_v41 = vmax.f32 %v4188_v50, %v1548_v62  ;;  %v2015_v15 = vmax.f32 %v4189_v42, %v1900_v3  ;;  %v1550_v5 = vpop.f32.mrb[159].mxu0  ;;  %v1902_v56 = vpop.f32.mrb[159].mxu1  ;;  %v4198_v62 = vld [vmem:[#allocation35_spill] sm:$0xff] }
 0x251   :  { %2793 = vst [vmem:[%s4123_s3 + $0x80] sm:$0xff] %v2751_v49   ;;  %v2109_v6 = vadd.f32 %v3922_v9, %v2058_v4  ;;  %v2059_v57 = vmax.f32 %v1971_v41, %v2015_v15  ;;  %v4199_v49 = vld [vmem:[#allocation36_spill] sm:$0xff] }
 0x253   :  { %v2110_v58 = vadd.f32 %v3922_v9, %v2059_v57  ;;  %v2153_v24 = vmax.f32 %v2109_v6, 0.0  ;;  %v4200_v6 = vld [vmem:[#allocation37_spill] sm:$0xff] }
 0x254   :  { %v1553_v23 = vpop.f32.mrb[160].mxu0  ;;  %v1905_v55 = vpop.f32.mrb[160].mxu1 }
 0x255   :  { %v2154_v52 = vmax.f32 %v2110_v58, 0.0  ;;  %v1972_v38 = vmax.f32 %v4190_v13, %v1553_v23  ;;  %v2016_v43 = vmax.f32 %v4191_v14, %v1905_v55  ;;  %v1555_v47 = vpop.f32.mrb[161].mxu0  ;;  %v1907_v7 = vpop.f32.mrb[161].mxu1  ;;  %v4201_v58 = vld [vmem:[#allocation38_spill] sm:$0xff] }
 0x256   :  { %v1556_v27 = vpop.f32.mrb[162].mxu0  ;;  %v1908_v8 = vpop.f32.mrb[162].mxu1 }
 0x257   :  { %v2756_v48 = vpack.c.bf16 %v2154_v52, %v2153_v24  ;;  %v2060_v11 = vmax.f32 %v1972_v38, %v2016_v43  ;;  %v1973_v22 = vmax.f32 %v4192_v21, %v1556_v27  ;;  %v2017_v19 = vmax.f32 %v4193_v29, %v1908_v8  ;;  %v1558_v20 = vpop.f32.mrb[163].mxu0  ;;  %v1910_v30 = vpop.f32.mrb[163].mxu1  ;;  %v4202_v27 = vld [vmem:[#allocation39_spill] sm:$0xff] }
 0x259   :  { %2794 = vst [vmem:[%s4123_s3 + $0x88] sm:$0xff] %v2756_v48   ;;  %v2111_v25 = vadd.f32 %v3922_v9, %v2060_v11  ;;  %v2061_v12 = vmax.f32 %v1973_v22, %v2017_v19  ;;  %v4203_v48 = vld [vmem:[#allocation40_spill] sm:$0xff] }
 0x25b   :  { %v2112_v53 = vadd.f32 %v3922_v9, %v2061_v12  ;;  %v2155_v10 = vmax.f32 %v2111_v25, 0.0  ;;  %v4204_v25 = vld [vmem:[#allocation41_spill] sm:$0xff] }
 0x25c   :  { %v1561_v54 = vpop.f32.mrb[164].mxu0  ;;  %v1913_v63 = vpop.f32.mrb[164].mxu1 }
 0x25d   :  { %v2156_v0 = vmax.f32 %v2112_v53, 0.0  ;;  %v1974_v33 = vmax.f32 %v4194_v31, %v1561_v54  ;;  %v2018_v34 = vmax.f32 %v4195_v28, %v1913_v63  ;;  %v1563_v32 = vpop.f32.mrb[165].mxu0  ;;  %v1915_v16 = vpop.f32.mrb[165].mxu1  ;;  %v4205_v53 = vld [vmem:[#allocation42_spill] sm:$0xff] }
 0x25e   :  { %v1564_v17 = vpop.f32.mrb[166].mxu0  ;;  %v1916_v18 = vpop.f32.mrb[166].mxu1 }
 0x25f   :  { %v2761_v35 = vpack.c.bf16 %v2156_v0, %v2155_v10  ;;  %v2062_v45 = vmax.f32 %v1974_v33, %v2018_v34  ;;  %v1975_v37 = vmax.f32 %v4196_v46, %v1564_v17  ;;  %v2019_v40 = vmax.f32 %v4197_v39, %v1916_v18  ;;  %v1566_v59 = vpop.f32.mrb[167].mxu0  ;;  %v1918_v36 = vpop.f32.mrb[167].mxu1 }
 0x261   :  { %2795 = vst [vmem:[%s4123_s3 + $0x90] sm:$0xff] %v2761_v35   ;;  %v2113_v60 = vadd.f32 %v3922_v9, %v2062_v45  ;;  %v2063_v1 = vmax.f32 %v1975_v37, %v2019_v40 }
 0x263   :  { %v2114_v26 = vadd.f32 %v3922_v9, %v2063_v1  ;;  %v2157_v61 = vmax.f32 %v2113_v60, 0.0 }
 0x264   :  { %v1569_v44 = vpop.f32.mrb[168].mxu0  ;;  %v1921_v2 = vpop.f32.mrb[168].mxu1 }
 0x265   :  { %v2158_v51 = vmax.f32 %v2114_v26, 0.0  ;;  %v1976_v3 = vmax.f32 %v4198_v62, %v1569_v44  ;;  %v2020_v4 = vmax.f32 %v4199_v49, %v1921_v2  ;;  %v1571_v50 = vpop.f32.mrb[169].mxu0  ;;  %v1923_v41 = vpop.f32.mrb[169].mxu1 }
 0x266   :  { %v1572_v42 = vpop.f32.mrb[170].mxu0  ;;  %v1924_v15 = vpop.f32.mrb[170].mxu1 }
 0x267   :  { %v2766_v5 = vpack.c.bf16 %v2158_v51, %v2157_v61  ;;  %v2064_v56 = vmax.f32 %v1976_v3, %v2020_v4  ;;  %v1977_v57 = vmax.f32 %v4200_v6, %v1572_v42  ;;  %v2021_v23 = vmax.f32 %v4201_v58, %v1924_v15  ;;  %v1574_v55 = vpop.f32.mrb[171].mxu0  ;;  %v1926_v24 = vpop.f32.mrb[171].mxu1 }
 0x269   :  { %2796 = vst [vmem:[%s4123_s3 + $0x98] sm:$0xff] %v2766_v5   ;;  %v2115_v52 = vadd.f32 %v3922_v9, %v2064_v56  ;;  %v2065_v13 = vmax.f32 %v1977_v57, %v2021_v23 }
 0x26b   :  { %v2116_v38 = vadd.f32 %v3922_v9, %v2065_v13  ;;  %v2159_v47 = vmax.f32 %v2115_v52, 0.0 }
 0x26c   :  { %v1577_v14 = vpop.f32.mrb[172].mxu0  ;;  %v1929_v43 = vpop.f32.mrb[172].mxu1 }
 0x26d   :  { %v2160_v7 = vmax.f32 %v2116_v38, 0.0  ;;  %v1978_v8 = vmax.f32 %v4202_v27, %v1577_v14  ;;  %v2022_v11 = vmax.f32 %v4203_v48, %v1929_v43  ;;  %v1579_v21 = vpop.f32.mrb[173].mxu0  ;;  %v1931_v22 = vpop.f32.mrb[173].mxu1 }
 0x26e   :  { %v1580_v29 = vpop.f32.mrb[174].mxu0  ;;  %v1932_v19 = vpop.f32.mrb[174].mxu1 }
 0x26f   :  { %v2771_v20 = vpack.c.bf16 %v2160_v7, %v2159_v47  ;;  %v2066_v30 = vmax.f32 %v1978_v8, %v2022_v11  ;;  %v1979_v12 = vmax.f32 %v4204_v25, %v1580_v29  ;;  %v2023_v54 = vmax.f32 %v4205_v53, %v1932_v19  ;;  %v1582_v63 = vpop.f32.mrb[175].mxu0  ;;  %v1934_v10 = vpop.f32.mrb[175].mxu1 }
 0x271   :  { %2797 = vst [vmem:[%s4123_s3 + $0xa0] sm:$0xff] %v2771_v20   ;;  %v2117_v0 = vadd.f32 %v3922_v9, %v2066_v30  ;;  %v2067_v31 = vmax.f32 %v1979_v12, %v2023_v54 }
 0x273   :  { %v2118_v33 = vadd.f32 %v3922_v9, %v2067_v31  ;;  %v2161_v28 = vmax.f32 %v2117_v0, 0.0 }
 0x275   :  { %v2162_v34 = vmax.f32 %v2118_v33, 0.0 }
 0x277   :  { %v2776_v32 = vpack.c.bf16 %v2162_v34, %v2161_v28 }
 0x279   :  { %2798 = vst [vmem:[%s4123_s3 + $0xa8] sm:$0xff] %v2776_v32  }

// kernel: mcadnnet_forward.6
= control target key start
LH: loop header
LB: loop body
LE: loop exit
PB: predicated region body
PF: predicated region fallthrough
CT: control target
= control target key end

     0   :  { %s1257_s1 = inlined_call_operand.vmem [shape: bf16[512,128], index: 1, kind: input, shape index: {}]   ;;  %s1258_s0 = inlined_call_operand.vmem [shape: bf16[4,32,512], index: 0, kind: input, shape index: {}]   ;;  %s1259_s2 = inlined_call_operand.vmem [shape: f32[1,128], index: 2, kind: input, shape index: {}]   ;;  %s1260_s3 = inlined_call_operand.vmem [shape: bf16[32,128], index: 3, kind: output, shape index: {}]  }
   0x1   :  { %v920_v0 = vld [vmem:[%s1257_s1 + $0x40] sm:$0xff]   ;;  %v924_v4 = vld [vmem:[%s1257_s1 + $0x48] sm:$0xff]   ;;  %v928_v8 = vld [vmem:[%s1257_s1 + $0x50] sm:$0xff]  }
   0x2   :  { %v921_v1 = vld [vmem:[%s1257_s1 + $0xc0] sm:$0xff]   ;;  %792 = vmatprep.subr.bf16.mxu0 %v920_v0  ;;  %v925_v5 = vld [vmem:[%s1257_s1 + $0xc8] sm:$0xff]   ;;  %v929_v9 = vld [vmem:[%s1257_s1 + $0xd0] sm:$0xff]  }
   0x3   :  { %v922_v2 = vld [vmem:[%s1257_s1] sm:$0xff]   ;;  %856 = vmatprep.subr.bf16.mxu1 %v921_v1  ;;  %v926_v6 = vld [vmem:[%s1257_s1 + $0x8] sm:$0xff]   ;;  %v930_v10 = vld [vmem:[%s1257_s1 + $0x10] sm:$0xff]  }
   0x4   :  { %v923_v3 = vld [vmem:[%s1257_s1 + $0x80] sm:$0xff]   ;;  %793 = vmatpush3.bf16.msra.mxu0 %v922_v2  ;;  %v927_v7 = vld [vmem:[%s1257_s1 + $0x88] sm:$0xff]   ;;  %v931_v11 = vld [vmem:[%s1257_s1 + $0x90] sm:$0xff]  }
   0x5   :  { %857 = vmatpush3.bf16.msra.mxu1 %v923_v3  ;;  %794 = vmatprep.subr.bf16.mxu0 %v924_v4  ;;  %v932_v12 = vld [vmem:[%s1257_s1 + $0x58] sm:$0xff]   ;;  %v936_v16 = vld [vmem:[%s1257_s1 + $0x60] sm:$0xff]   ;;  %v940_v20 = vld [vmem:[%s1257_s1 + $0x68] sm:$0xff]  }
   0x6   :  { %858 = vmatprep.subr.bf16.mxu1 %v925_v5  ;;  %v933_v13 = vld [vmem:[%s1257_s1 + $0xd8] sm:$0xff]   ;;  %v937_v17 = vld [vmem:[%s1257_s1 + $0xe0] sm:$0xff]   ;;  %v941_v21 = vld [vmem:[%s1257_s1 + $0xe8] sm:$0xff]  }
   0x7   :  { %v934_v14 = vld [vmem:[%s1257_s1 + $0x18] sm:$0xff]   ;;  %v938_v18 = vld [vmem:[%s1257_s1 + $0x20] sm:$0xff]   ;;  %v942_v22 = vld [vmem:[%s1257_s1 + $0x28] sm:$0xff]  }
   0x8   :  { %795 = vmatpush3.bf16.msra.mxu0 %v926_v6  ;;  %v935_v15 = vld [vmem:[%s1257_s1 + $0x98] sm:$0xff]   ;;  %v939_v19 = vld [vmem:[%s1257_s1 + $0xa0] sm:$0xff]   ;;  %v943_v23 = vld [vmem:[%s1257_s1 + $0xa8] sm:$0xff]  }
   0x9   :  { %859 = vmatpush3.bf16.msra.mxu1 %v927_v7  ;;  %796 = vmatprep.subr.bf16.mxu0 %v928_v8  ;;  %v944_v24 = vld [vmem:[%s1257_s1 + $0x70] sm:$0xff]   ;;  %v948_v28 = vld [vmem:[%s1257_s1 + $0x78] sm:$0xff]  }
   0xa   :  { %860 = vmatprep.subr.bf16.mxu1 %v929_v9  ;;  %v945_v25 = vld [vmem:[%s1257_s1 + $0xf0] sm:$0xff]   ;;  %v949_v29 = vld [vmem:[%s1257_s1 + $0xf8] sm:$0xff]  }
   0xb   :  { %v946_v26 = vld [vmem:[%s1257_s1 + $0x30] sm:$0xff]   ;;  %v950_v30 = vld [vmem:[%s1257_s1 + $0x38] sm:$0xff]  }
   0xc   :  { %797 = vmatpush3.bf16.msra.mxu0 %v930_v10  ;;  %v947_v27 = vld [vmem:[%s1257_s1 + $0xb0] sm:$0xff]   ;;  %v951_v31 = vld [vmem:[%s1257_s1 + $0xb8] sm:$0xff]  }
   0xd   :  { %861 = vmatpush3.bf16.msra.mxu1 %v931_v11  ;;  %798 = vmatprep.subr.bf16.mxu0 %v932_v12  ;;  %v952_v32 = vld [vmem:[%s1258_s0] ss:$16 sps:$4 sm:$0xff]   ;;  %v954_v33 = vld [vmem:[%s1258_s0 + $0x4] ss:$16 sps:$4 sm:$0xff]   ;;  %v955_v34 = vld [vmem:[%s1258_s0 + $0x8] ss:$16 sps:$4 sm:$0xff]  }
   0xe   :  { %862 = vmatprep.subr.bf16.mxu1 %v933_v13  ;;  %v957_v35 = vld [vmem:[%s1258_s0 + $0xc] ss:$16 sps:$4 sm:$0xff]   ;;  %495 = vmatprep.mubr.bf16.mxu0 %v954_v33  ;;  %v958_v36 = vld [vmem:[%s1258_s0 + $0x24] ss:$16 sps:$4 sm:$0xff]   ;;  %v962_v38 = vld [vmem:[%s1258_s0 + $0x20] ss:$16 sps:$4 sm:$0xff]  }
   0xf   :  { %592 = vmatprep.mubr.bf16.mxu1 %v957_v35  ;;  %v960_v37 = vld [vmem:[%s1258_s0 + $0x2c] ss:$16 sps:$4 sm:$0xff]   ;;  %v963_v39 = vld [vmem:[%s1258_s0 + $0x28] ss:$16 sps:$4 sm:$0xff]   ;;  %v964_v40 = vld [vmem:[%s1258_s0 + $0x44] ss:$16 sps:$4 sm:$0xff]  }
  0x10   :  { %799 = vmatpush3.bf16.msra.mxu0 %v934_v14  ;;  %v966_v41 = vld [vmem:[%s1258_s0 + $0x4c] ss:$16 sps:$4 sm:$0xff]   ;;  %v968_v42 = vld [vmem:[%s1258_s0 + $0x40] ss:$16 sps:$4 sm:$0xff]   ;;  %v969_v43 = vld [vmem:[%s1258_s0 + $0x48] ss:$16 sps:$4 sm:$0xff]  }
  0x11   :  { %863 = vmatpush3.bf16.msra.mxu1 %v935_v15  ;;  %800 = vmatprep.subr.bf16.mxu0 %v936_v16  ;;  %v970_v44 = vld [vmem:[%s1258_s0 + $0x64] ss:$16 sps:$4 sm:$0xff]   ;;  %v972_v45 = vld [vmem:[%s1258_s0 + $0x6c] ss:$16 sps:$4 sm:$0xff]   ;;  %v974_v46 = vld [vmem:[%s1258_s0 + $0x60] ss:$16 sps:$4 sm:$0xff]  }
  0x12   :  { %864 = vmatprep.subr.bf16.mxu1 %v937_v17  ;;  %v975_v47 = vld [vmem:[%s1258_s0 + $0x68] ss:$16 sps:$4 sm:$0xff]   ;;  %v976_v48 = vld [vmem:[%s1258_s0 + $0x84] ss:$16 sps:$4 sm:$0xff]   ;;  %v978_v49 = vld [vmem:[%s1258_s0 + $0x8c] ss:$16 sps:$4 sm:$0xff]  }
  0x13   :  { %v980_v50 = vld [vmem:[%s1258_s0 + $0x80] ss:$16 sps:$4 sm:$0xff]   ;;  %v981_v51 = vld [vmem:[%s1258_s0 + $0x88] ss:$16 sps:$4 sm:$0xff]   ;;  %v982_v52 = vld [vmem:[%s1258_s0 + $0xa4] ss:$16 sps:$4 sm:$0xff]  }
  0x14   :  { %801 = vmatpush3.bf16.msra.mxu0 %v938_v18  ;;  %v984_v53 = vld [vmem:[%s1258_s0 + $0xac] ss:$16 sps:$4 sm:$0xff]   ;;  %v986_v54 = vld [vmem:[%s1258_s0 + $0xa0] ss:$16 sps:$4 sm:$0xff]   ;;  %v987_v55 = vld [vmem:[%s1258_s0 + $0xa8] ss:$16 sps:$4 sm:$0xff]  }
  0x15   :  { %865 = vmatpush3.bf16.msra.mxu1 %v939_v19  ;;  %802 = vmatprep.subr.bf16.mxu0 %v940_v20  ;;  %v988_v56 = vld [vmem:[%s1258_s0 + $0xc4] ss:$16 sps:$4 sm:$0xff]   ;;  %v990_v57 = vld [vmem:[%s1258_s0 + $0xcc] ss:$16 sps:$4 sm:$0xff]   ;;  %v992_v58 = vld [vmem:[%s1258_s0 + $0xc0] ss:$16 sps:$4 sm:$0xff]  }
  0x16   :  { %866 = vmatprep.subr.bf16.mxu1 %v941_v21  ;;  %v993_v59 = vld [vmem:[%s1258_s0 + $0xc8] ss:$16 sps:$4 sm:$0xff]   ;;  %v994_v60 = vld [vmem:[%s1258_s0 + $0xe4] ss:$16 sps:$4 sm:$0xff]   ;;  %v996_v61 = vld [vmem:[%s1258_s0 + $0xec] ss:$16 sps:$4 sm:$0xff]  }
  0x17   :  { %v998_v62 = vld [vmem:[%s1258_s0 + $0xe0] ss:$16 sps:$4 sm:$0xff]   ;;  %v999_v63 = vld [vmem:[%s1258_s0 + $0xe8] ss:$16 sps:$4 sm:$0xff]  }
  0x18   :  { %803 = vmatpush3.bf16.msra.mxu0 %v942_v22 }
  0x19   :  { %867 = vmatpush3.bf16.msra.mxu1 %v943_v23  ;;  %804 = vmatprep.subr.bf16.mxu0 %v944_v24 }
  0x1a   :  { %868 = vmatprep.subr.bf16.mxu1 %v945_v25 }
  0x1c   :  { %805 = vmatpush3.bf16.msra.mxu0 %v946_v26 }
  0x1d   :  { %869 = vmatpush3.bf16.msra.mxu1 %v947_v27  ;;  %806 = vmatprep.subr.bf16.mxu0 %v948_v28 }
  0x1e   :  { %870 = vmatprep.subr.bf16.mxu1 %v949_v29 }
  0x20   :  { %807 = vmatpush3.bf16.msra.mxu0 %v950_v30 }
  0x21   :  { %871 = vmatpush3.bf16.msra.mxu1 %v951_v31 }
  0x23   :  { %496 = vmatmul.mubr.bf16.vlgmr.msra.gmra.mrb[0].mxu0 %v952_v32 }
  0x24   :  { %593 = vmatmul.mubr.bf16.vlgmr.msra.gmra.mrb[0].mxu1 %v955_v34  ;;  %503 = vmatprep.mubr.bf16.mxu0 %v958_v36 }
  0x25   :  { %600 = vmatprep.mubr.bf16.mxu1 %v960_v37 }
  0x2b   :  { %504 = vmatmul.mubr.bf16.gmra.mrb[4].mxu0 %v962_v38 }
  0x2c   :  { %601 = vmatmul.mubr.bf16.gmra.mrb[4].mxu1 %v963_v39  ;;  %511 = vmatprep.mubr.bf16.mxu0 %v964_v40 }
  0x2d   :  { %608 = vmatprep.mubr.bf16.mxu1 %v966_v41 }
  0x33   :  { %512 = vmatmul.mubr.bf16.gmra.mrb[8].mxu0 %v968_v42 }
  0x34   :  { %609 = vmatmul.mubr.bf16.gmra.mrb[8].mxu1 %v969_v43  ;;  %519 = vmatprep.mubr.bf16.mxu0 %v970_v44 }
  0x35   :  { %616 = vmatprep.mubr.bf16.mxu1 %v972_v45 }
  0x3b   :  { %520 = vmatmul.mubr.bf16.gmra.mrb[12].mxu0 %v974_v46 }
  0x3c   :  { %617 = vmatmul.mubr.bf16.gmra.mrb[12].mxu1 %v975_v47  ;;  %527 = vmatprep.mubr.bf16.mxu0 %v976_v48 }
  0x3d   :  { %624 = vmatprep.mubr.bf16.mxu1 %v978_v49 }
  0x43   :  { %528 = vmatmul.mubr.bf16.gmra.mrb[16].mxu0 %v980_v50 }
  0x44   :  { %625 = vmatmul.mubr.bf16.gmra.mrb[16].mxu1 %v981_v51  ;;  %535 = vmatprep.mubr.bf16.mxu0 %v982_v52 }
  0x45   :  { %632 = vmatprep.mubr.bf16.mxu1 %v984_v53 }
  0x4b   :  { %536 = vmatmul.mubr.bf16.gmra.mrb[20].mxu0 %v986_v54 }
  0x4c   :  { %633 = vmatmul.mubr.bf16.gmra.mrb[20].mxu1 %v987_v55  ;;  %543 = vmatprep.mubr.bf16.mxu0 %v988_v56 }
  0x4d   :  { %640 = vmatprep.mubr.bf16.mxu1 %v990_v57 }
  0x53   :  { %544 = vmatmul.mubr.bf16.gmra.mrb[24].mxu0 %v992_v58 }
  0x54   :  { %641 = vmatmul.mubr.bf16.gmra.mrb[24].mxu1 %v993_v59  ;;  %551 = vmatprep.mubr.bf16.mxu0 %v994_v60 }
  0x55   :  { %648 = vmatprep.mubr.bf16.mxu1 %v996_v61 }
  0x5b   :  { %552 = vmatmul.mubr.bf16.gmra.mrb[28].mxu0 %v998_v62 }
  0x5c   :  { %649 = vmatmul.mubr.bf16.gmra.mrb[28].mxu1 %v999_v63 }
  0xf6   :  { %v808_v0 = vpop.f32.mrb[0].mxu0 }
  0xf7   :  { %v872_v1 = vpop.f32.mrb[0].mxu1  ;;  %v809_v2 = vpop.f32.mrb[1].mxu0 }
  0xf8   :  { %v810_v3 = vadd.f32 %v809_v2, %v808_v0  ;;  %v873_v4 = vpop.f32.mrb[1].mxu1  ;;  %v811_v5 = vpop.f32.mrb[2].mxu0 }
  0xf9   :  { %v874_v6 = vadd.f32 %v873_v4, %v872_v1  ;;  %v875_v7 = vpop.f32.mrb[2].mxu1  ;;  %v812_v8 = vpop.f32.mrb[3].mxu0 }
  0xfa   :  { %v813_v9 = vadd.f32 %v812_v8, %v811_v5  ;;  %v876_v10 = vpop.f32.mrb[3].mxu1 }
  0xfb   :  { %v1212_v11 = vadd.f32 %v874_v6, %v810_v3  ;;  %v877_v12 = vadd.f32 %v876_v10, %v875_v7 }
  0xfd   :  { %v1214_v13 = vadd.f32 %v877_v12, %v813_v9 }
  0xfe   :  { %v814_v14 = vpop.f32.mrb[4].mxu0 }
  0xff   :  { %v878_v15 = vpop.f32.mrb[4].mxu1  ;;  %v815_v16 = vpop.f32.mrb[5].mxu0 }
 0x100   :  { %v816_v17 = vadd.f32 %v815_v16, %v814_v14  ;;  %v879_v18 = vpop.f32.mrb[5].mxu1  ;;  %v817_v19 = vpop.f32.mrb[6].mxu0 }
 0x101   :  { %v880_v20 = vadd.f32 %v879_v18, %v878_v15  ;;  %v881_v21 = vpop.f32.mrb[6].mxu1  ;;  %v818_v22 = vpop.f32.mrb[7].mxu0 }
 0x102   :  { %v819_v23 = vadd.f32 %v818_v22, %v817_v19  ;;  %v882_v24 = vpop.f32.mrb[7].mxu1 }
 0x103   :  { %v1216_v25 = vadd.f32 %v880_v20, %v816_v17  ;;  %v883_v26 = vadd.f32 %v882_v24, %v881_v21 }
 0x105   :  { %v1218_v27 = vadd.f32 %v883_v26, %v819_v23 }
 0x106   :  { %v820_v28 = vpop.f32.mrb[8].mxu0 }
 0x107   :  { %v884_v29 = vpop.f32.mrb[8].mxu1  ;;  %v821_v30 = vpop.f32.mrb[9].mxu0 }
 0x108   :  { %v822_v31 = vadd.f32 %v821_v30, %v820_v28  ;;  %v885_v32 = vpop.f32.mrb[9].mxu1  ;;  %v823_v33 = vpop.f32.mrb[10].mxu0 }
 0x109   :  { %v886_v34 = vadd.f32 %v885_v32, %v884_v29  ;;  %v887_v35 = vpop.f32.mrb[10].mxu1  ;;  %v824_v36 = vpop.f32.mrb[11].mxu0 }
 0x10a   :  { %v825_v37 = vadd.f32 %v824_v36, %v823_v33  ;;  %v888_v38 = vpop.f32.mrb[11].mxu1 }
 0x10b   :  { %v1220_v39 = vadd.f32 %v886_v34, %v822_v31  ;;  %v889_v40 = vadd.f32 %v888_v38, %v887_v35 }
 0x10d   :  { %v657_v41 = vmax.f32 %v1212_v11, %v1220_v39  ;;  %v1224_v42 = vadd.f32 %v889_v40, %v825_v37 }
 0x10e   :  { %v826_v43 = vpop.f32.mrb[12].mxu0 }
 0x10f   :  { %v658_v44 = vmax.f32 %v1214_v13, %v1224_v42  ;;  %v890_v45 = vpop.f32.mrb[12].mxu1  ;;  %v827_v46 = vpop.f32.mrb[13].mxu0 }
 0x110   :  { %v828_v47 = vadd.f32 %v827_v46, %v826_v43  ;;  %v891_v48 = vpop.f32.mrb[13].mxu1  ;;  %v829_v49 = vpop.f32.mrb[14].mxu0 }
 0x111   :  { %v892_v50 = vadd.f32 %v891_v48, %v890_v45  ;;  %v893_v51 = vpop.f32.mrb[14].mxu1  ;;  %v830_v52 = vpop.f32.mrb[15].mxu0 }
 0x112   :  { %v831_v53 = vadd.f32 %v830_v52, %v829_v49  ;;  %v894_v54 = vpop.f32.mrb[15].mxu1 }
 0x113   :  { %v1228_v55 = vadd.f32 %v892_v50, %v828_v47  ;;  %v895_v56 = vadd.f32 %v894_v54, %v893_v51  ;;  %v772_v47 = vld [vmem:[%s1259_s2] ss:$0 sm:$0xff] }
 0x115   :  { %v659_v57 = vmax.f32 %v1216_v25, %v1228_v55  ;;  %v1232_v58 = vadd.f32 %v895_v56, %v831_v53 }
 0x116   :  { %v832_v59 = vpop.f32.mrb[16].mxu0 }
 0x117   :  { %v660_v60 = vmax.f32 %v1218_v27, %v1232_v58  ;;  %v896_v61 = vpop.f32.mrb[16].mxu1  ;;  %v833_v62 = vpop.f32.mrb[17].mxu0 }
 0x118   :  { %v834_v63 = vadd.f32 %v833_v62, %v832_v59  ;;  %v897_v0 = vpop.f32.mrb[17].mxu1  ;;  %v835_v1 = vpop.f32.mrb[18].mxu0 }
 0x119   :  { %v898_v2 = vadd.f32 %v897_v0, %v896_v61  ;;  %v899_v3 = vpop.f32.mrb[18].mxu1  ;;  %v836_v4 = vpop.f32.mrb[19].mxu0 }
 0x11a   :  { %v837_v5 = vadd.f32 %v836_v4, %v835_v1  ;;  %v900_v6 = vpop.f32.mrb[19].mxu1 }
 0x11b   :  { %v627_v7 = vadd.f32 %v898_v2, %v834_v63  ;;  %v901_v8 = vadd.f32 %v900_v6, %v899_v3 }
 0x11d   :  { %v630_v9 = vadd.f32 %v901_v8, %v837_v5 }
 0x11e   :  { %v838_v10 = vpop.f32.mrb[20].mxu0 }
 0x11f   :  { %v902_v12 = vpop.f32.mrb[20].mxu1  ;;  %v839_v14 = vpop.f32.mrb[21].mxu0 }
 0x120   :  { %v840_v15 = vadd.f32 %v839_v14, %v838_v10  ;;  %v903_v16 = vpop.f32.mrb[21].mxu1  ;;  %v841_v17 = vpop.f32.mrb[22].mxu0 }
 0x121   :  { %v904_v18 = vadd.f32 %v903_v16, %v902_v12  ;;  %v905_v19 = vpop.f32.mrb[22].mxu1  ;;  %v842_v20 = vpop.f32.mrb[23].mxu0 }
 0x122   :  { %v843_v21 = vadd.f32 %v842_v20, %v841_v17  ;;  %v906_v22 = vpop.f32.mrb[23].mxu1 }
 0x123   :  { %v635_v23 = vadd.f32 %v904_v18, %v840_v15  ;;  %v907_v24 = vadd.f32 %v906_v22, %v905_v19 }
 0x125   :  { %v638_v26 = vadd.f32 %v907_v24, %v843_v21 }
 0x126   :  { %v844_v28 = vpop.f32.mrb[24].mxu0 }
 0x127   :  { %v908_v29 = vpop.f32.mrb[24].mxu1  ;;  %v845_v30 = vpop.f32.mrb[25].mxu0 }
 0x128   :  { %v846_v31 = vadd.f32 %v845_v30, %v844_v28  ;;  %v909_v32 = vpop.f32.mrb[25].mxu1  ;;  %v847_v33 = vpop.f32.mrb[26].mxu0 }
 0x129   :  { %v910_v34 = vadd.f32 %v909_v32, %v908_v29  ;;  %v911_v35 = vpop.f32.mrb[26].mxu1  ;;  %v848_v36 = vpop.f32.mrb[27].mxu0 }
 0x12a   :  { %v849_v37 = vadd.f32 %v848_v36, %v847_v33  ;;  %v912_v38 = vpop.f32.mrb[27].mxu1 }
 0x12b   :  { %v643_v40 = vadd.f32 %v910_v34, %v846_v31  ;;  %v913_v43 = vadd.f32 %v912_v38, %v911_v35 }
 0x12d   :  { %v661_v45 = vmax.f32 %v627_v7, %v643_v40  ;;  %v646_v46 = vadd.f32 %v913_v43, %v849_v37 }
 0x12e   :  { %v850_v48 = vpop.f32.mrb[28].mxu0 }
 0x12f   :  { %v665_v49 = vmax.f32 %v657_v41, %v661_v45  ;;  %v662_v50 = vmax.f32 %v630_v9, %v646_v46  ;;  %v914_v51 = vpop.f32.mrb[28].mxu1  ;;  %v851_v52 = vpop.f32.mrb[29].mxu0 }
 0x130   :  { %v852_v53 = vadd.f32 %v851_v52, %v850_v48  ;;  %v915_v54 = vpop.f32.mrb[29].mxu1  ;;  %v853_v56 = vpop.f32.mrb[30].mxu0 }
 0x131   :  { %v676_v59 = vadd.f32 %v772_v47, %v665_v49  ;;  %v666_v61 = vmax.f32 %v658_v44, %v662_v50  ;;  %v916_v62 = vadd.f32 %v915_v54, %v914_v51  ;;  %v917_v63 = vpop.f32.mrb[30].mxu1  ;;  %v854_v0 = vpop.f32.mrb[31].mxu0 }
 0x132   :  { %v855_v1 = vadd.f32 %v854_v0, %v853_v56  ;;  %v918_v2 = vpop.f32.mrb[31].mxu1 }
 0x133   :  { %v677_v3 = vadd.f32 %v772_v47, %v666_v61  ;;  %v651_v4 = vadd.f32 %v916_v62, %v852_v53  ;;  %v919_v11 = vadd.f32 %v918_v2, %v917_v63  ;;  %v680_v39 = vmax.f32 %v676_v59, 0.0 }
 0x135   :  { %v681_v41 = vmax.f32 %v677_v3, 0.0  ;;  %v663_v5 = vmax.f32 %v635_v23, %v651_v4  ;;  %v654_v6 = vadd.f32 %v919_v11, %v855_v1 }
 0x137   :  { %v784_v7 = vpack.c.bf16 %v681_v41, %v680_v39  ;;  %v667_v8 = vmax.f32 %v659_v57, %v663_v5  ;;  %v664_v9 = vmax.f32 %v638_v26, %v654_v6 }
 0x139   :  { %785 = vst [vmem:[%s1260_s3] sm:$0xff] %v784_v7   ;;  %v678_v13 = vadd.f32 %v772_v47, %v667_v8  ;;  %v668_v42 = vmax.f32 %v660_v60, %v664_v9 }
 0x13b   :  { %v679_v44 = vadd.f32 %v772_v47, %v668_v42  ;;  %v682_v10 = vmax.f32 %v678_v13, 0.0 }
 0x13d   :  { %v683_v12 = vmax.f32 %v679_v44, 0.0 }
 0x13f   :  { %v789_v14 = vpack.c.bf16 %v683_v12, %v682_v10 }
 0x141   :  { %791 = vst [vmem:[%s1260_s3 + $0x8] sm:$0xff] %v789_v14  }

// kernel: mcadnnet_forward.7
= control target key start
LH: loop header
LB: loop body
LE: loop exit
PB: predicated region body
PF: predicated region fallthrough
CT: control target
= control target key end

     0   :  { %s3894_s1 = inlined_call_operand.vmem [shape: bf16[2048,256], index: 1, kind: input, shape index: {}]   ;;  %s3895_s0 = inlined_call_operand.vmem [shape: bf16[16,2048], index: 0, kind: input, shape index: {}]   ;;  %s3896_s3 = inlined_call_operand.vmem [shape: bf16[256,128], index: 3, kind: input, shape index: {}]   ;;  %s3897_s2 = inlined_call_operand.vmem [shape: f32[1,256], index: 2, kind: input, shape index: {}]   ;;  %s3898_s4 = inlined_call_operand.vmem [shape: f32[1,128], index: 4, kind: input, shape index: {}]   ;;  %s3899_s5 = inlined_call_operand.vmem [shape: f32[16,128], index: 5, kind: output, shape index: {}]  }
   0x1   :  { %v2540_v0 = vld [vmem:[%s3894_s1 + $0x4] ss:$8 sps:$4 sm:$0xff]   ;;  %v2544_v2 = vld [vmem:[%s3894_s1] ss:$8 sps:$4 sm:$0xff]   ;;  %v2546_v4 = vld [vmem:[%s3894_s1 + $0x14] ss:$8 sps:$4 sm:$0xff]  }
   0x2   :  { %v2542_v1 = vld [vmem:[%s3894_s1 + $0x404] ss:$8 sps:$4 sm:$0xff]   ;;  %1665 = vmatprep.subr.bf16.mxu1 %v2540_v0  ;;  %v2545_v3 = vld [vmem:[%s3894_s1 + $0x400] ss:$8 sps:$4 sm:$0xff]   ;;  %v2548_v5 = vld [vmem:[%s3894_s1 + $0x414] ss:$8 sps:$4 sm:$0xff]  }
   0x3   :  { %1837 = vmatprep.subr.bf16.mxu0 %v2542_v1  ;;  %1666 = vmatpush1.bf16.msra.mxu1 %v2544_v2  ;;  %v2550_v6 = vld [vmem:[%s3894_s1 + $0x10] ss:$8 sps:$4 sm:$0xff]   ;;  %v2552_v8 = vld [vmem:[%s3894_s1 + $0x24] ss:$8 sps:$4 sm:$0xff]   ;;  %v2556_v10 = vld [vmem:[%s3894_s1 + $0x20] ss:$8 sps:$4 sm:$0xff]  }
   0x4   :  { %1838 = vmatpush1.bf16.msra.mxu0 %v2545_v3  ;;  %1667 = vmatprep.subr.bf16.mxu1 %v2546_v4  ;;  %v2551_v7 = vld [vmem:[%s3894_s1 + $0x410] ss:$8 sps:$4 sm:$0xff]   ;;  %v2554_v9 = vld [vmem:[%s3894_s1 + $0x424] ss:$8 sps:$4 sm:$0xff]   ;;  %v2557_v11 = vld [vmem:[%s3894_s1 + $0x420] ss:$8 sps:$4 sm:$0xff]  }
   0x5   :  { %1839 = vmatprep.subr.bf16.mxu0 %v2548_v5  ;;  %v2558_v12 = vld [vmem:[%s3894_s1 + $0x34] ss:$8 sps:$4 sm:$0xff]   ;;  %v2562_v14 = vld [vmem:[%s3894_s1 + $0x30] ss:$8 sps:$4 sm:$0xff]   ;;  %v2564_v16 = vld [vmem:[%s3894_s1 + $0x44] ss:$8 sps:$4 sm:$0xff]  }
   0x6   :  { %v2560_v13 = vld [vmem:[%s3894_s1 + $0x434] ss:$8 sps:$4 sm:$0xff]   ;;  %v2563_v15 = vld [vmem:[%s3894_s1 + $0x430] ss:$8 sps:$4 sm:$0xff]   ;;  %v2566_v17 = vld [vmem:[%s3894_s1 + $0x444] ss:$8 sps:$4 sm:$0xff]  }
   0x7   :  { %1668 = vmatpush1.bf16.msra.mxu1 %v2550_v6  ;;  %v2568_v18 = vld [vmem:[%s3894_s1 + $0x40] ss:$8 sps:$4 sm:$0xff]   ;;  %v2570_v20 = vld [vmem:[%s3894_s1 + $0x54] ss:$8 sps:$4 sm:$0xff]   ;;  %v2574_v22 = vld [vmem:[%s3894_s1 + $0x50] ss:$8 sps:$4 sm:$0xff]  }
   0x8   :  { %1840 = vmatpush1.bf16.msra.mxu0 %v2551_v7  ;;  %1669 = vmatprep.subr.bf16.mxu1 %v2552_v8  ;;  %v2569_v19 = vld [vmem:[%s3894_s1 + $0x440] ss:$8 sps:$4 sm:$0xff]   ;;  %v2572_v21 = vld [vmem:[%s3894_s1 + $0x454] ss:$8 sps:$4 sm:$0xff]   ;;  %v2575_v23 = vld [vmem:[%s3894_s1 + $0x450] ss:$8 sps:$4 sm:$0xff]  }
   0x9   :  { %1841 = vmatprep.subr.bf16.mxu0 %v2554_v9  ;;  %v2576_v24 = vld [vmem:[%s3894_s1 + $0x64] ss:$8 sps:$4 sm:$0xff]   ;;  %v2580_v26 = vld [vmem:[%s3894_s1 + $0x60] ss:$8 sps:$4 sm:$0xff]   ;;  %v2582_v28 = vld [vmem:[%s3894_s1 + $0x74] ss:$8 sps:$4 sm:$0xff]  }
   0xa   :  { %v2578_v25 = vld [vmem:[%s3894_s1 + $0x464] ss:$8 sps:$4 sm:$0xff]   ;;  %v2581_v27 = vld [vmem:[%s3894_s1 + $0x460] ss:$8 sps:$4 sm:$0xff]   ;;  %v2584_v29 = vld [vmem:[%s3894_s1 + $0x474] ss:$8 sps:$4 sm:$0xff]  }
   0xb   :  { %1670 = vmatpush1.bf16.msra.mxu1 %v2556_v10  ;;  %v2586_v30 = vld [vmem:[%s3894_s1 + $0x70] ss:$8 sps:$4 sm:$0xff]   ;;  %v2588_v32 = vld [vmem:[%s3894_s1 + $0x84] ss:$8 sps:$4 sm:$0xff]   ;;  %v2592_v34 = vld [vmem:[%s3894_s1 + $0x80] ss:$8 sps:$4 sm:$0xff]  }
   0xc   :  { %1842 = vmatpush1.bf16.msra.mxu0 %v2557_v11  ;;  %1671 = vmatprep.subr.bf16.mxu1 %v2558_v12  ;;  %v2587_v31 = vld [vmem:[%s3894_s1 + $0x470] ss:$8 sps:$4 sm:$0xff]   ;;  %v2590_v33 = vld [vmem:[%s3894_s1 + $0x484] ss:$8 sps:$4 sm:$0xff]   ;;  %v2593_v35 = vld [vmem:[%s3894_s1 + $0x480] ss:$8 sps:$4 sm:$0xff]  }
   0xd   :  { %1843 = vmatprep.subr.bf16.mxu0 %v2560_v13  ;;  %v2594_v36 = vld [vmem:[%s3894_s1 + $0x94] ss:$8 sps:$4 sm:$0xff]   ;;  %v2598_v38 = vld [vmem:[%s3894_s1 + $0x90] ss:$8 sps:$4 sm:$0xff]   ;;  %v2600_v40 = vld [vmem:[%s3894_s1 + $0xa4] ss:$8 sps:$4 sm:$0xff]  }
   0xe   :  { %v2596_v37 = vld [vmem:[%s3894_s1 + $0x494] ss:$8 sps:$4 sm:$0xff]   ;;  %v2599_v39 = vld [vmem:[%s3894_s1 + $0x490] ss:$8 sps:$4 sm:$0xff]   ;;  %v2602_v41 = vld [vmem:[%s3894_s1 + $0x4a4] ss:$8 sps:$4 sm:$0xff]  }
   0xf   :  { %1672 = vmatpush1.bf16.msra.mxu1 %v2562_v14  ;;  %v2604_v42 = vld [vmem:[%s3894_s1 + $0xa0] ss:$8 sps:$4 sm:$0xff]   ;;  %v2606_v44 = vld [vmem:[%s3894_s1 + $0xb4] ss:$8 sps:$4 sm:$0xff]   ;;  %v2610_v46 = vld [vmem:[%s3894_s1 + $0xb0] ss:$8 sps:$4 sm:$0xff]  }
  0x10   :  { %1844 = vmatpush1.bf16.msra.mxu0 %v2563_v15  ;;  %1673 = vmatprep.subr.bf16.mxu1 %v2564_v16  ;;  %v2605_v43 = vld [vmem:[%s3894_s1 + $0x4a0] ss:$8 sps:$4 sm:$0xff]   ;;  %v2608_v45 = vld [vmem:[%s3894_s1 + $0x4b4] ss:$8 sps:$4 sm:$0xff]   ;;  %v2611_v47 = vld [vmem:[%s3894_s1 + $0x4b0] ss:$8 sps:$4 sm:$0xff]  }
  0x11   :  { %1845 = vmatprep.subr.bf16.mxu0 %v2566_v17  ;;  %v21_v48 = vld [vmem:[%s3895_s0] sm:$0xff]  ;;  %v2618_v58 = vld [vmem:[%s3894_s1 + $0xd4] ss:$8 sps:$4 sm:$0xff]   ;;  %v2622_v60 = vld [vmem:[%s3894_s1 + $0xd0] ss:$8 sps:$4 sm:$0xff]  }
  0x12   :  { %v29_v49 = vld [vmem:[%s3895_s0 + $0x40] sm:$0xff]  ;;  %v2620_v59 = vld [vmem:[%s3894_s1 + $0x4d4] ss:$8 sps:$4 sm:$0xff]   ;;  %v2623_v61 = vld [vmem:[%s3894_s1 + $0x4d0] ss:$8 sps:$4 sm:$0xff]  }
  0x13   :  { %1674 = vmatpush1.bf16.msra.mxu1 %v2568_v18  ;;  %v2612_v50 = vld [vmem:[%s3894_s1 + $0xc4] ss:$8 sps:$4 sm:$0xff]   ;;  %v2198_v52 = vcombine.high %v21_v48, %v29_v49  ;;  %v2616_v56 = vld [vmem:[%s3894_s1 + $0xc0] ss:$8 sps:$4 sm:$0xff]   ;;  %v2630_v2 = vld [vmem:[%s3894_s1 + $0xf4] ss:$8 sps:$4 sm:$0xff]   ;;  %v2197_v8 = vcombine.low %v21_v48, %v29_v49 }
  0x14   :  { %1846 = vmatpush1.bf16.msra.mxu0 %v2569_v19  ;;  %1675 = vmatprep.subr.bf16.mxu1 %v2570_v20  ;;  %v2614_v51 = vld [vmem:[%s3894_s1 + $0x4c4] ss:$8 sps:$4 sm:$0xff]   ;;  %v2617_v57 = vld [vmem:[%s3894_s1 + $0x4c0] ss:$8 sps:$4 sm:$0xff]   ;;  %v2632_v3 = vld [vmem:[%s3894_s1 + $0x4f4] ss:$8 sps:$4 sm:$0xff]  }
  0x15   :  { %1847 = vmatprep.subr.bf16.mxu0 %v2572_v21  ;;  %v25_v53 = vld [vmem:[%s3895_s0 + $0x20] sm:$0xff]  ;;  %1697 = vmatprep.mubr.bf16.mxu1 %v2198_v52  ;;  %v2634_v4 = vld [vmem:[%s3894_s1 + $0xf0] ss:$8 sps:$4 sm:$0xff]   ;;  %v2644_v12 = vld [vmem:[%s3894_s1 + $0x114] ss:$8 sps:$4 sm:$0xff]  }
  0x16   :  { %v33_v54 = vld [vmem:[%s3895_s0 + $0x60] sm:$0xff]  ;;  %v2635_v5 = vld [vmem:[%s3894_s1 + $0x4f0] ss:$8 sps:$4 sm:$0xff]   ;;  %v2647_v13 = vld [vmem:[%s3894_s1 + $0x514] ss:$8 sps:$4 sm:$0xff]  }
  0x17   :  { %1676 = vmatpush1.bf16.msra.mxu1 %v2574_v22  ;;  %v2206_v55 = vcombine.high %v25_v53, %v33_v54  ;;  %v2624_v62 = vld [vmem:[%s3894_s1 + $0xe4] ss:$8 sps:$4 sm:$0xff]   ;;  %v2628_v0 = vld [vmem:[%s3894_s1 + $0xe0] ss:$8 sps:$4 sm:$0xff]   ;;  %v2205_v10 = vcombine.low %v25_v53, %v33_v54  ;;  %v2642_v14 = vld [vmem:[%s3894_s1 + $0x110] ss:$8 sps:$4 sm:$0xff]  }
  0x18   :  { %1848 = vmatpush1.bf16.msra.mxu0 %v2575_v23  ;;  %1677 = vmatprep.subr.bf16.mxu1 %v2576_v24  ;;  %v2626_v63 = vld [vmem:[%s3894_s1 + $0x4e4] ss:$8 sps:$4 sm:$0xff]   ;;  %v2629_v1 = vld [vmem:[%s3894_s1 + $0x4e0] ss:$8 sps:$4 sm:$0xff]   ;;  %v2645_v15 = vld [vmem:[%s3894_s1 + $0x510] ss:$8 sps:$4 sm:$0xff]  }
  0x19   :  { %1849 = vmatprep.subr.bf16.mxu0 %v2578_v25  ;;  %1869 = vmatprep.mubr.bf16.mxu0 %v2206_v55  ;;  %v2638_v6 = vld [vmem:[%s3894_s1 + $0x104] ss:$8 sps:$4 sm:$0xff]   ;;  %v2636_v9 = vld [vmem:[%s3894_s1 + $0x100] ss:$8 sps:$4 sm:$0xff]   ;;  %v2656_v20 = vld [vmem:[%s3894_s1 + $0x134] ss:$8 sps:$4 sm:$0xff]  }
  0x1a   :  { %v2641_v7 = vld [vmem:[%s3894_s1 + $0x504] ss:$8 sps:$4 sm:$0xff]   ;;  %v2639_v11 = vld [vmem:[%s3894_s1 + $0x500] ss:$8 sps:$4 sm:$0xff]   ;;  %v2659_v21 = vld [vmem:[%s3894_s1 + $0x534] ss:$8 sps:$4 sm:$0xff]  }
  0x1b   :  { %1678 = vmatpush1.bf16.msra.mxu1 %v2580_v26  ;;  %v2650_v16 = vld [vmem:[%s3894_s1 + $0x124] ss:$8 sps:$4 sm:$0xff]   ;;  %v2648_v18 = vld [vmem:[%s3894_s1 + $0x120] ss:$8 sps:$4 sm:$0xff]   ;;  %v2654_v22 = vld [vmem:[%s3894_s1 + $0x130] ss:$8 sps:$4 sm:$0xff]  }
  0x1c   :  { %1850 = vmatpush1.bf16.msra.mxu0 %v2581_v27  ;;  %1679 = vmatprep.subr.bf16.mxu1 %v2582_v28  ;;  %v2653_v17 = vld [vmem:[%s3894_s1 + $0x524] ss:$8 sps:$4 sm:$0xff]   ;;  %v2651_v19 = vld [vmem:[%s3894_s1 + $0x520] ss:$8 sps:$4 sm:$0xff]   ;;  %v2657_v23 = vld [vmem:[%s3894_s1 + $0x530] ss:$8 sps:$4 sm:$0xff]  }
  0x1d   :  { %1851 = vmatprep.subr.bf16.mxu0 %v2584_v29  ;;  %v2662_v24 = vld [vmem:[%s3894_s1 + $0x144] ss:$8 sps:$4 sm:$0xff]   ;;  %v2660_v26 = vld [vmem:[%s3894_s1 + $0x140] ss:$8 sps:$4 sm:$0xff]   ;;  %v2668_v28 = vld [vmem:[%s3894_s1 + $0x154] ss:$8 sps:$4 sm:$0xff]  }
  0x1e   :  { %v2665_v25 = vld [vmem:[%s3894_s1 + $0x544] ss:$8 sps:$4 sm:$0xff]   ;;  %v2663_v27 = vld [vmem:[%s3894_s1 + $0x540] ss:$8 sps:$4 sm:$0xff]   ;;  %v2671_v29 = vld [vmem:[%s3894_s1 + $0x554] ss:$8 sps:$4 sm:$0xff]  }
  0x1f   :  { %1680 = vmatpush1.bf16.msra.mxu1 %v2586_v30  ;;  %v2666_v30 = vld [vmem:[%s3894_s1 + $0x150] ss:$8 sps:$4 sm:$0xff]   ;;  %v2684_v48 = vld [vmem:[%s3894_s1 + $0x180] ss:$8 sps:$4 sm:$0xff]   ;;  %v2698_v54 = vld [vmem:[%s3894_s1 + $0x1a4] ss:$8 sps:$4 sm:$0xff]  }
  0x20   :  { %1852 = vmatpush1.bf16.msra.mxu0 %v2587_v31  ;;  %1681 = vmatprep.subr.bf16.mxu1 %v2588_v32  ;;  %v2669_v31 = vld [vmem:[%s3894_s1 + $0x550] ss:$8 sps:$4 sm:$0xff]   ;;  %v2674_v32 = vld [vmem:[%s3894_s1 + $0x164] ss:$8 sps:$4 sm:$0xff]   ;;  %v2687_v49 = vld [vmem:[%s3894_s1 + $0x580] ss:$8 sps:$4 sm:$0xff]  }
  0x21   :  { %1853 = vmatprep.subr.bf16.mxu0 %v2590_v33  ;;  %v2677_v33 = vld [vmem:[%s3894_s1 + $0x564] ss:$8 sps:$4 sm:$0xff]   ;;  %v2690_v52 = vld [vmem:[%s3894_s1 + $0x190] ss:$8 sps:$4 sm:$0xff]  }
  0x22   :  { %v2693_v53 = vld [vmem:[%s3894_s1 + $0x590] ss:$8 sps:$4 sm:$0xff]   ;;  %v2701_v55 = vld [vmem:[%s3894_s1 + $0x5a4] ss:$8 sps:$4 sm:$0xff]  }
  0x23   :  { %1682 = vmatpush1.bf16.msra.mxu1 %v2592_v34  ;;  %v2672_v34 = vld [vmem:[%s3894_s1 + $0x160] ss:$8 sps:$4 sm:$0xff]  }
  0x24   :  { %1854 = vmatpush1.bf16.msra.mxu0 %v2593_v35  ;;  %1683 = vmatprep.subr.bf16.mxu1 %v2594_v36  ;;  %v2675_v35 = vld [vmem:[%s3894_s1 + $0x560] ss:$8 sps:$4 sm:$0xff]  }
  0x25   :  { %1855 = vmatprep.subr.bf16.mxu0 %v2596_v37  ;;  %v3261_v36 = vld [vmem:[%s3895_s0 + $0x8] sm:$0xff] }
  0x26   :  { %v3266_v37 = vld [vmem:[%s3895_s0 + $0x48] sm:$0xff] }
  0x27   :  { %1684 = vmatpush1.bf16.msra.mxu1 %v2598_v38  ;;  %v2680_v38 = vld [vmem:[%s3894_s1 + $0x174] ss:$8 sps:$4 sm:$0xff]  }
  0x28   :  { %1856 = vmatpush1.bf16.msra.mxu0 %v2599_v39  ;;  %1685 = vmatprep.subr.bf16.mxu1 %v2600_v40  ;;  %v2683_v39 = vld [vmem:[%s3894_s1 + $0x574] ss:$8 sps:$4 sm:$0xff]   ;;  %v2200_v40 = vcombine.high %v3261_v36, %v3266_v37 }
  0x29   :  { %1857 = vmatprep.subr.bf16.mxu0 %v2602_v41  ;;  %v3279_v41 = vld [vmem:[%s3895_s0 + $0x28] sm:$0xff] }
  0x2b   :  { %1686 = vmatpush1.bf16.msra.mxu1 %v2604_v42  ;;  %v3284_v42 = vld [vmem:[%s3895_s0 + $0x68] sm:$0xff] }
  0x2c   :  { %1858 = vmatpush1.bf16.msra.mxu0 %v2605_v43  ;;  %1687 = vmatprep.subr.bf16.mxu1 %v2606_v44  ;;  %v2208_v43 = vcombine.high %v3279_v41, %v3284_v42  ;;  %v2678_v44 = vld [vmem:[%s3894_s1 + $0x170] ss:$8 sps:$4 sm:$0xff]  }
  0x2d   :  { %1859 = vmatprep.subr.bf16.mxu0 %v2608_v45  ;;  %v2681_v45 = vld [vmem:[%s3894_s1 + $0x570] ss:$8 sps:$4 sm:$0xff]  }
  0x2f   :  { %1688 = vmatpush1.bf16.msra.mxu1 %v2610_v46  ;;  %v2686_v46 = vld [vmem:[%s3894_s1 + $0x184] ss:$8 sps:$4 sm:$0xff]  }
  0x30   :  { %1860 = vmatpush1.bf16.msra.mxu0 %v2611_v47  ;;  %1689 = vmatprep.subr.bf16.mxu1 %v2612_v50  ;;  %v2689_v47 = vld [vmem:[%s3894_s1 + $0x584] ss:$8 sps:$4 sm:$0xff]   ;;  %v2692_v50 = vld [vmem:[%s3894_s1 + $0x194] ss:$8 sps:$4 sm:$0xff]  }
  0x31   :  { %1861 = vmatprep.subr.bf16.mxu0 %v2614_v51  ;;  %v2695_v51 = vld [vmem:[%s3894_s1 + $0x594] ss:$8 sps:$4 sm:$0xff]  }
  0x33   :  { %1690 = vmatpush1.bf16.msra.mxu1 %v2616_v56  ;;  %v2696_v56 = vld [vmem:[%s3894_s1 + $0x1a0] ss:$8 sps:$4 sm:$0xff]  }
  0x34   :  { %1862 = vmatpush1.bf16.msra.mxu0 %v2617_v57  ;;  %1691 = vmatprep.subr.bf16.mxu1 %v2618_v58  ;;  %v2699_v57 = vld [vmem:[%s3894_s1 + $0x5a0] ss:$8 sps:$4 sm:$0xff]   ;;  %v2704_v58 = vld [vmem:[%s3894_s1 + $0x1b4] ss:$8 sps:$4 sm:$0xff]  }
  0x35   :  { %1863 = vmatprep.subr.bf16.mxu0 %v2620_v59  ;;  %v2707_v59 = vld [vmem:[%s3894_s1 + $0x5b4] ss:$8 sps:$4 sm:$0xff]  }
  0x37   :  { %1692 = vmatpush1.bf16.msra.mxu1 %v2622_v60  ;;  %v2702_v60 = vld [vmem:[%s3894_s1 + $0x1b0] ss:$8 sps:$4 sm:$0xff]  }
  0x38   :  { %1864 = vmatpush1.bf16.msra.mxu0 %v2623_v61  ;;  %1693 = vmatprep.subr.bf16.mxu1 %v2624_v62  ;;  %v2705_v61 = vld [vmem:[%s3894_s1 + $0x5b0] ss:$8 sps:$4 sm:$0xff]   ;;  %v2710_v62 = vld [vmem:[%s3894_s1 + $0x1c4] ss:$8 sps:$4 sm:$0xff]  }
  0x39   :  { %1865 = vmatprep.subr.bf16.mxu0 %v2626_v63  ;;  %v2713_v63 = vld [vmem:[%s3894_s1 + $0x5c4] ss:$8 sps:$4 sm:$0xff]  }
  0x3b   :  { %1694 = vmatpush1.bf16.msra.mxu1 %v2628_v0  ;;  %v2708_v0 = vld [vmem:[%s3894_s1 + $0x1c0] ss:$8 sps:$4 sm:$0xff]  }
  0x3c   :  { %1866 = vmatpush1.bf16.msra.mxu0 %v2629_v1  ;;  %1695 = vmatprep.subr.bf16.mxu1 %v2630_v2  ;;  %v2711_v1 = vld [vmem:[%s3894_s1 + $0x5c0] ss:$8 sps:$4 sm:$0xff]   ;;  %v2716_v2 = vld [vmem:[%s3894_s1 + $0x1d4] ss:$8 sps:$4 sm:$0xff]  }
  0x3d   :  { %1867 = vmatprep.subr.bf16.mxu0 %v2632_v3  ;;  %v2719_v3 = vld [vmem:[%s3894_s1 + $0x5d4] ss:$8 sps:$4 sm:$0xff]  }
  0x3f   :  { %1696 = vmatpush1.bf16.msra.mxu1 %v2634_v4  ;;  %v2714_v4 = vld [vmem:[%s3894_s1 + $0x1d0] ss:$8 sps:$4 sm:$0xff]  }
  0x40   :  { %1868 = vmatpush1.bf16.msra.mxu0 %v2635_v5  ;;  %1708 = vmatprep.subr.bf16.mxu1 %v2638_v6  ;;  %v2717_v5 = vld [vmem:[%s3894_s1 + $0x5d0] ss:$8 sps:$4 sm:$0xff]   ;;  %v2722_v6 = vld [vmem:[%s3894_s1 + $0x1e4] ss:$8 sps:$4 sm:$0xff]  }
  0x41   :  { %1880 = vmatprep.subr.bf16.mxu0 %v2641_v7  ;;  %v2725_v7 = vld [vmem:[%s3894_s1 + $0x5e4] ss:$8 sps:$4 sm:$0xff]  }
  0x42   :  { %1698 = vmatmul.mubr.bf16.vlgmr.msra.gmra.mrb[0].mxu1 %v2197_v8  ;;  %v2720_v8 = vld [vmem:[%s3894_s1 + $0x1e0] ss:$8 sps:$4 sm:$0xff]  }
  0x43   :  { %1870 = vmatmul.mubr.bf16.vlgmr.msra.gmra.mrb[0].mxu0 %v2205_v10  ;;  %1709 = vmatpush1.bf16.msra.mxu1 %v2636_v9  ;;  %v2723_v9 = vld [vmem:[%s3894_s1 + $0x5e0] ss:$8 sps:$4 sm:$0xff]   ;;  %v2728_v10 = vld [vmem:[%s3894_s1 + $0x1f4] ss:$8 sps:$4 sm:$0xff]  }
  0x44   :  { %1881 = vmatpush1.bf16.msra.mxu0 %v2639_v11  ;;  %1710 = vmatprep.subr.bf16.mxu1 %v2644_v12  ;;  %v2731_v11 = vld [vmem:[%s3894_s1 + $0x5f4] ss:$8 sps:$4 sm:$0xff]   ;;  %v2726_v12 = vld [vmem:[%s3894_s1 + $0x1f0] ss:$8 sps:$4 sm:$0xff]  }
  0x45   :  { %1882 = vmatprep.subr.bf16.mxu0 %v2647_v13  ;;  %1740 = vmatprep.mubr.bf16.mxu1 %v2200_v40  ;;  %v2729_v13 = vld [vmem:[%s3894_s1 + $0x5f0] ss:$8 sps:$4 sm:$0xff]   ;;  %v2756_v40 = vld [vmem:[%s3894_s1 + $0x240] ss:$8 sps:$4 sm:$0xff]  }
  0x46   :  { %1912 = vmatprep.mubr.bf16.mxu0 %v2208_v43  ;;  %v2767_v43 = vld [vmem:[%s3894_s1 + $0x654] ss:$8 sps:$4 sm:$0xff]  }
  0x47   :  { %1711 = vmatpush1.bf16.msra.mxu1 %v2642_v14  ;;  %v2734_v14 = vld [vmem:[%s3894_s1 + $0x204] ss:$8 sps:$4 sm:$0xff]  }
  0x48   :  { %1883 = vmatpush1.bf16.msra.mxu0 %v2645_v15  ;;  %1712 = vmatprep.subr.bf16.mxu1 %v2650_v16  ;;  %v2737_v15 = vld [vmem:[%s3894_s1 + $0x604] ss:$8 sps:$4 sm:$0xff]   ;;  %v2199_v16 = vcombine.low %v3261_v36, %v3266_v37  ;;  %v2750_v36 = vld [vmem:[%s3894_s1 + $0x230] ss:$8 sps:$4 sm:$0xff]  }
  0x49   :  { %1884 = vmatprep.subr.bf16.mxu0 %v2653_v17  ;;  %v2732_v17 = vld [vmem:[%s3894_s1 + $0x200] ss:$8 sps:$4 sm:$0xff]   ;;  %v2753_v37 = vld [vmem:[%s3894_s1 + $0x630] ss:$8 sps:$4 sm:$0xff]  }
  0x4b   :  { %1713 = vmatpush1.bf16.msra.mxu1 %v2648_v18  ;;  %v2207_v18 = vcombine.low %v3279_v41, %v3284_v42  ;;  %v2759_v41 = vld [vmem:[%s3894_s1 + $0x640] ss:$8 sps:$4 sm:$0xff]   ;;  %v2764_v42 = vld [vmem:[%s3894_s1 + $0x254] ss:$8 sps:$4 sm:$0xff]  }
  0x4c   :  { %1885 = vmatpush1.bf16.msra.mxu0 %v2651_v19  ;;  %1714 = vmatprep.subr.bf16.mxu1 %v2656_v20  ;;  %v2735_v19 = vld [vmem:[%s3894_s1 + $0x600] ss:$8 sps:$4 sm:$0xff]   ;;  %v2740_v20 = vld [vmem:[%s3894_s1 + $0x214] ss:$8 sps:$4 sm:$0xff]  }
  0x4d   :  { %1886 = vmatprep.subr.bf16.mxu0 %v2659_v21  ;;  %v2743_v21 = vld [vmem:[%s3894_s1 + $0x614] ss:$8 sps:$4 sm:$0xff]  }
  0x4f   :  { %1715 = vmatpush1.bf16.msra.mxu1 %v2654_v22  ;;  %v2738_v22 = vld [vmem:[%s3894_s1 + $0x210] ss:$8 sps:$4 sm:$0xff]  }
  0x50   :  { %1887 = vmatpush1.bf16.msra.mxu0 %v2657_v23  ;;  %1716 = vmatprep.subr.bf16.mxu1 %v2662_v24  ;;  %v2741_v23 = vld [vmem:[%s3894_s1 + $0x610] ss:$8 sps:$4 sm:$0xff]  }
  0x51   :  { %1888 = vmatprep.subr.bf16.mxu0 %v2665_v25  ;;  %v3421_v24 = vld [vmem:[%s3895_s0 + $0x10] sm:$0xff] }
  0x52   :  { %v3426_v25 = vld [vmem:[%s3895_s0 + $0x50] sm:$0xff] }
  0x53   :  { %1717 = vmatpush1.bf16.msra.mxu1 %v2660_v26  ;;  %v2746_v26 = vld [vmem:[%s3894_s1 + $0x224] ss:$8 sps:$4 sm:$0xff]  }
  0x54   :  { %1889 = vmatpush1.bf16.msra.mxu0 %v2663_v27  ;;  %1718 = vmatprep.subr.bf16.mxu1 %v2668_v28  ;;  %v2749_v27 = vld [vmem:[%s3894_s1 + $0x624] ss:$8 sps:$4 sm:$0xff]   ;;  %v2202_v28 = vcombine.high %v3421_v24, %v3426_v25 }
  0x55   :  { %1890 = vmatprep.subr.bf16.mxu0 %v2671_v29  ;;  %v3439_v29 = vld [vmem:[%s3895_s0 + $0x30] sm:$0xff] }
  0x57   :  { %1719 = vmatpush1.bf16.msra.mxu1 %v2666_v30  ;;  %v3444_v30 = vld [vmem:[%s3895_s0 + $0x70] sm:$0xff] }
  0x58   :  { %1891 = vmatpush1.bf16.msra.mxu0 %v2669_v31  ;;  %1720 = vmatprep.subr.bf16.mxu1 %v2674_v32  ;;  %v2210_v31 = vcombine.high %v3439_v29, %v3444_v30  ;;  %v2744_v32 = vld [vmem:[%s3894_s1 + $0x220] ss:$8 sps:$4 sm:$0xff]  }
  0x59   :  { %1892 = vmatprep.subr.bf16.mxu0 %v2677_v33  ;;  %v2747_v33 = vld [vmem:[%s3894_s1 + $0x620] ss:$8 sps:$4 sm:$0xff]  }
  0x5b   :  { %1721 = vmatpush1.bf16.msra.mxu1 %v2672_v34  ;;  %v2752_v34 = vld [vmem:[%s3894_s1 + $0x234] ss:$8 sps:$4 sm:$0xff]  }
  0x5c   :  { %1893 = vmatpush1.bf16.msra.mxu0 %v2675_v35  ;;  %1722 = vmatprep.subr.bf16.mxu1 %v2680_v38  ;;  %v2755_v35 = vld [vmem:[%s3894_s1 + $0x634] ss:$8 sps:$4 sm:$0xff]   ;;  %v2758_v38 = vld [vmem:[%s3894_s1 + $0x244] ss:$8 sps:$4 sm:$0xff]  }
  0x5d   :  { %1894 = vmatprep.subr.bf16.mxu0 %v2683_v39  ;;  %v2761_v39 = vld [vmem:[%s3894_s1 + $0x644] ss:$8 sps:$4 sm:$0xff]  }
  0x5f   :  { %1723 = vmatpush1.bf16.msra.mxu1 %v2678_v44  ;;  %v2762_v44 = vld [vmem:[%s3894_s1 + $0x250] ss:$8 sps:$4 sm:$0xff]  }
  0x60   :  { %1895 = vmatpush1.bf16.msra.mxu0 %v2681_v45  ;;  %1724 = vmatprep.subr.bf16.mxu1 %v2686_v46  ;;  %v2765_v45 = vld [vmem:[%s3894_s1 + $0x650] ss:$8 sps:$4 sm:$0xff]   ;;  %v2770_v46 = vld [vmem:[%s3894_s1 + $0x264] ss:$8 sps:$4 sm:$0xff]  }
  0x61   :  { %1896 = vmatprep.subr.bf16.mxu0 %v2689_v47  ;;  %v2773_v47 = vld [vmem:[%s3894_s1 + $0x664] ss:$8 sps:$4 sm:$0xff]  }
  0x63   :  { %1725 = vmatpush1.bf16.msra.mxu1 %v2684_v48  ;;  %v2768_v48 = vld [vmem:[%s3894_s1 + $0x260] ss:$8 sps:$4 sm:$0xff]  }
  0x64   :  { %1897 = vmatpush1.bf16.msra.mxu0 %v2687_v49  ;;  %1726 = vmatprep.subr.bf16.mxu1 %v2692_v50  ;;  %v2771_v49 = vld [vmem:[%s3894_s1 + $0x660] ss:$8 sps:$4 sm:$0xff]   ;;  %v2776_v50 = vld [vmem:[%s3894_s1 + $0x274] ss:$8 sps:$4 sm:$0xff]  }
  0x65   :  { %1898 = vmatprep.subr.bf16.mxu0 %v2695_v51  ;;  %v2779_v51 = vld [vmem:[%s3894_s1 + $0x674] ss:$8 sps:$4 sm:$0xff]  }
  0x67   :  { %1727 = vmatpush1.bf16.msra.mxu1 %v2690_v52  ;;  %v2774_v52 = vld [vmem:[%s3894_s1 + $0x270] ss:$8 sps:$4 sm:$0xff]  }
  0x68   :  { %1899 = vmatpush1.bf16.msra.mxu0 %v2693_v53  ;;  %1728 = vmatprep.subr.bf16.mxu1 %v2698_v54  ;;  %v2777_v53 = vld [vmem:[%s3894_s1 + $0x670] ss:$8 sps:$4 sm:$0xff]   ;;  %v2782_v54 = vld [vmem:[%s3894_s1 + $0x284] ss:$8 sps:$4 sm:$0xff]  }
  0x69   :  { %1900 = vmatprep.subr.bf16.mxu0 %v2701_v55  ;;  %v2785_v55 = vld [vmem:[%s3894_s1 + $0x684] ss:$8 sps:$4 sm:$0xff]  }
  0x6b   :  { %1729 = vmatpush1.bf16.msra.mxu1 %v2696_v56  ;;  %v2780_v56 = vld [vmem:[%s3894_s1 + $0x280] ss:$8 sps:$4 sm:$0xff]  }
  0x6c   :  { %1901 = vmatpush1.bf16.msra.mxu0 %v2699_v57  ;;  %1730 = vmatprep.subr.bf16.mxu1 %v2704_v58  ;;  %v2783_v57 = vld [vmem:[%s3894_s1 + $0x680] ss:$8 sps:$4 sm:$0xff]   ;;  %v2788_v58 = vld [vmem:[%s3894_s1 + $0x294] ss:$8 sps:$4 sm:$0xff]  }
  0x6d   :  { %1902 = vmatprep.subr.bf16.mxu0 %v2707_v59  ;;  %v2791_v59 = vld [vmem:[%s3894_s1 + $0x694] ss:$8 sps:$4 sm:$0xff]  }
  0x6f   :  { %1731 = vmatpush1.bf16.msra.mxu1 %v2702_v60  ;;  %v2786_v60 = vld [vmem:[%s3894_s1 + $0x290] ss:$8 sps:$4 sm:$0xff]  }
  0x70   :  { %1903 = vmatpush1.bf16.msra.mxu0 %v2705_v61  ;;  %1732 = vmatprep.subr.bf16.mxu1 %v2710_v62  ;;  %v2789_v61 = vld [vmem:[%s3894_s1 + $0x690] ss:$8 sps:$4 sm:$0xff]   ;;  %v2794_v62 = vld [vmem:[%s3894_s1 + $0x2a4] ss:$8 sps:$4 sm:$0xff]  }
  0x71   :  { %1904 = vmatprep.subr.bf16.mxu0 %v2713_v63  ;;  %v2797_v63 = vld [vmem:[%s3894_s1 + $0x6a4] ss:$8 sps:$4 sm:$0xff]  }
  0x73   :  { %1733 = vmatpush1.bf16.msra.mxu1 %v2708_v0  ;;  %v2792_v0 = vld [vmem:[%s3894_s1 + $0x2a0] ss:$8 sps:$4 sm:$0xff]  }
  0x74   :  { %1905 = vmatpush1.bf16.msra.mxu0 %v2711_v1  ;;  %1734 = vmatprep.subr.bf16.mxu1 %v2716_v2  ;;  %v2795_v1 = vld [vmem:[%s3894_s1 + $0x6a0] ss:$8 sps:$4 sm:$0xff]   ;;  %v2800_v2 = vld [vmem:[%s3894_s1 + $0x2b4] ss:$8 sps:$4 sm:$0xff]  }
  0x75   :  { %1906 = vmatprep.subr.bf16.mxu0 %v2719_v3  ;;  %v2803_v3 = vld [vmem:[%s3894_s1 + $0x6b4] ss:$8 sps:$4 sm:$0xff]  }
  0x77   :  { %1735 = vmatpush1.bf16.msra.mxu1 %v2714_v4  ;;  %v2798_v4 = vld [vmem:[%s3894_s1 + $0x2b0] ss:$8 sps:$4 sm:$0xff]  }
  0x78   :  { %1907 = vmatpush1.bf16.msra.mxu0 %v2717_v5  ;;  %1736 = vmatprep.subr.bf16.mxu1 %v2722_v6  ;;  %v2801_v5 = vld [vmem:[%s3894_s1 + $0x6b0] ss:$8 sps:$4 sm:$0xff]   ;;  %v2806_v6 = vld [vmem:[%s3894_s1 + $0x2c4] ss:$8 sps:$4 sm:$0xff]  }
  0x79   :  { %1908 = vmatprep.subr.bf16.mxu0 %v2725_v7  ;;  %v2809_v7 = vld [vmem:[%s3894_s1 + $0x6c4] ss:$8 sps:$4 sm:$0xff]  }
  0x7b   :  { %1737 = vmatpush1.bf16.msra.mxu1 %v2720_v8  ;;  %v2804_v8 = vld [vmem:[%s3894_s1 + $0x2c0] ss:$8 sps:$4 sm:$0xff]  }
  0x7c   :  { %1909 = vmatpush1.bf16.msra.mxu0 %v2723_v9  ;;  %1738 = vmatprep.subr.bf16.mxu1 %v2728_v10  ;;  %v2807_v9 = vld [vmem:[%s3894_s1 + $0x6c0] ss:$8 sps:$4 sm:$0xff]   ;;  %v2812_v10 = vld [vmem:[%s3894_s1 + $0x2d4] ss:$8 sps:$4 sm:$0xff]  }
  0x7d   :  { %1910 = vmatprep.subr.bf16.mxu0 %v2731_v11  ;;  %v2815_v11 = vld [vmem:[%s3894_s1 + $0x6d4] ss:$8 sps:$4 sm:$0xff]  }
  0x7f   :  { %1739 = vmatpush1.bf16.msra.mxu1 %v2726_v12  ;;  %v2810_v12 = vld [vmem:[%s3894_s1 + $0x2d0] ss:$8 sps:$4 sm:$0xff]  }
  0x80   :  { %1911 = vmatpush1.bf16.msra.mxu0 %v2729_v13  ;;  %1751 = vmatprep.subr.bf16.mxu1 %v2734_v14  ;;  %v2813_v13 = vld [vmem:[%s3894_s1 + $0x6d0] ss:$8 sps:$4 sm:$0xff]   ;;  %v2818_v14 = vld [vmem:[%s3894_s1 + $0x2e4] ss:$8 sps:$4 sm:$0xff]  }
  0x81   :  { %1923 = vmatprep.subr.bf16.mxu0 %v2737_v15  ;;  %v2821_v15 = vld [vmem:[%s3894_s1 + $0x6e4] ss:$8 sps:$4 sm:$0xff]  }
  0x82   :  { %1741 = vmatmul.mubr.bf16.vlgmr.msra.gmra.mrb[0].mxu1 %v2199_v16  ;;  %v2816_v16 = vld [vmem:[%s3894_s1 + $0x2e0] ss:$8 sps:$4 sm:$0xff]  }
  0x83   :  { %1913 = vmatmul.mubr.bf16.vlgmr.msra.gmra.mrb[0].mxu0 %v2207_v18  ;;  %1752 = vmatpush1.bf16.msra.mxu1 %v2732_v17  ;;  %v2819_v17 = vld [vmem:[%s3894_s1 + $0x6e0] ss:$8 sps:$4 sm:$0xff]   ;;  %v2824_v18 = vld [vmem:[%s3894_s1 + $0x2f4] ss:$8 sps:$4 sm:$0xff]  }
  0x84   :  { %1924 = vmatpush1.bf16.msra.mxu0 %v2735_v19  ;;  %1753 = vmatprep.subr.bf16.mxu1 %v2740_v20  ;;  %v2827_v19 = vld [vmem:[%s3894_s1 + $0x6f4] ss:$8 sps:$4 sm:$0xff]   ;;  %v2822_v20 = vld [vmem:[%s3894_s1 + $0x2f0] ss:$8 sps:$4 sm:$0xff]  }
  0x85   :  { %1925 = vmatprep.subr.bf16.mxu0 %v2743_v21  ;;  %1783 = vmatprep.mubr.bf16.mxu1 %v2202_v28  ;;  %v2825_v21 = vld [vmem:[%s3894_s1 + $0x6f0] ss:$8 sps:$4 sm:$0xff]   ;;  %v2209_v28 = vcombine.low %v3439_v29, %v3444_v30  ;;  %v2836_v29 = vld [vmem:[%s3894_s1 + $0x314] ss:$8 sps:$4 sm:$0xff]  }
  0x86   :  { %1955 = vmatprep.mubr.bf16.mxu0 %v2210_v31  ;;  %v3628_v31 = vld [vmem:[%s3895_s0 + $0x58] sm:$0xff] }
  0x87   :  { %1754 = vmatpush1.bf16.msra.mxu1 %v2738_v22  ;;  %v2830_v22 = vld [vmem:[%s3894_s1 + $0x304] ss:$8 sps:$4 sm:$0xff]   ;;  %v2839_v30 = vld [vmem:[%s3894_s1 + $0x714] ss:$8 sps:$4 sm:$0xff]  }
  0x88   :  { %1926 = vmatpush1.bf16.msra.mxu0 %v2741_v23  ;;  %1755 = vmatprep.subr.bf16.mxu1 %v2746_v26  ;;  %v2833_v23 = vld [vmem:[%s3894_s1 + $0x704] ss:$8 sps:$4 sm:$0xff]   ;;  %v3619_v26 = vld [vmem:[%s3895_s0 + $0x18] sm:$0xff] }
  0x89   :  { %1927 = vmatprep.subr.bf16.mxu0 %v2749_v27  ;;  %v2201_v27 = vcombine.low %v3421_v24, %v3426_v25  ;;  %v2828_v24 = vld [vmem:[%s3894_s1 + $0x300] ss:$8 sps:$4 sm:$0xff]  }
  0x8a   :  { %v2831_v25 = vld [vmem:[%s3894_s1 + $0x700] ss:$8 sps:$4 sm:$0xff]  }
  0x8b   :  { %1756 = vmatpush1.bf16.msra.mxu1 %v2744_v32  ;;  %v3633_v32 = vld [vmem:[%s3895_s0 + $0x38] sm:$0xff] }
  0x8c   :  { %1928 = vmatpush1.bf16.msra.mxu0 %v2747_v33  ;;  %1757 = vmatprep.subr.bf16.mxu1 %v2752_v34  ;;  %v3638_v33 = vld [vmem:[%s3895_s0 + $0x78] sm:$0xff]  ;;  %v2204_v34 = vcombine.high %v3619_v26, %v3628_v31 }
  0x8d   :  { %1929 = vmatprep.subr.bf16.mxu0 %v2755_v35  ;;  %v2212_v35 = vcombine.high %v3633_v32, %v3638_v33 }
  0x8f   :  { %1758 = vmatpush1.bf16.msra.mxu1 %v2750_v36  ;;  %v2834_v36 = vld [vmem:[%s3894_s1 + $0x310] ss:$8 sps:$4 sm:$0xff]  }
  0x90   :  { %1930 = vmatpush1.bf16.msra.mxu0 %v2753_v37  ;;  %1759 = vmatprep.subr.bf16.mxu1 %v2758_v38  ;;  %v2837_v37 = vld [vmem:[%s3894_s1 + $0x710] ss:$8 sps:$4 sm:$0xff]   ;;  %v2842_v38 = vld [vmem:[%s3894_s1 + $0x324] ss:$8 sps:$4 sm:$0xff]  }
  0x91   :  { %1931 = vmatprep.subr.bf16.mxu0 %v2761_v39  ;;  %v2845_v39 = vld [vmem:[%s3894_s1 + $0x724] ss:$8 sps:$4 sm:$0xff]  }
  0x93   :  { %1760 = vmatpush1.bf16.msra.mxu1 %v2756_v40  ;;  %v2840_v40 = vld [vmem:[%s3894_s1 + $0x320] ss:$8 sps:$4 sm:$0xff]  }
  0x94   :  { %1932 = vmatpush1.bf16.msra.mxu0 %v2759_v41  ;;  %1761 = vmatprep.subr.bf16.mxu1 %v2764_v42  ;;  %v2843_v41 = vld [vmem:[%s3894_s1 + $0x720] ss:$8 sps:$4 sm:$0xff]   ;;  %v2848_v42 = vld [vmem:[%s3894_s1 + $0x334] ss:$8 sps:$4 sm:$0xff]  }
  0x95   :  { %1933 = vmatprep.subr.bf16.mxu0 %v2767_v43  ;;  %v2851_v43 = vld [vmem:[%s3894_s1 + $0x734] ss:$8 sps:$4 sm:$0xff]  }
  0x97   :  { %1762 = vmatpush1.bf16.msra.mxu1 %v2762_v44  ;;  %v2846_v44 = vld [vmem:[%s3894_s1 + $0x330] ss:$8 sps:$4 sm:$0xff]  }
  0x98   :  { %1934 = vmatpush1.bf16.msra.mxu0 %v2765_v45  ;;  %1763 = vmatprep.subr.bf16.mxu1 %v2770_v46  ;;  %v2849_v45 = vld [vmem:[%s3894_s1 + $0x730] ss:$8 sps:$4 sm:$0xff]   ;;  %v2854_v46 = vld [vmem:[%s3894_s1 + $0x344] ss:$8 sps:$4 sm:$0xff]  }
  0x99   :  { %1935 = vmatprep.subr.bf16.mxu0 %v2773_v47  ;;  %v2857_v47 = vld [vmem:[%s3894_s1 + $0x744] ss:$8 sps:$4 sm:$0xff]  }
  0x9b   :  { %1764 = vmatpush1.bf16.msra.mxu1 %v2768_v48  ;;  %v2852_v48 = vld [vmem:[%s3894_s1 + $0x340] ss:$8 sps:$4 sm:$0xff]  }
  0x9c   :  { %1936 = vmatpush1.bf16.msra.mxu0 %v2771_v49  ;;  %1765 = vmatprep.subr.bf16.mxu1 %v2776_v50  ;;  %v2855_v49 = vld [vmem:[%s3894_s1 + $0x740] ss:$8 sps:$4 sm:$0xff]   ;;  %v2860_v50 = vld [vmem:[%s3894_s1 + $0x354] ss:$8 sps:$4 sm:$0xff]  }
  0x9d   :  { %1937 = vmatprep.subr.bf16.mxu0 %v2779_v51  ;;  %v2863_v51 = vld [vmem:[%s3894_s1 + $0x754] ss:$8 sps:$4 sm:$0xff]  }
  0x9f   :  { %1766 = vmatpush1.bf16.msra.mxu1 %v2774_v52  ;;  %v2858_v52 = vld [vmem:[%s3894_s1 + $0x350] ss:$8 sps:$4 sm:$0xff]  }
  0xa0   :  { %1938 = vmatpush1.bf16.msra.mxu0 %v2777_v53  ;;  %1767 = vmatprep.subr.bf16.mxu1 %v2782_v54  ;;  %v2861_v53 = vld [vmem:[%s3894_s1 + $0x750] ss:$8 sps:$4 sm:$0xff]   ;;  %v2866_v54 = vld [vmem:[%s3894_s1 + $0x364] ss:$8 sps:$4 sm:$0xff]  }
  0xa1   :  { %1939 = vmatprep.subr.bf16.mxu0 %v2785_v55  ;;  %v2869_v55 = vld [vmem:[%s3894_s1 + $0x764] ss:$8 sps:$4 sm:$0xff]  }
  0xa3   :  { %1768 = vmatpush1.bf16.msra.mxu1 %v2780_v56  ;;  %v2864_v56 = vld [vmem:[%s3894_s1 + $0x360] ss:$8 sps:$4 sm:$0xff]  }
  0xa4   :  { %1940 = vmatpush1.bf16.msra.mxu0 %v2783_v57  ;;  %1769 = vmatprep.subr.bf16.mxu1 %v2788_v58  ;;  %v2867_v57 = vld [vmem:[%s3894_s1 + $0x760] ss:$8 sps:$4 sm:$0xff]   ;;  %v2872_v58 = vld [vmem:[%s3894_s1 + $0x374] ss:$8 sps:$4 sm:$0xff]  }
  0xa5   :  { %1941 = vmatprep.subr.bf16.mxu0 %v2791_v59  ;;  %v2875_v59 = vld [vmem:[%s3894_s1 + $0x774] ss:$8 sps:$4 sm:$0xff]  }
  0xa7   :  { %1770 = vmatpush1.bf16.msra.mxu1 %v2786_v60  ;;  %v2870_v60 = vld [vmem:[%s3894_s1 + $0x370] ss:$8 sps:$4 sm:$0xff]  }
  0xa8   :  { %1942 = vmatpush1.bf16.msra.mxu0 %v2789_v61  ;;  %1771 = vmatprep.subr.bf16.mxu1 %v2794_v62  ;;  %v2873_v61 = vld [vmem:[%s3894_s1 + $0x770] ss:$8 sps:$4 sm:$0xff]   ;;  %v2878_v62 = vld [vmem:[%s3894_s1 + $0x384] ss:$8 sps:$4 sm:$0xff]  }
  0xa9   :  { %1943 = vmatprep.subr.bf16.mxu0 %v2797_v63  ;;  %v2881_v63 = vld [vmem:[%s3894_s1 + $0x784] ss:$8 sps:$4 sm:$0xff]  }
  0xab   :  { %1772 = vmatpush1.bf16.msra.mxu1 %v2792_v0  ;;  %v2876_v0 = vld [vmem:[%s3894_s1 + $0x380] ss:$8 sps:$4 sm:$0xff]  }
  0xac   :  { %1944 = vmatpush1.bf16.msra.mxu0 %v2795_v1  ;;  %1773 = vmatprep.subr.bf16.mxu1 %v2800_v2  ;;  %v2879_v1 = vld [vmem:[%s3894_s1 + $0x780] ss:$8 sps:$4 sm:$0xff]   ;;  %v2884_v2 = vld [vmem:[%s3894_s1 + $0x394] ss:$8 sps:$4 sm:$0xff]  }
  0xad   :  { %1945 = vmatprep.subr.bf16.mxu0 %v2803_v3  ;;  %v2887_v3 = vld [vmem:[%s3894_s1 + $0x794] ss:$8 sps:$4 sm:$0xff]  }
  0xaf   :  { %1774 = vmatpush1.bf16.msra.mxu1 %v2798_v4  ;;  %v2882_v4 = vld [vmem:[%s3894_s1 + $0x390] ss:$8 sps:$4 sm:$0xff]  }
  0xb0   :  { %1946 = vmatpush1.bf16.msra.mxu0 %v2801_v5  ;;  %1775 = vmatprep.subr.bf16.mxu1 %v2806_v6  ;;  %v2885_v5 = vld [vmem:[%s3894_s1 + $0x790] ss:$8 sps:$4 sm:$0xff]   ;;  %v2890_v6 = vld [vmem:[%s3894_s1 + $0x3a4] ss:$8 sps:$4 sm:$0xff]  }
  0xb1   :  { %1947 = vmatprep.subr.bf16.mxu0 %v2809_v7  ;;  %v2893_v7 = vld [vmem:[%s3894_s1 + $0x7a4] ss:$8 sps:$4 sm:$0xff]  }
  0xb3   :  { %1776 = vmatpush1.bf16.msra.mxu1 %v2804_v8  ;;  %v2888_v8 = vld [vmem:[%s3894_s1 + $0x3a0] ss:$8 sps:$4 sm:$0xff]  }
  0xb4   :  { %1948 = vmatpush1.bf16.msra.mxu0 %v2807_v9  ;;  %1777 = vmatprep.subr.bf16.mxu1 %v2812_v10  ;;  %v2891_v9 = vld [vmem:[%s3894_s1 + $0x7a0] ss:$8 sps:$4 sm:$0xff]   ;;  %v2896_v10 = vld [vmem:[%s3894_s1 + $0x3b4] ss:$8 sps:$4 sm:$0xff]  }
  0xb5   :  { %1949 = vmatprep.subr.bf16.mxu0 %v2815_v11  ;;  %v2899_v11 = vld [vmem:[%s3894_s1 + $0x7b4] ss:$8 sps:$4 sm:$0xff]  }
  0xb7   :  { %1778 = vmatpush1.bf16.msra.mxu1 %v2810_v12  ;;  %v2894_v12 = vld [vmem:[%s3894_s1 + $0x3b0] ss:$8 sps:$4 sm:$0xff]  }
  0xb8   :  { %1950 = vmatpush1.bf16.msra.mxu0 %v2813_v13  ;;  %1779 = vmatprep.subr.bf16.mxu1 %v2818_v14  ;;  %v2897_v13 = vld [vmem:[%s3894_s1 + $0x7b0] ss:$8 sps:$4 sm:$0xff]   ;;  %v2902_v14 = vld [vmem:[%s3894_s1 + $0x3c4] ss:$8 sps:$4 sm:$0xff]  }
  0xb9   :  { %1951 = vmatprep.subr.bf16.mxu0 %v2821_v15  ;;  %v2905_v15 = vld [vmem:[%s3894_s1 + $0x7c4] ss:$8 sps:$4 sm:$0xff]  }
  0xbb   :  { %1780 = vmatpush1.bf16.msra.mxu1 %v2816_v16  ;;  %v2900_v16 = vld [vmem:[%s3894_s1 + $0x3c0] ss:$8 sps:$4 sm:$0xff]  }
  0xbc   :  { %1952 = vmatpush1.bf16.msra.mxu0 %v2819_v17  ;;  %1781 = vmatprep.subr.bf16.mxu1 %v2824_v18  ;;  %v2903_v17 = vld [vmem:[%s3894_s1 + $0x7c0] ss:$8 sps:$4 sm:$0xff]   ;;  %v2908_v18 = vld [vmem:[%s3894_s1 + $0x3d4] ss:$8 sps:$4 sm:$0xff]  }
  0xbd   :  { %1953 = vmatprep.subr.bf16.mxu0 %v2827_v19  ;;  %v2911_v19 = vld [vmem:[%s3894_s1 + $0x7d4] ss:$8 sps:$4 sm:$0xff]  }
  0xbf   :  { %1782 = vmatpush1.bf16.msra.mxu1 %v2822_v20  ;;  %v2906_v20 = vld [vmem:[%s3894_s1 + $0x3d0] ss:$8 sps:$4 sm:$0xff]  }
  0xc0   :  { %1954 = vmatpush1.bf16.msra.mxu0 %v2825_v21  ;;  %1794 = vmatprep.subr.bf16.mxu1 %v2830_v22  ;;  %v2909_v21 = vld [vmem:[%s3894_s1 + $0x7d0] ss:$8 sps:$4 sm:$0xff]   ;;  %v2914_v22 = vld [vmem:[%s3894_s1 + $0x3e4] ss:$8 sps:$4 sm:$0xff]  }
  0xc1   :  { %1966 = vmatprep.subr.bf16.mxu0 %v2833_v23  ;;  %v2917_v23 = vld [vmem:[%s3894_s1 + $0x7e4] ss:$8 sps:$4 sm:$0xff]  }
  0xc2   :  { %1784 = vmatmul.mubr.bf16.vlgmr.msra.gmra.mrb[0].mxu1 %v2201_v27  ;;  %v2912_v27 = vld [vmem:[%s3894_s1 + $0x3e0] ss:$8 sps:$4 sm:$0xff]  }
  0xc3   :  { %1956 = vmatmul.mubr.bf16.vlgmr.msra.gmra.mrb[0].mxu0 %v2209_v28  ;;  %1795 = vmatpush1.bf16.msra.mxu1 %v2828_v24  ;;  %v2915_v28 = vld [vmem:[%s3894_s1 + $0x7e0] ss:$8 sps:$4 sm:$0xff]   ;;  %v2920_v24 = vld [vmem:[%s3894_s1 + $0x3f4] ss:$8 sps:$4 sm:$0xff]  }
  0xc4   :  { %1967 = vmatpush1.bf16.msra.mxu0 %v2831_v25  ;;  %1796 = vmatprep.subr.bf16.mxu1 %v2836_v29  ;;  %v2923_v25 = vld [vmem:[%s3894_s1 + $0x7f4] ss:$8 sps:$4 sm:$0xff]   ;;  %v2918_v29 = vld [vmem:[%s3894_s1 + $0x3f0] ss:$8 sps:$4 sm:$0xff]  }
  0xc5   :  { %1968 = vmatprep.subr.bf16.mxu0 %v2839_v30  ;;  %1826 = vmatprep.mubr.bf16.mxu1 %v2204_v34  ;;  %v2921_v30 = vld [vmem:[%s3894_s1 + $0x7f0] ss:$8 sps:$4 sm:$0xff]   ;;  %v2924_v34 = vld [vmem:[%s3896_s3 + $0x40] sm:$0xff]  }
  0xc6   :  { %1998 = vmatprep.mubr.bf16.mxu0 %v2212_v35  ;;  %v2203_v35 = vcombine.low %v3619_v26, %v3628_v31  ;;  %v2927_v26 = vld [vmem:[%s3896_s3 + $0x8] sm:$0xff]   ;;  %v2928_v31 = vld [vmem:[%s3896_s3 + $0x50] sm:$0xff]  }
  0xc7   :  { %1797 = vmatpush1.bf16.msra.mxu1 %v2834_v36  ;;  %v2211_v36 = vcombine.low %v3633_v32, %v3638_v33  ;;  %v2929_v32 = vld [vmem:[%s3896_s3 + $0x10] sm:$0xff]   ;;  %v2930_v33 = vld [vmem:[%s3896_s3 + $0x58] sm:$0xff]  }
  0xc8   :  { %1969 = vmatpush1.bf16.msra.mxu0 %v2837_v37  ;;  %1798 = vmatprep.subr.bf16.mxu1 %v2842_v38  ;;  %v2925_v37 = vld [vmem:[%s3896_s3] sm:$0xff]   ;;  %v2926_v38 = vld [vmem:[%s3896_s3 + $0x48] sm:$0xff]  }
  0xc9   :  { %1970 = vmatprep.subr.bf16.mxu0 %v2845_v39  ;;  %v2931_v39 = vld [vmem:[%s3896_s3 + $0x18] sm:$0xff]  }
  0xcb   :  { %1799 = vmatpush1.bf16.msra.mxu1 %v2840_v40  ;;  %v2932_v40 = vld [vmem:[%s3896_s3 + $0x60] sm:$0xff]  }
  0xcc   :  { %1971 = vmatpush1.bf16.msra.mxu0 %v2843_v41  ;;  %1800 = vmatprep.subr.bf16.mxu1 %v2848_v42  ;;  %v2933_v41 = vld [vmem:[%s3896_s3 + $0x20] sm:$0xff]   ;;  %v2934_v42 = vld [vmem:[%s3896_s3 + $0x68] sm:$0xff]  }
  0xcd   :  { %1972 = vmatprep.subr.bf16.mxu0 %v2851_v43  ;;  %v2935_v43 = vld [vmem:[%s3896_s3 + $0x28] sm:$0xff]  }
  0xcf   :  { %1801 = vmatpush1.bf16.msra.mxu1 %v2846_v44  ;;  %v2936_v44 = vld [vmem:[%s3896_s3 + $0x70] sm:$0xff]  }
  0xd0   :  { %1973 = vmatpush1.bf16.msra.mxu0 %v2849_v45  ;;  %1802 = vmatprep.subr.bf16.mxu1 %v2854_v46  ;;  %v2937_v45 = vld [vmem:[%s3896_s3 + $0x30] sm:$0xff]   ;;  %v2938_v46 = vld [vmem:[%s3896_s3 + $0x78] sm:$0xff]  }
  0xd1   :  { %1974 = vmatprep.subr.bf16.mxu0 %v2857_v47  ;;  %v2939_v47 = vld [vmem:[%s3896_s3 + $0x38] sm:$0xff]  }
  0xd3   :  { %1803 = vmatpush1.bf16.msra.mxu1 %v2852_v48  ;;  %v295_v48 = vlaneseq }
  0xd4   :  { %1975 = vmatpush1.bf16.msra.mxu0 %v2855_v49  ;;  %1804 = vmatprep.subr.bf16.mxu1 %v2860_v50 }
  0xd5   :  { %1976 = vmatprep.subr.bf16.mxu0 %v2863_v51  ;;  %v296_v49 = vshrl.u32 %v295_v48, 7  ;;  %v293_v51 = vld [vmem:[%s3897_s2] sm:$0x3] }
  0xd7   :  { %1805 = vmatpush1.bf16.msra.mxu1 %v2858_v52  ;;  %v297_v50 = vsub.s32 0, %v296_v49  ;;  %v301_v52 = vsub.s32 1, %v296_v49 }
  0xd8   :  { %1977 = vmatpush1.bf16.msra.mxu0 %v2861_v53  ;;  %1806 = vmatprep.subr.bf16.mxu1 %v2866_v54 }
  0xd9   :  { %1978 = vmatprep.subr.bf16.mxu0 %v2869_v55  ;;  %v298_v53 = vrot.slane %v293_v51, %v297_v50  ;;  %v302_v54 = vrot.slane %v293_v51, %v301_v52 }
  0xdb   :  { %1807 = vmatpush1.bf16.msra.mxu1 %v2864_v56 }
  0xdc   :  { %1979 = vmatpush1.bf16.msra.mxu0 %v2867_v57  ;;  %1808 = vmatprep.subr.bf16.mxu1 %v2872_v58 }
  0xdd   :  { %1980 = vmatprep.subr.bf16.mxu0 %v2875_v59 }
  0xdf   :  { %1809 = vmatpush1.bf16.msra.mxu1 %v2870_v60 }
  0xe0   :  { %1981 = vmatpush1.bf16.msra.mxu0 %v2873_v61  ;;  %1810 = vmatprep.subr.bf16.mxu1 %v2878_v62 }
  0xe1   :  { %1982 = vmatprep.subr.bf16.mxu0 %v2881_v63 }
  0xe3   :  { %1811 = vmatpush1.bf16.msra.mxu1 %v2876_v0 }
  0xe4   :  { %1983 = vmatpush1.bf16.msra.mxu0 %v2879_v1  ;;  %1812 = vmatprep.subr.bf16.mxu1 %v2884_v2 }
  0xe5   :  { %1984 = vmatprep.subr.bf16.mxu0 %v2887_v3 }
  0xe7   :  { %1813 = vmatpush1.bf16.msra.mxu1 %v2882_v4 }
  0xe8   :  { %1985 = vmatpush1.bf16.msra.mxu0 %v2885_v5  ;;  %1814 = vmatprep.subr.bf16.mxu1 %v2890_v6 }
  0xe9   :  { %1986 = vmatprep.subr.bf16.mxu0 %v2893_v7 }
  0xeb   :  { %1815 = vmatpush1.bf16.msra.mxu1 %v2888_v8 }
  0xec   :  { %1987 = vmatpush1.bf16.msra.mxu0 %v2891_v9  ;;  %1816 = vmatprep.subr.bf16.mxu1 %v2896_v10 }
  0xed   :  { %1988 = vmatprep.subr.bf16.mxu0 %v2899_v11 }
  0xef   :  { %1817 = vmatpush1.bf16.msra.mxu1 %v2894_v12 }
  0xf0   :  { %1989 = vmatpush1.bf16.msra.mxu0 %v2897_v13  ;;  %1818 = vmatprep.subr.bf16.mxu1 %v2902_v14  ;;  %v2469_v14 = vld [vmem:[%s3898_s4] ss:$0 sm:$0xff] }
  0xf1   :  { %1990 = vmatprep.subr.bf16.mxu0 %v2905_v15 }
  0xf3   :  { %1819 = vmatpush1.bf16.msra.mxu1 %v2900_v16 }
  0xf4   :  { %1991 = vmatpush1.bf16.msra.mxu0 %v2903_v17  ;;  %1820 = vmatprep.subr.bf16.mxu1 %v2908_v18 }
  0xf5   :  { %1992 = vmatprep.subr.bf16.mxu0 %v2911_v19 }
  0xf7   :  { %1821 = vmatpush1.bf16.msra.mxu1 %v2906_v20 }
  0xf8   :  { %1993 = vmatpush1.bf16.msra.mxu0 %v2909_v21  ;;  %1822 = vmatprep.subr.bf16.mxu1 %v2914_v22 }
  0xf9   :  { %1994 = vmatprep.subr.bf16.mxu0 %v2917_v23 }
  0xfb   :  { %1823 = vmatpush1.bf16.msra.mxu1 %v2912_v27 }
  0xfc   :  { %1995 = vmatpush1.bf16.msra.mxu0 %v2915_v28  ;;  %1824 = vmatprep.subr.bf16.mxu1 %v2920_v24 }
  0xfd   :  { %1996 = vmatprep.subr.bf16.mxu0 %v2923_v25 }
  0xff   :  { %1825 = vmatpush1.bf16.msra.mxu1 %v2918_v29 }
 0x100   :  { %1997 = vmatpush1.bf16.msra.mxu0 %v2921_v30  ;;  %2486 = vmatprep.subr.bf16.mxu1 %v2924_v34 }
 0x102   :  { %1827 = vmatmul.mubr.bf16.vlgmr.msra.gmra.mrb[0].mxu1 %v2203_v35 }
 0x103   :  { %1999 = vmatmul.mubr.bf16.vlgmr.msra.gmra.mrb[0].mxu0 %v2211_v36  ;;  %2487 = vmatpush3.bf16.msra.mxu1 %v2925_v37 }
 0x104   :  { %2488 = vmatprep.subr.bf16.mxu1 %v2926_v38 }
 0x107   :  { %2489 = vmatpush3.bf16.msra.mxu1 %v2927_v26 }
 0x108   :  { %2490 = vmatprep.subr.bf16.mxu1 %v2928_v31 }
 0x10b   :  { %2491 = vmatpush3.bf16.msra.mxu1 %v2929_v32 }
 0x10c   :  { %2492 = vmatprep.subr.bf16.mxu1 %v2930_v33 }
 0x10f   :  { %2493 = vmatpush3.bf16.msra.mxu1 %v2931_v39 }
 0x110   :  { %2494 = vmatprep.subr.bf16.mxu1 %v2932_v40 }
 0x113   :  { %2495 = vmatpush3.bf16.msra.mxu1 %v2933_v41 }
 0x114   :  { %2496 = vmatprep.subr.bf16.mxu1 %v2934_v42 }
 0x117   :  { %2497 = vmatpush3.bf16.msra.mxu1 %v2935_v43 }
 0x118   :  { %2498 = vmatprep.subr.bf16.mxu1 %v2936_v44 }
 0x11b   :  { %2499 = vmatpush3.bf16.msra.mxu1 %v2937_v45 }
 0x11c   :  { %2500 = vmatprep.subr.bf16.mxu1 %v2938_v46 }
 0x11f   :  { %2501 = vmatpush3.bf16.msra.mxu1 %v2939_v47 }
 0x1d5   :  { %v1828_v55 = vpop.f32.mrb[0].mxu1 }
 0x1d6   :  { %v2000_v56 = vpop.f32.mrb[0].mxu0  ;;  %v2508_v57 = vadd.f32 %v1828_v55, %v298_v53  ;;  %v1830_v58 = vpop.f32.mrb[1].mxu1 }
 0x1d7   :  { %v2002_v59 = vpop.f32.mrb[1].mxu0  ;;  %v2510_v60 = vadd.f32 %v1830_v58, %v302_v54  ;;  %v1832_v61 = vpop.f32.mrb[2].mxu1 }
 0x1d8   :  { %v2004_v62 = vpop.f32.mrb[2].mxu0  ;;  %v2509_v63 = vadd.f32 %v2508_v57, %v2000_v56  ;;  %v2512_v0 = vadd.f32 %v1832_v61, %v298_v53  ;;  %v1834_v1 = vpop.f32.mrb[3].mxu1 }
 0x1d9   :  { %v2006_v2 = vpop.f32.mrb[3].mxu0  ;;  %v2511_v3 = vadd.f32 %v2510_v60, %v2002_v59  ;;  %v2514_v4 = vadd.f32 %v1834_v1, %v302_v54 }
 0x1da   :  { %v2513_v5 = vadd.f32 %v2512_v0, %v2004_v62  ;;  %v2009_v7 = vmax.f32 %v2509_v63, 0.0 }
 0x1db   :  { %v2515_v6 = vadd.f32 %v2514_v4, %v2006_v2  ;;  %v2010_v9 = vmax.f32 %v2511_v3, 0.0 }
 0x1dc   :  { %v2011_v8 = vmax.f32 %v2513_v5, 0.0 }
 0x1dd   :  { %v2012_v10 = vmax.f32 %v2515_v6, 0.0 }
 0x1de   :  { %v2013_v11 = vpack.c.bf16 %v2011_v8, %v2009_v7 }
 0x1df   :  { %v2014_v12 = vpack.c.bf16 %v2012_v10, %v2010_v9 }
 0x1e1   :  { %2182 = vmatprep.mubr.bf16.mxu1 %v2014_v12 }
 0x1e2   :  { %2183 = vmatmul.mubr.bf16.vlgmr.msra.gmra.mrb[4].mxu1 %v2013_v11 }
 0x2b5   :  { %v2502_v13 = vpop.f32.mrb[4].mxu1 }
 0x2b6   :  { %v2503_v15 = vpop.f32.mrb[5].mxu1 }
 0x2b7   :  { %v2504_v16 = vadd.f32 %v2503_v15, %v2502_v13  ;;  %v2505_v17 = vpop.f32.mrb[6].mxu1 }
 0x2b8   :  { %v2506_v18 = vpop.f32.mrb[7].mxu1 }
 0x2b9   :  { %v2185_v19 = vadd.f32 %v2504_v16, %v2469_v14  ;;  %v2507_v20 = vadd.f32 %v2506_v18, %v2505_v17 }
 0x2bb   :  { %2191 = vst [vmem:[%s3899_s5] sm:$0xff] %v2185_v19  ;;  %v2188_v21 = vadd.f32 %v2507_v20, %v2469_v14 }
 0x2bd   :  { %2192 = vst [vmem:[%s3899_s5 + $0x8] sm:$0xff] %v2188_v21 }

</bundles_post_ra>
